<compile_context>
chip_gen: v6e
topology: v6e:2x2x1
jax: 0.10.0
libtpu: 0.0.40
codegen_flags: <defaults>
</compile_context>

<pallas_src>
import jax
import jax.numpy as jnp
from jax.experimental import pallas as pl
from jax.experimental.pallas import tpu as pltpu

# ----------------------------- model dimensions ------------------------------
# Structure-preserving small sizes (original: channels=30000, seq=768,
# cnn feat=466, hidden=256, D=FINAL_DIM=512).
B = 2              # batch
C = 256            # input "channels" (signal length per timestep)
T = 4              # tstep
K = 16             # conv1d kernel == stride (non-overlapping)
L_OUT = C // K     # conv output length per timestep
SEQ = T * L_OUT    # total sequence length after torch.cat(dim=1)   (64)
F_CNN = 32         # cnn feature dim                               (stands in for 466)
H = 256            # lstm hidden (matches reference hidden_dim=256)
D = 2 * H          # bidirectional output dim == FINAL_DIM = 512
NHEAD = 4
HD = D // NHEAD    # 128 -> lane-aligned head slices
NCLASS = 4


def _full_spec(shape):
  nd = len(shape)
  return pl.BlockSpec(shape, lambda *_: (0,) * nd)


# =============================================================================
# Kernel 1: conv + ReLU + standardize + fused gate projection + bi-LSTM scan
# =============================================================================
def _encoder_kernel(patches_ref, conv_w_ref, conv_b_ref, wih_ref, bih_ref,
                    whh_f_ref, whh_b_ref, enc_ref,
                    gates_scr, hf_scr, hb_scr):
  bf16 = jnp.bfloat16

  # ---- Conv1d(1->F_CNN, kernel=K, stride=K) as one matmul + ReLU (both batches)
  p = patches_ref[...]                                       # (B*SEQ, K) f32
  feats = jnp.dot(p.astype(bf16), conv_w_ref[...],
                  preferred_element_type=jnp.float32) + conv_b_ref[...]
  feats = jnp.maximum(feats, 0.0)                            # (B*SEQ, F_CNN)

  # ---- per-batch standardization: torch.std_mean(dim=(1,2), unbiased=False)
  # (no epsilon, matching the reference torch.div((x - mean), std))
  parts = []
  for b in range(B):
    fb = feats[b * SEQ:(b + 1) * SEQ, :]
    mu = jnp.mean(fb, keepdims=True)
    var = jnp.mean((fb - mu) ** 2, keepdims=True)
    parts.append((fb - mu) * jax.lax.rsqrt(var))
  fn = jnp.concatenate(parts, axis=0)                        # (B*SEQ, F_CNN)

  # ---- fused input-gate projection for both LSTM directions -----------------
  # columns [0:4H) -> forward gates [i,f,g,o], [4H:8H) -> backward gates.
  gates_scr[...] = jnp.dot(fn.astype(bf16), wih_ref[...],
                           preferred_element_type=jnp.float32) + bih_ref[...]

  def lstm_step(gx, h, c, whh_ref):
    g = gx + jnp.dot(h.astype(bf16), whh_ref[...],
                     preferred_element_type=jnp.float32)     # (B, 4H)
    i = jax.nn.sigmoid(g[:, 0 * H:1 * H])
    f = jax.nn.sigmoid(g[:, 1 * H:2 * H])
    gg = jnp.tanh(g[:, 2 * H:3 * H])
    o = jax.nn.sigmoid(g[:, 3 * H:4 * H])
    c_new = f * c + i * gg
    h_new = o * jnp.tanh(c_new)
    return h_new, c_new

  # ---- single sequential scan: both directions + both batches per step ------
  def body(t, carry):
    h_f, c_f, h_b, c_b = carry
    tb = SEQ - 1 - t
    gx_f = jnp.concatenate(
        [gates_scr[pl.ds(b * SEQ + t, 1), 0:4 * H] for b in range(B)], axis=0)
    gx_b = jnp.concatenate(
        [gates_scr[pl.ds(b * SEQ + tb, 1), 4 * H:8 * H] for b in range(B)],
        axis=0)
    h_f, c_f = lstm_step(gx_f, h_f, c_f, whh_f_ref)
    h_b, c_b = lstm_step(gx_b, h_b, c_b, whh_b_ref)
    for b in range(B):
      hf_scr[pl.ds(b * SEQ + t, 1), :] = h_f[b:b + 1, :]
      hb_scr[pl.ds(b * SEQ + tb, 1), :] = h_b[b:b + 1, :]
    return h_f, c_f, h_b, c_b

  z = jnp.zeros((B, H), jnp.float32)
  jax.lax.fori_loop(0, SEQ, body, (z, z, z, z))

  # ---- write (B, SEQ, D) encoder output as full-width slabs ------------------
  for b in range(B):
    enc_ref[b, :, 0:H] = hf_scr[b * SEQ:(b + 1) * SEQ, :]
    enc_ref[b, :, H:D] = hb_scr[b * SEQ:(b + 1) * SEQ, :]


def encoder_call(patches, conv_w, conv_b, wih, bih, whh_f, whh_b):
  return pl.pallas_call(
      _encoder_kernel,
      out_shape=jax.ShapeDtypeStruct((B, SEQ, D), jnp.float32),
      in_specs=[_full_spec(patches.shape), _full_spec(conv_w.shape),
                _full_spec(conv_b.shape), _full_spec(wih.shape),
                _full_spec(bih.shape), _full_spec(whh_f.shape),
                _full_spec(whh_b.shape)],
      out_specs=_full_spec((B, SEQ, D)),
      scratch_shapes=[pltpu.VMEM((B * SEQ, 8 * H), jnp.float32),
                      pltpu.VMEM((B * SEQ, H), jnp.float32),
                      pltpu.VMEM((B * SEQ, H), jnp.float32)],
  )(patches, conv_w, conv_b, wih, bih, whh_f, whh_b)


# =============================================================================
# Kernel 2: LN -> fused QKV -> MHA -> out proj -> +residual -> LN -> head
# grid over batch, marked "parallel" (uses both TensorCores on v7x).
# =============================================================================
def _transformer_head_kernel(enc_ref, g_ref, b_ref, wqkv_ref, bqkv_ref,
                             wo_ref, bo_ref, flw_ref, flb_ref,
                             sfm_ref, logsfm_ref):
  bf16 = jnp.bfloat16
  x0 = enc_ref[0]                                            # (SEQ, D)
  gam = g_ref[...]
  bet = b_ref[...]

  # nn.LayerNorm([SEQ, D]): per-sample mean/var over both dims, shared params
  # for both applications (matches the reference, which reuses self.norm_layer).
  def layer_norm(v):
    mu = jnp.mean(v, keepdims=True)
    var = jnp.mean((v - mu) ** 2, keepdims=True)
    return (v - mu) * jax.lax.rsqrt(var + 1e-5) * gam + bet

  x1 = layer_norm(x0)

  qkv = jnp.dot(x1.astype(bf16), wqkv_ref[...],
                preferred_element_type=jnp.float32) + bqkv_ref[...]  # (SEQ, 3D)

  scale = 1.0 / float(HD) ** 0.5
  ctx_heads = []
  for h in range(NHEAD):
    qh = qkv[:, h * HD:(h + 1) * HD].astype(bf16)
    kh = qkv[:, D + h * HD:D + (h + 1) * HD].astype(bf16)
    vh = qkv[:, 2 * D + h * HD:2 * D + (h + 1) * HD].astype(bf16)
    s = jax.lax.dot_general(qh, kh, (((1,), (1,)), ((), ())),
                            preferred_element_type=jnp.float32) * scale
    s = s - jnp.max(s, axis=-1, keepdims=True)
    p = jnp.exp(s)
    p = p * pl.reciprocal(jnp.sum(p, axis=-1, keepdims=True), approx=True)
    ctx_heads.append(jnp.dot(p.astype(bf16), vh,
                             preferred_element_type=jnp.float32))
  ctx = jnp.concatenate(ctx_heads, axis=1)                   # (SEQ, D)

  attn = jnp.dot(ctx.astype(bf16), wo_ref[...],
                 preferred_element_type=jnp.float32) + bo_ref[...]
  # Dropout(p=0.2) in eval mode -> identity.
  y = layer_norm(attn + x0)                                  # residual = encout

  # head: mean over SEQ -> Linear(D, 4) -> softmax / log-softmax over classes
  m = jnp.mean(y, axis=0, keepdims=True)                     # (1, D)
  logits = jnp.dot(m, flw_ref[...],
                   preferred_element_type=jnp.float32) + flb_ref[...]
  z = logits - jnp.max(logits, axis=1, keepdims=True)
  e = jnp.exp(z)
  ssum = jnp.sum(e, axis=1, keepdims=True)
  sfm_ref[0] = e / ssum                                      # (1, NCLASS)
  logsfm_ref[0] = z - jnp.log(ssum)


def transformer_head_call(enc, ln_g, ln_b, wqkv, bqkv, wo, bo, flw, flb):
  return pl.pallas_call(
      _transformer_head_kernel,
      grid=(B,),
      out_shape=(jax.ShapeDtypeStruct((B, 1, NCLASS), jnp.float32),
                 jax.ShapeDtypeStruct((B, 1, NCLASS), jnp.float32)),
      in_specs=[pl.BlockSpec((1, SEQ, D), lambda b: (b, 0, 0)),
                pl.BlockSpec((SEQ, D), lambda b: (0, 0)),
                pl.BlockSpec((SEQ, D), lambda b: (0, 0)),
                pl.BlockSpec((D, 3 * D), lambda b: (0, 0)),
                pl.BlockSpec((1, 3 * D), lambda b: (0, 0)),
                pl.BlockSpec((D, D), lambda b: (0, 0)),
                pl.BlockSpec((1, D), lambda b: (0, 0)),
                pl.BlockSpec((D, NCLASS), lambda b: (0, 0)),
                pl.BlockSpec((1, NCLASS), lambda b: (0, 0))],
      out_specs=(pl.BlockSpec((1, 1, NCLASS), lambda b: (b, 0, 0)),
                 pl.BlockSpec((1, 1, NCLASS), lambda b: (b, 0, 0))),
      compiler_params=pltpu.CompilerParams(dimension_semantics=("parallel",)),
  )(enc, ln_g, ln_b, wqkv, bqkv, wo, bo, flw, flb)


# ------------------------------- parameters -----------------------------------
def init_params(key):
  ks = jax.random.split(key, 8)
  s = 0.05
  return {
      "conv_w": jax.random.normal(ks[0], (K, F_CNN), jnp.float32) * s,
      "conv_b": jax.random.normal(ks[1], (1, F_CNN), jnp.float32) * s,
      # fused input-gate projection: cols [0:4H)=forward [i,f,g,o], [4H:8H)=backward
      "lstm_wih": jax.random.normal(ks[2], (F_CNN, 8 * H), jnp.float32) * s,
      "lstm_bih": jnp.zeros((1, 8 * H), jnp.float32),
      "lstm_whh_f": jax.random.normal(ks[3], (H, 4 * H), jnp.float32) * s,
      "lstm_whh_b": jax.random.normal(ks[4], (H, 4 * H), jnp.float32) * s,
      "ln_g": jnp.ones((SEQ, D), jnp.float32),   # nn.LayerNorm([SEQ, D]) init
      "ln_b": jnp.zeros((SEQ, D), jnp.float32),
      # fused Q/K/V projection
      "wqkv": jax.random.normal(ks[5], (D, 3 * D), jnp.float32) * s,
      "bqkv": jnp.zeros((1, 3 * D), jnp.float32),
      "wo": jax.random.normal(ks[6], (D, D), jnp.float32) * s,
      "bo": jnp.zeros((1, D), jnp.float32),
      "fl_w": jax.random.normal(ks[7], (D, NCLASS), jnp.float32) * s,
      "fl_b": jnp.zeros((1, NCLASS), jnp.float32),
  }


# ------------------------------- forward pass ----------------------------------
def forward(params, x):
  """x: (B, C, T) — matches PyTorch (batch, channels, tstep)."""
  bsz = x.shape[0]
  # im2col for conv1d with kernel == stride; tiny (8 KB) wrapper layout op.
  patches = jnp.transpose(x, (0, 2, 1)).reshape(bsz * SEQ, K)

  bf = jnp.bfloat16
  enc = encoder_call(
      patches,
      params["conv_w"].astype(bf), params["conv_b"],
      params["lstm_wih"].astype(bf), params["lstm_bih"],
      params["lstm_whh_f"].astype(bf), params["lstm_whh_b"].astype(bf))

  sfm3, logsfm3 = transformer_head_call(
      enc, params["ln_g"], params["ln_b"],
      params["wqkv"].astype(bf), params["bqkv"],
      params["wo"].astype(bf), params["bo"],
      params["fl_w"], params["fl_b"])
  return sfm3[:, 0, :], logsfm3[:, 0, :]


if __name__ == "__main__":
  key = jax.random.PRNGKey(0)
  pkey, xkey = jax.random.split(key)
  params = init_params(pkey)
  x = jax.random.normal(xkey, (B, C, T), dtype=jnp.float32)

  sfm, logsfm = jax.jit(forward)(params, x)
  jax.block_until_ready((sfm, logsfm))

  assert sfm.shape == (B, NCLASS) and logsfm.shape == (B, NCLASS)
  assert bool(jnp.all(jnp.isfinite(sfm))) and bool(jnp.all(jnp.isfinite(logsfm)))
  assert bool(jnp.allclose(jnp.sum(sfm, axis=1), 1.0, atol=1e-5))
  assert bool(jnp.allclose(jnp.exp(logsfm), sfm, atol=1e-4))
  print("KERNEL_OK")
</pallas_src>

<mosaic_0001>
module attributes {stable_mosaic.version = 11 : i64} {
  func.func @_encoder_kernel(%arg0: memref<128x16xf32, #tpu.memory_space<vmem>>, %arg1: memref<16x32xbf16, #tpu.memory_space<vmem>>, %arg2: memref<1x32xf32, #tpu.memory_space<vmem>>, %arg3: memref<32x2048xbf16, #tpu.memory_space<vmem>>, %arg4: memref<1x2048xf32, #tpu.memory_space<vmem>>, %arg5: memref<256x1024xbf16, #tpu.memory_space<vmem>>, %arg6: memref<256x1024xbf16, #tpu.memory_space<vmem>>, %arg7: memref<2x64x512xf32, #tpu.memory_space<vmem>>, %arg8: memref<128x2048xf32, #tpu.memory_space<vmem>>, %arg9: memref<128x256xf32, #tpu.memory_space<vmem>>, %arg10: memref<128x256xf32, #tpu.memory_space<vmem>>) attributes {dimension_semantics = [], scalar_prefetch = 0 : i64, scratch_operands = 3 : i64, tpu.core_type = #tpu.core_type<tc>} {
    %c0 = arith.constant 0 : index
    %c0_0 = arith.constant 0 : index
    %0 = vector.load %arg0[%c0, %c0_0] : memref<128x16xf32, #tpu.memory_space<vmem>>, vector<128x16xf32>
    %1 = arith.truncf %0 : vector<128x16xf32> to vector<128x16xbf16>
    %c0_1 = arith.constant 0 : index
    %c0_2 = arith.constant 0 : index
    %2 = vector.load %arg1[%c0_1, %c0_2] : memref<16x32xbf16, #tpu.memory_space<vmem>>, vector<16x32xbf16>
    %cst = arith.constant dense<0.000000e+00> : vector<128x32xf32>
    %3 = tpu.matmul %1, %2, %cst {dimension_numbers = #tpu.dot_dimension_numbers<[1], [0], [0], [1], [0, 0, 1, 1], [], []>} : vector<128x16xbf16>, vector<16x32xbf16>, vector<128x32xf32> -> vector<128x32xf32>
    %c0_3 = arith.constant 0 : index
    %c0_4 = arith.constant 0 : index
    %4 = vector.load %arg2[%c0_3, %c0_4] : memref<1x32xf32, #tpu.memory_space<vmem>>, vector<1x32xf32>
    %5 = vector.broadcast %4 : vector<1x32xf32> to vector<128x32xf32>
    %6 = arith.addf %3, %5 : vector<128x32xf32>
    %cst_5 = arith.constant 0.000000e+00 : f32
    %7 = vector.broadcast %cst_5 : f32 to vector<128x32xf32>
    %8 = arith.maximumf %6, %7 : vector<128x32xf32>
    %9 = vector.extract_strided_slice %8 {offsets = [0, 0], sizes = [64, 32], strides = [1, 1]} : vector<128x32xf32> to vector<64x32xf32>
    %10 = vector.shape_cast %9 : vector<64x32xf32> to vector<1x64x32xf32>
    %cst_6 = arith.constant dense<0.000000e+00> : vector<1xf32>
    %11 = vector.multi_reduction <add>, %10, %cst_6 [1, 2] : vector<1x64x32xf32> to vector<1xf32>
    %12 = vector.shape_cast %11 : vector<1xf32> to vector<1x1x1xf32>
    %13 = vector.extract %12[0, 0, 0] : f32 from vector<1x1x1xf32>
    %14 = vector.broadcast %13 : f32 to vector<1x1xf32>
    %cst_7 = arith.constant 2.048000e+03 : f32
    %15 = vector.broadcast %cst_7 : f32 to vector<1x1xf32>
    %16 = arith.divf %14, %15 : vector<1x1xf32>
    %17 = vector.broadcast %16 : vector<1x1xf32> to vector<64x32xf32>
    %18 = arith.subf %9, %17 : vector<64x32xf32>
    %19 = arith.mulf %18, %18 : vector<64x32xf32>
    %20 = vector.shape_cast %19 : vector<64x32xf32> to vector<1x64x32xf32>
    %cst_8 = arith.constant dense<0.000000e+00> : vector<1xf32>
    %21 = vector.multi_reduction <add>, %20, %cst_8 [1, 2] : vector<1x64x32xf32> to vector<1xf32>
    %22 = vector.shape_cast %21 : vector<1xf32> to vector<1x1x1xf32>
    %23 = vector.extract %22[0, 0, 0] : f32 from vector<1x1x1xf32>
    %24 = vector.broadcast %23 : f32 to vector<1x1xf32>
    %cst_9 = arith.constant 2.048000e+03 : f32
    %25 = vector.broadcast %cst_9 : f32 to vector<1x1xf32>
    %26 = arith.divf %24, %25 : vector<1x1xf32>
    %27 = vector.broadcast %16 : vector<1x1xf32> to vector<64x32xf32>
    %28 = arith.subf %9, %27 : vector<64x32xf32>
    %29 = math.rsqrt %26 : vector<1x1xf32>
    %30 = vector.broadcast %29 : vector<1x1xf32> to vector<64x32xf32>
    %31 = arith.mulf %28, %30 : vector<64x32xf32>
    %32 = vector.extract_strided_slice %8 {offsets = [64, 0], sizes = [64, 32], strides = [1, 1]} : vector<128x32xf32> to vector<64x32xf32>
    %33 = vector.shape_cast %32 : vector<64x32xf32> to vector<1x64x32xf32>
    %cst_10 = arith.constant dense<0.000000e+00> : vector<1xf32>
    %34 = vector.multi_reduction <add>, %33, %cst_10 [1, 2] : vector<1x64x32xf32> to vector<1xf32>
    %35 = vector.shape_cast %34 : vector<1xf32> to vector<1x1x1xf32>
    %36 = vector.extract %35[0, 0, 0] : f32 from vector<1x1x1xf32>
    %37 = vector.broadcast %36 : f32 to vector<1x1xf32>
    %cst_11 = arith.constant 2.048000e+03 : f32
    %38 = vector.broadcast %cst_11 : f32 to vector<1x1xf32>
    %39 = arith.divf %37, %38 : vector<1x1xf32>
    %40 = vector.broadcast %39 : vector<1x1xf32> to vector<64x32xf32>
    %41 = arith.subf %32, %40 : vector<64x32xf32>
    %42 = arith.mulf %41, %41 : vector<64x32xf32>
    %43 = vector.shape_cast %42 : vector<64x32xf32> to vector<1x64x32xf32>
    %cst_12 = arith.constant dense<0.000000e+00> : vector<1xf32>
    %44 = vector.multi_reduction <add>, %43, %cst_12 [1, 2] : vector<1x64x32xf32> to vector<1xf32>
    %45 = vector.shape_cast %44 : vector<1xf32> to vector<1x1x1xf32>
    %46 = vector.extract %45[0, 0, 0] : f32 from vector<1x1x1xf32>
    %47 = vector.broadcast %46 : f32 to vector<1x1xf32>
    %cst_13 = arith.constant 2.048000e+03 : f32
    %48 = vector.broadcast %cst_13 : f32 to vector<1x1xf32>
    %49 = arith.divf %47, %48 : vector<1x1xf32>
    %50 = vector.broadcast %39 : vector<1x1xf32> to vector<64x32xf32>
    %51 = arith.subf %32, %50 : vector<64x32xf32>
    %52 = math.rsqrt %49 : vector<1x1xf32>
    %53 = vector.broadcast %52 : vector<1x1xf32> to vector<64x32xf32>
    %54 = arith.mulf %51, %53 : vector<64x32xf32>
    %55 = tpu.concatenate %31, %54 in 0 : vector<64x32xf32>, vector<64x32xf32> -> vector<128x32xf32>
    %56 = arith.truncf %55 : vector<128x32xf32> to vector<128x32xbf16>
    %c0_14 = arith.constant 0 : index
    %c0_15 = arith.constant 0 : index
    %57 = vector.load %arg3[%c0_14, %c0_15] : memref<32x2048xbf16, #tpu.memory_space<vmem>>, vector<32x2048xbf16>
    %cst_16 = arith.constant dense<0.000000e+00> : vector<128x2048xf32>
    %58 = tpu.matmul %56, %57, %cst_16 {dimension_numbers = #tpu.dot_dimension_numbers<[1], [0], [0], [1], [0, 0, 1, 1], [], []>} : vector<128x32xbf16>, vector<32x2048xbf16>, vector<128x2048xf32> -> vector<128x2048xf32>
    %c0_17 = arith.constant 0 : index
    %c0_18 = arith.constant 0 : index
    %59 = vector.load %arg4[%c0_17, %c0_18] : memref<1x2048xf32, #tpu.memory_space<vmem>>, vector<1x2048xf32>
    %60 = vector.broadcast %59 : vector<1x2048xf32> to vector<128x2048xf32>
    %61 = arith.addf %58, %60 : vector<128x2048xf32>
    %c0_19 = arith.constant 0 : index
    %c0_20 = arith.constant 0 : index
    %62 = vector.load %arg8[%c0_19, %c0_20] : memref<128x2048xf32, #tpu.memory_space<vmem>>, vector<128x2048xf32>
    tpu.vector_store %arg8[%c0_19, %c0_20], %61 {strides = array<i32>} : memref<128x2048xf32, #tpu.memory_space<vmem>>, vector<128x2048xf32>,
    %cst_21 = arith.constant 0.000000e+00 : f32
    %63 = vector.broadcast %cst_21 : f32 to vector<2x256xf32>
    %c0_i32 = arith.constant 0 : i32
    %c64_i32 = arith.constant 64 : i32
    %64 = arith.addi %c0_i32, %c64_i32 : i32
    %c1_i32 = arith.constant 1 : i32
    %65:4 = scf.for %arg11 = %c0_i32 to %64 step %c1_i32 iter_args(%arg12 = %63, %arg13 = %63, %arg14 = %63, %arg15 = %63) -> (vector<2x256xf32>, vector<2x256xf32>, vector<2x256xf32>, vector<2x256xf32>)  : i32 {
      %c63_i32 = arith.constant 63 : i32
      %82 = arith.subi %c63_i32, %arg11 : i32
      %c0_i32_40 = arith.constant 0 : i32
      %83 = arith.addi %c0_i32_40, %arg11 : i32
      %84 = arith.index_cast %83 : i32 to index
      %c0_41 = arith.constant 0 : index
      %85 = vector.load %arg8[%84, %c0_41] : memref<128x2048xf32, #tpu.memory_space<vmem>>, vector<1x1024xf32>
      %c64_i32_42 = arith.constant 64 : i32
      %86 = arith.addi %c64_i32_42, %arg11 : i32
      %87 = arith.index_cast %86 : i32 to index
      %c0_43 = arith.constant 0 : index
      %88 = vector.load %arg8[%87, %c0_43] : memref<128x2048xf32, #tpu.memory_space<vmem>>, vector<1x1024xf32>
      %89 = tpu.concatenate %85, %88 in 0 : vector<1x1024xf32>, vector<1x1024xf32> -> vector<2x1024xf32>
      %c0_i32_44 = arith.constant 0 : i32
      %90 = arith.addi %c0_i32_44, %82 : i32
      %91 = arith.index_cast %90 : i32 to index
      %c1024 = arith.constant 1024 : index
      %92 = vector.load %arg8[%91, %c1024] : memref<128x2048xf32, #tpu.memory_space<vmem>>, vector<1x1024xf32>
      %c64_i32_45 = arith.constant 64 : i32
      %93 = arith.addi %c64_i32_45, %82 : i32
      %94 = arith.index_cast %93 : i32 to index
      %c1024_46 = arith.constant 1024 : index
      %95 = vector.load %arg8[%94, %c1024_46] : memref<128x2048xf32, #tpu.memory_space<vmem>>, vector<1x1024xf32>
      %96 = tpu.concatenate %92, %95 in 0 : vector<1x1024xf32>, vector<1x1024xf32> -> vector<2x1024xf32>
      %97 = arith.truncf %arg12 : vector<2x256xf32> to vector<2x256xbf16>
      %c0_47 = arith.constant 0 : index
      %c0_48 = arith.constant 0 : index
      %98 = vector.load %arg5[%c0_47, %c0_48] : memref<256x1024xbf16, #tpu.memory_space<vmem>>, vector<256x1024xbf16>
      %cst_49 = arith.constant dense<0.000000e+00> : vector<2x1024xf32>
      %99 = tpu.matmul %97, %98, %cst_49 {dimension_numbers = #tpu.dot_dimension_numbers<[1], [0], [0], [1], [0, 0, 1, 1], [], []>} : vector<2x256xbf16>, vector<256x1024xbf16>, vector<2x1024xf32> -> vector<2x1024xf32>
      %100 = arith.addf %89, %99 : vector<2x1024xf32>
      %101 = vector.extract_strided_slice %100 {offsets = [0, 0], sizes = [2, 256], strides = [1, 1]} : vector<2x1024xf32> to vector<2x256xf32>
      %102 = arith.negf %101 : vector<2x256xf32>
      %103 = math.exp %102 : vector<2x256xf32>
      %cst_50 = arith.constant 1.000000e+00 : f32
      %104 = vector.broadcast %cst_50 : f32 to vector<2x256xf32>
      %105 = arith.addf %104, %103 : vector<2x256xf32>
      %106 = arith.divf %104, %105 : vector<2x256xf32>
      %107 = vector.extract_strided_slice %100 {offsets = [0, 256], sizes = [2, 256], strides = [1, 1]} : vector<2x1024xf32> to vector<2x256xf32>
      %108 = arith.negf %107 : vector<2x256xf32>
      %109 = math.exp %108 : vector<2x256xf32>
      %cst_51 = arith.constant 1.000000e+00 : f32
      %110 = vector.broadcast %cst_51 : f32 to vector<2x256xf32>
      %111 = arith.addf %110, %109 : vector<2x256xf32>
      %112 = arith.divf %110, %111 : vector<2x256xf32>
      %113 = vector.extract_strided_slice %100 {offsets = [0, 512], sizes = [2, 256], strides = [1, 1]} : vector<2x1024xf32> to vector<2x256xf32>
      %114 = math.tanh %113 : vector<2x256xf32>
      %115 = vector.extract_strided_slice %100 {offsets = [0, 768], sizes = [2, 256], strides = [1, 1]} : vector<2x1024xf32> to vector<2x256xf32>
      %116 = arith.negf %115 : vector<2x256xf32>
      %117 = math.exp %116 : vector<2x256xf32>
      %cst_52 = arith.constant 1.000000e+00 : f32
      %118 = vector.broadcast %cst_52 : f32 to vector<2x256xf32>
      %119 = arith.addf %118, %117 : vector<2x256xf32>
      %120 = arith.divf %118, %119 : vector<2x256xf32>
      %121 = arith.mulf %112, %arg13 : vector<2x256xf32>
      %122 = arith.mulf %106, %114 : vector<2x256xf32>
      %123 = arith.addf %121, %122 : vector<2x256xf32>
      %124 = math.tanh %123 : vector<2x256xf32>
      %125 = arith.mulf %120, %124 : vector<2x256xf32>
      %126 = arith.truncf %arg14 : vector<2x256xf32> to vector<2x256xbf16>
      %c0_53 = arith.constant 0 : index
      %c0_54 = arith.constant 0 : index
      %127 = vector.load %arg6[%c0_53, %c0_54] : memref<256x1024xbf16, #tpu.memory_space<vmem>>, vector<256x1024xbf16>
      %cst_55 = arith.constant dense<0.000000e+00> : vector<2x1024xf32>
      %128 = tpu.matmul %126, %127, %cst_55 {dimension_numbers = #tpu.dot_dimension_numbers<[1], [0], [0], [1], [0, 0, 1, 1], [], []>} : vector<2x256xbf16>, vector<256x1024xbf16>, vector<2x1024xf32> -> vector<2x1024xf32>
      %129 = arith.addf %96, %128 : vector<2x1024xf32>
      %130 = vector.extract_strided_slice %129 {offsets = [0, 0], sizes = [2, 256], strides = [1, 1]} : vector<2x1024xf32> to vector<2x256xf32>
      %131 = arith.negf %130 : vector<2x256xf32>
      %132 = math.exp %131 : vector<2x256xf32>
      %cst_56 = arith.constant 1.000000e+00 : f32
      %133 = vector.broadcast %cst_56 : f32 to vector<2x256xf32>
      %134 = arith.addf %133, %132 : vector<2x256xf32>
      %135 = arith.divf %133, %134 : vector<2x256xf32>
      %136 = vector.extract_strided_slice %129 {offsets = [0, 256], sizes = [2, 256], strides = [1, 1]} : vector<2x1024xf32> to vector<2x256xf32>
      %137 = arith.negf %136 : vector<2x256xf32>
      %138 = math.exp %137 : vector<2x256xf32>
      %cst_57 = arith.constant 1.000000e+00 : f32
      %139 = vector.broadcast %cst_57 : f32 to vector<2x256xf32>
      %140 = arith.addf %139, %138 : vector<2x256xf32>
      %141 = arith.divf %139, %140 : vector<2x256xf32>
      %142 = vector.extract_strided_slice %129 {offsets = [0, 512], sizes = [2, 256], strides = [1, 1]} : vector<2x1024xf32> to vector<2x256xf32>
      %143 = math.tanh %142 : vector<2x256xf32>
      %144 = vector.extract_strided_slice %129 {offsets = [0, 768], sizes = [2, 256], strides = [1, 1]} : vector<2x1024xf32> to vector<2x256xf32>
      %145 = arith.negf %144 : vector<2x256xf32>
      %146 = math.exp %145 : vector<2x256xf32>
      %cst_58 = arith.constant 1.000000e+00 : f32
      %147 = vector.broadcast %cst_58 : f32 to vector<2x256xf32>
      %148 = arith.addf %147, %146 : vector<2x256xf32>
      %149 = arith.divf %147, %148 : vector<2x256xf32>
      %150 = arith.mulf %141, %arg15 : vector<2x256xf32>
      %151 = arith.mulf %135, %143 : vector<2x256xf32>
      %152 = arith.addf %150, %151 : vector<2x256xf32>
      %153 = math.tanh %152 : vector<2x256xf32>
      %154 = arith.mulf %149, %153 : vector<2x256xf32>
      %155 = vector.extract_strided_slice %125 {offsets = [0, 0], sizes = [1, 256], strides = [1, 1]} : vector<2x256xf32> to vector<1x256xf32>
      %c0_i32_59 = arith.constant 0 : i32
      %156 = arith.addi %c0_i32_59, %arg11 : i32
      %157 = arith.index_cast %156 : i32 to index
      %c0_60 = arith.constant 0 : index
      %158 = vector.load %arg9[%157, %c0_60] : memref<128x256xf32, #tpu.memory_space<vmem>>, vector<1x256xf32>
      tpu.vector_store %arg9[%157, %c0_60], %155 {strides = array<i32>} : memref<128x256xf32, #tpu.memory_space<vmem>>, vector<1x256xf32>,
      %159 = vector.extract_strided_slice %154 {offsets = [0, 0], sizes = [1, 256], strides = [1, 1]} : vector<2x256xf32> to vector<1x256xf32>
      %c0_i32_61 = arith.constant 0 : i32
      %160 = arith.addi %c0_i32_61, %82 : i32
      %161 = arith.index_cast %160 : i32 to index
      %c0_62 = arith.constant 0 : index
      %162 = vector.load %arg10[%161, %c0_62] : memref<128x256xf32, #tpu.memory_space<vmem>>, vector<1x256xf32>
      tpu.vector_store %arg10[%161, %c0_62], %159 {strides = array<i32>} : memref<128x256xf32, #tpu.memory_space<vmem>>, vector<1x256xf32>,
      %163 = vector.extract_strided_slice %125 {offsets = [1, 0], sizes = [1, 256], strides = [1, 1]} : vector<2x256xf32> to vector<1x256xf32>
      %c64_i32_63 = arith.constant 64 : i32
      %164 = arith.addi %c64_i32_63, %arg11 : i32
      %165 = arith.index_cast %164 : i32 to index
      %c0_64 = arith.constant 0 : index
      %166 = vector.load %arg9[%165, %c0_64] : memref<128x256xf32, #tpu.memory_space<vmem>>, vector<1x256xf32>
      tpu.vector_store %arg9[%165, %c0_64], %163 {strides = array<i32>} : memref<128x256xf32, #tpu.memory_space<vmem>>, vector<1x256xf32>,
      %167 = vector.extract_strided_slice %154 {offsets = [1, 0], sizes = [1, 256], strides = [1, 1]} : vector<2x256xf32> to vector<1x256xf32>
      %c64_i32_65 = arith.constant 64 : i32
      %168 = arith.addi %c64_i32_65, %82 : i32
      %169 = arith.index_cast %168 : i32 to index
      %c0_66 = arith.constant 0 : index
      %170 = vector.load %arg10[%169, %c0_66] : memref<128x256xf32, #tpu.memory_space<vmem>>, vector<1x256xf32>
      tpu.vector_store %arg10[%169, %c0_66], %167 {strides = array<i32>} : memref<128x256xf32, #tpu.memory_space<vmem>>, vector<1x256xf32>,
      scf.yield %125, %123, %154, %152 : vector<2x256xf32>, vector<2x256xf32>, vector<2x256xf32>, vector<2x256xf32>
    }
    %c64_i32_22 = arith.constant 64 : i32
    %c0_23 = arith.constant 0 : index
    %c0_24 = arith.constant 0 : index
    %66 = vector.load %arg9[%c0_23, %c0_24] : memref<128x256xf32, #tpu.memory_space<vmem>>, vector<64x256xf32>
    %c0_25 = arith.constant 0 : index
    %c0_26 = arith.constant 0 : index
    %c0_27 = arith.constant 0 : index
    %67 = vector.load %arg7[%c0_25, %c0_26, %c0_27] : memref<2x64x512xf32, #tpu.memory_space<vmem>>, vector<1x64x256xf32>
    %68 = vector.shape_cast %67 : vector<1x64x256xf32> to vector<64x256xf32>
    %69 = vector.shape_cast %66 : vector<64x256xf32> to vector<1x64x256xf32>
    tpu.vector_store %arg7[%c0_25, %c0_26, %c0_27], %69 {strides = array<i32>} : memref<2x64x512xf32, #tpu.memory_space<vmem>>, vector<1x64x256xf32>,
    %c0_28 = arith.constant 0 : index
    %c0_29 = arith.constant 0 : index
    %70 = vector.load %arg10[%c0_28, %c0_29] : memref<128x256xf32, #tpu.memory_space<vmem>>, vector<64x256xf32>
    %c0_30 = arith.constant 0 : index
    %c0_31 = arith.constant 0 : index
    %c256 = arith.constant 256 : index
    %71 = vector.load %arg7[%c0_30, %c0_31, %c256] : memref<2x64x512xf32, #tpu.memory_space<vmem>>, vector<1x64x256xf32>
    %72 = vector.shape_cast %71 : vector<1x64x256xf32> to vector<64x256xf32>
    %73 = vector.shape_cast %70 : vector<64x256xf32> to vector<1x64x256xf32>
    tpu.vector_store %arg7[%c0_30, %c0_31, %c256], %73 {strides = array<i32>} : memref<2x64x512xf32, #tpu.memory_space<vmem>>, vector<1x64x256xf32>,
    %c64 = arith.constant 64 : index
    %c0_32 = arith.constant 0 : index
    %74 = vector.load %arg9[%c64, %c0_32] : memref<128x256xf32, #tpu.memory_space<vmem>>, vector<64x256xf32>
    %c1 = arith.constant 1 : index
    %c0_33 = arith.constant 0 : index
    %c0_34 = arith.constant 0 : index
    %75 = vector.load %arg7[%c1, %c0_33, %c0_34] : memref<2x64x512xf32, #tpu.memory_space<vmem>>, vector<1x64x256xf32>
    %76 = vector.shape_cast %75 : vector<1x64x256xf32> to vector<64x256xf32>
    %77 = vector.shape_cast %74 : vector<64x256xf32> to vector<1x64x256xf32>
    tpu.vector_store %arg7[%c1, %c0_33, %c0_34], %77 {strides = array<i32>} : memref<2x64x512xf32, #tpu.memory_space<vmem>>, vector<1x64x256xf32>,
    %c64_35 = arith.constant 64 : index
    %c0_36 = arith.constant 0 : index
    %78 = vector.load %arg10[%c64_35, %c0_36] : memref<128x256xf32, #tpu.memory_space<vmem>>, vector<64x256xf32>
    %c1_37 = arith.constant 1 : index
    %c0_38 = arith.constant 0 : index
    %c256_39 = arith.constant 256 : index
    %79 = vector.load %arg7[%c1_37, %c0_38, %c256_39] : memref<2x64x512xf32, #tpu.memory_space<vmem>>, vector<1x64x256xf32>
    %80 = vector.shape_cast %79 : vector<1x64x256xf32> to vector<64x256xf32>
    %81 = vector.shape_cast %78 : vector<64x256xf32> to vector<1x64x256xf32>
    tpu.vector_store %arg7[%c1_37, %c0_38, %c256_39], %81 {strides = array<i32>} : memref<2x64x512xf32, #tpu.memory_space<vmem>>, vector<1x64x256xf32>,
    return
  }
}

module attributes {stable_mosaic.version = 11 : i64} {
  func.func @_transformer_head_kernel(%arg0: i32, %arg1: memref<1x64x512xf32, #tpu.memory_space<vmem>>, %arg2: memref<64x512xf32, #tpu.memory_space<vmem>>, %arg3: memref<64x512xf32, #tpu.memory_space<vmem>>, %arg4: memref<512x1536xbf16, #tpu.memory_space<vmem>>, %arg5: memref<1x1536xf32, #tpu.memory_space<vmem>>, %arg6: memref<512x512xbf16, #tpu.memory_space<vmem>>, %arg7: memref<1x512xf32, #tpu.memory_space<vmem>>, %arg8: memref<512x4xf32, #tpu.memory_space<vmem>>, %arg9: memref<1x4xf32, #tpu.memory_space<vmem>>, %arg10: memref<1x1x4xf32, #tpu.memory_space<vmem>>, %arg11: memref<1x1x4xf32, #tpu.memory_space<vmem>>) attributes {dimension_semantics = [#tpu.dimension_semantics<parallel>], iteration_bounds = array<i64: 2>, scalar_prefetch = 0 : i64, scratch_operands = 0 : i64, tpu.core_type = #tpu.core_type<tc>, window_params = [{transform_indices = @transform_0, window_bounds = array<i64: 1, 64, 512>}, {pipeline_mode = #tpu.pipeline_mode<synchronous>, transform_indices = @transform_1, window_bounds = array<i64: 64, 512>}, {pipeline_mode = #tpu.pipeline_mode<synchronous>, transform_indices = @transform_2, window_bounds = array<i64: 64, 512>}, {pipeline_mode = #tpu.pipeline_mode<synchronous>, transform_indices = @transform_3, window_bounds = array<i64: 512, 1536>}, {pipeline_mode = #tpu.pipeline_mode<synchronous>, transform_indices = @transform_4, window_bounds = array<i64: 1, 1536>}, {pipeline_mode = #tpu.pipeline_mode<synchronous>, transform_indices = @transform_5, window_bounds = array<i64: 512, 512>}, {pipeline_mode = #tpu.pipeline_mode<synchronous>, transform_indices = @transform_6, window_bounds = array<i64: 1, 512>}, {pipeline_mode = #tpu.pipeline_mode<synchronous>, transform_indices = @transform_7, window_bounds = array<i64: 512, 4>}, {pipeline_mode = #tpu.pipeline_mode<synchronous>, transform_indices = @transform_8, window_bounds = array<i64: 1, 4>}, {transform_indices = @transform_9, window_bounds = array<i64: 1, 1, 4>}, {transform_indices = @transform_10, window_bounds = array<i64: 1, 1, 4>}]} {
    %c0 = arith.constant 0 : index
    %c0_0 = arith.constant 0 : index
    %c0_1 = arith.constant 0 : index
    %0 = vector.load %arg1[%c0, %c0_0, %c0_1] : memref<1x64x512xf32, #tpu.memory_space<vmem>>, vector<1x64x512xf32>
    %1 = vector.shape_cast %0 : vector<1x64x512xf32> to vector<64x512xf32>
    %c0_2 = arith.constant 0 : index
    %c0_3 = arith.constant 0 : index
    %2 = vector.load %arg2[%c0_2, %c0_3] : memref<64x512xf32, #tpu.memory_space<vmem>>, vector<64x512xf32>
    %c0_4 = arith.constant 0 : index
    %c0_5 = arith.constant 0 : index
    %3 = vector.load %arg3[%c0_4, %c0_5] : memref<64x512xf32, #tpu.memory_space<vmem>>, vector<64x512xf32>
    %4 = vector.shape_cast %1 : vector<64x512xf32> to vector<1x64x512xf32>
    %cst = arith.constant dense<0.000000e+00> : vector<1xf32>
    %5 = vector.multi_reduction <add>, %4, %cst [1, 2] : vector<1x64x512xf32> to vector<1xf32>
    %6 = vector.shape_cast %5 : vector<1xf32> to vector<1x1x1xf32>
    %7 = vector.extract %6[0, 0, 0] : f32 from vector<1x1x1xf32>
    %8 = vector.broadcast %7 : f32 to vector<1x1xf32>
    %cst_6 = arith.constant 3.276800e+04 : f32
    %9 = vector.broadcast %cst_6 : f32 to vector<1x1xf32>
    %10 = arith.divf %8, %9 : vector<1x1xf32>
    %11 = vector.broadcast %10 : vector<1x1xf32> to vector<64x512xf32>
    %12 = arith.subf %1, %11 : vector<64x512xf32>
    %13 = arith.mulf %12, %12 : vector<64x512xf32>
    %14 = vector.shape_cast %13 : vector<64x512xf32> to vector<1x64x512xf32>
    %cst_7 = arith.constant dense<0.000000e+00> : vector<1xf32>
    %15 = vector.multi_reduction <add>, %14, %cst_7 [1, 2] : vector<1x64x512xf32> to vector<1xf32>
    %16 = vector.shape_cast %15 : vector<1xf32> to vector<1x1x1xf32>
    %17 = vector.extract %16[0, 0, 0] : f32 from vector<1x1x1xf32>
    %18 = vector.broadcast %17 : f32 to vector<1x1xf32>
    %cst_8 = arith.constant 3.276800e+04 : f32
    %19 = vector.broadcast %cst_8 : f32 to vector<1x1xf32>
    %20 = arith.divf %18, %19 : vector<1x1xf32>
    %21 = vector.broadcast %10 : vector<1x1xf32> to vector<64x512xf32>
    %22 = arith.subf %1, %21 : vector<64x512xf32>
    %cst_9 = arith.constant 9.99999974E-6 : f32
    %23 = vector.broadcast %cst_9 : f32 to vector<1x1xf32>
    %24 = arith.addf %20, %23 : vector<1x1xf32>
    %25 = math.rsqrt %24 : vector<1x1xf32>
    %26 = vector.broadcast %25 : vector<1x1xf32> to vector<64x512xf32>
    %27 = arith.mulf %22, %26 : vector<64x512xf32>
    %28 = arith.mulf %27, %2 : vector<64x512xf32>
    %29 = arith.addf %28, %3 : vector<64x512xf32>
    %30 = arith.truncf %29 : vector<64x512xf32> to vector<64x512xbf16>
    %c0_10 = arith.constant 0 : index
    %c0_11 = arith.constant 0 : index
    %31 = vector.load %arg4[%c0_10, %c0_11] : memref<512x1536xbf16, #tpu.memory_space<vmem>>, vector<512x1536xbf16>
    %cst_12 = arith.constant dense<0.000000e+00> : vector<64x1536xf32>
    %32 = tpu.matmul %30, %31, %cst_12 {dimension_numbers = #tpu.dot_dimension_numbers<[1], [0], [0], [1], [0, 0, 1, 1], [], []>} : vector<64x512xbf16>, vector<512x1536xbf16>, vector<64x1536xf32> -> vector<64x1536xf32>
    %c0_13 = arith.constant 0 : index
    %c0_14 = arith.constant 0 : index
    %33 = vector.load %arg5[%c0_13, %c0_14] : memref<1x1536xf32, #tpu.memory_space<vmem>>, vector<1x1536xf32>
    %34 = vector.broadcast %33 : vector<1x1536xf32> to vector<64x1536xf32>
    %35 = arith.addf %32, %34 : vector<64x1536xf32>
    %36 = vector.extract_strided_slice %35 {offsets = [0, 0], sizes = [64, 128], strides = [1, 1]} : vector<64x1536xf32> to vector<64x128xf32>
    %37 = arith.truncf %36 : vector<64x128xf32> to vector<64x128xbf16>
    %38 = vector.extract_strided_slice %35 {offsets = [0, 512], sizes = [64, 128], strides = [1, 1]} : vector<64x1536xf32> to vector<64x128xf32>
    %39 = arith.truncf %38 : vector<64x128xf32> to vector<64x128xbf16>
    %40 = vector.extract_strided_slice %35 {offsets = [0, 1024], sizes = [64, 128], strides = [1, 1]} : vector<64x1536xf32> to vector<64x128xf32>
    %41 = arith.truncf %40 : vector<64x128xf32> to vector<64x128xbf16>
    %cst_15 = arith.constant dense<0.000000e+00> : vector<64x64xf32>
    %42 = tpu.matmul %37, %39, %cst_15 {dimension_numbers = #tpu.dot_dimension_numbers<[1], [1], [0], [0], [0, 0, 1, 0], [], []>} : vector<64x128xbf16>, vector<64x128xbf16>, vector<64x64xf32> -> vector<64x64xf32>
    %cst_16 = arith.constant 0.0883883461 : f32
    %43 = vector.broadcast %cst_16 : f32 to vector<64x64xf32>
    %44 = arith.mulf %42, %43 : vector<64x64xf32>
    %cst_17 = arith.constant dense<0xFF800000> : vector<64xf32>
    %45 = vector.multi_reduction <maximumf>, %44, %cst_17 [1] : vector<64x64xf32> to vector<64xf32>
    %46 = vector.shape_cast %45 : vector<64xf32> to vector<64x1xf32>
    %47 = vector.broadcast %46 : vector<64x1xf32> to vector<64x64xf32>
    %48 = arith.subf %44, %47 : vector<64x64xf32>
    %49 = math.exp %48 : vector<64x64xf32>
    %cst_18 = arith.constant dense<0.000000e+00> : vector<64xf32>
    %50 = vector.multi_reduction <add>, %49, %cst_18 [1] : vector<64x64xf32> to vector<64xf32>
    %51 = vector.shape_cast %50 : vector<64xf32> to vector<64x1xf32>
    %52 = tpu.reciprocal %51 {approx = true} : vector<64x1xf32> -> vector<64x1xf32>
    %53 = vector.broadcast %52 : vector<64x1xf32> to vector<64x64xf32>
    %54 = arith.mulf %49, %53 : vector<64x64xf32>
    %55 = arith.truncf %54 : vector<64x64xf32> to vector<64x64xbf16>
    %cst_19 = arith.constant dense<0.000000e+00> : vector<64x128xf32>
    %56 = tpu.matmul %55, %41, %cst_19 {dimension_numbers = #tpu.dot_dimension_numbers<[1], [0], [0], [1], [0, 0, 1, 1], [], []>} : vector<64x64xbf16>, vector<64x128xbf16>, vector<64x128xf32> -> vector<64x128xf32>
    %57 = vector.extract_strided_slice %35 {offsets = [0, 128], sizes = [64, 128], strides = [1, 1]} : vector<64x1536xf32> to vector<64x128xf32>
    %58 = arith.truncf %57 : vector<64x128xf32> to vector<64x128xbf16>
    %59 = vector.extract_strided_slice %35 {offsets = [0, 640], sizes = [64, 128], strides = [1, 1]} : vector<64x1536xf32> to vector<64x128xf32>
    %60 = arith.truncf %59 : vector<64x128xf32> to vector<64x128xbf16>
    %61 = vector.extract_strided_slice %35 {offsets = [0, 1152], sizes = [64, 128], strides = [1, 1]} : vector<64x1536xf32> to vector<64x128xf32>
    %62 = arith.truncf %61 : vector<64x128xf32> to vector<64x128xbf16>
    %cst_20 = arith.constant dense<0.000000e+00> : vector<64x64xf32>
    %63 = tpu.matmul %58, %60, %cst_20 {dimension_numbers = #tpu.dot_dimension_numbers<[1], [1], [0], [0], [0, 0, 1, 0], [], []>} : vector<64x128xbf16>, vector<64x128xbf16>, vector<64x64xf32> -> vector<64x64xf32>
    %cst_21 = arith.constant 0.0883883461 : f32
    %64 = vector.broadcast %cst_21 : f32 to vector<64x64xf32>
    %65 = arith.mulf %63, %64 : vector<64x64xf32>
    %cst_22 = arith.constant dense<0xFF800000> : vector<64xf32>
    %66 = vector.multi_reduction <maximumf>, %65, %cst_22 [1] : vector<64x64xf32> to vector<64xf32>
    %67 = vector.shape_cast %66 : vector<64xf32> to vector<64x1xf32>
    %68 = vector.broadcast %67 : vector<64x1xf32> to vector<64x64xf32>
    %69 = arith.subf %65, %68 : vector<64x64xf32>
    %70 = math.exp %69 : vector<64x64xf32>
    %cst_23 = arith.constant dense<0.000000e+00> : vector<64xf32>
    %71 = vector.multi_reduction <add>, %70, %cst_23 [1] : vector<64x64xf32> to vector<64xf32>
    %72 = vector.shape_cast %71 : vector<64xf32> to vector<64x1xf32>
    %73 = tpu.reciprocal %72 {approx = true} : vector<64x1xf32> -> vector<64x1xf32>
    %74 = vector.broadcast %73 : vector<64x1xf32> to vector<64x64xf32>
    %75 = arith.mulf %70, %74 : vector<64x64xf32>
    %76 = arith.truncf %75 : vector<64x64xf32> to vector<64x64xbf16>
    %cst_24 = arith.constant dense<0.000000e+00> : vector<64x128xf32>
    %77 = tpu.matmul %76, %62, %cst_24 {dimension_numbers = #tpu.dot_dimension_numbers<[1], [0], [0], [1], [0, 0, 1, 1], [], []>} : vector<64x64xbf16>, vector<64x128xbf16>, vector<64x128xf32> -> vector<64x128xf32>
    %78 = vector.extract_strided_slice %35 {offsets = [0, 256], sizes = [64, 128], strides = [1, 1]} : vector<64x1536xf32> to vector<64x128xf32>
    %79 = arith.truncf %78 : vector<64x128xf32> to vector<64x128xbf16>
    %80 = vector.extract_strided_slice %35 {offsets = [0, 768], sizes = [64, 128], strides = [1, 1]} : vector<64x1536xf32> to vector<64x128xf32>
    %81 = arith.truncf %80 : vector<64x128xf32> to vector<64x128xbf16>
    %82 = vector.extract_strided_slice %35 {offsets = [0, 1280], sizes = [64, 128], strides = [1, 1]} : vector<64x1536xf32> to vector<64x128xf32>
    %83 = arith.truncf %82 : vector<64x128xf32> to vector<64x128xbf16>
    %cst_25 = arith.constant dense<0.000000e+00> : vector<64x64xf32>
    %84 = tpu.matmul %79, %81, %cst_25 {dimension_numbers = #tpu.dot_dimension_numbers<[1], [1], [0], [0], [0, 0, 1, 0], [], []>} : vector<64x128xbf16>, vector<64x128xbf16>, vector<64x64xf32> -> vector<64x64xf32>
    %cst_26 = arith.constant 0.0883883461 : f32
    %85 = vector.broadcast %cst_26 : f32 to vector<64x64xf32>
    %86 = arith.mulf %84, %85 : vector<64x64xf32>
    %cst_27 = arith.constant dense<0xFF800000> : vector<64xf32>
    %87 = vector.multi_reduction <maximumf>, %86, %cst_27 [1] : vector<64x64xf32> to vector<64xf32>
    %88 = vector.shape_cast %87 : vector<64xf32> to vector<64x1xf32>
    %89 = vector.broadcast %88 : vector<64x1xf32> to vector<64x64xf32>
    %90 = arith.subf %86, %89 : vector<64x64xf32>
    %91 = math.exp %90 : vector<64x64xf32>
    %cst_28 = arith.constant dense<0.000000e+00> : vector<64xf32>
    %92 = vector.multi_reduction <add>, %91, %cst_28 [1] : vector<64x64xf32> to vector<64xf32>
    %93 = vector.shape_cast %92 : vector<64xf32> to vector<64x1xf32>
    %94 = tpu.reciprocal %93 {approx = true} : vector<64x1xf32> -> vector<64x1xf32>
    %95 = vector.broadcast %94 : vector<64x1xf32> to vector<64x64xf32>
    %96 = arith.mulf %91, %95 : vector<64x64xf32>
    %97 = arith.truncf %96 : vector<64x64xf32> to vector<64x64xbf16>
    %cst_29 = arith.constant dense<0.000000e+00> : vector<64x128xf32>
    %98 = tpu.matmul %97, %83, %cst_29 {dimension_numbers = #tpu.dot_dimension_numbers<[1], [0], [0], [1], [0, 0, 1, 1], [], []>} : vector<64x64xbf16>, vector<64x128xbf16>, vector<64x128xf32> -> vector<64x128xf32>
    %99 = vector.extract_strided_slice %35 {offsets = [0, 384], sizes = [64, 128], strides = [1, 1]} : vector<64x1536xf32> to vector<64x128xf32>
    %100 = arith.truncf %99 : vector<64x128xf32> to vector<64x128xbf16>
    %101 = vector.extract_strided_slice %35 {offsets = [0, 896], sizes = [64, 128], strides = [1, 1]} : vector<64x1536xf32> to vector<64x128xf32>
    %102 = arith.truncf %101 : vector<64x128xf32> to vector<64x128xbf16>
    %103 = vector.extract_strided_slice %35 {offsets = [0, 1408], sizes = [64, 128], strides = [1, 1]} : vector<64x1536xf32> to vector<64x128xf32>
    %104 = arith.truncf %103 : vector<64x128xf32> to vector<64x128xbf16>
    %cst_30 = arith.constant dense<0.000000e+00> : vector<64x64xf32>
    %105 = tpu.matmul %100, %102, %cst_30 {dimension_numbers = #tpu.dot_dimension_numbers<[1], [1], [0], [0], [0, 0, 1, 0], [], []>} : vector<64x128xbf16>, vector<64x128xbf16>, vector<64x64xf32> -> vector<64x64xf32>
    %cst_31 = arith.constant 0.0883883461 : f32
    %106 = vector.broadcast %cst_31 : f32 to vector<64x64xf32>
    %107 = arith.mulf %105, %106 : vector<64x64xf32>
    %cst_32 = arith.constant dense<0xFF800000> : vector<64xf32>
    %108 = vector.multi_reduction <maximumf>, %107, %cst_32 [1] : vector<64x64xf32> to vector<64xf32>
    %109 = vector.shape_cast %108 : vector<64xf32> to vector<64x1xf32>
    %110 = vector.broadcast %109 : vector<64x1xf32> to vector<64x64xf32>
    %111 = arith.subf %107, %110 : vector<64x64xf32>
    %112 = math.exp %111 : vector<64x64xf32>
    %cst_33 = arith.constant dense<0.000000e+00> : vector<64xf32>
    %113 = vector.multi_reduction <add>, %112, %cst_33 [1] : vector<64x64xf32> to vector<64xf32>
    %114 = vector.shape_cast %113 : vector<64xf32> to vector<64x1xf32>
    %115 = tpu.reciprocal %114 {approx = true} : vector<64x1xf32> -> vector<64x1xf32>
    %116 = vector.broadcast %115 : vector<64x1xf32> to vector<64x64xf32>
    %117 = arith.mulf %112, %116 : vector<64x64xf32>
    %118 = arith.truncf %117 : vector<64x64xf32> to vector<64x64xbf16>
    %cst_34 = arith.constant dense<0.000000e+00> : vector<64x128xf32>
    %119 = tpu.matmul %118, %104, %cst_34 {dimension_numbers = #tpu.dot_dimension_numbers<[1], [0], [0], [1], [0, 0, 1, 1], [], []>} : vector<64x64xbf16>, vector<64x128xbf16>, vector<64x128xf32> -> vector<64x128xf32>
    %120 = tpu.concatenate %56, %77, %98, %119 in 1 : vector<64x128xf32>, vector<64x128xf32>, vector<64x128xf32>, vector<64x128xf32> -> vector<64x512xf32>
    %121 = arith.truncf %120 : vector<64x512xf32> to vector<64x512xbf16>
    %c0_35 = arith.constant 0 : index
    %c0_36 = arith.constant 0 : index
    %122 = vector.load %arg6[%c0_35, %c0_36] : memref<512x512xbf16, #tpu.memory_space<vmem>>, vector<512x512xbf16>
    %cst_37 = arith.constant dense<0.000000e+00> : vector<64x512xf32>
    %123 = tpu.matmul %121, %122, %cst_37 {dimension_numbers = #tpu.dot_dimension_numbers<[1], [0], [0], [1], [0, 0, 1, 1], [], []>} : vector<64x512xbf16>, vector<512x512xbf16>, vector<64x512xf32> -> vector<64x512xf32>
    %c0_38 = arith.constant 0 : index
    %c0_39 = arith.constant 0 : index
    %124 = vector.load %arg7[%c0_38, %c0_39] : memref<1x512xf32, #tpu.memory_space<vmem>>, vector<1x512xf32>
    %125 = vector.broadcast %124 : vector<1x512xf32> to vector<64x512xf32>
    %126 = arith.addf %123, %125 : vector<64x512xf32>
    %127 = arith.addf %126, %1 : vector<64x512xf32>
    %128 = vector.shape_cast %127 : vector<64x512xf32> to vector<1x64x512xf32>
    %cst_40 = arith.constant dense<0.000000e+00> : vector<1xf32>
    %129 = vector.multi_reduction <add>, %128, %cst_40 [1, 2] : vector<1x64x512xf32> to vector<1xf32>
    %130 = vector.shape_cast %129 : vector<1xf32> to vector<1x1x1xf32>
    %131 = vector.extract %130[0, 0, 0] : f32 from vector<1x1x1xf32>
    %132 = vector.broadcast %131 : f32 to vector<1x1xf32>
    %cst_41 = arith.constant 3.276800e+04 : f32
    %133 = vector.broadcast %cst_41 : f32 to vector<1x1xf32>
    %134 = arith.divf %132, %133 : vector<1x1xf32>
    %135 = vector.broadcast %134 : vector<1x1xf32> to vector<64x512xf32>
    %136 = arith.subf %127, %135 : vector<64x512xf32>
    %137 = arith.mulf %136, %136 : vector<64x512xf32>
    %138 = vector.shape_cast %137 : vector<64x512xf32> to vector<1x64x512xf32>
    %cst_42 = arith.constant dense<0.000000e+00> : vector<1xf32>
    %139 = vector.multi_reduction <add>, %138, %cst_42 [1, 2] : vector<1x64x512xf32> to vector<1xf32>
    %140 = vector.shape_cast %139 : vector<1xf32> to vector<1x1x1xf32>
    %141 = vector.extract %140[0, 0, 0] : f32 from vector<1x1x1xf32>
    %142 = vector.broadcast %141 : f32 to vector<1x1xf32>
    %cst_43 = arith.constant 3.276800e+04 : f32
    %143 = vector.broadcast %cst_43 : f32 to vector<1x1xf32>
    %144 = arith.divf %142, %143 : vector<1x1xf32>
    %145 = vector.broadcast %134 : vector<1x1xf32> to vector<64x512xf32>
    %146 = arith.subf %127, %145 : vector<64x512xf32>
    %cst_44 = arith.constant 9.99999974E-6 : f32
    %147 = vector.broadcast %cst_44 : f32 to vector<1x1xf32>
    %148 = arith.addf %144, %147 : vector<1x1xf32>
    %149 = math.rsqrt %148 : vector<1x1xf32>
    %150 = vector.broadcast %149 : vector<1x1xf32> to vector<64x512xf32>
    %151 = arith.mulf %146, %150 : vector<64x512xf32>
    %152 = arith.mulf %151, %2 : vector<64x512xf32>
    %153 = arith.addf %152, %3 : vector<64x512xf32>
    %cst_45 = arith.constant dense<0.000000e+00> : vector<512xf32>
    %154 = vector.multi_reduction <add>, %153, %cst_45 [0] : vector<64x512xf32> to vector<512xf32>
    %155 = vector.shape_cast %154 : vector<512xf32> to vector<1x512xf32>
    %cst_46 = arith.constant 6.400000e+01 : f32
    %156 = vector.broadcast %cst_46 : f32 to vector<1x512xf32>
    %157 = arith.divf %155, %156 : vector<1x512xf32>
    %c0_47 = arith.constant 0 : index
    %c0_48 = arith.constant 0 : index
    %158 = vector.load %arg8[%c0_47, %c0_48] : memref<512x4xf32, #tpu.memory_space<vmem>>, vector<512x4xf32>
    %cst_49 = arith.constant dense<0.000000e+00> : vector<1x4xf32>
    %159 = tpu.matmul %157, %158, %cst_49 {dimension_numbers = #tpu.dot_dimension_numbers<[1], [0], [0], [1], [0, 0, 1, 1], [], []>} : vector<1x512xf32>, vector<512x4xf32>, vector<1x4xf32> -> vector<1x4xf32>
    %c0_50 = arith.constant 0 : index
    %c0_51 = arith.constant 0 : index
    %160 = vector.load %arg9[%c0_50, %c0_51] : memref<1x4xf32, #tpu.memory_space<vmem>>, vector<1x4xf32>
    %161 = arith.addf %159, %160 : vector<1x4xf32>
    %cst_52 = arith.constant dense<0xFF800000> : vector<1xf32>
    %162 = vector.multi_reduction <maximumf>, %161, %cst_52 [1] : vector<1x4xf32> to vector<1xf32>
    %163 = vector.shape_cast %162 : vector<1xf32> to vector<1x1xf32>
    %164 = vector.broadcast %163 : vector<1x1xf32> to vector<1x4xf32>
    %165 = arith.subf %161, %164 : vector<1x4xf32>
    %166 = math.exp %165 : vector<1x4xf32>
    %cst_53 = arith.constant dense<0.000000e+00> : vector<1xf32>
    %167 = vector.multi_reduction <add>, %166, %cst_53 [1] : vector<1x4xf32> to vector<1xf32>
    %168 = vector.shape_cast %167 : vector<1xf32> to vector<1x1xf32>
    %169 = vector.broadcast %168 : vector<1x1xf32> to vector<1x4xf32>
    %170 = arith.divf %166, %169 : vector<1x4xf32>
    %c0_54 = arith.constant 0 : index
    %c0_55 = arith.constant 0 : index
    %c0_56 = arith.constant 0 : index
    %171 = vector.load %arg10[%c0_54, %c0_55, %c0_56] : memref<1x1x4xf32, #tpu.memory_space<vmem>>, vector<1x1x4xf32>
    %172 = vector.shape_cast %171 : vector<1x1x4xf32> to vector<1x4xf32>
    %173 = vector.shape_cast %170 : vector<1x4xf32> to vector<1x1x4xf32>
    tpu.vector_store %arg10[%c0_54, %c0_55, %c0_56], %173 {strides = array<i32>} : memref<1x1x4xf32, #tpu.memory_space<vmem>>, vector<1x1x4xf32>,
    %174 = math.log %168 : vector<1x1xf32>
    %175 = vector.broadcast %174 : vector<1x1xf32> to vector<1x4xf32>
    %176 = arith.subf %165, %175 : vector<1x4xf32>
    %c0_57 = arith.constant 0 : index
    %c0_58 = arith.constant 0 : index
    %c0_59 = arith.constant 0 : index
    %177 = vector.load %arg11[%c0_57, %c0_58, %c0_59] : memref<1x1x4xf32, #tpu.memory_space<vmem>>, vector<1x1x4xf32>
    %178 = vector.shape_cast %177 : vector<1x1x4xf32> to vector<1x4xf32>
    %179 = vector.shape_cast %176 : vector<1x4xf32> to vector<1x1x4xf32>
    tpu.vector_store %arg11[%c0_57, %c0_58, %c0_59], %179 {strides = array<i32>} : memref<1x1x4xf32, #tpu.memory_space<vmem>>, vector<1x1x4xf32>,
    return
  }
  func.func @transform_0(%arg0: i32) -> (i32, i32, i32) {
    %c0_i32 = arith.constant 0 : i32
    %c0_i32_0 = arith.constant 0 : i32
    %c0_i32_1 = arith.constant 0 : i32
    return %arg0, %c0_i32, %c0_i32_0 : i32, i32, i32
  }
  func.func @transform_1(%arg0: i32) -> (i32, i32) {
    %c0_i32 = arith.constant 0 : i32
    %c0_i32_0 = arith.constant 0 : i32
    %c0_i32_1 = arith.constant 0 : i32
    return %c0_i32, %c0_i32_0 : i32, i32
  }
  func.func @transform_2(%arg0: i32) -> (i32, i32) {
    %c0_i32 = arith.constant 0 : i32
    %c0_i32_0 = arith.constant 0 : i32
    %c0_i32_1 = arith.constant 0 : i32
    return %c0_i32, %c0_i32_0 : i32, i32
  }
  func.func @transform_3(%arg0: i32) -> (i32, i32) {
    %c0_i32 = arith.constant 0 : i32
    %c0_i32_0 = arith.constant 0 : i32
    %c0_i32_1 = arith.constant 0 : i32
    return %c0_i32, %c0_i32_0 : i32, i32
  }
  func.func @transform_4(%arg0: i32) -> (i32, i32) {
    %c0_i32 = arith.constant 0 : i32
    %c0_i32_0 = arith.constant 0 : i32
    %c0_i32_1 = arith.constant 0 : i32
    return %c0_i32, %c0_i32_0 : i32, i32
  }
  func.func @transform_5(%arg0: i32) -> (i32, i32) {
    %c0_i32 = arith.constant 0 : i32
    %c0_i32_0 = arith.constant 0 : i32
    %c0_i32_1 = arith.constant 0 : i32
    return %c0_i32, %c0_i32_0 : i32, i32
  }
  func.func @transform_6(%arg0: i32) -> (i32, i32) {
    %c0_i32 = arith.constant 0 : i32
    %c0_i32_0 = arith.constant 0 : i32
    %c0_i32_1 = arith.constant 0 : i32
    return %c0_i32, %c0_i32_0 : i32, i32
  }
  func.func @transform_7(%arg0: i32) -> (i32, i32) {
    %c0_i32 = arith.constant 0 : i32
    %c0_i32_0 = arith.constant 0 : i32
    %c0_i32_1 = arith.constant 0 : i32
    return %c0_i32, %c0_i32_0 : i32, i32
  }
  func.func @transform_8(%arg0: i32) -> (i32, i32) {
    %c0_i32 = arith.constant 0 : i32
    %c0_i32_0 = arith.constant 0 : i32
    %c0_i32_1 = arith.constant 0 : i32
    return %c0_i32, %c0_i32_0 : i32, i32
  }
  func.func @transform_9(%arg0: i32) -> (i32, i32, i32) {
    %c0_i32 = arith.constant 0 : i32
    %c0_i32_0 = arith.constant 0 : i32
    %c0_i32_1 = arith.constant 0 : i32
    return %arg0, %c0_i32, %c0_i32_0 : i32, i32, i32
  }
  func.func @transform_10(%arg0: i32) -> (i32, i32, i32) {
    %c0_i32 = arith.constant 0 : i32
    %c0_i32_0 = arith.constant 0 : i32
    %c0_i32_1 = arith.constant 0 : i32
    return %arg0, %c0_i32, %c0_i32_0 : i32, i32, i32
  }
}

</mosaic_0001>

<bundles_post_ra>
// kernel: forward.2
= control target key start
LH: loop header
LB: loop body
LE: loop exit
PB: predicated region body
PF: predicated region fallthrough
CT: control target
= control target key end

     0   :  { %vm66_vm0 = vcmask 130048   ;;  %vm204_vm1 = vcmask 261120   ;;  %s7218_s1 = inlined_call_operand.vmem [shape: bf16[16,32], index: 1, kind: input, shape index: {}]   ;;  %s7219_s5 = inlined_call_operand.vmem [shape: bf16[256,1024], index: 5, kind: input, shape index: {}]   ;;  %s7220_s6 = inlined_call_operand.vmem [shape: bf16[256,1024], index: 6, kind: input, shape index: {}]   ;;  %s7221_s7 = inlined_call_operand.vmem [shape: f32[2,64,512], index: 7, kind: output, shape index: {}]   ;;  %s7222_s0 = inlined_call_operand.vmem [shape: f32[128,16], index: 0, kind: input, shape index: {}]   ;;  %s7223_s2 = inlined_call_operand.vmem [shape: f32[1,32], index: 2, kind: input, shape index: {}]   ;;  %s7224_s3 = inlined_call_operand.vmem [shape: bf16[32,2048], index: 3, kind: input, shape index: {}]   ;;  %s7225_s4 = inlined_call_operand.vmem [shape: f32[1,2048], index: 4, kind: input, shape index: {}]  }
   0x1   :  { %v4869_v0 = vld [vmem:[%s7218_s1] sm:$0xff]   ;;  %v28_v2 = vld [vmem:[%s7222_s0 + $0x8] sm:$0xff]  ;;  %v29_v3 = vld [vmem:[%s7222_s0 + $0x10] sm:$0xff] }
   0x2   :  { %v27_v1 = vld [vmem:[%s7222_s0] sm:$0xff]  ;;  %4767 = vmatprep.subr.bf16.mxu0 %v4869_v0  ;;  %v30_v5 = vld [vmem:[%s7222_s0 + $0x18] sm:$0xff]  ;;  %v32_v7 = vld [vmem:[%s7222_s0 + $0x28] sm:$0xff]  ;;  %4785 = vmatprep.subr.bf16.mxu1 %v4869_v0 }
   0x3   :  { %v43_v4 = vpack.c.bf16 %v28_v2, %v27_v1  ;;  %v31_v6 = vld [vmem:[%s7222_s0 + $0x20] sm:$0xff]  ;;  %4768 = vmatpush3.bf16.msra.mxu0 %v4869_v0  ;;  %v44_v8 = vpack.c.bf16 %v30_v5, %v29_v3  ;;  %4786 = vmatpush3.bf16.msra.mxu1 %v4869_v0  ;;  %v33_v10 = vld [vmem:[%s7222_s0 + $0x30] sm:$0xff]  ;;  %v34_v11 = vld [vmem:[%s7222_s0 + $0x38] sm:$0xff] }
   0x4   :  { %v45_v9 = vpack.c.bf16 %v32_v7, %v31_v6  ;;  %v46_v12 = vpack.c.bf16 %v34_v11, %v33_v10  ;;  %v35_v13 = vld [vmem:[%s7222_s0 + $0x40] sm:$0xff]  ;;  %v36_v14 = vld [vmem:[%s7222_s0 + $0x48] sm:$0xff]  ;;  %v37_v16 = vld [vmem:[%s7222_s0 + $0x50] sm:$0xff] }
   0x5   :  { %4769 = vmatprep.mubr.msk.bf16.mxu0 %vm66_vm0, %v43_v4  ;;  %v47_v15 = vpack.c.bf16 %v36_v14, %v35_v13  ;;  %v38_v17 = vld [vmem:[%s7222_s0 + $0x58] sm:$0xff]  ;;  %v39_v19 = vld [vmem:[%s7222_s0 + $0x60] sm:$0xff]  ;;  %v40_v20 = vld [vmem:[%s7222_s0 + $0x68] sm:$0xff] }
   0x6   :  { %4770 = vmatmul.mubr.msk.bf16.vlgmr.msra.gmra.mxu0 %vm66_vm0, %v44_v8  ;;  %v48_v18 = vpack.c.bf16 %v38_v17, %v37_v16  ;;  %v49_v21 = vpack.c.bf16 %v40_v20, %v39_v19  ;;  %v41_v22 = vld [vmem:[%s7222_s0 + $0x70] sm:$0xff]  ;;  %v42_v23 = vld [vmem:[%s7222_s0 + $0x78] sm:$0xff]  ;;  %v5114_v26 = vld [vmem:[%s7223_s2] ss:$0 sm:$0xff] }
   0x7   :  { %4773 = vmatprep.mubr.msk.bf16.mxu0 %vm66_vm0, %v45_v9  ;;  %4777 = vmatprep.mubr.msk.bf16.mxu1 %vm66_vm0, %v47_v15  ;;  %v50_v24 = vpack.c.bf16 %v42_v23, %v41_v22 }
   0x8   :  { %4778 = vmatmul.mubr.msk.bf16.vlgmr.msra.gmra.mxu1 %vm66_vm0, %v48_v18 }
   0x9   :  { %4781 = vmatprep.mubr.msk.bf16.mxu1 %vm66_vm0, %v49_v21 }
   0xe   :  { %4774 = vmatmul.mubr.msk.bf16.gmra.mxu0 %vm66_vm0, %v46_v12 }
  0x10   :  { %4782 = vmatmul.mubr.msk.bf16.gmra.mxu1 %vm66_vm0, %v50_v24 }
  0xc6   :  { %v4771_v25 = vpop.f32.mrf.mxu0 }
  0xc7   :  { %v5120_v30 = vadd.f32 %v4771_v25, %v5114_v26 }
  0xc8   :  { %v125_v27 = vpop.f32.mrf.mxu0  ;;  %v4779_v1 = vpop.f32.mrf.mxu1 }
  0xc9   :  { %v5117_v28 = vadd.f32 %v5114_v26, %v125_v27  ;;  %v190_v36 = vmax.f32 %v5120_v30, 0.0  ;;  %v5173_v3 = vadd.f32 %v4779_v1, %v5114_v26 }
  0xca   :  { %v4772_v29 = vpop.f32.mrf.mxu0  ;;  %v157_v2 = vpop.f32.mrf.mxu1 }
  0xcb   :  { %v188_v32 = vmax.f32 %v5117_v28, 0.0  ;;  %v5124_v33 = vadd.f32 %v4772_v29, %v5114_v26  ;;  %v208_v45 = vsel %vm204_vm1, %v190_v36, 0.0  ;;  %v5176_v4 = vadd.f32 %v5114_v26, %v157_v2 }
  0xcc   :  { %v128_v31 = vpop.f32.mrf.mxu0  ;;  %v4780_v5 = vpop.f32.mrf.mxu1  ;;  %v198_v9 = vmax.f32 %v5173_v3, 0.0 }
  0xcd   :  { %v5127_v34 = vadd.f32 %v5114_v26, %v128_v31  ;;  %v205_v39 = vsel %vm204_vm1, %v188_v32, 0.0  ;;  %v191_v40 = vmax.f32 %v5124_v33, 0.0  ;;  %v196_v6 = vmax.f32 %v5176_v4, 0.0 }
  0xce   :  { %v4775_v35 = vpop.f32.mrf.mxu0  ;;  %v5180_v7 = vadd.f32 %v4780_v5, %v5114_v26  ;;  %v160_v8 = vpop.f32.mrf.mxu1  ;;  %v286_v16 = vsel %vm204_vm1, %v198_v9, 0.0 }
  0xcf   :  { %v189_v37 = vmax.f32 %v5127_v34, 0.0  ;;  %v5145_v46 = vadd.f32 %v4775_v35, %v5114_v26  ;;  %v210_v50 = vsel %vm204_vm1, %v191_v40, 0.0  ;;  %v5184_v10 = vadd.f32 %v5114_v26, %v160_v8 }
  0xd0   :  { %v141_v38 = vpop.f32.mrf.mxu0  ;;  %v4783_v11 = vpop.f32.mrf.mxu1  ;;  %v283_v12 = vsel %vm204_vm1, %v196_v6, 0.0  ;;  %v199_v13 = vmax.f32 %v5180_v7, 0.0 }
  0xd1   :  { %v206_v41 = vsel %vm204_vm1, %v189_v37, 0.0  ;;  %v5139_v42 = vadd.f32 %v5114_v26, %v141_v38  ;;  %v194_v54 = vmax.f32 %v5145_v46, 0.0  ;;  %v197_v14 = vmax.f32 %v5184_v10, 0.0 }
  0xd2   :  { %v207_v43 = vadd.f32 %v206_v41, %v205_v39  ;;  %v4776_v44 = vpop.f32.mrf.mxu0  ;;  %v173_v15 = vpop.f32.mrf.mxu1  ;;  %v288_v21 = vsel %vm204_vm1, %v199_v13, 0.0  ;;  %v5204_v22 = vadd.f32 %v4783_v11, %v5114_v26 }
  0xd3   :  { %v192_v47 = vmax.f32 %v5139_v42, 0.0  ;;  %v5152_v51 = vadd.f32 %v4776_v44, %v5114_v26  ;;  %v216_v61 = vsel %vm204_vm1, %v194_v54, 0.0  ;;  %v284_v17 = vsel %vm204_vm1, %v197_v14, 0.0 }
  0xd4   :  { %v209_v48 = vadd.f32 %v208_v45, %v207_v43  ;;  %v144_v49 = vpop.f32.mrf.mxu0  ;;  %v5198_v18 = vadd.f32 %v5114_v26, %v173_v15  ;;  %v285_v19 = vadd.f32 %v284_v17, %v283_v12  ;;  %v4784_v20 = vpop.f32.mrf.mxu1  ;;  %v202_v38 = vmax.f32 %v5204_v22, 0.0 }
  0xd5   :  { %v5155_v52 = vadd.f32 %v5114_v26, %v144_v49  ;;  %v212_v55 = vsel %vm204_vm1, %v192_v47, 0.0  ;;  %v195_v58 = vmax.f32 %v5152_v51, 0.0  ;;  %v5208_v24 = vadd.f32 %v4784_v20, %v5114_v26 }
  0xd6   :  { %v211_v53 = vadd.f32 %v210_v50, %v209_v48  ;;  %v200_v23 = vmax.f32 %v5198_v18, 0.0  ;;  %v287_v25 = vadd.f32 %v286_v16, %v285_v19  ;;  %v176_v27 = vpop.f32.mrf.mxu1  ;;  %v294_v48 = vsel %vm204_vm1, %v202_v38, 0.0 }
  0xd7   :  { %v193_v56 = vmax.f32 %v5155_v52, 0.0  ;;  %v218_v63 = vsel %vm204_vm1, %v195_v58, 0.0  ;;  %v5214_v31 = vadd.f32 %v5114_v26, %v176_v27  ;;  %v203_v39 = vmax.f32 %v5208_v24, 0.0 }
  0xd8   :  { %v213_v57 = vadd.f32 %v212_v55, %v211_v53  ;;  %v290_v29 = vsel %vm204_vm1, %v200_v23, 0.0  ;;  %v289_v35 = vadd.f32 %v288_v21, %v287_v25 }
  0xd9   :  { %v214_v59 = vsel %vm204_vm1, %v193_v56, 0.0  ;;  %v201_v41 = vmax.f32 %v5214_v31, 0.0  ;;  %v296_v26 = vsel %vm204_vm1, %v203_v39, 0.0 }
  0xda   :  { %v215_v60 = vadd.f32 %v214_v59, %v213_v57  ;;  %v291_v43 = vadd.f32 %v290_v29, %v289_v35  ;;  %v384_v35 = vld [vmem:[%s7224_s3 + $0x80] sm:$0xff] }
  0xdb   :  { %v292_v44 = vsel %vm204_vm1, %v201_v41, 0.0 }
  0xdc   :  { %v217_v62 = vadd.f32 %v216_v61, %v215_v60  ;;  %v293_v45 = vadd.f32 %v292_v44, %v291_v43  ;;  %v392_v43 = vld [vmem:[%s7224_s3 + $0xc0] sm:$0xff]  ;;  %v385_v44 = vld [vmem:[%s7224_s3 + $0x88] sm:$0xff] }
  0xde   :  { %v219_v0 = vadd.f32 %v218_v63, %v217_v62  ;;  %v295_v49 = vadd.f32 %v294_v48, %v293_v45  ;;  %v5010_v45 = vmov 0   ;;  %v4350_v48 = vcombine.low %v384_v35, %v392_v43 }
  0xdf   :  { %700 = vmatprep.mubr.bf16.mxu1 %v5010_v45  ;;  %813 = vmatprep.mubr.bf16.mxu0 %v5010_v45 }
  0xe0   :  { %220 = vadd.xlane.f32.xlu0 %v219_v0  ;;  %v297_v50 = vadd.f32 %v296_v26, %v295_v49  ;;  %v4351_v26 = vcombine.high %v384_v35, %v392_v43  ;;  %v393_v49 = vld [vmem:[%s7224_s3 + $0xc8] sm:$0xff] }
  0xe2   :  { %298 = vadd.xlane.f32.xlu1 %v297_v50  ;;  %v368_v50 = vld [vmem:[%s7224_s3] sm:$0xff]  ;;  %680 = vmatprep.subr.bf16.mxu1 %v4351_v26 }
  0xe3   :  { %681 = vmatpush1.bf16.msra.mxu1 %v4350_v48 }
 0x169   :  { %v221_v53 = vpop.xlane.xlu0 %220 }
 0x16a   :  { %v222_v55 = vrot.slane %v221_v53, 4 }
 0x16c   :  { %v223_v57 = vadd.f32 %v222_v55, %v221_v53  ;;  %v376_v53 = vld [vmem:[%s7224_s3 + $0x40] sm:$0xff]  ;;  %v4352_v55 = vcombine.low %v385_v44, %v393_v49 }
 0x16e   :  { %v224_v59 = vrot.slane %v223_v57, 2 }
 0x170   :  { %v225_v60 = vadd.f32 %v224_v59, %v223_v57  ;;  %v4353_v57 = vcombine.high %v385_v44, %v393_v49  ;;  %v4335_v59 = vcombine.high %v368_v50, %v376_v53 }
 0x172   :  { %v226_v61 = vrot.slane %v225_v60, 1  ;;  %793 = vmatprep.subr.bf16.mxu0 %v4353_v57  ;;  %682 = vmatprep.subr.bf16.mxu1 %v4335_v59 }
 0x173   :  { %794 = vmatpush1.bf16.msra.mxu0 %v4352_v55 }
 0x174   :  { %v227_v62 = vadd.f32 %v226_v61, %v225_v60  ;;  %v369_v60 = vld [vmem:[%s7224_s3 + $0x8] sm:$0xff] }
 0x175   :  { %v377_v61 = vld [vmem:[%s7224_s3 + $0x48] sm:$0xff] }
 0x176   :  { %4787 = vpush %v227_v62  ;;  %v4337_v62 = vcombine.high %v369_v60, %v377_v61 }
 0x178   :  { %795 = vmatprep.subr.bf16.mxu0 %v4337_v62 }
 0x1a7   :  { %s4788_s0 = spop %4787 }
 0x1a8   :  { %v229_v63 = vstv %s4788_s0 }
 0x1a9   :  { %v231_v0 = vmul.f32 0.00048828125, %v229_v63  ;;  %v4334_v63 = vcombine.low %v368_v50, %v376_v53 }
 0x1ab   :  { %v5230_v1 = vsub.f32 %v188_v32, %v231_v0  ;;  %v5234_v2 = vsub.f32 %v189_v37, %v231_v0  ;;  %v5238_v5 = vsub.f32 %v190_v36, %v231_v0  ;;  %v5242_v8 = vsub.f32 %v191_v40, %v231_v0  ;;  %683 = vmatpush1.bf16.msra.mxu1 %v4334_v63 }
 0x1ac   :  { %v5246_v11 = vsub.f32 %v192_v47, %v231_v0  ;;  %v5256_v30 = vsub.f32 %v193_v56, %v231_v0  ;;  %v5264_v42 = vsub.f32 %v194_v54, %v231_v0  ;;  %v5271_v56 = vsub.f32 %v195_v58, %v231_v0 }
 0x1ad   :  { %v240_v28 = vmul.f32 %v5230_v1, %v5230_v1  ;;  %v241_v32 = vmul.f32 %v5234_v2, %v5234_v2  ;;  %v242_v34 = vmul.f32 %v5238_v5, %v5238_v5  ;;  %v243_v33 = vmul.f32 %v5242_v8, %v5242_v8 }
 0x1ae   :  { %v244_v47 = vmul.f32 %v5246_v11, %v5246_v11  ;;  %v245_v15 = vmul.f32 %v5256_v30, %v5256_v30  ;;  %v246_v46 = vmul.f32 %v5264_v42, %v5264_v42  ;;  %v247_v20 = vmul.f32 %v5271_v56, %v5271_v56 }
 0x1af   :  { %v248_v36 = vsel %vm204_vm1, %v240_v28, 0.0  ;;  %v249_v37 = vsel %vm204_vm1, %v241_v32, 0.0  ;;  %v251_v12 = vsel %vm204_vm1, %v242_v34, 0.0  ;;  %v253_v16 = vsel %vm204_vm1, %v243_v33, 0.0  ;;  %v299_v28 = vpop.xlane.xlu1 %298 }
 0x1b0   :  { %v250_v40 = vadd.f32 %v249_v37, %v248_v36  ;;  %v255_v54 = vsel %vm204_vm1, %v244_v47, 0.0  ;;  %v257_v21 = vsel %vm204_vm1, %v245_v15, 0.0  ;;  %v259_v58 = vsel %vm204_vm1, %v246_v46, 0.0 }
 0x1b1   :  { %v261_v27 = vsel %vm204_vm1, %v247_v20, 0.0  ;;  %v4336_v0 = vcombine.low %v369_v60, %v377_v61  ;;  %v300_v32 = vrot.slane %v299_v28, 4 }
 0x1b2   :  { %v252_v52 = vadd.f32 %v251_v12, %v250_v40 }
 0x1b3   :  { %796 = vmatpush1.bf16.msra.mxu0 %v4336_v0  ;;  %v301_v34 = vadd.f32 %v300_v32, %v299_v28 }
 0x1b4   :  { %v254_v17 = vadd.f32 %v253_v16, %v252_v52 }
 0x1b5   :  { %v302_v33 = vrot.slane %v301_v34, 2 }
 0x1b6   :  { %v256_v19 = vadd.f32 %v255_v54, %v254_v17 }
 0x1b7   :  { %v303_v47 = vadd.f32 %v302_v33, %v301_v34 }
 0x1b8   :  { %v258_v51 = vadd.f32 %v257_v21, %v256_v19 }
 0x1b9   :  { %v304_v15 = vrot.slane %v303_v47, 1 }
 0x1ba   :  { %v260_v25 = vadd.f32 %v259_v58, %v258_v51 }
 0x1bb   :  { %v305_v46 = vadd.f32 %v304_v15, %v303_v47  ;;  %v370_v47 = vld [vmem:[%s7224_s3 + $0x10] sm:$0xff] }
 0x1bc   :  { %v262_v29 = vadd.f32 %v261_v27, %v260_v25 }
 0x1be   :  { %263 = vadd.xlane.f32.xlu0 %v262_v29 }
 0x247   :  { %v264_v36 = vpop.xlane.xlu0 %263 }
 0x248   :  { %v265_v37 = vrot.slane %v264_v36, 4 }
 0x24a   :  { %v266_v40 = vadd.f32 %v265_v37, %v264_v36  ;;  %v395_v36 = vld [vmem:[%s7224_s3 + $0xd8] sm:$0xff] }
 0x24c   :  { %v267_v12 = vrot.slane %v266_v40, 2 }
 0x24e   :  { %v268_v52 = vadd.f32 %v267_v12, %v266_v40  ;;  %v378_v12 = vld [vmem:[%s7224_s3 + $0x50] sm:$0xff] }
 0x24f   :  { %v4338_v15 = vcombine.low %v370_v47, %v378_v12 }
 0x250   :  { %v269_v16 = vrot.slane %v268_v52, 1 }
 0x252   :  { %v270_v17 = vadd.f32 %v269_v16, %v268_v52  ;;  %v371_v52 = vld [vmem:[%s7224_s3 + $0x18] sm:$0xff]  ;;  %v4339_v16 = vcombine.high %v370_v47, %v378_v12 }
 0x254   :  { %4789 = vpush %v270_v17  ;;  %v379_v17 = vld [vmem:[%s7224_s3 + $0x58] sm:$0xff] }
 0x255   :  { %4791 = vpush %v305_v46  ;;  %v4340_v46 = vcombine.low %v371_v52, %v379_v17 }
 0x285   :  { %s4790_s27 = spop %4789 }
 0x286   :  { %v272_v54 = vstv %s4790_s27  ;;  %s4792_s28 = spop %4791 }
 0x287   :  { %v273_v19 = vmul.f32 0.00048828125, %v272_v54  ;;  %v307_v20 = vstv %s4792_s28  ;;  %v4341_v54 = vcombine.high %v371_v52, %v379_v17 }
 0x288   :  { %v308_v21 = vmul.f32 0.00048828125, %v307_v20  ;;  %v5438_v20 = vld [vmem:[%s7224_s3 + $0xe0] sm:$0xff] }
 0x289   :  { %4870 = vrsqrt.f32 %v273_v19  ;;  %v5433_v19 = vld [vmem:[%s7224_s3 + $0xa0] sm:$0xff] }
 0x28a   :  { %v5312_v51 = vsub.f32 %v196_v6, %v308_v21  ;;  %v5316_v58 = vsub.f32 %v197_v14, %v308_v21  ;;  %v5320_v25 = vsub.f32 %v198_v9, %v308_v21  ;;  %v5324_v27 = vsub.f32 %v199_v13, %v308_v21 }
 0x28b   :  { %v5328_v29 = vsub.f32 %v200_v23, %v308_v21  ;;  %v5338_v3 = vsub.f32 %v201_v41, %v308_v21  ;;  %v5346_v18 = vsub.f32 %v202_v38, %v308_v21  ;;  %v5353_v41 = vsub.f32 %v203_v39, %v308_v21  ;;  %v5443_v21 = vld [vmem:[%s7224_s3 + $0xa8] sm:$0xff] }
 0x28c   :  { %v317_v4 = vmul.f32 %v5312_v51, %v5312_v51  ;;  %v318_v6 = vmul.f32 %v5316_v58, %v5316_v58  ;;  %v319_v10 = vmul.f32 %v5320_v25, %v5320_v25  ;;  %v320_v7 = vmul.f32 %v5324_v27, %v5324_v27 }
 0x28d   :  { %v321_v23 = vmul.f32 %v5328_v29, %v5328_v29  ;;  %v322_v43 = vmul.f32 %v5338_v3, %v5338_v3  ;;  %v323_v22 = vmul.f32 %v5346_v18, %v5346_v18  ;;  %v324_v50 = vmul.f32 %v5353_v41, %v5353_v41 }
 0x28e   :  { %v325_v9 = vsel %vm204_vm1, %v317_v4, 0.0  ;;  %v326_v13 = vsel %vm204_vm1, %v318_v6, 0.0  ;;  %v328_v35 = vsel %vm204_vm1, %v319_v10, 0.0  ;;  %v330_v44 = vsel %vm204_vm1, %v320_v7, 0.0  ;;  %v5452_v10 = vld [vmem:[%s7224_s3 + $0xe8] sm:$0xff] }
 0x28f   :  { %v327_v14 = vadd.f32 %v326_v13, %v325_v9  ;;  %v332_v38 = vsel %vm204_vm1, %v321_v23, 0.0  ;;  %v334_v24 = vsel %vm204_vm1, %v322_v43, 0.0  ;;  %v336_v57 = vsel %vm204_vm1, %v323_v22, 0.0 }
 0x290   :  { %v338_v61 = vsel %vm204_vm1, %v324_v50, 0.0  ;;  %v4358_v4 = vcombine.low %v5433_v19, %v5438_v20  ;;  %v4359_v6 = vcombine.high %v5433_v19, %v5438_v20  ;;  %v4360_v7 = vcombine.low %v5443_v21, %v5452_v10  ;;  %v374_v19 = vld [vmem:[%s7224_s3 + $0x30] sm:$0xff] }
 0x291   :  { %v329_v31 = vadd.f32 %v328_v35, %v327_v14  ;;  %v4361_v9 = vcombine.high %v5443_v21, %v5452_v10  ;;  %v382_v20 = vld [vmem:[%s7224_s3 + $0x70] sm:$0xff]  ;;  %v375_v21 = vld [vmem:[%s7224_s3 + $0x38] sm:$0xff] }
 0x293   :  { %v331_v48 = vadd.f32 %v330_v44, %v329_v31 }
 0x295   :  { %v333_v26 = vadd.f32 %v332_v38, %v331_v48  ;;  %v404_v48 = vlaneseq }
 0x296   :  { %v4871_v49 = vpop.eup %4870 }
 0x297   :  { %v275_v39 = vmul.f32 %v4871_v49, %v5230_v1  ;;  %v276_v53 = vmul.f32 %v4871_v49, %v5234_v2  ;;  %v335_v55 = vadd.f32 %v334_v24, %v333_v26  ;;  %v277_v1 = vmul.f32 %v4871_v49, %v5238_v5 }
 0x298   :  { %v278_v2 = vmul.f32 %v4871_v49, %v5242_v8  ;;  %v279_v0 = vmul.f32 %v4871_v49, %v5246_v11  ;;  %v280_v28 = vmul.f32 %v4871_v49, %v5256_v30  ;;  %v281_v5 = vmul.f32 %v4871_v49, %v5264_v42  ;;  %v386_v11 = vld [vmem:[%s7224_s3 + $0x90] sm:$0xff]  ;;  %v387_v42 = vld [vmem:[%s7224_s3 + $0x98] sm:$0xff] }
 0x299   :  { %v5367_v59 = vpack.c.bf16 %v276_v53, %v275_v39  ;;  %v337_v60 = vadd.f32 %v336_v57, %v335_v55  ;;  %v282_v8 = vmul.f32 %v4871_v49, %v5271_v56  ;;  %v394_v30 = vld [vmem:[%s7224_s3 + $0xd0] sm:$0xff]  ;;  %v4356_v37 = vcombine.low %v387_v42, %v395_v36  ;;  %v5470_v49 = vld [vmem:[%s7225_s4] sm:$0xff] }
 0x29a   :  { %v5378_v63 = vpack.c.bf16 %v278_v2, %v277_v1  ;;  %v5388_v32 = vpack.c.bf16 %v280_v28, %v279_v0  ;;  %v4354_v56 = vcombine.low %v386_v11, %v394_v30  ;;  %v4355_v33 = vcombine.high %v386_v11, %v394_v30 }
 0x29b   :  { %4366 = vmatmul.mubr.msk.bf16.vlgmr.msra.gmra.mxu1 %vm204_vm1, %v5367_v59  ;;  %4374 = vmatmul.mubr.msk.bf16.vlgmr.msra.gmra.mxu0 %vm204_vm1, %v5367_v59  ;;  %v339_v62 = vadd.f32 %v338_v61, %v337_v60  ;;  %v5398_v34 = vpack.c.bf16 %v282_v8, %v281_v5  ;;  %v4357_v40 = vcombine.high %v387_v42, %v395_v36  ;;  %v5459_v22 = vshrl.u32 %v404_v48, 7 }
 0x29c   :  { %710 = vmatprep.mubr.bf16.mxu1 %v5010_v45  ;;  %823 = vmatprep.mubr.bf16.mxu0 %v5010_v45 }
 0x29d   :  { %340 = vadd.xlane.f32.xlu1 %v339_v62  ;;  %906 = vmatprep.subr.bf16.mxu1 %v4355_v33  ;;  %v5462_v38 = vsub.s32 0, %v5459_v22  ;;  %v5465_v26 = vsub.s32 2, %v5459_v22  ;;  %v5473_v50 = vsub.s32 1, %v5459_v22  ;;  %v5476_v24 = vsub.s32 3, %v5459_v22 }
 0x29e   :  { %1019 = vmatprep.subr.bf16.mxu0 %v4357_v40  ;;  %907 = vmatpush1.bf16.msra.mxu1 %v4354_v56 }
 0x29f   :  { %1020 = vmatpush1.bf16.msra.mxu0 %v4356_v37  ;;  %908 = vmatprep.subr.bf16.mxu1 %v4339_v16  ;;  %v5480_v39 = vrot.slane %v5470_v49, %v5462_v38  ;;  %v5484_v53 = vrot.slane %v5470_v49, %v5465_v26  ;;  %v5488_v55 = vrot.slane %v5470_v49, %v5473_v50 }
 0x2a0   :  { %1021 = vmatprep.subr.bf16.mxu0 %v4341_v54  ;;  %v5492_v57 = vrot.slane %v5470_v49, %v5476_v24 }
 0x2a2   :  { %909 = vmatpush1.bf16.msra.mxu1 %v4338_v15 }
 0x2a3   :  { %4367 = vmatmul.mubr.msk.bf16.gmra.mxu1 %vm204_vm1, %v5378_v63  ;;  %4375 = vmatmul.mubr.msk.bf16.gmra.mxu0 %vm204_vm1, %v5378_v63 }
 0x2a4   :  { %720 = vmatprep.mubr.bf16.mxu1 %v5010_v45  ;;  %833 = vmatprep.mubr.bf16.mxu0 %v5010_v45 }
 0x2a5   :  { %1022 = vmatpush1.bf16.msra.mxu0 %v4340_v46  ;;  %1132 = vmatprep.subr.bf16.mxu1 %v4359_v6 }
 0x2a6   :  { %1245 = vmatprep.subr.bf16.mxu0 %v4361_v9 }
 0x2ab   :  { %4368 = vmatmul.mubr.msk.bf16.gmra.mxu1 %vm204_vm1, %v5388_v32  ;;  %4376 = vmatmul.mubr.msk.bf16.gmra.mxu0 %vm204_vm1, %v5388_v32 }
 0x2ac   :  { %730 = vmatprep.mubr.bf16.mxu1 %v5010_v45  ;;  %843 = vmatprep.mubr.bf16.mxu0 %v5010_v45 }
 0x2b3   :  { %4369 = vmatmul.mubr.msk.bf16.gmra.mxu1 %vm204_vm1, %v5398_v34  ;;  %4377 = vmatmul.mubr.msk.bf16.gmra.mxu0 %vm204_vm1, %v5398_v34 }
 0x2b4   :  { %740 = vmatprep.mubr.bf16.mxu1 %v5010_v45  ;;  %853 = vmatprep.mubr.bf16.mxu0 %v5010_v45 }
 0x326   :  { %v341_v13 = vpop.xlane.xlu1 %340 }
 0x327   :  { %v342_v14 = vrot.slane %v341_v13, 4 }
 0x329   :  { %v343_v23 = vadd.f32 %v342_v14, %v341_v13 }
 0x32b   :  { %v344_v35 = vrot.slane %v343_v23, 2 }
 0x32d   :  { %v345_v31 = vadd.f32 %v344_v35, %v343_v23 }
 0x32f   :  { %v346_v43 = vrot.slane %v345_v31, 1 }
 0x331   :  { %v347_v44 = vadd.f32 %v346_v43, %v345_v31 }
 0x333   :  { %4793 = vpush %v347_v44 }
 0x35b   :  { %v702_v60 = vpop.f32.mrf.mxu1  ;;  %v815_v61 = vpop.f32.mrf.mxu0 }
 0x35c   :  { %v703_v62 = vadd.f32 %v702_v60, %v5480_v39  ;;  %v816_v1 = vadd.f32 %v815_v61, %v5484_v53 }
 0x35d   :  { %v704_v2 = vpop.f32.mrf.mxu1  ;;  %v817_v0 = vpop.f32.mrf.mxu0 }
 0x35e   :  { %1572 = vst [vmem:[#allocation2] sm:$0xff] %v703_v62  ;;  %1574 = vst [vmem:[#allocation2 + $0x10] sm:$0xff] %v816_v1  ;;  %v705_v28 = vadd.f32 %v704_v2, %v5488_v55  ;;  %v818_v5 = vadd.f32 %v817_v0, %v5492_v57 }
 0x35f   :  { %v706_v8 = vpop.f32.mrf.mxu1  ;;  %v819_v11 = vpop.f32.mrf.mxu0 }
 0x360   :  { %1573 = vst [vmem:[#allocation2 + $0x8] sm:$0xff] %v705_v28  ;;  %1575 = vst [vmem:[#allocation2 + $0x18] sm:$0xff] %v818_v5  ;;  %v707_v30 = vadd.f32 %v706_v8, %v5480_v39  ;;  %v820_v42 = vadd.f32 %v819_v11, %v5484_v53 }
 0x361   :  { %v708_v56 = vpop.f32.mrf.mxu1  ;;  %v821_v33 = vpop.f32.mrf.mxu0 }
 0x362   :  { %1588 = vst [vmem:[#allocation2 + $0x80] sm:$0xff] %v707_v30  ;;  %1590 = vst [vmem:[#allocation2 + $0x90] sm:$0xff] %v820_v42  ;;  %v709_v36 = vadd.f32 %v708_v56, %v5488_v55  ;;  %v822_v37 = vadd.f32 %v821_v33, %v5492_v57 }
 0x363   :  { %v712_v40 = vpop.f32.mrf.mxu1  ;;  %v825_v47 = vpop.f32.mrf.mxu0 }
 0x364   :  { %1589 = vst [vmem:[#allocation2 + $0x88] sm:$0xff] %v709_v36  ;;  %1591 = vst [vmem:[#allocation2 + $0x98] sm:$0xff] %v822_v37  ;;  %s4794_s29 = spop %4793  ;;  %v713_v12 = vadd.f32 %v712_v40, %v5480_v39  ;;  %v826_v52 = vadd.f32 %v825_v47, %v5484_v53 }
 0x365   :  { %v349_v15 = vstv %s4794_s29  ;;  %v714_v16 = vpop.f32.mrf.mxu1  ;;  %v827_v17 = vpop.f32.mrf.mxu0 }
 0x366   :  { %v350_v46 = vmul.f32 0.00048828125, %v349_v15  ;;  %1604 = vst [vmem:[#allocation2 + $0x100] sm:$0xff] %v713_v12  ;;  %1606 = vst [vmem:[#allocation2 + $0x110] sm:$0xff] %v826_v52  ;;  %v715_v54 = vadd.f32 %v714_v16, %v5488_v55  ;;  %v828_v6 = vadd.f32 %v827_v17, %v5492_v57 }
 0x367   :  { %v716_v9 = vpop.f32.mrf.mxu1  ;;  %v829_v13 = vpop.f32.mrf.mxu0 }
 0x368   :  { %4872 = vrsqrt.f32 %v350_v46  ;;  %1605 = vst [vmem:[#allocation2 + $0x108] sm:$0xff] %v715_v54  ;;  %1607 = vst [vmem:[#allocation2 + $0x118] sm:$0xff] %v828_v6  ;;  %v717_v14 = vadd.f32 %v716_v9, %v5480_v39  ;;  %v830_v23 = vadd.f32 %v829_v13, %v5484_v53 }
 0x369   :  { %v718_v35 = vpop.f32.mrf.mxu1  ;;  %v831_v31 = vpop.f32.mrf.mxu0 }
 0x36a   :  { %1620 = vst [vmem:[#allocation2 + $0x180] sm:$0xff] %v717_v14  ;;  %1622 = vst [vmem:[#allocation2 + $0x190] sm:$0xff] %v830_v23  ;;  %v719_v43 = vadd.f32 %v718_v35, %v5488_v55  ;;  %v832_v44 = vadd.f32 %v831_v31, %v5492_v57 }
 0x36b   :  { %v722_v60 = vpop.f32.mrf.mxu1  ;;  %v835_v61 = vpop.f32.mrf.mxu0 }
 0x36c   :  { %1621 = vst [vmem:[#allocation2 + $0x188] sm:$0xff] %v719_v43  ;;  %1623 = vst [vmem:[#allocation2 + $0x198] sm:$0xff] %v832_v44  ;;  %v723_v62 = vadd.f32 %v722_v60, %v5480_v39  ;;  %v836_v1 = vadd.f32 %v835_v61, %v5484_v53 }
 0x36d   :  { %v724_v2 = vpop.f32.mrf.mxu1  ;;  %v837_v0 = vpop.f32.mrf.mxu0 }
 0x36e   :  { %1636 = vst [vmem:[#allocation2 + $0x200] sm:$0xff] %v723_v62  ;;  %1638 = vst [vmem:[#allocation2 + $0x210] sm:$0xff] %v836_v1  ;;  %v725_v28 = vadd.f32 %v724_v2, %v5488_v55  ;;  %v838_v5 = vadd.f32 %v837_v0, %v5492_v57 }
 0x36f   :  { %v726_v8 = vpop.f32.mrf.mxu1  ;;  %v839_v11 = vpop.f32.mrf.mxu0 }
 0x370   :  { %1637 = vst [vmem:[#allocation2 + $0x208] sm:$0xff] %v725_v28  ;;  %1639 = vst [vmem:[#allocation2 + $0x218] sm:$0xff] %v838_v5  ;;  %v727_v30 = vadd.f32 %v726_v8, %v5480_v39  ;;  %v840_v42 = vadd.f32 %v839_v11, %v5484_v53  ;;  %v390_v5 = vld [vmem:[%s7224_s3 + $0xb0] sm:$0xff] }
 0x371   :  { %v728_v56 = vpop.f32.mrf.mxu1  ;;  %v841_v33 = vpop.f32.mrf.mxu0 }
 0x372   :  { %1652 = vst [vmem:[#allocation2 + $0x280] sm:$0xff] %v727_v30  ;;  %1654 = vst [vmem:[#allocation2 + $0x290] sm:$0xff] %v840_v42  ;;  %v729_v36 = vadd.f32 %v728_v56, %v5488_v55  ;;  %v842_v37 = vadd.f32 %v841_v33, %v5492_v57  ;;  %v398_v30 = vld [vmem:[%s7224_s3 + $0xf0] sm:$0xff]  ;;  %v391_v42 = vld [vmem:[%s7224_s3 + $0xb8] sm:$0xff] }
 0x373   :  { %v732_v40 = vpop.f32.mrf.mxu1  ;;  %v845_v47 = vpop.f32.mrf.mxu0  ;;  %v399_v56 = vld [vmem:[%s7224_s3 + $0xf8] sm:$0xff]  ;;  %v4362_v10 = vcombine.low %v390_v5, %v398_v30 }
 0x374   :  { %1653 = vst [vmem:[#allocation2 + $0x288] sm:$0xff] %v729_v36  ;;  %1655 = vst [vmem:[#allocation2 + $0x298] sm:$0xff] %v842_v37  ;;  %v733_v12 = vadd.f32 %v732_v40, %v5480_v39  ;;  %v846_v52 = vadd.f32 %v845_v47, %v5484_v53  ;;  %v4363_v37 = vcombine.high %v390_v5, %v398_v30 }
 0x375   :  { %v4873_v15 = vpop.eup %4872  ;;  %v734_v16 = vpop.f32.mrf.mxu1  ;;  %v4365_v40 = vcombine.high %v391_v42, %v399_v56  ;;  %v4347_v47 = vcombine.high %v374_v19, %v382_v20 }
 0x376   :  { %v847_v17 = vpop.f32.mrf.mxu0  ;;  %1668 = vst [vmem:[#allocation2 + $0x300] sm:$0xff] %v733_v12  ;;  %1670 = vst [vmem:[#allocation2 + $0x310] sm:$0xff] %v846_v52  ;;  %v735_v46 = vadd.f32 %v734_v16, %v5488_v55  ;;  %v352_v6 = vmul.f32 %v4873_v15, %v5312_v51  ;;  %v353_v9 = vmul.f32 %v4873_v15, %v5316_v58 }
 0x377   :  { %v848_v54 = vadd.f32 %v847_v17, %v5492_v57  ;;  %v736_v13 = vpop.f32.mrf.mxu1  ;;  %v354_v58 = vmul.f32 %v4873_v15, %v5320_v25  ;;  %v355_v61 = vmul.f32 %v4873_v15, %v5324_v27  ;;  %v356_v1 = vmul.f32 %v4873_v15, %v5328_v29  ;;  %v372_v29 = vld [vmem:[%s7224_s3 + $0x20] sm:$0xff] }
 0x378   :  { %v849_v14 = vpop.f32.mrf.mxu0  ;;  %1669 = vst [vmem:[#allocation2 + $0x308] sm:$0xff] %v735_v46  ;;  %v737_v23 = vadd.f32 %v736_v13, %v5480_v39  ;;  %v5526_v31 = vpack.c.bf16 %v353_v9, %v352_v6  ;;  %v357_v2 = vmul.f32 %v4873_v15, %v5338_v3  ;;  %v358_v25 = vmul.f32 %v4873_v15, %v5346_v18  ;;  %v380_v3 = vld [vmem:[%s7224_s3 + $0x60] sm:$0xff]  ;;  %v373_v18 = vld [vmem:[%s7224_s3 + $0x28] sm:$0xff] }
 0x379   :  { %1671 = vst [vmem:[#allocation2 + $0x318] sm:$0xff] %v848_v54  ;;  %v850_v35 = vadd.f32 %v849_v14, %v5484_v53  ;;  %v738_v43 = vpop.f32.mrf.mxu1  ;;  %v5538_v62 = vpack.c.bf16 %v355_v61, %v354_v58  ;;  %v359_v27 = vmul.f32 %v4873_v15, %v5353_v41  ;;  %v381_v41 = vld [vmem:[%s7224_s3 + $0x68] sm:$0xff]  ;;  %v4343_v8 = vcombine.high %v372_v29, %v380_v3 }
 0x37a   :  { %v851_v44 = vpop.f32.mrf.mxu0  ;;  %1684 = vst [vmem:[#allocation2 + $0x380] sm:$0xff] %v737_v23  ;;  %v739_v60 = vadd.f32 %v738_v43, %v5488_v55  ;;  %4370 = vmatmul.mubr.msk.bf16.gmra.mxu1 %vm204_vm1, %v5526_v31  ;;  %4378 = vmatmul.mubr.msk.bf16.gmra.mxu0 %vm204_vm1, %v5526_v31  ;;  %v5548_v0 = vpack.c.bf16 %v357_v2, %v356_v1 }
 0x37b   :  { %1686 = vst [vmem:[#allocation2 + $0x390] sm:$0xff] %v850_v35  ;;  %v852_v51 = vadd.f32 %v851_v44, %v5492_v57  ;;  %750 = vmatprep.mubr.bf16.mxu1 %v5010_v45  ;;  %863 = vmatprep.mubr.bf16.mxu0 %v5010_v45  ;;  %v5558_v28 = vpack.c.bf16 %v359_v27, %v358_v25 }
 0x37c   :  { %1685 = vst [vmem:[#allocation2 + $0x388] sm:$0xff] %v739_v60  ;;  %v4345_v11 = vcombine.high %v373_v18, %v381_v41  ;;  %v4342_v33 = vcombine.low %v372_v29, %v380_v3  ;;  %v4344_v36 = vcombine.low %v373_v18, %v381_v41  ;;  %v4346_v52 = vcombine.low %v374_v19, %v382_v20 }
 0x37d   :  { %1687 = vst [vmem:[#allocation2 + $0x398] sm:$0xff] %v852_v51 }
 0x382   :  { %4371 = vmatmul.mubr.msk.bf16.gmra.mxu1 %vm204_vm1, %v5538_v62  ;;  %4379 = vmatmul.mubr.msk.bf16.gmra.mxu0 %vm204_vm1, %v5538_v62 }
 0x383   :  { %760 = vmatprep.mubr.bf16.mxu1 %v5010_v45  ;;  %873 = vmatprep.mubr.bf16.mxu0 %v5010_v45 }
 0x38a   :  { %4372 = vmatmul.mubr.msk.bf16.gmra.mxu1 %vm204_vm1, %v5548_v0  ;;  %4380 = vmatmul.mubr.msk.bf16.gmra.mxu0 %vm204_vm1, %v5548_v0 }
 0x38b   :  { %770 = vmatprep.mubr.bf16.mxu1 %v5010_v45  ;;  %883 = vmatprep.mubr.bf16.mxu0 %v5010_v45 }
 0x392   :  { %4373 = vmatmul.mubr.msk.bf16.gmra.mxu1 %vm204_vm1, %v5558_v28  ;;  %4381 = vmatmul.mubr.msk.bf16.gmra.mxu0 %vm204_vm1, %v5558_v28 }
 0x393   :  { %926 = vmatprep.mubr.bf16.mxu1 %v5010_v45  ;;  %1039 = vmatprep.mubr.bf16.mxu0 %v5010_v45 }
 0x39a   :  { %4382 = vmatmul.mubr.msk.bf16.vlgmr.msra.gmra.mxu1 %vm204_vm1, %v5367_v59  ;;  %4390 = vmatmul.mubr.msk.bf16.vlgmr.msra.gmra.mxu0 %vm204_vm1, %v5367_v59 }
 0x39b   :  { %1133 = vmatpush1.bf16.msra.mxu1 %v4358_v4  ;;  %1246 = vmatpush1.bf16.msra.mxu0 %v4360_v7  ;;  %v383_v4 = vld [vmem:[%s7224_s3 + $0x78] sm:$0xff]  ;;  %v4364_v7 = vcombine.low %v391_v42, %v399_v56 }
 0x39c   :  { %936 = vmatprep.mubr.bf16.mxu1 %v5010_v45  ;;  %1049 = vmatprep.mubr.bf16.mxu0 %v5010_v45  ;;  %v4349_v12 = vcombine.high %v375_v21, %v383_v4  ;;  %v4348_v15 = vcombine.low %v375_v21, %v383_v4 }
 0x39d   :  { %1134 = vmatprep.subr.bf16.mxu1 %v4343_v8  ;;  %1247 = vmatprep.subr.bf16.mxu0 %v4345_v11 }
 0x39f   :  { %1135 = vmatpush1.bf16.msra.mxu1 %v4342_v33  ;;  %1248 = vmatpush1.bf16.msra.mxu0 %v4344_v36 }
 0x3a0   :  { %1358 = vmatprep.subr.bf16.mxu1 %v4363_v37  ;;  %1471 = vmatprep.subr.bf16.mxu0 %v4365_v40 }
 0x3a2   :  { %4383 = vmatmul.mubr.msk.bf16.gmra.mxu1 %vm204_vm1, %v5378_v63  ;;  %4391 = vmatmul.mubr.msk.bf16.gmra.mxu0 %vm204_vm1, %v5378_v63 }
 0x3a3   :  { %946 = vmatprep.mubr.bf16.mxu1 %v5010_v45  ;;  %1059 = vmatprep.mubr.bf16.mxu0 %v5010_v45 }
 0x3aa   :  { %4384 = vmatmul.mubr.msk.bf16.gmra.mxu1 %vm204_vm1, %v5388_v32  ;;  %4392 = vmatmul.mubr.msk.bf16.gmra.mxu0 %vm204_vm1, %v5388_v32 }
 0x3ab   :  { %956 = vmatprep.mubr.bf16.mxu1 %v5010_v45  ;;  %1069 = vmatprep.mubr.bf16.mxu0 %v5010_v45 }
 0x3b2   :  { %4385 = vmatmul.mubr.msk.bf16.gmra.mxu1 %vm204_vm1, %v5398_v34  ;;  %4393 = vmatmul.mubr.msk.bf16.gmra.mxu0 %vm204_vm1, %v5398_v34 }
 0x3b3   :  { %966 = vmatprep.mubr.bf16.mxu1 %v5010_v45  ;;  %1079 = vmatprep.mubr.bf16.mxu0 %v5010_v45 }
 0x3ba   :  { %4386 = vmatmul.mubr.msk.bf16.gmra.mxu1 %vm204_vm1, %v5526_v31  ;;  %4394 = vmatmul.mubr.msk.bf16.gmra.mxu0 %vm204_vm1, %v5526_v31 }
 0x3bb   :  { %976 = vmatprep.mubr.bf16.mxu1 %v5010_v45  ;;  %1089 = vmatprep.mubr.bf16.mxu0 %v5010_v45 }
 0x3c2   :  { %4387 = vmatmul.mubr.msk.bf16.gmra.mxu1 %vm204_vm1, %v5538_v62  ;;  %4395 = vmatmul.mubr.msk.bf16.gmra.mxu0 %vm204_vm1, %v5538_v62 }
 0x3c3   :  { %986 = vmatprep.mubr.bf16.mxu1 %v5010_v45  ;;  %1099 = vmatprep.mubr.bf16.mxu0 %v5010_v45 }
 0x3ca   :  { %4388 = vmatmul.mubr.msk.bf16.gmra.mxu1 %vm204_vm1, %v5548_v0  ;;  %4396 = vmatmul.mubr.msk.bf16.gmra.mxu0 %vm204_vm1, %v5548_v0 }
 0x3cb   :  { %996 = vmatprep.mubr.bf16.mxu1 %v5010_v45  ;;  %1109 = vmatprep.mubr.bf16.mxu0 %v5010_v45 }
 0x3d2   :  { %4389 = vmatmul.mubr.msk.bf16.gmra.mxu1 %vm204_vm1, %v5558_v28  ;;  %4397 = vmatmul.mubr.msk.bf16.gmra.mxu0 %vm204_vm1, %v5558_v28 }
 0x3d3   :  { %1152 = vmatprep.mubr.bf16.mxu1 %v5010_v45  ;;  %1265 = vmatprep.mubr.bf16.mxu0 %v5010_v45 }
 0x3da   :  { %4398 = vmatmul.mubr.msk.bf16.vlgmr.msra.gmra.mxu1 %vm204_vm1, %v5367_v59  ;;  %4406 = vmatmul.mubr.msk.bf16.vlgmr.msra.gmra.mxu0 %vm204_vm1, %v5367_v59 }
 0x3db   :  { %1359 = vmatpush1.bf16.msra.mxu1 %v4362_v10  ;;  %1472 = vmatpush1.bf16.msra.mxu0 %v4364_v7 }
 0x3dc   :  { %1162 = vmatprep.mubr.bf16.mxu1 %v5010_v45  ;;  %1275 = vmatprep.mubr.bf16.mxu0 %v5010_v45 }
 0x3dd   :  { %1360 = vmatprep.subr.bf16.mxu1 %v4347_v47  ;;  %1473 = vmatprep.subr.bf16.mxu0 %v4349_v12 }
 0x3df   :  { %1361 = vmatpush1.bf16.msra.mxu1 %v4346_v52  ;;  %1474 = vmatpush1.bf16.msra.mxu0 %v4348_v15 }
 0x3e2   :  { %4399 = vmatmul.mubr.msk.bf16.gmra.mxu1 %vm204_vm1, %v5378_v63  ;;  %4407 = vmatmul.mubr.msk.bf16.gmra.mxu0 %vm204_vm1, %v5378_v63 }
 0x3e3   :  { %1172 = vmatprep.mubr.bf16.mxu1 %v5010_v45  ;;  %1285 = vmatprep.mubr.bf16.mxu0 %v5010_v45 }
 0x3ea   :  { %4400 = vmatmul.mubr.msk.bf16.gmra.mxu1 %vm204_vm1, %v5388_v32  ;;  %4408 = vmatmul.mubr.msk.bf16.gmra.mxu0 %vm204_vm1, %v5388_v32 }
 0x3eb   :  { %1182 = vmatprep.mubr.bf16.mxu1 %v5010_v45  ;;  %1295 = vmatprep.mubr.bf16.mxu0 %v5010_v45 }
 0x3f2   :  { %4401 = vmatmul.mubr.msk.bf16.gmra.mxu1 %vm204_vm1, %v5398_v34  ;;  %4409 = vmatmul.mubr.msk.bf16.gmra.mxu0 %vm204_vm1, %v5398_v34 }
 0x3f3   :  { %1192 = vmatprep.mubr.bf16.mxu1 %v5010_v45  ;;  %1305 = vmatprep.mubr.bf16.mxu0 %v5010_v45 }
 0x3fa   :  { %4402 = vmatmul.mubr.msk.bf16.gmra.mxu1 %vm204_vm1, %v5526_v31  ;;  %4410 = vmatmul.mubr.msk.bf16.gmra.mxu0 %vm204_vm1, %v5526_v31 }
 0x3fb   :  { %1202 = vmatprep.mubr.bf16.mxu1 %v5010_v45  ;;  %1315 = vmatprep.mubr.bf16.mxu0 %v5010_v45 }
 0x402   :  { %4403 = vmatmul.mubr.msk.bf16.gmra.mxu1 %vm204_vm1, %v5538_v62  ;;  %4411 = vmatmul.mubr.msk.bf16.gmra.mxu0 %vm204_vm1, %v5538_v62 }
 0x403   :  { %1212 = vmatprep.mubr.bf16.mxu1 %v5010_v45  ;;  %1325 = vmatprep.mubr.bf16.mxu0 %v5010_v45 }
 0x40a   :  { %4404 = vmatmul.mubr.msk.bf16.gmra.mxu1 %vm204_vm1, %v5548_v0  ;;  %4412 = vmatmul.mubr.msk.bf16.gmra.mxu0 %vm204_vm1, %v5548_v0 }
 0x40b   :  { %1222 = vmatprep.mubr.bf16.mxu1 %v5010_v45  ;;  %1335 = vmatprep.mubr.bf16.mxu0 %v5010_v45 }
 0x412   :  { %4405 = vmatmul.mubr.msk.bf16.gmra.mxu1 %vm204_vm1, %v5558_v28  ;;  %4413 = vmatmul.mubr.msk.bf16.gmra.mxu0 %vm204_vm1, %v5558_v28 }
 0x413   :  { %1378 = vmatprep.mubr.bf16.mxu1 %v5010_v45  ;;  %1491 = vmatprep.mubr.bf16.mxu0 %v5010_v45 }
 0x41a   :  { %4414 = vmatmul.mubr.msk.bf16.vlgmr.msra.gmra.mxu1 %vm204_vm1, %v5367_v59  ;;  %4422 = vmatmul.mubr.msk.bf16.vlgmr.msra.gmra.mxu0 %vm204_vm1, %v5367_v59 }
 0x41b   :  { %1388 = vmatprep.mubr.bf16.mxu1 %v5010_v45  ;;  %1501 = vmatprep.mubr.bf16.mxu0 %v5010_v45 }
 0x422   :  { %4415 = vmatmul.mubr.msk.bf16.gmra.mxu1 %vm204_vm1, %v5378_v63  ;;  %4423 = vmatmul.mubr.msk.bf16.gmra.mxu0 %vm204_vm1, %v5378_v63 }
 0x423   :  { %1398 = vmatprep.mubr.bf16.mxu1 %v5010_v45  ;;  %1511 = vmatprep.mubr.bf16.mxu0 %v5010_v45 }
 0x42a   :  { %4416 = vmatmul.mubr.msk.bf16.gmra.mxu1 %vm204_vm1, %v5388_v32  ;;  %4424 = vmatmul.mubr.msk.bf16.gmra.mxu0 %vm204_vm1, %v5388_v32 }
 0x42b   :  { %1408 = vmatprep.mubr.bf16.mxu1 %v5010_v45  ;;  %1521 = vmatprep.mubr.bf16.mxu0 %v5010_v45 }
 0x432   :  { %4417 = vmatmul.mubr.msk.bf16.gmra.mxu1 %vm204_vm1, %v5398_v34  ;;  %4425 = vmatmul.mubr.msk.bf16.gmra.mxu0 %vm204_vm1, %v5398_v34 }
 0x433   :  { %1418 = vmatprep.mubr.bf16.mxu1 %v5010_v45  ;;  %1531 = vmatprep.mubr.bf16.mxu0 %v5010_v45 }
 0x43a   :  { %v742_v59 = vpop.f32.mrf.mxu1  ;;  %v855_v63 = vpop.f32.mrf.mxu0  ;;  %4418 = vmatmul.mubr.msk.bf16.gmra.mxu1 %vm204_vm1, %v5526_v31  ;;  %4426 = vmatmul.mubr.msk.bf16.gmra.mxu0 %vm204_vm1, %v5526_v31 }
 0x43b   :  { %v743_v32 = vadd.f32 %v742_v59, %v5480_v39  ;;  %v856_v16 = vadd.f32 %v855_v63, %v5484_v53  ;;  %1428 = vmatprep.mubr.bf16.mxu1 %v5010_v45  ;;  %1541 = vmatprep.mubr.bf16.mxu0 %v5010_v45  ;;  %v5777_v59 = vsub.s32 4, %v5459_v22  ;;  %v5780_v63 = vsub.s32 6, %v5459_v22 }
 0x43c   :  { %v744_v34 = vpop.f32.mrf.mxu1  ;;  %v857_v17 = vpop.f32.mrf.mxu0 }
 0x43d   :  { %1700 = vst [vmem:[#allocation2 + $0x400] sm:$0xff] %v743_v32  ;;  %1702 = vst [vmem:[#allocation2 + $0x410] sm:$0xff] %v856_v16  ;;  %v745_v46 = vadd.f32 %v744_v34, %v5488_v55  ;;  %v858_v54 = vadd.f32 %v857_v17, %v5492_v57  ;;  %v5785_v17 = vsub.s32 5, %v5459_v22 }
 0x43e   :  { %v746_v6 = vpop.f32.mrf.mxu1  ;;  %v859_v9 = vpop.f32.mrf.mxu0 }
 0x43f   :  { %1701 = vst [vmem:[#allocation2 + $0x408] sm:$0xff] %v745_v46  ;;  %1703 = vst [vmem:[#allocation2 + $0x418] sm:$0xff] %v858_v54  ;;  %v747_v13 = vadd.f32 %v746_v6, %v5480_v39  ;;  %v860_v14 = vadd.f32 %v859_v9, %v5484_v53  ;;  %v5788_v46 = vsub.s32 7, %v5459_v22 }
 0x440   :  { %v748_v23 = vpop.f32.mrf.mxu1  ;;  %v861_v35 = vpop.f32.mrf.mxu0 }
 0x441   :  { %1716 = vst [vmem:[#allocation2 + $0x480] sm:$0xff] %v747_v13  ;;  %1718 = vst [vmem:[#allocation2 + $0x490] sm:$0xff] %v860_v14  ;;  %v749_v31 = vadd.f32 %v748_v23, %v5488_v55  ;;  %v862_v43 = vadd.f32 %v861_v35, %v5492_v57  ;;  %v5794_v14 = vrot.slane %v5470_v49, %v5777_v59 }
 0x442   :  { %v752_v44 = vpop.f32.mrf.mxu1  ;;  %v865_v60 = vpop.f32.mrf.mxu0  ;;  %4419 = vmatmul.mubr.msk.bf16.gmra.mxu1 %vm204_vm1, %v5538_v62  ;;  %4427 = vmatmul.mubr.msk.bf16.gmra.mxu0 %vm204_vm1, %v5538_v62  ;;  %v5798_v23 = vrot.slane %v5470_v49, %v5780_v63 }
 0x443   :  { %1717 = vst [vmem:[#allocation2 + $0x488] sm:$0xff] %v749_v31  ;;  %1719 = vst [vmem:[#allocation2 + $0x498] sm:$0xff] %v862_v43  ;;  %v753_v51 = vadd.f32 %v752_v44, %v5480_v39  ;;  %v866_v58 = vadd.f32 %v865_v60, %v5484_v53  ;;  %1438 = vmatprep.mubr.bf16.mxu1 %v5010_v45  ;;  %1551 = vmatprep.mubr.bf16.mxu0 %v5010_v45 }
 0x444   :  { %v754_v61 = vpop.f32.mrf.mxu1  ;;  %v867_v1 = vpop.f32.mrf.mxu0 }
 0x445   :  { %1732 = vst [vmem:[#allocation2 + $0x500] sm:$0xff] %v753_v51  ;;  %1734 = vst [vmem:[#allocation2 + $0x510] sm:$0xff] %v866_v58  ;;  %v755_v2 = vadd.f32 %v754_v61, %v5488_v55  ;;  %v868_v25 = vadd.f32 %v867_v1, %v5492_v57 }
 0x446   :  { %v756_v27 = vpop.f32.mrf.mxu1  ;;  %v869_v62 = vpop.f32.mrf.mxu0 }
 0x447   :  { %1733 = vst [vmem:[#allocation2 + $0x508] sm:$0xff] %v755_v2  ;;  %1735 = vst [vmem:[#allocation2 + $0x518] sm:$0xff] %v868_v25  ;;  %v757_v29 = vadd.f32 %v756_v27, %v5480_v39  ;;  %v870_v3 = vadd.f32 %v869_v62, %v5484_v53 }
 0x448   :  { %v758_v18 = vpop.f32.mrf.mxu1  ;;  %v871_v41 = vpop.f32.mrf.mxu0 }
 0x449   :  { %1748 = vst [vmem:[#allocation2 + $0x580] sm:$0xff] %v757_v29  ;;  %1750 = vst [vmem:[#allocation2 + $0x590] sm:$0xff] %v870_v3  ;;  %v759_v5 = vadd.f32 %v758_v18, %v5488_v55  ;;  %v872_v8 = vadd.f32 %v871_v41, %v5492_v57 }
 0x44a   :  { %v762_v11 = vpop.f32.mrf.mxu1  ;;  %v875_v30 = vpop.f32.mrf.mxu0  ;;  %4420 = vmatmul.mubr.msk.bf16.gmra.mxu1 %vm204_vm1, %v5548_v0  ;;  %4428 = vmatmul.mubr.msk.bf16.gmra.mxu0 %vm204_vm1, %v5548_v0 }
 0x44b   :  { %1749 = vst [vmem:[#allocation2 + $0x588] sm:$0xff] %v759_v5  ;;  %1751 = vst [vmem:[#allocation2 + $0x598] sm:$0xff] %v872_v8  ;;  %v763_v42 = vadd.f32 %v762_v11, %v5480_v39  ;;  %v876_v56 = vadd.f32 %v875_v30, %v5484_v53  ;;  %1448 = vmatprep.mubr.bf16.mxu1 %v5010_v45  ;;  %1561 = vmatprep.mubr.bf16.mxu0 %v5010_v45 }
 0x44c   :  { %v764_v33 = vpop.f32.mrf.mxu1  ;;  %v877_v36 = vpop.f32.mrf.mxu0 }
 0x44d   :  { %1764 = vst [vmem:[#allocation2 + $0x600] sm:$0xff] %v763_v42  ;;  %1766 = vst [vmem:[#allocation2 + $0x610] sm:$0xff] %v876_v56  ;;  %v765_v37 = vadd.f32 %v764_v33, %v5488_v55  ;;  %v878_v40 = vadd.f32 %v877_v36, %v5492_v57 }
 0x44e   :  { %v766_v19 = vpop.f32.mrf.mxu1  ;;  %v879_v0 = vpop.f32.mrf.mxu0 }
 0x44f   :  { %1765 = vst [vmem:[#allocation2 + $0x608] sm:$0xff] %v765_v37  ;;  %1767 = vst [vmem:[#allocation2 + $0x618] sm:$0xff] %v878_v40  ;;  %v767_v20 = vadd.f32 %v766_v19, %v5480_v39  ;;  %v880_v21 = vadd.f32 %v879_v0, %v5484_v53 }
 0x450   :  { %v768_v4 = vpop.f32.mrf.mxu1  ;;  %v881_v10 = vpop.f32.mrf.mxu0 }
 0x451   :  { %1780 = vst [vmem:[#allocation2 + $0x680] sm:$0xff] %v767_v20  ;;  %1782 = vst [vmem:[#allocation2 + $0x690] sm:$0xff] %v880_v21  ;;  %v769_v45 = vadd.f32 %v768_v4, %v5488_v55  ;;  %v882_v7 = vadd.f32 %v881_v10, %v5492_v57 }
 0x452   :  { %v772_v47 = vpop.f32.mrf.mxu1  ;;  %v885_v12 = vpop.f32.mrf.mxu0  ;;  %4421 = vmatmul.mubr.msk.bf16.gmra.mxu1 %vm204_vm1, %v5558_v28  ;;  %4429 = vmatmul.mubr.msk.bf16.gmra.mxu0 %vm204_vm1, %v5558_v28 }
 0x453   :  { %1781 = vst [vmem:[#allocation2 + $0x688] sm:$0xff] %v769_v45  ;;  %1783 = vst [vmem:[#allocation2 + $0x698] sm:$0xff] %v882_v7  ;;  %v773_v52 = vadd.f32 %v772_v47, %v5480_v39  ;;  %v886_v15 = vadd.f32 %v885_v12, %v5484_v53 }
 0x454   :  { %v774_v32 = vpop.f32.mrf.mxu1  ;;  %v887_v16 = vpop.f32.mrf.mxu0 }
 0x455   :  { %1796 = vst [vmem:[#allocation2 + $0x700] sm:$0xff] %v773_v52  ;;  %1798 = vst [vmem:[#allocation2 + $0x710] sm:$0xff] %v886_v15  ;;  %v775_v34 = vadd.f32 %v774_v32, %v5488_v55  ;;  %v888_v28 = vadd.f32 %v887_v16, %v5492_v57 }
 0x456   :  { %v776_v54 = vpop.f32.mrf.mxu1  ;;  %v889_v6 = vpop.f32.mrf.mxu0 }
 0x457   :  { %1797 = vst [vmem:[#allocation2 + $0x708] sm:$0xff] %v775_v34  ;;  %1799 = vst [vmem:[#allocation2 + $0x718] sm:$0xff] %v888_v28  ;;  %v777_v9 = vadd.f32 %v776_v54, %v5480_v39  ;;  %v890_v13 = vadd.f32 %v889_v6, %v5484_v53  ;;  %v5804_v39 = vrot.slane %v5470_v49, %v5785_v17 }
 0x458   :  { %v778_v35 = vpop.f32.mrf.mxu1  ;;  %v891_v31 = vpop.f32.mrf.mxu0  ;;  %v5808_v53 = vrot.slane %v5470_v49, %v5788_v46 }
 0x459   :  { %1812 = vst [vmem:[#allocation2 + $0x780] sm:$0xff] %v777_v9  ;;  %1814 = vst [vmem:[#allocation2 + $0x790] sm:$0xff] %v890_v13  ;;  %v779_v43 = vadd.f32 %v778_v35, %v5488_v55  ;;  %v892_v44 = vadd.f32 %v891_v31, %v5492_v57 }
 0x45a   :  { %v928_v60 = vpop.f32.mrf.mxu1  ;;  %v1041_v51 = vpop.f32.mrf.mxu0 }
 0x45b   :  { %1813 = vst [vmem:[#allocation2 + $0x788] sm:$0xff] %v779_v43  ;;  %1815 = vst [vmem:[#allocation2 + $0x798] sm:$0xff] %v892_v44  ;;  %v929_v58 = vadd.f32 %v928_v60, %v5794_v14  ;;  %v1042_v61 = vadd.f32 %v1041_v51, %v5798_v23 }
 0x45c   :  { %v930_v1 = vpop.f32.mrf.mxu1  ;;  %v1043_v55 = vpop.f32.mrf.mxu0 }
 0x45d   :  { %1576 = vst [vmem:[#allocation2 + $0x20] sm:$0xff] %v929_v58  ;;  %1578 = vst [vmem:[#allocation2 + $0x30] sm:$0xff] %v1042_v61  ;;  %v931_v57 = vadd.f32 %v930_v1, %v5804_v39  ;;  %v1044_v2 = vadd.f32 %v1043_v55, %v5808_v53 }
 0x45e   :  { %v932_v25 = vpop.f32.mrf.mxu1  ;;  %v1045_v27 = vpop.f32.mrf.mxu0 }
 0x45f   :  { %1577 = vst [vmem:[#allocation2 + $0x28] sm:$0xff] %v931_v57  ;;  %1579 = vst [vmem:[#allocation2 + $0x38] sm:$0xff] %v1044_v2  ;;  %v933_v49 = vadd.f32 %v932_v25, %v5794_v14  ;;  %v1046_v62 = vadd.f32 %v1045_v27, %v5798_v23 }
 0x460   :  { %v934_v29 = vpop.f32.mrf.mxu1  ;;  %v1047_v3 = vpop.f32.mrf.mxu0 }
 0x461   :  { %1592 = vst [vmem:[#allocation2 + $0xa0] sm:$0xff] %v933_v49  ;;  %1594 = vst [vmem:[#allocation2 + $0xb0] sm:$0xff] %v1046_v62  ;;  %v935_v18 = vadd.f32 %v934_v29, %v5804_v39  ;;  %v1048_v41 = vadd.f32 %v1047_v3, %v5808_v53 }
 0x462   :  { %v938_v5 = vpop.f32.mrf.mxu1  ;;  %v1051_v8 = vpop.f32.mrf.mxu0 }
 0x463   :  { %1593 = vst [vmem:[#allocation2 + $0xa8] sm:$0xff] %v935_v18  ;;  %1595 = vst [vmem:[#allocation2 + $0xb8] sm:$0xff] %v1048_v41  ;;  %v939_v11 = vadd.f32 %v938_v5, %v5794_v14  ;;  %v1052_v30 = vadd.f32 %v1051_v8, %v5798_v23 }
 0x464   :  { %v940_v42 = vpop.f32.mrf.mxu1  ;;  %v1053_v56 = vpop.f32.mrf.mxu0 }
 0x465   :  { %1608 = vst [vmem:[#allocation2 + $0x120] sm:$0xff] %v939_v11  ;;  %1610 = vst [vmem:[#allocation2 + $0x130] sm:$0xff] %v1052_v30  ;;  %v941_v33 = vadd.f32 %v940_v42, %v5804_v39  ;;  %v1054_v36 = vadd.f32 %v1053_v56, %v5808_v53 }
 0x466   :  { %v942_v37 = vpop.f32.mrf.mxu1  ;;  %v1055_v40 = vpop.f32.mrf.mxu0 }
 0x467   :  { %1609 = vst [vmem:[#allocation2 + $0x128] sm:$0xff] %v941_v33  ;;  %1611 = vst [vmem:[#allocation2 + $0x138] sm:$0xff] %v1054_v36  ;;  %v943_v19 = vadd.f32 %v942_v37, %v5794_v14  ;;  %v1056_v0 = vadd.f32 %v1055_v40, %v5798_v23 }
 0x468   :  { %v944_v20 = vpop.f32.mrf.mxu1  ;;  %v1057_v21 = vpop.f32.mrf.mxu0 }
 0x469   :  { %1624 = vst [vmem:[#allocation2 + $0x1a0] sm:$0xff] %v943_v19  ;;  %1626 = vst [vmem:[#allocation2 + $0x1b0] sm:$0xff] %v1056_v0  ;;  %v945_v4 = vadd.f32 %v944_v20, %v5804_v39  ;;  %v1058_v10 = vadd.f32 %v1057_v21, %v5808_v53 }
 0x46a   :  { %v948_v45 = vpop.f32.mrf.mxu1  ;;  %v1061_v7 = vpop.f32.mrf.mxu0 }
 0x46b   :  { %1625 = vst [vmem:[#allocation2 + $0x1a8] sm:$0xff] %v945_v4  ;;  %1627 = vst [vmem:[#allocation2 + $0x1b8] sm:$0xff] %v1058_v10  ;;  %v949_v47 = vadd.f32 %v948_v45, %v5794_v14  ;;  %v1062_v12 = vadd.f32 %v1061_v7, %v5798_v23 }
 0x46c   :  { %v950_v52 = vpop.f32.mrf.mxu1  ;;  %v1063_v15 = vpop.f32.mrf.mxu0 }
 0x46d   :  { %1640 = vst [vmem:[#allocation2 + $0x220] sm:$0xff] %v949_v47  ;;  %1642 = vst [vmem:[#allocation2 + $0x230] sm:$0xff] %v1062_v12  ;;  %v951_v32 = vadd.f32 %v950_v52, %v5804_v39  ;;  %v1064_v16 = vadd.f32 %v1063_v15, %v5808_v53 }
 0x46e   :  { %v952_v34 = vpop.f32.mrf.mxu1  ;;  %v1065_v28 = vpop.f32.mrf.mxu0 }
 0x46f   :  { %1641 = vst [vmem:[#allocation2 + $0x228] sm:$0xff] %v951_v32  ;;  %1643 = vst [vmem:[#allocation2 + $0x238] sm:$0xff] %v1064_v16  ;;  %v953_v54 = vadd.f32 %v952_v34, %v5794_v14  ;;  %v1066_v6 = vadd.f32 %v1065_v28, %v5798_v23 }
 0x470   :  { %v954_v9 = vpop.f32.mrf.mxu1  ;;  %v1067_v13 = vpop.f32.mrf.mxu0 }
 0x471   :  { %1656 = vst [vmem:[#allocation2 + $0x2a0] sm:$0xff] %v953_v54  ;;  %1658 = vst [vmem:[#allocation2 + $0x2b0] sm:$0xff] %v1066_v6  ;;  %v955_v35 = vadd.f32 %v954_v9, %v5804_v39  ;;  %v1068_v31 = vadd.f32 %v1067_v13, %v5808_v53 }
 0x472   :  { %v958_v43 = vpop.f32.mrf.mxu1  ;;  %v1071_v44 = vpop.f32.mrf.mxu0 }
 0x473   :  { %1657 = vst [vmem:[#allocation2 + $0x2a8] sm:$0xff] %v955_v35  ;;  %1659 = vst [vmem:[#allocation2 + $0x2b8] sm:$0xff] %v1068_v31  ;;  %v959_v60 = vadd.f32 %v958_v43, %v5794_v14  ;;  %v1072_v51 = vadd.f32 %v1071_v44, %v5798_v23 }
 0x474   :  { %v960_v58 = vpop.f32.mrf.mxu1  ;;  %v1073_v61 = vpop.f32.mrf.mxu0 }
 0x475   :  { %1672 = vst [vmem:[#allocation2 + $0x320] sm:$0xff] %v959_v60  ;;  %1674 = vst [vmem:[#allocation2 + $0x330] sm:$0xff] %v1072_v51  ;;  %v961_v1 = vadd.f32 %v960_v58, %v5804_v39  ;;  %v1074_v55 = vadd.f32 %v1073_v61, %v5808_v53 }
 0x476   :  { %v962_v57 = vpop.f32.mrf.mxu1  ;;  %v1075_v2 = vpop.f32.mrf.mxu0 }
 0x477   :  { %1673 = vst [vmem:[#allocation2 + $0x328] sm:$0xff] %v961_v1  ;;  %1675 = vst [vmem:[#allocation2 + $0x338] sm:$0xff] %v1074_v55  ;;  %v963_v25 = vadd.f32 %v962_v57, %v5794_v14  ;;  %v1076_v27 = vadd.f32 %v1075_v2, %v5798_v23 }
 0x478   :  { %v964_v49 = vpop.f32.mrf.mxu1  ;;  %v1077_v62 = vpop.f32.mrf.mxu0 }
 0x479   :  { %1688 = vst [vmem:[#allocation2 + $0x3a0] sm:$0xff] %v963_v25  ;;  %1690 = vst [vmem:[#allocation2 + $0x3b0] sm:$0xff] %v1076_v27  ;;  %v965_v29 = vadd.f32 %v964_v49, %v5804_v39  ;;  %v1078_v3 = vadd.f32 %v1077_v62, %v5808_v53 }
 0x47a   :  { %v968_v18 = vpop.f32.mrf.mxu1  ;;  %v1081_v41 = vpop.f32.mrf.mxu0 }
 0x47b   :  { %1689 = vst [vmem:[#allocation2 + $0x3a8] sm:$0xff] %v965_v29  ;;  %1691 = vst [vmem:[#allocation2 + $0x3b8] sm:$0xff] %v1078_v3  ;;  %v969_v5 = vadd.f32 %v968_v18, %v5794_v14  ;;  %v1082_v8 = vadd.f32 %v1081_v41, %v5798_v23 }
 0x47c   :  { %v970_v11 = vpop.f32.mrf.mxu1  ;;  %v1083_v30 = vpop.f32.mrf.mxu0 }
 0x47d   :  { %1704 = vst [vmem:[#allocation2 + $0x420] sm:$0xff] %v969_v5  ;;  %1706 = vst [vmem:[#allocation2 + $0x430] sm:$0xff] %v1082_v8  ;;  %v971_v42 = vadd.f32 %v970_v11, %v5804_v39  ;;  %v1084_v56 = vadd.f32 %v1083_v30, %v5808_v53  ;;  %v5871_v11 = vld [vmem:[%s7225_s4 + $0x8] sm:$0xff]  ;;  %s6055_s4 = smov 0  }
 0x47e   :  { %v972_v33 = vpop.f32.mrf.mxu1  ;;  %v1085_v36 = vpop.f32.mrf.mxu0 }
 0x47f   :  { %1705 = vst [vmem:[#allocation2 + $0x428] sm:$0xff] %v971_v42  ;;  %1707 = vst [vmem:[#allocation2 + $0x438] sm:$0xff] %v1084_v56  ;;  %v973_v37 = vadd.f32 %v972_v33, %v5794_v14  ;;  %v1086_v40 = vadd.f32 %v1085_v36, %v5798_v23 }
 0x480   :  { %v974_v19 = vpop.f32.mrf.mxu1  ;;  %v1087_v0 = vpop.f32.mrf.mxu0 }
 0x481   :  { %1720 = vst [vmem:[#allocation2 + $0x4a0] sm:$0xff] %v973_v37  ;;  %1722 = vst [vmem:[#allocation2 + $0x4b0] sm:$0xff] %v1086_v40  ;;  %v975_v20 = vadd.f32 %v974_v19, %v5804_v39  ;;  %v1088_v21 = vadd.f32 %v1087_v0, %v5808_v53  ;;  %v5879_v40 = vrot.slane %v5871_v11, %v5462_v38 }
 0x482   :  { %v978_v4 = vpop.f32.mrf.mxu1  ;;  %v1091_v10 = vpop.f32.mrf.mxu0  ;;  %v5883_v19 = vrot.slane %v5871_v11, %v5465_v26 }
 0x483   :  { %1721 = vst [vmem:[#allocation2 + $0x4a8] sm:$0xff] %v975_v20  ;;  %1723 = vst [vmem:[#allocation2 + $0x4b8] sm:$0xff] %v1088_v21  ;;  %v979_v45 = vadd.f32 %v978_v4, %v5794_v14  ;;  %v1092_v7 = vadd.f32 %v1091_v10, %v5798_v23 }
 0x484   :  { %v980_v47 = vpop.f32.mrf.mxu1  ;;  %v1093_v12 = vpop.f32.mrf.mxu0 }
 0x485   :  { %1736 = vst [vmem:[#allocation2 + $0x520] sm:$0xff] %v979_v45  ;;  %1738 = vst [vmem:[#allocation2 + $0x530] sm:$0xff] %v1092_v7  ;;  %v981_v52 = vadd.f32 %v980_v47, %v5804_v39  ;;  %v1094_v15 = vadd.f32 %v1093_v12, %v5808_v53 }
 0x486   :  { %v982_v32 = vpop.f32.mrf.mxu1  ;;  %v1095_v16 = vpop.f32.mrf.mxu0 }
 0x487   :  { %1737 = vst [vmem:[#allocation2 + $0x528] sm:$0xff] %v981_v52  ;;  %1739 = vst [vmem:[#allocation2 + $0x538] sm:$0xff] %v1094_v15  ;;  %v983_v34 = vadd.f32 %v982_v32, %v5794_v14  ;;  %v1096_v28 = vadd.f32 %v1095_v16, %v5798_v23 }
 0x488   :  { %v984_v54 = vpop.f32.mrf.mxu1  ;;  %v1097_v6 = vpop.f32.mrf.mxu0 }
 0x489   :  { %1752 = vst [vmem:[#allocation2 + $0x5a0] sm:$0xff] %v983_v34  ;;  %1754 = vst [vmem:[#allocation2 + $0x5b0] sm:$0xff] %v1096_v28  ;;  %v985_v9 = vadd.f32 %v984_v54, %v5804_v39  ;;  %v1098_v13 = vadd.f32 %v1097_v6, %v5808_v53 }
 0x48a   :  { %v988_v35 = vpop.f32.mrf.mxu1  ;;  %v1101_v31 = vpop.f32.mrf.mxu0 }
 0x48b   :  { %1753 = vst [vmem:[#allocation2 + $0x5a8] sm:$0xff] %v985_v9  ;;  %1755 = vst [vmem:[#allocation2 + $0x5b8] sm:$0xff] %v1098_v13  ;;  %v989_v43 = vadd.f32 %v988_v35, %v5794_v14  ;;  %v1102_v44 = vadd.f32 %v1101_v31, %v5798_v23 }
 0x48c   :  { %v990_v60 = vpop.f32.mrf.mxu1  ;;  %v1103_v51 = vpop.f32.mrf.mxu0 }
 0x48d   :  { %1768 = vst [vmem:[#allocation2 + $0x620] sm:$0xff] %v989_v43  ;;  %1770 = vst [vmem:[#allocation2 + $0x630] sm:$0xff] %v1102_v44  ;;  %v991_v58 = vadd.f32 %v990_v60, %v5804_v39  ;;  %v1104_v61 = vadd.f32 %v1103_v51, %v5808_v53 }
 0x48e   :  { %v992_v1 = vpop.f32.mrf.mxu1  ;;  %v1105_v55 = vpop.f32.mrf.mxu0 }
 0x48f   :  { %1769 = vst [vmem:[#allocation2 + $0x628] sm:$0xff] %v991_v58  ;;  %1771 = vst [vmem:[#allocation2 + $0x638] sm:$0xff] %v1104_v61  ;;  %v993_v57 = vadd.f32 %v992_v1, %v5794_v14  ;;  %v1106_v2 = vadd.f32 %v1105_v55, %v5798_v23 }
 0x490   :  { %v994_v25 = vpop.f32.mrf.mxu1  ;;  %v1107_v27 = vpop.f32.mrf.mxu0 }
 0x491   :  { %1784 = vst [vmem:[#allocation2 + $0x6a0] sm:$0xff] %v993_v57  ;;  %1786 = vst [vmem:[#allocation2 + $0x6b0] sm:$0xff] %v1106_v2  ;;  %v995_v49 = vadd.f32 %v994_v25, %v5804_v39  ;;  %v1108_v62 = vadd.f32 %v1107_v27, %v5808_v53 }
 0x492   :  { %v998_v29 = vpop.f32.mrf.mxu1  ;;  %v1111_v3 = vpop.f32.mrf.mxu0 }
 0x493   :  { %1785 = vst [vmem:[#allocation2 + $0x6a8] sm:$0xff] %v995_v49  ;;  %1787 = vst [vmem:[#allocation2 + $0x6b8] sm:$0xff] %v1108_v62  ;;  %v999_v18 = vadd.f32 %v998_v29, %v5794_v14  ;;  %v1112_v41 = vadd.f32 %v1111_v3, %v5798_v23 }
 0x494   :  { %v1000_v5 = vpop.f32.mrf.mxu1  ;;  %v1113_v8 = vpop.f32.mrf.mxu0 }
 0x495   :  { %1800 = vst [vmem:[#allocation2 + $0x720] sm:$0xff] %v999_v18  ;;  %1802 = vst [vmem:[#allocation2 + $0x730] sm:$0xff] %v1112_v41  ;;  %v1001_v30 = vadd.f32 %v1000_v5, %v5804_v39  ;;  %v1114_v42 = vadd.f32 %v1113_v8, %v5808_v53 }
 0x496   :  { %v1002_v56 = vpop.f32.mrf.mxu1  ;;  %v1115_v33 = vpop.f32.mrf.mxu0 }
 0x497   :  { %1801 = vst [vmem:[#allocation2 + $0x728] sm:$0xff] %v1001_v30  ;;  %1803 = vst [vmem:[#allocation2 + $0x738] sm:$0xff] %v1114_v42  ;;  %v1003_v36 = vadd.f32 %v1002_v56, %v5794_v14  ;;  %v1116_v37 = vadd.f32 %v1115_v33, %v5798_v23  ;;  %v5889_v14 = vrot.slane %v5871_v11, %v5473_v50 }
 0x498   :  { %v1004_v0 = vpop.f32.mrf.mxu1  ;;  %v1117_v20 = vpop.f32.mrf.mxu0  ;;  %v5893_v23 = vrot.slane %v5871_v11, %v5476_v24 }
 0x499   :  { %1816 = vst [vmem:[#allocation2 + $0x7a0] sm:$0xff] %v1003_v36  ;;  %1818 = vst [vmem:[#allocation2 + $0x7b0] sm:$0xff] %v1116_v37  ;;  %v1005_v21 = vadd.f32 %v1004_v0, %v5804_v39  ;;  %v1118_v4 = vadd.f32 %v1117_v20, %v5808_v53 }
 0x49a   :  { %v1154_v10 = vpop.f32.mrf.mxu1  ;;  %v1267_v45 = vpop.f32.mrf.mxu0 }
 0x49b   :  { %1817 = vst [vmem:[#allocation2 + $0x7a8] sm:$0xff] %v1005_v21  ;;  %1819 = vst [vmem:[#allocation2 + $0x7b8] sm:$0xff] %v1118_v4  ;;  %v1155_v7 = vadd.f32 %v1154_v10, %v5879_v40  ;;  %v1268_v47 = vadd.f32 %v1267_v45, %v5883_v19 }
 0x49c   :  { %v1156_v12 = vpop.f32.mrf.mxu1  ;;  %v1269_v39 = vpop.f32.mrf.mxu0 }
 0x49d   :  { %1580 = vst [vmem:[#allocation2 + $0x40] sm:$0xff] %v1155_v7  ;;  %1582 = vst [vmem:[#allocation2 + $0x50] sm:$0xff] %v1268_v47  ;;  %v1157_v53 = vadd.f32 %v1156_v12, %v5889_v14  ;;  %v1270_v52 = vadd.f32 %v1269_v39, %v5893_v23 }
 0x49e   :  { %v1158_v15 = vpop.f32.mrf.mxu1  ;;  %v1271_v32 = vpop.f32.mrf.mxu0 }
 0x49f   :  { %1581 = vst [vmem:[#allocation2 + $0x48] sm:$0xff] %v1157_v53  ;;  %1583 = vst [vmem:[#allocation2 + $0x58] sm:$0xff] %v1270_v52  ;;  %v1159_v16 = vadd.f32 %v1158_v15, %v5879_v40  ;;  %v1272_v34 = vadd.f32 %v1271_v32, %v5883_v19 }
 0x4a0   :  { %v1160_v28 = vpop.f32.mrf.mxu1  ;;  %v1273_v54 = vpop.f32.mrf.mxu0 }
 0x4a1   :  { %1596 = vst [vmem:[#allocation2 + $0xc0] sm:$0xff] %v1159_v16  ;;  %1598 = vst [vmem:[#allocation2 + $0xd0] sm:$0xff] %v1272_v34  ;;  %v1161_v6 = vadd.f32 %v1160_v28, %v5889_v14  ;;  %v1274_v9 = vadd.f32 %v1273_v54, %v5893_v23 }
 0x4a2   :  { %v1164_v13 = vpop.f32.mrf.mxu1  ;;  %v1277_v35 = vpop.f32.mrf.mxu0 }
 0x4a3   :  { %1597 = vst [vmem:[#allocation2 + $0xc8] sm:$0xff] %v1161_v6  ;;  %1599 = vst [vmem:[#allocation2 + $0xd8] sm:$0xff] %v1274_v9  ;;  %v1165_v31 = vadd.f32 %v1164_v13, %v5879_v40  ;;  %v1278_v43 = vadd.f32 %v1277_v35, %v5883_v19 }
 0x4a4   :  { %v1166_v44 = vpop.f32.mrf.mxu1  ;;  %v1279_v60 = vpop.f32.mrf.mxu0 }
 0x4a5   :  { %1612 = vst [vmem:[#allocation2 + $0x140] sm:$0xff] %v1165_v31  ;;  %1614 = vst [vmem:[#allocation2 + $0x150] sm:$0xff] %v1278_v43  ;;  %v1167_v51 = vadd.f32 %v1166_v44, %v5889_v14  ;;  %v1280_v58 = vadd.f32 %v1279_v60, %v5893_v23 }
 0x4a6   :  { %v1168_v61 = vpop.f32.mrf.mxu1  ;;  %v1281_v1 = vpop.f32.mrf.mxu0 }
 0x4a7   :  { %1613 = vst [vmem:[#allocation2 + $0x148] sm:$0xff] %v1167_v51  ;;  %1615 = vst [vmem:[#allocation2 + $0x158] sm:$0xff] %v1280_v58  ;;  %v1169_v55 = vadd.f32 %v1168_v61, %v5879_v40  ;;  %v1282_v57 = vadd.f32 %v1281_v1, %v5883_v19 }
 0x4a8   :  { %v1170_v2 = vpop.f32.mrf.mxu1  ;;  %v1283_v25 = vpop.f32.mrf.mxu0 }
 0x4a9   :  { %1628 = vst [vmem:[#allocation2 + $0x1c0] sm:$0xff] %v1169_v55  ;;  %1630 = vst [vmem:[#allocation2 + $0x1d0] sm:$0xff] %v1282_v57  ;;  %v1171_v27 = vadd.f32 %v1170_v2, %v5889_v14  ;;  %v1284_v49 = vadd.f32 %v1283_v25, %v5893_v23 }
 0x4aa   :  { %v1174_v62 = vpop.f32.mrf.mxu1  ;;  %v1287_v29 = vpop.f32.mrf.mxu0 }
 0x4ab   :  { %1629 = vst [vmem:[#allocation2 + $0x1c8] sm:$0xff] %v1171_v27  ;;  %1631 = vst [vmem:[#allocation2 + $0x1d8] sm:$0xff] %v1284_v49  ;;  %v1175_v3 = vadd.f32 %v1174_v62, %v5879_v40  ;;  %v1288_v18 = vadd.f32 %v1287_v29, %v5883_v19 }
 0x4ac   :  { %v1176_v41 = vpop.f32.mrf.mxu1  ;;  %v1289_v5 = vpop.f32.mrf.mxu0 }
 0x4ad   :  { %1644 = vst [vmem:[#allocation2 + $0x240] sm:$0xff] %v1175_v3  ;;  %1646 = vst [vmem:[#allocation2 + $0x250] sm:$0xff] %v1288_v18  ;;  %v1177_v8 = vadd.f32 %v1176_v41, %v5889_v14  ;;  %v1290_v30 = vadd.f32 %v1289_v5, %v5893_v23 }
 0x4ae   :  { %v1178_v42 = vpop.f32.mrf.mxu1  ;;  %v1291_v56 = vpop.f32.mrf.mxu0 }
 0x4af   :  { %1645 = vst [vmem:[#allocation2 + $0x248] sm:$0xff] %v1177_v8  ;;  %1647 = vst [vmem:[#allocation2 + $0x258] sm:$0xff] %v1290_v30  ;;  %v1179_v33 = vadd.f32 %v1178_v42, %v5879_v40  ;;  %v1292_v36 = vadd.f32 %v1291_v56, %v5883_v19 }
 0x4b0   :  { %v1180_v37 = vpop.f32.mrf.mxu1  ;;  %v1293_v0 = vpop.f32.mrf.mxu0 }
 0x4b1   :  { %1660 = vst [vmem:[#allocation2 + $0x2c0] sm:$0xff] %v1179_v33  ;;  %1662 = vst [vmem:[#allocation2 + $0x2d0] sm:$0xff] %v1292_v36  ;;  %v1181_v20 = vadd.f32 %v1180_v37, %v5889_v14  ;;  %v1294_v21 = vadd.f32 %v1293_v0, %v5893_v23 }
 0x4b2   :  { %v1184_v4 = vpop.f32.mrf.mxu1  ;;  %v1297_v10 = vpop.f32.mrf.mxu0 }
 0x4b3   :  { %1661 = vst [vmem:[#allocation2 + $0x2c8] sm:$0xff] %v1181_v20  ;;  %1663 = vst [vmem:[#allocation2 + $0x2d8] sm:$0xff] %v1294_v21  ;;  %v1185_v45 = vadd.f32 %v1184_v4, %v5879_v40  ;;  %v1298_v7 = vadd.f32 %v1297_v10, %v5883_v19 }
 0x4b4   :  { %v1186_v47 = vpop.f32.mrf.mxu1  ;;  %v1299_v12 = vpop.f32.mrf.mxu0 }
 0x4b5   :  { %1676 = vst [vmem:[#allocation2 + $0x340] sm:$0xff] %v1185_v45  ;;  %1678 = vst [vmem:[#allocation2 + $0x350] sm:$0xff] %v1298_v7  ;;  %v1187_v39 = vadd.f32 %v1186_v47, %v5889_v14  ;;  %v1300_v53 = vadd.f32 %v1299_v12, %v5893_v23 }
 0x4b6   :  { %v1188_v52 = vpop.f32.mrf.mxu1  ;;  %v1301_v15 = vpop.f32.mrf.mxu0 }
 0x4b7   :  { %1677 = vst [vmem:[#allocation2 + $0x348] sm:$0xff] %v1187_v39  ;;  %1679 = vst [vmem:[#allocation2 + $0x358] sm:$0xff] %v1300_v53  ;;  %v1189_v32 = vadd.f32 %v1188_v52, %v5879_v40  ;;  %v1302_v16 = vadd.f32 %v1301_v15, %v5883_v19 }
 0x4b8   :  { %v1190_v34 = vpop.f32.mrf.mxu1  ;;  %v1303_v28 = vpop.f32.mrf.mxu0 }
 0x4b9   :  { %1692 = vst [vmem:[#allocation2 + $0x3c0] sm:$0xff] %v1189_v32  ;;  %1694 = vst [vmem:[#allocation2 + $0x3d0] sm:$0xff] %v1302_v16  ;;  %v1191_v54 = vadd.f32 %v1190_v34, %v5889_v14  ;;  %v1304_v6 = vadd.f32 %v1303_v28, %v5893_v23 }
 0x4ba   :  { %v1194_v9 = vpop.f32.mrf.mxu1  ;;  %v1307_v13 = vpop.f32.mrf.mxu0 }
 0x4bb   :  { %1693 = vst [vmem:[#allocation2 + $0x3c8] sm:$0xff] %v1191_v54  ;;  %1695 = vst [vmem:[#allocation2 + $0x3d8] sm:$0xff] %v1304_v6  ;;  %v1195_v35 = vadd.f32 %v1194_v9, %v5879_v40  ;;  %v1308_v31 = vadd.f32 %v1307_v13, %v5883_v19 }
 0x4bc   :  { %v1196_v43 = vpop.f32.mrf.mxu1  ;;  %v1309_v44 = vpop.f32.mrf.mxu0 }
 0x4bd   :  { %1708 = vst [vmem:[#allocation2 + $0x440] sm:$0xff] %v1195_v35  ;;  %1710 = vst [vmem:[#allocation2 + $0x450] sm:$0xff] %v1308_v31  ;;  %v1197_v60 = vadd.f32 %v1196_v43, %v5889_v14  ;;  %v1310_v51 = vadd.f32 %v1309_v44, %v5893_v23 }
 0x4be   :  { %v1198_v58 = vpop.f32.mrf.mxu1  ;;  %v1311_v61 = vpop.f32.mrf.mxu0 }
 0x4bf   :  { %1709 = vst [vmem:[#allocation2 + $0x448] sm:$0xff] %v1197_v60  ;;  %1711 = vst [vmem:[#allocation2 + $0x458] sm:$0xff] %v1310_v51  ;;  %v1199_v1 = vadd.f32 %v1198_v58, %v5879_v40  ;;  %v1312_v55 = vadd.f32 %v1311_v61, %v5883_v19 }
 0x4c0   :  { %v1200_v57 = vpop.f32.mrf.mxu1  ;;  %v1313_v2 = vpop.f32.mrf.mxu0 }
 0x4c1   :  { %1724 = vst [vmem:[#allocation2 + $0x4c0] sm:$0xff] %v1199_v1  ;;  %1726 = vst [vmem:[#allocation2 + $0x4d0] sm:$0xff] %v1312_v55  ;;  %v1201_v25 = vadd.f32 %v1200_v57, %v5889_v14  ;;  %v1314_v27 = vadd.f32 %v1313_v2, %v5893_v23  ;;  %v5959_v55 = vrot.slane %v5871_v11, %v5777_v59 }
 0x4c2   :  { %v1204_v49 = vpop.f32.mrf.mxu1  ;;  %v1317_v62 = vpop.f32.mrf.mxu0  ;;  %v5963_v57 = vrot.slane %v5871_v11, %v5780_v63 }
 0x4c3   :  { %1725 = vst [vmem:[#allocation2 + $0x4c8] sm:$0xff] %v1201_v25  ;;  %1727 = vst [vmem:[#allocation2 + $0x4d8] sm:$0xff] %v1314_v27  ;;  %v1205_v29 = vadd.f32 %v1204_v49, %v5879_v40  ;;  %v1318_v3 = vadd.f32 %v1317_v62, %v5883_v19 }
 0x4c4   :  { %v1206_v18 = vpop.f32.mrf.mxu1  ;;  %v1319_v41 = vpop.f32.mrf.mxu0 }
 0x4c5   :  { %1740 = vst [vmem:[#allocation2 + $0x540] sm:$0xff] %v1205_v29  ;;  %1742 = vst [vmem:[#allocation2 + $0x550] sm:$0xff] %v1318_v3  ;;  %v1207_v5 = vadd.f32 %v1206_v18, %v5889_v14  ;;  %v1320_v8 = vadd.f32 %v1319_v41, %v5893_v23 }
 0x4c6   :  { %v1208_v30 = vpop.f32.mrf.mxu1  ;;  %v1321_v42 = vpop.f32.mrf.mxu0 }
 0x4c7   :  { %1741 = vst [vmem:[#allocation2 + $0x548] sm:$0xff] %v1207_v5  ;;  %1743 = vst [vmem:[#allocation2 + $0x558] sm:$0xff] %v1320_v8  ;;  %v1209_v56 = vadd.f32 %v1208_v30, %v5879_v40  ;;  %v1322_v33 = vadd.f32 %v1321_v42, %v5883_v19 }
 0x4c8   :  { %v1210_v36 = vpop.f32.mrf.mxu1  ;;  %v1323_v37 = vpop.f32.mrf.mxu0 }
 0x4c9   :  { %1756 = vst [vmem:[#allocation2 + $0x5c0] sm:$0xff] %v1209_v56  ;;  %1758 = vst [vmem:[#allocation2 + $0x5d0] sm:$0xff] %v1322_v33  ;;  %v1211_v0 = vadd.f32 %v1210_v36, %v5889_v14  ;;  %v1324_v20 = vadd.f32 %v1323_v37, %v5893_v23 }
 0x4ca   :  { %v1214_v21 = vpop.f32.mrf.mxu1  ;;  %v1327_v4 = vpop.f32.mrf.mxu0 }
 0x4cb   :  { %1757 = vst [vmem:[#allocation2 + $0x5c8] sm:$0xff] %v1211_v0  ;;  %1759 = vst [vmem:[#allocation2 + $0x5d8] sm:$0xff] %v1324_v20  ;;  %v1215_v10 = vadd.f32 %v1214_v21, %v5879_v40  ;;  %v1328_v45 = vadd.f32 %v1327_v4, %v5883_v19 }
 0x4cc   :  { %v1216_v7 = vpop.f32.mrf.mxu1  ;;  %v1329_v47 = vpop.f32.mrf.mxu0 }
 0x4cd   :  { %1772 = vst [vmem:[#allocation2 + $0x640] sm:$0xff] %v1215_v10  ;;  %1774 = vst [vmem:[#allocation2 + $0x650] sm:$0xff] %v1328_v45  ;;  %v1217_v12 = vadd.f32 %v1216_v7, %v5889_v14  ;;  %v1330_v39 = vadd.f32 %v1329_v47, %v5893_v23 }
 0x4ce   :  { %v1218_v53 = vpop.f32.mrf.mxu1  ;;  %v1331_v52 = vpop.f32.mrf.mxu0 }
 0x4cf   :  { %1773 = vst [vmem:[#allocation2 + $0x648] sm:$0xff] %v1217_v12  ;;  %1775 = vst [vmem:[#allocation2 + $0x658] sm:$0xff] %v1330_v39  ;;  %v1219_v15 = vadd.f32 %v1218_v53, %v5879_v40  ;;  %v1332_v32 = vadd.f32 %v1331_v52, %v5883_v19 }
 0x4d0   :  { %v1220_v16 = vpop.f32.mrf.mxu1  ;;  %v1333_v34 = vpop.f32.mrf.mxu0 }
 0x4d1   :  { %1788 = vst [vmem:[#allocation2 + $0x6c0] sm:$0xff] %v1219_v15  ;;  %1790 = vst [vmem:[#allocation2 + $0x6d0] sm:$0xff] %v1332_v32  ;;  %v1221_v28 = vadd.f32 %v1220_v16, %v5889_v14  ;;  %v1334_v54 = vadd.f32 %v1333_v34, %v5893_v23 }
 0x4d2   :  { %v1224_v6 = vpop.f32.mrf.mxu1  ;;  %v1337_v9 = vpop.f32.mrf.mxu0 }
 0x4d3   :  { %1789 = vst [vmem:[#allocation2 + $0x6c8] sm:$0xff] %v1221_v28  ;;  %1791 = vst [vmem:[#allocation2 + $0x6d8] sm:$0xff] %v1334_v54  ;;  %v1225_v13 = vadd.f32 %v1224_v6, %v5879_v40  ;;  %v1338_v35 = vadd.f32 %v1337_v9, %v5883_v19 }
 0x4d4   :  { %v1226_v31 = vpop.f32.mrf.mxu1  ;;  %v1339_v43 = vpop.f32.mrf.mxu0 }
 0x4d5   :  { %1804 = vst [vmem:[#allocation2 + $0x740] sm:$0xff] %v1225_v13  ;;  %1806 = vst [vmem:[#allocation2 + $0x750] sm:$0xff] %v1338_v35  ;;  %v1227_v44 = vadd.f32 %v1226_v31, %v5889_v14  ;;  %v1340_v60 = vadd.f32 %v1339_v43, %v5893_v23 }
 0x4d6   :  { %v1228_v51 = vpop.f32.mrf.mxu1  ;;  %v1341_v58 = vpop.f32.mrf.mxu0 }
 0x4d7   :  { %1805 = vst [vmem:[#allocation2 + $0x748] sm:$0xff] %v1227_v44  ;;  %1807 = vst [vmem:[#allocation2 + $0x758] sm:$0xff] %v1340_v60  ;;  %v1229_v61 = vadd.f32 %v1228_v51, %v5879_v40  ;;  %v1342_v1 = vadd.f32 %v1341_v58, %v5883_v19  ;;  %v5969_v40 = vrot.slane %v5871_v11, %v5785_v17 }
 0x4d8   :  { %v1230_v2 = vpop.f32.mrf.mxu1  ;;  %v1343_v25 = vpop.f32.mrf.mxu0  ;;  %v5973_v19 = vrot.slane %v5871_v11, %v5788_v46 }
 0x4d9   :  { %1820 = vst [vmem:[#allocation2 + $0x7c0] sm:$0xff] %v1229_v61  ;;  %1822 = vst [vmem:[#allocation2 + $0x7d0] sm:$0xff] %v1342_v1  ;;  %v1231_v27 = vadd.f32 %v1230_v2, %v5889_v14  ;;  %v1344_v49 = vadd.f32 %v1343_v25, %v5893_v23 }
 0x4da   :  { %v1380_v62 = vpop.f32.mrf.mxu1  ;;  %v1493_v29 = vpop.f32.mrf.mxu0 }
 0x4db   :  { %1821 = vst [vmem:[#allocation2 + $0x7c8] sm:$0xff] %v1231_v27  ;;  %1823 = vst [vmem:[#allocation2 + $0x7d8] sm:$0xff] %v1344_v49  ;;  %v1381_v3 = vadd.f32 %v1380_v62, %v5959_v55  ;;  %v1494_v18 = vadd.f32 %v1493_v29, %v5963_v57 }
 0x4dc   :  { %v1382_v41 = vpop.f32.mrf.mxu1  ;;  %v1495_v14 = vpop.f32.mrf.mxu0 }
 0x4dd   :  { %1584 = vst [vmem:[#allocation2 + $0x60] sm:$0xff] %v1381_v3  ;;  %1586 = vst [vmem:[#allocation2 + $0x70] sm:$0xff] %v1494_v18  ;;  %v1383_v23 = vadd.f32 %v1382_v41, %v5969_v40  ;;  %v1496_v5 = vadd.f32 %v1495_v14, %v5973_v19 }
 0x4de   :  { %v1384_v8 = vpop.f32.mrf.mxu1  ;;  %v1497_v30 = vpop.f32.mrf.mxu0 }
 0x4df   :  { %1585 = vst [vmem:[#allocation2 + $0x68] sm:$0xff] %v1383_v23  ;;  %1587 = vst [vmem:[#allocation2 + $0x78] sm:$0xff] %v1496_v5  ;;  %v1385_v11 = vadd.f32 %v1384_v8, %v5959_v55  ;;  %v1498_v42 = vadd.f32 %v1497_v30, %v5963_v57 }
 0x4e0   :  { %v1386_v56 = vpop.f32.mrf.mxu1  ;;  %v1499_v33 = vpop.f32.mrf.mxu0 }
 0x4e1   :  { %1600 = vst [vmem:[#allocation2 + $0xe0] sm:$0xff] %v1385_v11  ;;  %1602 = vst [vmem:[#allocation2 + $0xf0] sm:$0xff] %v1498_v42  ;;  %v1387_v36 = vadd.f32 %v1386_v56, %v5969_v40  ;;  %v1500_v37 = vadd.f32 %v1499_v33, %v5973_v19 }
 0x4e2   :  { %v1390_v0 = vpop.f32.mrf.mxu1  ;;  %v1503_v20 = vpop.f32.mrf.mxu0 }
 0x4e3   :  { %1601 = vst [vmem:[#allocation2 + $0xe8] sm:$0xff] %v1387_v36  ;;  %1603 = vst [vmem:[#allocation2 + $0xf8] sm:$0xff] %v1500_v37  ;;  %v1391_v21 = vadd.f32 %v1390_v0, %v5959_v55  ;;  %v1504_v4 = vadd.f32 %v1503_v20, %v5963_v57 }
 0x4e4   :  { %v1392_v10 = vpop.f32.mrf.mxu1  ;;  %v1505_v45 = vpop.f32.mrf.mxu0 }
 0x4e5   :  { %1616 = vst [vmem:[#allocation2 + $0x160] sm:$0xff] %v1391_v21  ;;  %1618 = vst [vmem:[#allocation2 + $0x170] sm:$0xff] %v1504_v4  ;;  %v1393_v7 = vadd.f32 %v1392_v10, %v5969_v40  ;;  %v1506_v47 = vadd.f32 %v1505_v45, %v5973_v19 }
 0x4e6   :  { %v1394_v12 = vpop.f32.mrf.mxu1  ;;  %v1507_v39 = vpop.f32.mrf.mxu0 }
 0x4e7   :  { %1617 = vst [vmem:[#allocation2 + $0x168] sm:$0xff] %v1393_v7  ;;  %1619 = vst [vmem:[#allocation2 + $0x178] sm:$0xff] %v1506_v47  ;;  %v1395_v53 = vadd.f32 %v1394_v12, %v5959_v55  ;;  %v1508_v52 = vadd.f32 %v1507_v39, %v5963_v57 }
 0x4e8   :  { %v1396_v15 = vpop.f32.mrf.mxu1  ;;  %v1509_v32 = vpop.f32.mrf.mxu0 }
 0x4e9   :  { %1632 = vst [vmem:[#allocation2 + $0x1e0] sm:$0xff] %v1395_v53  ;;  %1634 = vst [vmem:[#allocation2 + $0x1f0] sm:$0xff] %v1508_v52  ;;  %v1397_v16 = vadd.f32 %v1396_v15, %v5969_v40  ;;  %v1510_v34 = vadd.f32 %v1509_v32, %v5973_v19 }
 0x4ea   :  { %v1400_v28 = vpop.f32.mrf.mxu1  ;;  %v1513_v54 = vpop.f32.mrf.mxu0 }
 0x4eb   :  { %1633 = vst [vmem:[#allocation2 + $0x1e8] sm:$0xff] %v1397_v16  ;;  %1635 = vst [vmem:[#allocation2 + $0x1f8] sm:$0xff] %v1510_v34  ;;  %v1401_v6 = vadd.f32 %v1400_v28, %v5959_v55  ;;  %v1514_v9 = vadd.f32 %v1513_v54, %v5963_v57 }
 0x4ec   :  { %v1402_v13 = vpop.f32.mrf.mxu1  ;;  %v1515_v35 = vpop.f32.mrf.mxu0 }
 0x4ed   :  { %1648 = vst [vmem:[#allocation2 + $0x260] sm:$0xff] %v1401_v6  ;;  %1650 = vst [vmem:[#allocation2 + $0x270] sm:$0xff] %v1514_v9  ;;  %v1403_v31 = vadd.f32 %v1402_v13, %v5969_v40  ;;  %v1516_v43 = vadd.f32 %v1515_v35, %v5973_v19 }
 0x4ee   :  { %v1404_v44 = vpop.f32.mrf.mxu1  ;;  %v1517_v60 = vpop.f32.mrf.mxu0 }
 0x4ef   :  { %1649 = vst [vmem:[#allocation2 + $0x268] sm:$0xff] %v1403_v31  ;;  %1651 = vst [vmem:[#allocation2 + $0x278] sm:$0xff] %v1516_v43  ;;  %v1405_v51 = vadd.f32 %v1404_v44, %v5959_v55  ;;  %v1518_v58 = vadd.f32 %v1517_v60, %v5963_v57 }
 0x4f0   :  { %v1406_v61 = vpop.f32.mrf.mxu1  ;;  %v1519_v1 = vpop.f32.mrf.mxu0 }
 0x4f1   :  { %1664 = vst [vmem:[#allocation2 + $0x2e0] sm:$0xff] %v1405_v51  ;;  %1666 = vst [vmem:[#allocation2 + $0x2f0] sm:$0xff] %v1518_v58  ;;  %v1407_v2 = vadd.f32 %v1406_v61, %v5969_v40  ;;  %v1520_v25 = vadd.f32 %v1519_v1, %v5973_v19 }
 0x4f2   :  { %v1410_v27 = vpop.f32.mrf.mxu1  ;;  %v1523_v49 = vpop.f32.mrf.mxu0 }
 0x4f3   :  { %1665 = vst [vmem:[#allocation2 + $0x2e8] sm:$0xff] %v1407_v2  ;;  %1667 = vst [vmem:[#allocation2 + $0x2f8] sm:$0xff] %v1520_v25  ;;  %v1411_v62 = vadd.f32 %v1410_v27, %v5959_v55  ;;  %v1524_v29 = vadd.f32 %v1523_v49, %v5963_v57 }
 0x4f4   :  { %v1412_v3 = vpop.f32.mrf.mxu1  ;;  %v1525_v18 = vpop.f32.mrf.mxu0 }
 0x4f5   :  { %1680 = vst [vmem:[#allocation2 + $0x360] sm:$0xff] %v1411_v62  ;;  %1682 = vst [vmem:[#allocation2 + $0x370] sm:$0xff] %v1524_v29  ;;  %v1413_v41 = vadd.f32 %v1412_v3, %v5969_v40  ;;  %v1526_v14 = vadd.f32 %v1525_v18, %v5973_v19 }
 0x4f6   :  { %v1414_v23 = vpop.f32.mrf.mxu1  ;;  %v1527_v5 = vpop.f32.mrf.mxu0 }
 0x4f7   :  { %1681 = vst [vmem:[#allocation2 + $0x368] sm:$0xff] %v1413_v41  ;;  %1683 = vst [vmem:[#allocation2 + $0x378] sm:$0xff] %v1526_v14  ;;  %v1415_v8 = vadd.f32 %v1414_v23, %v5959_v55  ;;  %v1528_v30 = vadd.f32 %v1527_v5, %v5963_v57 }
 0x4f8   :  { %v1416_v11 = vpop.f32.mrf.mxu1  ;;  %v1529_v42 = vpop.f32.mrf.mxu0 }
 0x4f9   :  { %1696 = vst [vmem:[#allocation2 + $0x3e0] sm:$0xff] %v1415_v8  ;;  %1698 = vst [vmem:[#allocation2 + $0x3f0] sm:$0xff] %v1528_v30  ;;  %v1417_v56 = vadd.f32 %v1416_v11, %v5969_v40  ;;  %v1530_v33 = vadd.f32 %v1529_v42, %v5973_v19 }
 0x4fa   :  { %v1420_v36 = vpop.f32.mrf.mxu1  ;;  %v1533_v37 = vpop.f32.mrf.mxu0 }
 0x4fb   :  { %1697 = vst [vmem:[#allocation2 + $0x3e8] sm:$0xff] %v1417_v56  ;;  %1699 = vst [vmem:[#allocation2 + $0x3f8] sm:$0xff] %v1530_v33  ;;  %v1421_v0 = vadd.f32 %v1420_v36, %v5959_v55  ;;  %v1534_v20 = vadd.f32 %v1533_v37, %v5963_v57 }
 0x4fc   :  { %v1422_v21 = vpop.f32.mrf.mxu1  ;;  %v1535_v4 = vpop.f32.mrf.mxu0 }
 0x4fd   :  { %1712 = vst [vmem:[#allocation2 + $0x460] sm:$0xff] %v1421_v0  ;;  %1714 = vst [vmem:[#allocation2 + $0x470] sm:$0xff] %v1534_v20  ;;  %v1423_v10 = vadd.f32 %v1422_v21, %v5969_v40  ;;  %v1536_v45 = vadd.f32 %v1535_v4, %v5973_v19 }
 0x4fe   :  { %v1424_v7 = vpop.f32.mrf.mxu1  ;;  %v1537_v47 = vpop.f32.mrf.mxu0 }
 0x4ff   :  { %1713 = vst [vmem:[#allocation2 + $0x468] sm:$0xff] %v1423_v10  ;;  %1715 = vst [vmem:[#allocation2 + $0x478] sm:$0xff] %v1536_v45  ;;  %v1425_v12 = vadd.f32 %v1424_v7, %v5959_v55  ;;  %v1538_v39 = vadd.f32 %v1537_v47, %v5963_v57 }
 0x500   :  { %v1426_v53 = vpop.f32.mrf.mxu1  ;;  %v1539_v52 = vpop.f32.mrf.mxu0 }
 0x501   :  { %1728 = vst [vmem:[#allocation2 + $0x4e0] sm:$0xff] %v1425_v12  ;;  %1730 = vst [vmem:[#allocation2 + $0x4f0] sm:$0xff] %v1538_v39  ;;  %v1427_v15 = vadd.f32 %v1426_v53, %v5969_v40  ;;  %v1540_v32 = vadd.f32 %v1539_v52, %v5973_v19 }
 0x502   :  { %v1430_v16 = vpop.f32.mrf.mxu1  ;;  %v1543_v34 = vpop.f32.mrf.mxu0 }
 0x503   :  { %1729 = vst [vmem:[#allocation2 + $0x4e8] sm:$0xff] %v1427_v15  ;;  %1731 = vst [vmem:[#allocation2 + $0x4f8] sm:$0xff] %v1540_v32  ;;  %v1431_v28 = vadd.f32 %v1430_v16, %v5959_v55  ;;  %v1544_v54 = vadd.f32 %v1543_v34, %v5963_v57  ;;  %v6039_v15 = vmov 0.0   ;;  %v6041_v32 = vmov 0.0  }
 0x504   :  { %v1432_v6 = vpop.f32.mrf.mxu1  ;;  %v1545_v9 = vpop.f32.mrf.mxu0  ;;  %v6043_v16 = vmov 0.0   ;;  %v6045_v34 = vmov 0.0  }
 0x505   :  { %1744 = vst [vmem:[#allocation2 + $0x560] sm:$0xff] %v1431_v28  ;;  %1746 = vst [vmem:[#allocation2 + $0x570] sm:$0xff] %v1544_v54  ;;  %v1433_v13 = vadd.f32 %v1432_v6, %v5969_v40  ;;  %v1546_v35 = vadd.f32 %v1545_v9, %v5973_v19  ;;  %v6051_v28 = vmov 0.0   ;;  %v6053_v54 = vmov 0.0  }
 0x506   :  { %v1434_v31 = vpop.f32.mrf.mxu1  ;;  %v1547_v43 = vpop.f32.mrf.mxu0 }
 0x507   :  { %1745 = vst [vmem:[#allocation2 + $0x568] sm:$0xff] %v1433_v13  ;;  %1747 = vst [vmem:[#allocation2 + $0x578] sm:$0xff] %v1546_v35  ;;  %v1435_v44 = vadd.f32 %v1434_v31, %v5959_v55  ;;  %v1548_v60 = vadd.f32 %v1547_v43, %v5963_v57 }
 0x508   :  { %v1436_v51 = vpop.f32.mrf.mxu1  ;;  %v1549_v58 = vpop.f32.mrf.mxu0 }
 0x509   :  { %1760 = vst [vmem:[#allocation2 + $0x5e0] sm:$0xff] %v1435_v44  ;;  %1762 = vst [vmem:[#allocation2 + $0x5f0] sm:$0xff] %v1548_v60  ;;  %v1437_v61 = vadd.f32 %v1436_v51, %v5969_v40  ;;  %v1550_v1 = vadd.f32 %v1549_v58, %v5973_v19 }
 0x50a   :  { %v1440_v2 = vpop.f32.mrf.mxu1  ;;  %v1553_v25 = vpop.f32.mrf.mxu0 }
 0x50b   :  { %1761 = vst [vmem:[#allocation2 + $0x5e8] sm:$0xff] %v1437_v61  ;;  %1763 = vst [vmem:[#allocation2 + $0x5f8] sm:$0xff] %v1550_v1  ;;  %v1441_v27 = vadd.f32 %v1440_v2, %v5959_v55  ;;  %v1554_v49 = vadd.f32 %v1553_v25, %v5963_v57 }
 0x50c   :  { %v1442_v62 = vpop.f32.mrf.mxu1  ;;  %v1555_v29 = vpop.f32.mrf.mxu0 }
 0x50d   :  { %1776 = vst [vmem:[#allocation2 + $0x660] sm:$0xff] %v1441_v27  ;;  %1778 = vst [vmem:[#allocation2 + $0x670] sm:$0xff] %v1554_v49  ;;  %v1443_v3 = vadd.f32 %v1442_v62, %v5969_v40  ;;  %v1556_v18 = vadd.f32 %v1555_v29, %v5973_v19 }
 0x50e   :  { %v1444_v41 = vpop.f32.mrf.mxu1  ;;  %v1557_v14 = vpop.f32.mrf.mxu0 }
 0x50f   :  { %1777 = vst [vmem:[#allocation2 + $0x668] sm:$0xff] %v1443_v3  ;;  %1779 = vst [vmem:[#allocation2 + $0x678] sm:$0xff] %v1556_v18  ;;  %v1445_v23 = vadd.f32 %v1444_v41, %v5959_v55  ;;  %v1558_v5 = vadd.f32 %v1557_v14, %v5963_v57 }
 0x510   :  { %v1446_v8 = vpop.f32.mrf.mxu1  ;;  %v1559_v30 = vpop.f32.mrf.mxu0 }
 0x511   :  { %1792 = vst [vmem:[#allocation2 + $0x6e0] sm:$0xff] %v1445_v23  ;;  %1794 = vst [vmem:[#allocation2 + $0x6f0] sm:$0xff] %v1558_v5  ;;  %v1447_v11 = vadd.f32 %v1446_v8, %v5969_v40  ;;  %v1560_v42 = vadd.f32 %v1559_v30, %v5973_v19 }
 0x512   :  { %v1450_v56 = vpop.f32.mrf.mxu1  ;;  %v1563_v33 = vpop.f32.mrf.mxu0 }
 0x513   :  { %1793 = vst [vmem:[#allocation2 + $0x6e8] sm:$0xff] %v1447_v11  ;;  %1795 = vst [vmem:[#allocation2 + $0x6f8] sm:$0xff] %v1560_v42  ;;  %v1451_v36 = vadd.f32 %v1450_v56, %v5959_v55  ;;  %v1564_v37 = vadd.f32 %v1563_v33, %v5963_v57 }
 0x514   :  { %v1452_v0 = vpop.f32.mrf.mxu1  ;;  %v1565_v20 = vpop.f32.mrf.mxu0 }
 0x515   :  { %1808 = vst [vmem:[#allocation2 + $0x760] sm:$0xff] %v1451_v36  ;;  %1810 = vst [vmem:[#allocation2 + $0x770] sm:$0xff] %v1564_v37  ;;  %v1453_v21 = vadd.f32 %v1452_v0, %v5969_v40  ;;  %v1566_v4 = vadd.f32 %v1565_v20, %v5973_v19 }
 0x516   :  { %v1454_v10 = vpop.f32.mrf.mxu1  ;;  %v1567_v45 = vpop.f32.mrf.mxu0 }
 0x517   :  { %1809 = vst [vmem:[#allocation2 + $0x768] sm:$0xff] %v1453_v21  ;;  %1811 = vst [vmem:[#allocation2 + $0x778] sm:$0xff] %v1566_v4  ;;  %v1455_v7 = vadd.f32 %v1454_v10, %v5959_v55  ;;  %v1568_v47 = vadd.f32 %v1567_v45, %v5963_v57  ;;  %v6047_v55 = vmov 0.0   ;;  %v6049_v57 = vmov 0.0  }
 0x518   :  { %v1456_v12 = vpop.f32.mrf.mxu1  ;;  %v1569_v39 = vpop.f32.mrf.mxu0 }
 0x519   :  { %1824 = vst [vmem:[#allocation2 + $0x7e0] sm:$0xff] %v1455_v7  ;;  %1826 = vst [vmem:[#allocation2 + $0x7f0] sm:$0xff] %v1568_v47  ;;  %v1457_v53 = vadd.f32 %v1456_v12, %v5969_v40  ;;  %v1570_v52 = vadd.f32 %v1569_v39, %v5973_v19 }
 0x51b   :  { %1825 = vst [vmem:[#allocation2 + $0x7e8] sm:$0xff] %v1457_v53  ;;  %1827 = vst [vmem:[#allocation2 + $0x7f8] sm:$0xff] %v1570_v52 }
 0x51c LB: > { %v2130_v40 = vld [vmem:[%s7219_s5 + $0x1c0] sm:$0xff]  ;;  %v2131_v6 = vld [vmem:[%s7219_s5 + $0x1c8] sm:$0xff]  ;;  %v6118_v62 = vpack.c.bf16 %v5000_v28, %v5000_v28  ;;  %s1854_s28 = sadd.s32 64, %s5008_s4  ;;  %s1843_s29 = sshra.s32 %s5008_s4, 3  ;;  %vm1948_vm2 = vcmask 1040384   ;;  %vm6942_vm3 = vcmp.lt.s32.totalorder %v404_v48, 256  ;;  %s5008_s4 = sphi %s6055_s4, %s1833_s4   ;;  %v5004_v54 = vphi %v6053_v54, %v6927_v54   ;;  %v5000_v28 = vphi %v6051_v28, %v6929_v28   ;;  %v4996_v57 = vphi %v6049_v57, %v6918_v57   ;;  %v4992_v55 = vphi %v6047_v55, %v6922_v55   ;;  %v4988_v34 = vphi %v6045_v34, %v4050_v34   ;;  %v4984_v16 = vphi %v6043_v16, %v4051_v16   ;;  %v4980_v32 = vphi %v6041_v32, %v4046_v32   ;;  %v4976_v15 = vphi %v6039_v15, %v4047_v15  }
 0x51d   : > { %v2134_v19 = vld [vmem:[%s7219_s5 + $0x1e0] sm:$0xff]  ;;  %v2135_v13 = vld [vmem:[%s7219_s5 + $0x1e8] sm:$0xff]  ;;  %s6882_s30 = sshra.s32 %s1854_s28, 3  ;;  %s1846_s8 = sand.u32 7, %s5008_s4 }
 0x51e   : > { %v4499_v9 = vcombine.high %v2130_v40, %v2134_v19  ;;  %v4498_v35 = vcombine.low %v2130_v40, %v2134_v19  ;;  %v2122_v31 = vld [vmem:[%s7219_s5 + $0x180] sm:$0xff]  ;;  %v4501_v44 = vcombine.high %v2131_v6, %v2135_v13  ;;  %v4500_v60 = vcombine.low %v2131_v6, %v2135_v13  ;;  %v2123_v58 = vld [vmem:[%s7219_s5 + $0x188] sm:$0xff]  ;;  %2874 = vmatprep.mubr.bf16.mxu0 %v6118_v62  ;;  %s4750_s9 = sshll.u32 %s1843_s29, 7  ;;  %s6887_s10 = sand.u32 7, %s1854_s28 }
 0x51f   : > { %v2126_v43 = vld [vmem:[%s7219_s5 + $0x1a0] sm:$0xff]  ;;  %v2127_v61 = vld [vmem:[%s7219_s5 + $0x1a8] sm:$0xff]  ;;  %2915 = vmatprep.mubr.bf16.mxu1 %v6118_v62  ;;  %s4751_s1 = sshll.u32 %s6882_s30, 7  ;;  %s1849_s11 = sadd.s32 %s4750_s9, %s1846_s8 }
 0x520   : > { %v4491_v51 = vcombine.high %v2122_v31, %v2126_v43  ;;  %v2114_v1 = vld [vmem:[%s7219_s5 + $0x140] sm:$0xff]  ;;  %2842 = vmatprep.subr.bf16.mxu0 %v4499_v9  ;;  %v4493_v2 = vcombine.high %v2123_v58, %v2127_v61  ;;  %v2115_v27 = vld [vmem:[%s7219_s5 + $0x148] sm:$0xff]  ;;  %2883 = vmatprep.subr.bf16.mxu1 %v4501_v44  ;;  %v4490_v29 = vcombine.low %v2122_v31, %v2126_v43  ;;  %s1861_s0 = sadd.s32 %s4751_s1, %s6887_s10  ;;  %s1850_s2 = scalar_lea.vmem [#allocation2], %s1849_s11 }
 0x521   : > { %v2118_v25 = vld [vmem:[%s7219_s5 + $0x160] sm:$0xff]  ;;  %v2119_v49 = vld [vmem:[%s7219_s5 + $0x168] sm:$0xff]  ;;  %2843 = vmatpush1.bf16.msra.mxu0 %v4498_v35  ;;  %2884 = vmatpush1.bf16.msra.mxu1 %v4500_v60  ;;  %v4492_v3 = vcombine.low %v2123_v58, %v2127_v61  ;;  %s1862_s12 = scalar_lea.vmem [#allocation2], %s1861_s0  ;;  %s4754_s13 = sshll.u32 %s1843_s29, 4 }
 0x522   : > { %2844 = vmatprep.subr.bf16.mxu0 %v4491_v51  ;;  %v4483_v18 = vcombine.high %v2114_v1, %v2118_v25  ;;  %2885 = vmatprep.subr.bf16.mxu1 %v4493_v2  ;;  %v4485_v41 = vcombine.high %v2115_v27, %v2119_v49  ;;  %v2106_v14 = vld [vmem:[%s7219_s5 + $0x100] sm:$0xff]  ;;  %v2107_v5 = vld [vmem:[%s7219_s5 + $0x108] sm:$0xff]  ;;  %v4482_v30 = vcombine.low %v2114_v1, %v2118_v25  ;;  %s4756_s14 = sshll.u32 %s6882_s30, 4  ;;  %s4076_s15 = sadd.s32 %s4754_s13, %s1846_s8 }
 0x523   : > { %v2110_v23 = vld [vmem:[%s7219_s5 + $0x120] sm:$0xff]  ;;  %v2111_v8 = vld [vmem:[%s7219_s5 + $0x128] sm:$0xff]  ;;  %v4484_v11 = vcombine.low %v2115_v27, %v2119_v49  ;;  %s4115_s16 = sadd.s32 %s4756_s14, %s6887_s10  ;;  %s4077_s17 = scalar_lea.vmem [#allocation3], %s4076_s15 }
 0x524   : > { %v4475_v42 = vcombine.high %v2106_v14, %v2110_v23  ;;  %v4477_v56 = vcombine.high %v2107_v5, %v2111_v8  ;;  %v2098_v33 = vld [vmem:[%s7219_s5 + $0xc0] sm:$0xff]  ;;  %v2099_v37 = vld [vmem:[%s7219_s5 + $0xc8] sm:$0xff]  ;;  %v4474_v20 = vcombine.low %v2106_v14, %v2110_v23  ;;  %v4476_v21 = vcombine.low %v2107_v5, %v2111_v8  ;;  %s4116_s18 = scalar_lea.vmem [#allocation3], %s4115_s16  ;;  %s1842_s19 = ssub.s32 63, %s5008_s4 }
 0x525   : > { %2845 = vmatpush1.bf16.msra.mxu0 %v4490_v29  ;;  %2886 = vmatpush1.bf16.msra.mxu1 %v4492_v3  ;;  %v2102_v36 = vld [vmem:[%s7219_s5 + $0xe0] sm:$0xff]  ;;  %v2103_v0 = vld [vmem:[%s7219_s5 + $0xe8] sm:$0xff]  ;;  %s1969_s20 = ssub.s32 127, %s5008_s4  ;;  %s6954_s21 = sshra.s32 %s1842_s19, 3 }
 0x526   : > { %2846 = vmatprep.subr.bf16.mxu0 %v4483_v18  ;;  %2887 = vmatprep.subr.bf16.mxu1 %v4485_v41  ;;  %v4467_v4 = vcombine.high %v2098_v33, %v2102_v36  ;;  %v4469_v10 = vcombine.high %v2099_v37, %v2103_v0  ;;  %v2090_v45 = vld [vmem:[%s7219_s5 + $0x80] sm:$0xff]  ;;  %v2091_v47 = vld [vmem:[%s7219_s5 + $0x88] sm:$0xff]  ;;  %v4466_v39 = vcombine.low %v2098_v33, %v2102_v36  ;;  %s6956_s22 = sshra.s32 %s1969_s20, 3  ;;  %s6958_s23 = sand.u32 7, %s1842_s19 }
 0x527   : > { %v2094_v7 = vld [vmem:[%s7219_s5 + $0xa0] sm:$0xff]  ;;  %v2095_v12 = vld [vmem:[%s7219_s5 + $0xa8] sm:$0xff]  ;;  %v4468_v53 = vcombine.low %v2099_v37, %v2103_v0  ;;  %s4752_s24 = sshll.u32 %s6954_s21, 7  ;;  %s6961_s25 = sand.u32 7, %s1969_s20 }
 0x528   : > { %v4459_v52 = vcombine.high %v2090_v45, %v2094_v7  ;;  %v4461_v28 = vcombine.high %v2091_v47, %v2095_v12  ;;  %v2082_v40 = vld [vmem:[%s7219_s5 + $0x40] sm:$0xff]  ;;  %v2083_v6 = vld [vmem:[%s7219_s5 + $0x48] sm:$0xff]  ;;  %v4458_v13 = vcombine.low %v2090_v45, %v2094_v7  ;;  %v4460_v35 = vcombine.low %v2091_v47, %v2095_v12  ;;  %s4753_s26 = sshll.u32 %s6956_s22, 7  ;;  %s4275_s27 = sadd.s32 %s4752_s24, %s6958_s23 }
 0x529   : > { %2847 = vmatpush1.bf16.msra.mxu0 %v4482_v30  ;;  %2888 = vmatpush1.bf16.msra.mxu1 %v4484_v11  ;;  %v2086_v19 = vld [vmem:[%s7219_s5 + $0x60] sm:$0xff]  ;;  %v2087_v9 = vld [vmem:[%s7219_s5 + $0x68] sm:$0xff]  ;;  %s4280_s3 = sadd.s32 %s4753_s26, %s6961_s25  ;;  %s4276_s28 = scalar_lea.vmem [#allocation2], %s4275_s27 }
 0x52a   : > { %2848 = vmatprep.subr.bf16.mxu0 %v4475_v42  ;;  %2889 = vmatprep.subr.bf16.mxu1 %v4477_v56  ;;  %v4451_v31 = vcombine.high %v2082_v40, %v2086_v19  ;;  %v4453_v43 = vcombine.high %v2083_v6, %v2087_v9  ;;  %v2074_v44 = vld [vmem:[%s7219_s5] sm:$0xff]  ;;  %v2075_v51 = vld [vmem:[%s7219_s5 + $0x8] sm:$0xff]  ;;  %v4450_v61 = vcombine.low %v2082_v40, %v2086_v19  ;;  %s4281_s29 = scalar_lea.vmem [#allocation2], %s4280_s3  ;;  %s4755_s30 = sshll.u32 %s6954_s21, 4 }
 0x52b   : > { %v2078_v60 = vld [vmem:[%s7219_s5 + $0x20] sm:$0xff]  ;;  %v2079_v58 = vld [vmem:[%s7219_s5 + $0x28] sm:$0xff]  ;;  %v4452_v1 = vcombine.low %v2083_v6, %v2087_v9  ;;  %s4757_s8 = sshll.u32 %s6956_s22, 4  ;;  %s4100_s9 = sadd.s32 %s4755_s30, %s6958_s23 }
 0x52c   : > { %v4443_v2 = vcombine.high %v2074_v44, %v2078_v60  ;;  %v4445_v25 = vcombine.high %v2075_v51, %v2079_v58  ;;  %v2194_v27 = vld [vmem:[%s7219_s5 + $0x3c0] sm:$0xff]  ;;  %v2195_v29 = vld [vmem:[%s7219_s5 + $0x3c8] sm:$0xff]  ;;  %v4442_v18 = vcombine.low %v2074_v44, %v2078_v60  ;;  %v4444_v41 = vcombine.low %v2075_v51, %v2079_v58  ;;  %s4130_s10 = sadd.s32 %s4757_s8, %s6961_s25  ;;  %s4101_s1 = scalar_lea.vmem [#allocation4], %s4100_s9 }
 0x52d   : > { %2849 = vmatpush1.bf16.msra.mxu0 %v4474_v20  ;;  %2890 = vmatpush1.bf16.msra.mxu1 %v4476_v21  ;;  %v2198_v49 = vld [vmem:[%s7219_s5 + $0x3e0] sm:$0xff]  ;;  %v2199_v3 = vld [vmem:[%s7219_s5 + $0x3e8] sm:$0xff]  ;;  %s4131_s11 = scalar_lea.vmem [#allocation4], %s4130_s10  ;;  %s1833_s4 = sadd.s32 1, %s5008_s4  }
 0x52e   : > { %2850 = vmatprep.subr.bf16.mxu0 %v4467_v4  ;;  %2891 = vmatprep.subr.bf16.mxu1 %v4469_v10  ;;  %v4563_v14 = vcombine.high %v2194_v27, %v2198_v49  ;;  %v4565_v23 = vcombine.high %v2195_v29, %v2199_v3  ;;  %v2186_v5 = vld [vmem:[%s7219_s5 + $0x380] sm:$0xff]  ;;  %v2187_v30 = vld [vmem:[%s7219_s5 + $0x388] sm:$0xff]  ;;  %v4562_v42 = vcombine.low %v2194_v27, %v2198_v49  ;;  %p1830_p0 = scmp.ge.s32.totalorder %s1833_s4, 64  }
 0x52f   : > { %v2190_v8 = vld [vmem:[%s7219_s5 + $0x3a0] sm:$0xff]  ;;  %v2191_v11 = vld [vmem:[%s7219_s5 + $0x3a8] sm:$0xff]  ;;  %v4564_v56 = vcombine.low %v2195_v29, %v2199_v3 }
 0x530   : > { %v4555_v33 = vcombine.high %v2186_v5, %v2190_v8  ;;  %v4557_v36 = vcombine.high %v2187_v30, %v2191_v11  ;;  %v2178_v37 = vld [vmem:[%s7219_s5 + $0x340] sm:$0xff]  ;;  %v2179_v20 = vld [vmem:[%s7219_s5 + $0x348] sm:$0xff]  ;;  %v4554_v4 = vcombine.low %v2186_v5, %v2190_v8  ;;  %v4556_v10 = vcombine.low %v2187_v30, %v2191_v11 }
 0x531   : > { %2851 = vmatpush1.bf16.msra.mxu0 %v4466_v39  ;;  %2892 = vmatpush1.bf16.msra.mxu1 %v4468_v53  ;;  %v2182_v0 = vld [vmem:[%s7219_s5 + $0x360] sm:$0xff]  ;;  %v2183_v21 = vld [vmem:[%s7219_s5 + $0x368] sm:$0xff] }
 0x532   : > { %2852 = vmatprep.subr.bf16.mxu0 %v4459_v52  ;;  %2893 = vmatprep.subr.bf16.mxu1 %v4461_v28  ;;  %v4547_v45 = vcombine.high %v2178_v37, %v2182_v0  ;;  %v4549_v7 = vcombine.high %v2179_v20, %v2183_v21  ;;  %v2170_v47 = vld [vmem:[%s7219_s5 + $0x300] sm:$0xff]  ;;  %v2171_v39 = vld [vmem:[%s7219_s5 + $0x308] sm:$0xff]  ;;  %v4546_v52 = vcombine.low %v2178_v37, %v2182_v0 }
 0x533   : > { %v2174_v12 = vld [vmem:[%s7219_s5 + $0x320] sm:$0xff]  ;;  %v2175_v53 = vld [vmem:[%s7219_s5 + $0x328] sm:$0xff]  ;;  %v4548_v28 = vcombine.low %v2179_v20, %v2183_v21  ;;  %v2132_v20 = vld [vmem:[%s7219_s5 + $0x1d0] sm:$0xff] }
 0x534   : > { %v4539_v40 = vcombine.high %v2170_v47, %v2174_v12  ;;  %v4541_v19 = vcombine.high %v2171_v39, %v2175_v53  ;;  %v2162_v6 = vld [vmem:[%s7219_s5 + $0x2c0] sm:$0xff]  ;;  %v2136_v21 = vld [vmem:[%s7219_s5 + $0x1f0] sm:$0xff] }
 0x535   : > { %2853 = vmatpush1.bf16.msra.mxu0 %v4458_v13  ;;  %2894 = vmatpush1.bf16.msra.mxu1 %v4460_v35  ;;  %v2166_v9 = vld [vmem:[%s7219_s5 + $0x2e0] sm:$0xff]  ;;  %v2163_v13 = vld [vmem:[%s7219_s5 + $0x2c8] sm:$0xff] }
 0x536   : > { %2854 = vmatprep.subr.bf16.mxu0 %v4451_v31  ;;  %2895 = vmatprep.subr.bf16.mxu1 %v4453_v43  ;;  %v2167_v35 = vld [vmem:[%s7219_s5 + $0x2e8] sm:$0xff]  ;;  %v4538_v31 = vcombine.low %v2170_v47, %v2174_v12  ;;  %v4540_v43 = vcombine.low %v2171_v39, %v2175_v53  ;;  %v4531_v44 = vcombine.high %v2162_v6, %v2166_v9  ;;  %v2154_v51 = vld [vmem:[%s7219_s5 + $0x280] sm:$0xff]  ;;  %v2124_v39 = vld [vmem:[%s7219_s5 + $0x190] sm:$0xff] }
 0x537   : > { %v4533_v60 = vcombine.high %v2163_v13, %v2167_v35  ;;  %v2158_v58 = vld [vmem:[%s7219_s5 + $0x2a0] sm:$0xff]  ;;  %v4503_v47 = vcombine.high %v2132_v20, %v2136_v21  ;;  %v2128_v53 = vld [vmem:[%s7219_s5 + $0x1b0] sm:$0xff] }
 0x538   : > { %v4523_v27 = vcombine.high %v2154_v51, %v2158_v58  ;;  %v2146_v29 = vld [vmem:[%s7219_s5 + $0x240] sm:$0xff] }
 0x539   : > { %2855 = vmatpush1.bf16.msra.mxu0 %v4450_v61  ;;  %2896 = vmatpush1.bf16.msra.mxu1 %v4452_v1  ;;  %v2155_v61 = vld [vmem:[%s7219_s5 + $0x288] sm:$0xff]  ;;  %v2150_v3 = vld [vmem:[%s7219_s5 + $0x260] sm:$0xff] }
 0x53a   : > { %2856 = vmatprep.subr.bf16.mxu0 %v4443_v2  ;;  %2897 = vmatprep.subr.bf16.mxu1 %v4445_v25  ;;  %v2159_v1 = vld [vmem:[%s7219_s5 + $0x2a8] sm:$0xff]  ;;  %v4530_v2 = vcombine.low %v2162_v6, %v2166_v9  ;;  %v4532_v25 = vcombine.low %v2163_v13, %v2167_v35  ;;  %v4515_v5 = vcombine.high %v2146_v29, %v2150_v3  ;;  %v2138_v30 = vld [vmem:[%s7219_s5 + $0x200] sm:$0xff]  ;;  %v2120_v35 = vld [vmem:[%s7219_s5 + $0x170] sm:$0xff] }
 0x53b   : > { %v4525_v49 = vcombine.high %v2155_v61, %v2159_v1  ;;  %v2142_v11 = vld [vmem:[%s7219_s5 + $0x220] sm:$0xff]  ;;  %v4495_v9 = vcombine.high %v2124_v39, %v2128_v53 }
 0x53c   : > { %v4507_v37 = vcombine.high %v2138_v30, %v2142_v11 }
 0x53d   : > { %2857 = vmatpush1.bf16.msra.mxu0 %v4442_v18  ;;  %2898 = vmatpush1.bf16.msra.mxu1 %v4444_v41  ;;  %v2147_v18 = vld [vmem:[%s7219_s5 + $0x248] sm:$0xff] }
 0x53e   : > { %2858 = vmatprep.subr.bf16.mxu0 %v4563_v14  ;;  %2899 = vmatprep.subr.bf16.mxu1 %v4565_v23  ;;  %v2151_v41 = vld [vmem:[%s7219_s5 + $0x268] sm:$0xff]  ;;  %v4522_v14 = vcombine.low %v2154_v51, %v2158_v58  ;;  %v4524_v23 = vcombine.low %v2155_v61, %v2159_v1  ;;  %v2108_v61 = vld [vmem:[%s7219_s5 + $0x110] sm:$0xff] }
 0x53f   : > { %v4517_v8 = vcombine.high %v2147_v18, %v2151_v41  ;;  %v2112_v1 = vld [vmem:[%s7219_s5 + $0x130] sm:$0xff] }
 0x541   : > { %2859 = vmatpush2.bf16.msra.mxu0 %v4562_v42  ;;  %2900 = vmatpush2.bf16.msra.mxu1 %v4564_v56  ;;  %v2139_v42 = vld [vmem:[%s7219_s5 + $0x208] sm:$0xff] }
 0x542   : > { %2860 = vmatprep.subr.bf16.mxu0 %v4555_v33  ;;  %2901 = vmatprep.subr.bf16.mxu1 %v4557_v36  ;;  %v2143_v56 = vld [vmem:[%s7219_s5 + $0x228] sm:$0xff]  ;;  %v4514_v33 = vcombine.low %v2146_v29, %v2150_v3  ;;  %v4516_v36 = vcombine.low %v2147_v18, %v2151_v41  ;;  %v4479_v29 = vcombine.high %v2108_v61, %v2112_v1  ;;  %v2100_v18 = vld [vmem:[%s7219_s5 + $0xd0] sm:$0xff] }
 0x543   : > { %v4509_v0 = vcombine.high %v2139_v42, %v2143_v56  ;;  %v2104_v41 = vld [vmem:[%s7219_s5 + $0xf0] sm:$0xff] }
 0x545   : > { %2861 = vmatpush2.bf16.msra.mxu0 %v4554_v4  ;;  %2902 = vmatpush2.bf16.msra.mxu1 %v4556_v10  ;;  %v2133_v4 = vld [vmem:[%s7219_s5 + $0x1d8] sm:$0xff] }
 0x546   : > { %2862 = vmatprep.subr.bf16.mxu0 %v4547_v45  ;;  %2903 = vmatprep.subr.bf16.mxu1 %v4549_v7  ;;  %v2137_v10 = vld [vmem:[%s7219_s5 + $0x1f8] sm:$0xff]  ;;  %v4506_v45 = vcombine.low %v2138_v30, %v2142_v11  ;;  %v4508_v7 = vcombine.low %v2139_v42, %v2143_v56  ;;  %v2092_v11 = vld [vmem:[%s7219_s5 + $0x90] sm:$0xff] }
 0x547   : > { %v4505_v12 = vcombine.high %v2133_v4, %v2137_v10  ;;  %v4504_v6 = vcombine.low %v2133_v4, %v2137_v10  ;;  %v2096_v42 = vld [vmem:[%s7219_s5 + $0xb0] sm:$0xff]  ;;  %v2093_v56 = vld [vmem:[%s7219_s5 + $0x98] sm:$0xff] }
 0x548   : > { %v2088_v4 = vld [vmem:[%s7219_s5 + $0x70] sm:$0xff]  ;;  %v2085_v10 = vld [vmem:[%s7219_s5 + $0x58] sm:$0xff] }
 0x549   : > { %2863 = vmatpush2.bf16.msra.mxu0 %v4546_v52  ;;  %2904 = vmatpush2.bf16.msra.mxu1 %v4548_v28  ;;  %v6298_v52 = vpack.c.bf16 %v5004_v54, %v5004_v54  ;;  %v2125_v28 = vld [vmem:[%s7219_s5 + $0x198] sm:$0xff]  ;;  %v2116_v54 = vld [vmem:[%s7219_s5 + $0x150] sm:$0xff] }
 0x54a   : > { %2864 = vmatprep.subr.bf16.mxu0 %v4539_v40  ;;  %2905 = vmatprep.subr.bf16.mxu1 %v4541_v19  ;;  %v2129_v40 = vld [vmem:[%s7219_s5 + $0x1b8] sm:$0xff]  ;;  %v4502_v19 = vcombine.low %v2132_v20, %v2136_v21  ;;  %v4487_v51 = vcombine.high %v2116_v54, %v2120_v35  ;;  %v2084_v21 = vld [vmem:[%s7219_s5 + $0x50] sm:$0xff] }
 0x54b   : > { %v4497_v13 = vcombine.high %v2125_v28, %v2129_v40 }
 0x54d   : > { %2865 = vmatpush2.bf16.msra.mxu0 %v4538_v31  ;;  %2906 = vmatpush2.bf16.msra.mxu1 %v4540_v43  ;;  %v2117_v31 = vld [vmem:[%s7219_s5 + $0x158] sm:$0xff] }
 0x54e   : > { %2866 = vmatprep.subr.bf16.mxu0 %v4531_v44  ;;  %2907 = vmatprep.subr.bf16.mxu1 %v4533_v60  ;;  %v2121_v43 = vld [vmem:[%s7219_s5 + $0x178] sm:$0xff]  ;;  %v4494_v44 = vcombine.low %v2124_v39, %v2128_v53  ;;  %v4496_v60 = vcombine.low %v2125_v28, %v2129_v40  ;;  %v2076_v53 = vld [vmem:[%s7219_s5 + $0x10] sm:$0xff] }
 0x54f   : > { %v4489_v58 = vcombine.high %v2117_v31, %v2121_v43  ;;  %v2080_v28 = vld [vmem:[%s7219_s5 + $0x30] sm:$0xff]  ;;  %v2077_v40 = vld [vmem:[%s7219_s5 + $0x18] sm:$0xff] }
 0x551   : > { %2867 = vmatpush2.bf16.msra.mxu0 %v4530_v2  ;;  %2908 = vmatpush2.bf16.msra.mxu1 %v4532_v25  ;;  %v2109_v2 = vld [vmem:[%s7219_s5 + $0x118] sm:$0xff] }
 0x552   : > { %2868 = vmatprep.subr.bf16.mxu0 %v4523_v27  ;;  %2909 = vmatprep.subr.bf16.mxu1 %v4525_v49  ;;  %v2113_v25 = vld [vmem:[%s7219_s5 + $0x138] sm:$0xff]  ;;  %v4486_v27 = vcombine.low %v2116_v54, %v2120_v35  ;;  %v4488_v49 = vcombine.low %v2117_v31, %v2121_v43  ;;  %v2196_v35 = vld [vmem:[%s7219_s5 + $0x3d0] sm:$0xff] }
 0x553   : > { %v4481_v3 = vcombine.high %v2109_v2, %v2113_v25  ;;  %v2200_v31 = vld [vmem:[%s7219_s5 + $0x3f0] sm:$0xff]  ;;  %v2197_v43 = vld [vmem:[%s7219_s5 + $0x3d8] sm:$0xff] }
 0x555   : > { %2869 = vmatpush2.bf16.msra.mxu0 %v4522_v14  ;;  %2910 = vmatpush2.bf16.msra.mxu1 %v4524_v23  ;;  %v2105_v14 = vld [vmem:[%s7219_s5 + $0xf8] sm:$0xff]  ;;  %v4478_v23 = vcombine.low %v2108_v61, %v2112_v1  ;;  %v2188_v1 = vld [vmem:[%s7219_s5 + $0x390] sm:$0xff] }
 0x556   : > { %2870 = vmatprep.subr.bf16.mxu0 %v4515_v5  ;;  %2911 = vmatprep.subr.bf16.mxu1 %v4517_v8  ;;  %v4480_v5 = vcombine.low %v2109_v2, %v2113_v25  ;;  %v4471_v8 = vcombine.high %v2100_v18, %v2104_v41  ;;  %v2192_v2 = vld [vmem:[%s7219_s5 + $0x3b0] sm:$0xff]  ;;  %v2189_v25 = vld [vmem:[%s7219_s5 + $0x398] sm:$0xff] }
 0x559   : > { %2871 = vmatpush2.bf16.msra.mxu0 %v4514_v33  ;;  %2912 = vmatpush2.bf16.msra.mxu1 %v4516_v36  ;;  %v2097_v33 = vld [vmem:[%s7219_s5 + $0xb8] sm:$0xff]  ;;  %v4470_v36 = vcombine.low %v2100_v18, %v2104_v41  ;;  %v2180_v41 = vld [vmem:[%s7219_s5 + $0x350] sm:$0xff] }
 0x55a   : > { %2872 = vmatprep.subr.bf16.mxu0 %v4507_v37  ;;  %2913 = vmatprep.subr.bf16.mxu1 %v4509_v0  ;;  %v4463_v0 = vcombine.high %v2092_v11, %v2096_v42  ;;  %v4465_v20 = vcombine.high %v2093_v56, %v2097_v33 }
 0x55d   : > { %2873 = vmatpush2.bf16.msra.mxu0 %v4506_v45  ;;  %2914 = vmatpush2.bf16.msra.mxu1 %v4508_v7  ;;  %v2089_v45 = vld [vmem:[%s7219_s5 + $0x78] sm:$0xff]  ;;  %v4462_v7 = vcombine.low %v2092_v11, %v2096_v42  ;;  %v2172_v42 = vld [vmem:[%s7219_s5 + $0x310] sm:$0xff] }
 0x55e   : > { %2924 = vmatprep.subr.bf16.mxu0 %v4503_v47  ;;  %2965 = vmatprep.subr.bf16.mxu1 %v4505_v12  ;;  %v4464_v47 = vcombine.low %v2093_v56, %v2097_v33  ;;  %v4455_v12 = vcombine.high %v2084_v21, %v2088_v4  ;;  %v4457_v39 = vcombine.high %v2085_v10, %v2089_v45  ;;  %v2176_v56 = vld [vmem:[%s7219_s5 + $0x330] sm:$0xff]  ;;  %v2173_v33 = vld [vmem:[%s7219_s5 + $0x318] sm:$0xff] }
 0x560   : > { %2875 = vmatmul.mubr.bf16.vlgmr.msra.gmra.mxu0 %v6298_v52  ;;  %2916 = vmatmul.mubr.bf16.vlgmr.msra.gmra.mxu1 %v6298_v52 }
 0x561   : > { %2925 = vmatpush1.bf16.msra.mxu0 %v4502_v19  ;;  %2966 = vmatpush1.bf16.msra.mxu1 %v4504_v6  ;;  %v2081_v19 = vld [vmem:[%s7219_s5 + $0x38] sm:$0xff]  ;;  %v4454_v6 = vcombine.low %v2084_v21, %v2088_v4  ;;  %v2164_v4 = vld [vmem:[%s7219_s5 + $0x2d0] sm:$0xff] }
 0x562   : > { %2926 = vmatprep.subr.bf16.mxu0 %v4495_v9  ;;  %2967 = vmatprep.subr.bf16.mxu1 %v4497_v13  ;;  %v4456_v9 = vcombine.low %v2085_v10, %v2089_v45  ;;  %v4447_v13 = vcombine.high %v2076_v53, %v2080_v28  ;;  %v4449_v54 = vcombine.high %v2077_v40, %v2081_v19  ;;  %v2168_v10 = vld [vmem:[%s7219_s5 + $0x2f0] sm:$0xff]  ;;  %v2165_v45 = vld [vmem:[%s7219_s5 + $0x2d8] sm:$0xff] }
 0x563   : > { %2956 = vmatprep.mubr.bf16.mxu0 %v6118_v62  ;;  %2997 = vmatprep.mubr.bf16.mxu1 %v6118_v62  ;;  %v2101_v62 = vld [vmem:[%s7219_s5 + $0xd8] sm:$0xff] }
 0x564   : > { %v4473_v30 = vcombine.high %v2101_v62, %v2105_v14  ;;  %v4472_v37 = vcombine.low %v2101_v62, %v2105_v14  ;;  %v2184_v62 = vld [vmem:[%s7219_s5 + $0x370] sm:$0xff]  ;;  %v2181_v14 = vld [vmem:[%s7219_s5 + $0x358] sm:$0xff] }
 0x565   : > { %2927 = vmatpush1.bf16.msra.mxu0 %v4494_v44  ;;  %2968 = vmatpush1.bf16.msra.mxu1 %v4496_v60  ;;  %v2201_v44 = vld [vmem:[%s7219_s5 + $0x3f8] sm:$0xff]  ;;  %v4446_v60 = vcombine.low %v2076_v53, %v2080_v28  ;;  %v2156_v28 = vld [vmem:[%s7219_s5 + $0x290] sm:$0xff] }
 0x566   : > { %2928 = vmatprep.subr.bf16.mxu0 %v4487_v51  ;;  %2969 = vmatprep.subr.bf16.mxu1 %v4489_v58  ;;  %v4448_v51 = vcombine.low %v2077_v40, %v2081_v19  ;;  %v4567_v58 = vcombine.high %v2196_v35, %v2200_v31  ;;  %v4569_v61 = vcombine.high %v2197_v43, %v2201_v44  ;;  %v2160_v40 = vld [vmem:[%s7219_s5 + $0x2b0] sm:$0xff]  ;;  %v2157_v19 = vld [vmem:[%s7219_s5 + $0x298] sm:$0xff] }
 0x569   : > { %2929 = vmatpush1.bf16.msra.mxu0 %v4486_v27  ;;  %2970 = vmatpush1.bf16.msra.mxu1 %v4488_v49  ;;  %v2193_v27 = vld [vmem:[%s7219_s5 + $0x3b8] sm:$0xff]  ;;  %v4566_v49 = vcombine.low %v2196_v35, %v2200_v31  ;;  %v2148_v31 = vld [vmem:[%s7219_s5 + $0x250] sm:$0xff] }
 0x56a   : > { %2930 = vmatprep.subr.bf16.mxu0 %v4479_v29  ;;  %2971 = vmatprep.subr.bf16.mxu1 %v4481_v3  ;;  %v4568_v29 = vcombine.low %v2197_v43, %v2201_v44  ;;  %v4559_v3 = vcombine.high %v2188_v1, %v2192_v2  ;;  %v4561_v18 = vcombine.high %v2189_v25, %v2193_v27  ;;  %v2152_v43 = vld [vmem:[%s7219_s5 + $0x270] sm:$0xff]  ;;  %v2149_v44 = vld [vmem:[%s7219_s5 + $0x258] sm:$0xff] }
 0x56d   : > { %2931 = vmatpush1.bf16.msra.mxu0 %v4478_v23  ;;  %2972 = vmatpush1.bf16.msra.mxu1 %v4480_v5  ;;  %v2185_v23 = vld [vmem:[%s7219_s5 + $0x378] sm:$0xff]  ;;  %v4558_v5 = vcombine.low %v2188_v1, %v2192_v2  ;;  %v2140_v2 = vld [vmem:[%s7219_s5 + $0x210] sm:$0xff] }
 0x56e   : > { %2932 = vmatprep.subr.bf16.mxu0 %v4471_v8  ;;  %2973 = vmatprep.subr.bf16.mxu1 %v4473_v30  ;;  %v4560_v8 = vcombine.low %v2189_v25, %v2193_v27  ;;  %v4551_v30 = vcombine.high %v2180_v41, %v2184_v62  ;;  %v4553_v11 = vcombine.high %v2181_v14, %v2185_v23  ;;  %v2144_v25 = vld [vmem:[%s7219_s5 + $0x230] sm:$0xff]  ;;  %v2141_v27 = vld [vmem:[%s7219_s5 + $0x218] sm:$0xff] }
 0x571   : > { %2933 = vmatpush1.bf16.msra.mxu0 %v4470_v36  ;;  %2974 = vmatpush1.bf16.msra.mxu1 %v4472_v37  ;;  %v2177_v36 = vld [vmem:[%s7219_s5 + $0x338] sm:$0xff]  ;;  %v4550_v37 = vcombine.low %v2180_v41, %v2184_v62  ;;  %v3120_v62 = vld [vmem:[%s7220_s6 + $0x1c0] sm:$0xff] }
 0x572   : > { %2934 = vmatprep.subr.bf16.mxu0 %v4463_v0  ;;  %2975 = vmatprep.subr.bf16.mxu1 %v4465_v20  ;;  %v4552_v0 = vcombine.low %v2181_v14, %v2185_v23  ;;  %v4543_v20 = vcombine.high %v2172_v42, %v2176_v56  ;;  %v4545_v21 = vcombine.high %v2173_v33, %v2177_v36  ;;  %v3124_v14 = vld [vmem:[%s7220_s6 + $0x1e0] sm:$0xff]  ;;  %v3121_v23 = vld [vmem:[%s7220_s6 + $0x1c8] sm:$0xff] }
 0x575   : > { %2935 = vmatpush1.bf16.msra.mxu0 %v4462_v7  ;;  %2976 = vmatpush1.bf16.msra.mxu1 %v4464_v47  ;;  %v2169_v7 = vld [vmem:[%s7219_s5 + $0x2f8] sm:$0xff]  ;;  %v4542_v47 = vcombine.low %v2172_v42, %v2176_v56  ;;  %v3112_v56 = vld [vmem:[%s7220_s6 + $0x180] sm:$0xff] }
 0x576   : > { %2936 = vmatprep.subr.bf16.mxu0 %v4455_v12  ;;  %2977 = vmatprep.subr.bf16.mxu1 %v4457_v39  ;;  %v4544_v12 = vcombine.low %v2173_v33, %v2177_v36  ;;  %v4535_v39 = vcombine.high %v2164_v4, %v2168_v10  ;;  %v4537_v53 = vcombine.high %v2165_v45, %v2169_v7  ;;  %v3116_v33 = vld [vmem:[%s7220_s6 + $0x1a0] sm:$0xff]  ;;  %v3113_v36 = vld [vmem:[%s7220_s6 + $0x188] sm:$0xff] }
 0x579   : > { %2937 = vmatpush1.bf16.msra.mxu0 %v4454_v6  ;;  %2978 = vmatpush1.bf16.msra.mxu1 %v4456_v9  ;;  %v2161_v6 = vld [vmem:[%s7219_s5 + $0x2b8] sm:$0xff]  ;;  %v4534_v9 = vcombine.low %v2164_v4, %v2168_v10  ;;  %v3104_v10 = vld [vmem:[%s7220_s6 + $0x140] sm:$0xff] }
 0x57a   : > { %2938 = vmatprep.subr.bf16.mxu0 %v4447_v13  ;;  %2979 = vmatprep.subr.bf16.mxu1 %v4449_v54  ;;  %v4536_v13 = vcombine.low %v2165_v45, %v2169_v7  ;;  %v4527_v54 = vcombine.high %v2156_v28, %v2160_v40  ;;  %v4529_v35 = vcombine.high %v2157_v19, %v2161_v6  ;;  %v3108_v45 = vld [vmem:[%s7220_s6 + $0x160] sm:$0xff] }
 0x57b   : > { %v6510_v7 = vpack.c.bf16 %v4984_v16, %v4984_v16 }
 0x57d   : > { %2939 = vmatpush1.bf16.msra.mxu0 %v4446_v60  ;;  %2980 = vmatpush1.bf16.msra.mxu1 %v4448_v51  ;;  %v2153_v60 = vld [vmem:[%s7219_s5 + $0x278] sm:$0xff]  ;;  %v4526_v51 = vcombine.low %v2156_v28, %v2160_v40  ;;  %v4617_v28 = vcombine.high %v3104_v10, %v3108_v45  ;;  %v3096_v40 = vld [vmem:[%s7220_s6 + $0x100] sm:$0xff] }
 0x57e   : > { %2940 = vmatprep.subr.bf16.mxu0 %v4567_v58  ;;  %2981 = vmatprep.subr.bf16.mxu1 %v4569_v61  ;;  %v4528_v58 = vcombine.low %v2157_v19, %v2161_v6  ;;  %v4519_v61 = vcombine.high %v2148_v31, %v2152_v43  ;;  %v4521_v1 = vcombine.high %v2149_v44, %v2153_v60  ;;  %v3100_v19 = vld [vmem:[%s7220_s6 + $0x120] sm:$0xff]  ;;  %v3101_v6 = vld [vmem:[%s7220_s6 + $0x128] sm:$0xff] }
 0x581   : > { %2941 = vmatpush2.bf16.msra.mxu0 %v4566_v49  ;;  %2982 = vmatpush2.bf16.msra.mxu1 %v4568_v29  ;;  %v2145_v49 = vld [vmem:[%s7219_s5 + $0x238] sm:$0xff]  ;;  %v4518_v29 = vcombine.low %v2148_v31, %v2152_v43  ;;  %v3088_v31 = vld [vmem:[%s7220_s6 + $0xc0] sm:$0xff] }
 0x582   : > { %2942 = vmatprep.subr.bf16.mxu0 %v4559_v3  ;;  %2983 = vmatprep.subr.bf16.mxu1 %v4561_v18  ;;  %v4520_v3 = vcombine.low %v2149_v44, %v2153_v60  ;;  %v4511_v18 = vcombine.high %v2140_v2, %v2144_v25  ;;  %v4513_v41 = vcombine.high %v2141_v27, %v2145_v49  ;;  %v3092_v43 = vld [vmem:[%s7220_s6 + $0xe0] sm:$0xff]  ;;  %v3089_v44 = vld [vmem:[%s7220_s6 + $0xc8] sm:$0xff] }
 0x583   : > { %v3093_v60 = vld [vmem:[%s7220_s6 + $0xe8] sm:$0xff] }
 0x585   : > { %2943 = vmatpush2.bf16.msra.mxu0 %v4558_v5  ;;  %2984 = vmatpush2.bf16.msra.mxu1 %v4560_v8  ;;  %v3125_v5 = vld [vmem:[%s7220_s6 + $0x1e8] sm:$0xff]  ;;  %v4510_v8 = vcombine.low %v2140_v2, %v2144_v25  ;;  %v3080_v2 = vld [vmem:[%s7220_s6 + $0x80] sm:$0xff] }
 0x586   : > { %2944 = vmatprep.subr.bf16.mxu0 %v4551_v30  ;;  %2985 = vmatprep.subr.bf16.mxu1 %v4553_v11  ;;  %v4512_v30 = vcombine.low %v2141_v27, %v2145_v49  ;;  %v4633_v11 = vcombine.high %v3120_v62, %v3124_v14  ;;  %v4635_v42 = vcombine.high %v3121_v23, %v3125_v5  ;;  %v3084_v25 = vld [vmem:[%s7220_s6 + $0xa0] sm:$0xff]  ;;  %v3081_v27 = vld [vmem:[%s7220_s6 + $0x88] sm:$0xff] }
 0x587   : > { %v3085_v49 = vld [vmem:[%s7220_s6 + $0xa8] sm:$0xff] }
 0x589   : > { %2945 = vmatpush2.bf16.msra.mxu0 %v4550_v37  ;;  %2986 = vmatpush2.bf16.msra.mxu1 %v4552_v0  ;;  %v3117_v37 = vld [vmem:[%s7220_s6 + $0x1a8] sm:$0xff]  ;;  %v4632_v0 = vcombine.low %v3120_v62, %v3124_v14  ;;  %v3072_v62 = vld [vmem:[%s7220_s6 + $0x40] sm:$0xff] }
 0x58a   : > { %2946 = vmatprep.subr.bf16.mxu0 %v4543_v20  ;;  %2987 = vmatprep.subr.bf16.mxu1 %v4545_v21  ;;  %v4634_v20 = vcombine.low %v3121_v23, %v3125_v5  ;;  %v4625_v21 = vcombine.high %v3112_v56, %v3116_v33  ;;  %v4627_v4 = vcombine.high %v3113_v36, %v3117_v37  ;;  %v3076_v14 = vld [vmem:[%s7220_s6 + $0x60] sm:$0xff]  ;;  %v3073_v23 = vld [vmem:[%s7220_s6 + $0x48] sm:$0xff] }
 0x58b   : > { %v3077_v5 = vld [vmem:[%s7220_s6 + $0x68] sm:$0xff] }
 0x58d   : > { %2947 = vmatpush2.bf16.msra.mxu0 %v4542_v47  ;;  %2988 = vmatpush2.bf16.msra.mxu1 %v4544_v12  ;;  %v3105_v47 = vld [vmem:[%s7220_s6 + $0x148] sm:$0xff] }
 0x58e   : > { %2948 = vmatprep.subr.bf16.mxu0 %v4535_v39  ;;  %2989 = vmatprep.subr.bf16.mxu1 %v4537_v53  ;;  %v3109_v12 = vld [vmem:[%s7220_s6 + $0x168] sm:$0xff]  ;;  %v4624_v39 = vcombine.low %v3112_v56, %v3116_v33  ;;  %v4626_v53 = vcombine.low %v3113_v36, %v3117_v37  ;;  %v3064_v56 = vld [vmem:[%s7220_s6] sm:$0xff] }
 0x58f   : > { %v4619_v16 = vcombine.high %v3105_v47, %v3109_v12  ;;  %v3068_v33 = vld [vmem:[%s7220_s6 + $0x20] sm:$0xff]  ;;  %v3065_v36 = vld [vmem:[%s7220_s6 + $0x8] sm:$0xff] }
 0x590   : > { %v3069_v37 = vld [vmem:[%s7220_s6 + $0x28] sm:$0xff] }
 0x591   : > { %2949 = vmatpush2.bf16.msra.mxu0 %v4534_v9  ;;  %2990 = vmatpush2.bf16.msra.mxu1 %v4536_v13  ;;  %v4616_v9 = vcombine.low %v3104_v10, %v3108_v45  ;;  %v4618_v13 = vcombine.low %v3105_v47, %v3109_v12  ;;  %v3184_v10 = vld [vmem:[%s7220_s6 + $0x3c0] sm:$0xff]  ;;  %v3185_v47 = vld [vmem:[%s7220_s6 + $0x3c8] sm:$0xff] }
 0x592   : > { %2950 = vmatprep.subr.bf16.mxu0 %v4527_v54  ;;  %2991 = vmatprep.subr.bf16.mxu1 %v4529_v35  ;;  %v4609_v54 = vcombine.high %v3096_v40, %v3100_v19  ;;  %v3188_v45 = vld [vmem:[%s7220_s6 + $0x3e0] sm:$0xff]  ;;  %v3189_v12 = vld [vmem:[%s7220_s6 + $0x3e8] sm:$0xff] }
 0x595   : > { %2951 = vmatpush2.bf16.msra.mxu0 %v4526_v51  ;;  %2992 = vmatpush2.bf16.msra.mxu1 %v4528_v58  ;;  %v4608_v51 = vcombine.low %v3096_v40, %v3100_v19  ;;  %v3176_v40 = vld [vmem:[%s7220_s6 + $0x380] sm:$0xff] }
 0x596   : > { %2952 = vmatprep.subr.bf16.mxu0 %v4519_v61  ;;  %2993 = vmatprep.subr.bf16.mxu1 %v4521_v1  ;;  %v4601_v61 = vcombine.high %v3088_v31, %v3092_v43  ;;  %v4603_v1 = vcombine.high %v3089_v44, %v3093_v60  ;;  %v3180_v19 = vld [vmem:[%s7220_s6 + $0x3a0] sm:$0xff] }
 0x599   : > { %2953 = vmatpush2.bf16.msra.mxu0 %v4518_v29  ;;  %2994 = vmatpush2.bf16.msra.mxu1 %v4520_v3  ;;  %v4600_v29 = vcombine.low %v3088_v31, %v3092_v43  ;;  %v4602_v3 = vcombine.low %v3089_v44, %v3093_v60  ;;  %v3168_v31 = vld [vmem:[%s7220_s6 + $0x340] sm:$0xff]  ;;  %v3169_v44 = vld [vmem:[%s7220_s6 + $0x348] sm:$0xff] }
 0x59a   : > { %2954 = vmatprep.subr.bf16.mxu0 %v4511_v18  ;;  %2995 = vmatprep.subr.bf16.mxu1 %v4513_v41  ;;  %v4593_v18 = vcombine.high %v3080_v2, %v3084_v25  ;;  %v4595_v41 = vcombine.high %v3081_v27, %v3085_v49  ;;  %v3172_v43 = vld [vmem:[%s7220_s6 + $0x360] sm:$0xff]  ;;  %v3173_v60 = vld [vmem:[%s7220_s6 + $0x368] sm:$0xff] }
 0x59d   : > { %2955 = vmatpush2.bf16.msra.mxu0 %v4510_v8  ;;  %2996 = vmatpush2.bf16.msra.mxu1 %v4512_v30  ;;  %v4592_v8 = vcombine.low %v3080_v2, %v3084_v25  ;;  %v4594_v30 = vcombine.low %v3081_v27, %v3085_v49  ;;  %v3160_v2 = vld [vmem:[%s7220_s6 + $0x300] sm:$0xff]  ;;  %v3161_v27 = vld [vmem:[%s7220_s6 + $0x308] sm:$0xff] }
 0x59e   : > { %3832 = vmatprep.subr.bf16.mxu0 %v4633_v11  ;;  %3873 = vmatprep.subr.bf16.mxu1 %v4635_v42  ;;  %v4585_v11 = vcombine.high %v3072_v62, %v3076_v14  ;;  %v4587_v42 = vcombine.high %v3073_v23, %v3077_v5  ;;  %v3164_v25 = vld [vmem:[%s7220_s6 + $0x320] sm:$0xff]  ;;  %v3165_v49 = vld [vmem:[%s7220_s6 + $0x328] sm:$0xff] }
 0x5a0   : > { %2957 = vmatmul.mubr.bf16.vlgmr.msra.gmra.mxu0 %v6298_v52  ;;  %2998 = vmatmul.mubr.bf16.vlgmr.msra.gmra.mxu1 %v6298_v52  ;;  %v3097_v52 = vld [vmem:[%s7220_s6 + $0x108] sm:$0xff] }
 0x5a1   : > { %3833 = vmatpush1.bf16.msra.mxu0 %v4632_v0  ;;  %3874 = vmatpush1.bf16.msra.mxu1 %v4634_v20  ;;  %v4611_v35 = vcombine.high %v3097_v52, %v3101_v6  ;;  %v4610_v58 = vcombine.low %v3097_v52, %v3101_v6  ;;  %v4584_v0 = vcombine.low %v3072_v62, %v3076_v14  ;;  %v3177_v52 = vld [vmem:[%s7220_s6 + $0x388] sm:$0xff]  ;;  %v3152_v62 = vld [vmem:[%s7220_s6 + $0x2c0] sm:$0xff] }
 0x5a2   : > { %3834 = vmatprep.subr.bf16.mxu0 %v4625_v21  ;;  %3875 = vmatprep.subr.bf16.mxu1 %v4627_v4  ;;  %v4586_v20 = vcombine.low %v3073_v23, %v3077_v5  ;;  %v4577_v21 = vcombine.high %v3064_v56, %v3068_v33  ;;  %v4579_v4 = vcombine.high %v3065_v36, %v3069_v37  ;;  %v3181_v6 = vld [vmem:[%s7220_s6 + $0x3a8] sm:$0xff]  ;;  %v3156_v14 = vld [vmem:[%s7220_s6 + $0x2e0] sm:$0xff] }
 0x5a3   : > { %3864 = vmatprep.mubr.bf16.mxu0 %v6510_v7  ;;  %3905 = vmatprep.mubr.bf16.mxu1 %v6510_v7  ;;  %v3153_v23 = vld [vmem:[%s7220_s6 + $0x2c8] sm:$0xff] }
 0x5a4   : > { %v3157_v5 = vld [vmem:[%s7220_s6 + $0x2e8] sm:$0xff] }
 0x5a5   : > { %3835 = vmatpush1.bf16.msra.mxu0 %v4624_v39  ;;  %3876 = vmatpush1.bf16.msra.mxu1 %v4626_v53  ;;  %v4576_v39 = vcombine.low %v3064_v56, %v3068_v33  ;;  %v4578_v53 = vcombine.low %v3065_v36, %v3069_v37  ;;  %v3144_v56 = vld [vmem:[%s7220_s6 + $0x280] sm:$0xff]  ;;  %v3145_v36 = vld [vmem:[%s7220_s6 + $0x288] sm:$0xff] }
 0x5a6   : > { %3836 = vmatprep.subr.bf16.mxu0 %v4617_v28  ;;  %3877 = vmatprep.subr.bf16.mxu1 %v4619_v16  ;;  %v4697_v28 = vcombine.high %v3184_v10, %v3188_v45  ;;  %v4699_v16 = vcombine.high %v3185_v47, %v3189_v12  ;;  %v3148_v33 = vld [vmem:[%s7220_s6 + $0x2a0] sm:$0xff]  ;;  %v3149_v37 = vld [vmem:[%s7220_s6 + $0x2a8] sm:$0xff] }
 0x5a9   : > { %3837 = vmatpush1.bf16.msra.mxu0 %v4616_v9  ;;  %3878 = vmatpush1.bf16.msra.mxu1 %v4618_v13  ;;  %v4696_v9 = vcombine.low %v3184_v10, %v3188_v45  ;;  %v4698_v13 = vcombine.low %v3185_v47, %v3189_v12  ;;  %v3136_v10 = vld [vmem:[%s7220_s6 + $0x240] sm:$0xff]  ;;  %v3137_v47 = vld [vmem:[%s7220_s6 + $0x248] sm:$0xff] }
 0x5aa   : > { %3838 = vmatprep.subr.bf16.mxu0 %v4609_v54  ;;  %3879 = vmatprep.subr.bf16.mxu1 %v4611_v35  ;;  %v4689_v54 = vcombine.high %v3176_v40, %v3180_v19  ;;  %v4691_v35 = vcombine.high %v3177_v52, %v3181_v6  ;;  %v3140_v45 = vld [vmem:[%s7220_s6 + $0x260] sm:$0xff]  ;;  %v3141_v12 = vld [vmem:[%s7220_s6 + $0x268] sm:$0xff] }
 0x5ad   : > { %3839 = vmatpush1.bf16.msra.mxu0 %v4608_v51  ;;  %3880 = vmatpush1.bf16.msra.mxu1 %v4610_v58  ;;  %v4688_v51 = vcombine.low %v3176_v40, %v3180_v19  ;;  %v4690_v58 = vcombine.low %v3177_v52, %v3181_v6  ;;  %v3128_v40 = vld [vmem:[%s7220_s6 + $0x200] sm:$0xff]  ;;  %v3129_v52 = vld [vmem:[%s7220_s6 + $0x208] sm:$0xff] }
 0x5ae   : > { %3840 = vmatprep.subr.bf16.mxu0 %v4601_v61  ;;  %3881 = vmatprep.subr.bf16.mxu1 %v4603_v1  ;;  %v4681_v61 = vcombine.high %v3168_v31, %v3172_v43  ;;  %v4683_v1 = vcombine.high %v3169_v44, %v3173_v60  ;;  %v3132_v19 = vld [vmem:[%s7220_s6 + $0x220] sm:$0xff]  ;;  %v3133_v6 = vld [vmem:[%s7220_s6 + $0x228] sm:$0xff] }
 0x5b1   : > { %3841 = vmatpush1.bf16.msra.mxu0 %v4600_v29  ;;  %3882 = vmatpush1.bf16.msra.mxu1 %v4602_v3  ;;  %v4680_v29 = vcombine.low %v3168_v31, %v3172_v43  ;;  %v4682_v3 = vcombine.low %v3169_v44, %v3173_v60  ;;  %v3122_v31 = vld [vmem:[%s7220_s6 + $0x1d0] sm:$0xff]  ;;  %v3123_v44 = vld [vmem:[%s7220_s6 + $0x1d8] sm:$0xff] }
 0x5b2   : > { %3842 = vmatprep.subr.bf16.mxu0 %v4593_v18  ;;  %3883 = vmatprep.subr.bf16.mxu1 %v4595_v41  ;;  %v4673_v18 = vcombine.high %v3160_v2, %v3164_v25  ;;  %v4675_v41 = vcombine.high %v3161_v27, %v3165_v49  ;;  %v3126_v43 = vld [vmem:[%s7220_s6 + $0x1f0] sm:$0xff]  ;;  %v3127_v60 = vld [vmem:[%s7220_s6 + $0x1f8] sm:$0xff] }
 0x5b5   : > { %3843 = vmatpush1.bf16.msra.mxu0 %v4592_v8  ;;  %3884 = vmatpush1.bf16.msra.mxu1 %v4594_v30  ;;  %v4672_v8 = vcombine.low %v3160_v2, %v3164_v25  ;;  %v4674_v30 = vcombine.low %v3161_v27, %v3165_v49  ;;  %v3114_v2 = vld [vmem:[%s7220_s6 + $0x190] sm:$0xff]  ;;  %v6698_v27 = vpack.c.bf16 %v4988_v34, %v4988_v34  ;;  %v3115_v49 = vld [vmem:[%s7220_s6 + $0x198] sm:$0xff] }
 0x5b6   : > { %3844 = vmatprep.subr.bf16.mxu0 %v4585_v11  ;;  %3885 = vmatprep.subr.bf16.mxu1 %v4587_v42  ;;  %v4665_v11 = vcombine.high %v3152_v62, %v3156_v14  ;;  %v4667_v42 = vcombine.high %v3153_v23, %v3157_v5  ;;  %v3118_v25 = vld [vmem:[%s7220_s6 + $0x1b0] sm:$0xff] }
 0x5b7   : > { %v3106_v34 = vld [vmem:[%s7220_s6 + $0x150] sm:$0xff] }
 0x5b9   : > { %3845 = vmatpush1.bf16.msra.mxu0 %v4584_v0  ;;  %3886 = vmatpush1.bf16.msra.mxu1 %v4586_v20  ;;  %v4664_v0 = vcombine.low %v3152_v62, %v3156_v14  ;;  %v4666_v20 = vcombine.low %v3153_v23, %v3157_v5  ;;  %v3110_v14 = vld [vmem:[%s7220_s6 + $0x170] sm:$0xff]  ;;  %v3107_v23 = vld [vmem:[%s7220_s6 + $0x158] sm:$0xff] }
 0x5ba   : > { %3846 = vmatprep.subr.bf16.mxu0 %v4577_v21  ;;  %3887 = vmatprep.subr.bf16.mxu1 %v4579_v4  ;;  %v4657_v21 = vcombine.high %v3144_v56, %v3148_v33  ;;  %v4659_v4 = vcombine.high %v3145_v36, %v3149_v37  ;;  %v3111_v5 = vld [vmem:[%s7220_s6 + $0x178] sm:$0xff] }
 0x5bd   : > { %3847 = vmatpush1.bf16.msra.mxu0 %v4576_v39  ;;  %3888 = vmatpush1.bf16.msra.mxu1 %v4578_v53  ;;  %v4656_v39 = vcombine.low %v3144_v56, %v3148_v33  ;;  %v4658_v53 = vcombine.low %v3145_v36, %v3149_v37  ;;  %v3098_v56 = vld [vmem:[%s7220_s6 + $0x110] sm:$0xff]  ;;  %v3099_v36 = vld [vmem:[%s7220_s6 + $0x118] sm:$0xff] }
 0x5be   : > { %3848 = vmatprep.subr.bf16.mxu0 %v4697_v28  ;;  %3889 = vmatprep.subr.bf16.mxu1 %v4699_v16  ;;  %v4649_v28 = vcombine.high %v3136_v10, %v3140_v45  ;;  %v4651_v16 = vcombine.high %v3137_v47, %v3141_v12  ;;  %v3102_v33 = vld [vmem:[%s7220_s6 + $0x130] sm:$0xff]  ;;  %v3103_v37 = vld [vmem:[%s7220_s6 + $0x138] sm:$0xff] }
 0x5c1   : > { %3849 = vmatpush2.bf16.msra.mxu0 %v4696_v9  ;;  %3890 = vmatpush2.bf16.msra.mxu1 %v4698_v13  ;;  %v4648_v9 = vcombine.low %v3136_v10, %v3140_v45  ;;  %v4650_v13 = vcombine.low %v3137_v47, %v3141_v12  ;;  %v3090_v10 = vld [vmem:[%s7220_s6 + $0xd0] sm:$0xff]  ;;  %v3095_v47 = vld [vmem:[%s7220_s6 + $0xf8] sm:$0xff]  ;;  %v4612_v12 = vcombine.low %v3098_v56, %v3102_v33 }
 0x5c2   : > { %3850 = vmatprep.subr.bf16.mxu0 %v4689_v54  ;;  %3891 = vmatprep.subr.bf16.mxu1 %v4691_v35  ;;  %v4641_v54 = vcombine.high %v3128_v40, %v3132_v19  ;;  %v4643_v35 = vcombine.high %v3129_v52, %v3133_v6  ;;  %v3094_v45 = vld [vmem:[%s7220_s6 + $0xf0] sm:$0xff] }
 0x5c5   : > { %3851 = vmatpush2.bf16.msra.mxu0 %v4688_v51  ;;  %3892 = vmatpush2.bf16.msra.mxu1 %v4690_v58  ;;  %v4640_v51 = vcombine.low %v3128_v40, %v3132_v19  ;;  %v4642_v58 = vcombine.low %v3129_v52, %v3133_v6  ;;  %v3086_v40 = vld [vmem:[%s7220_s6 + $0xb0] sm:$0xff]  ;;  %v3083_v19 = vld [vmem:[%s7220_s6 + $0x98] sm:$0xff]  ;;  %v4604_v6 = vcombine.low %v3090_v10, %v3094_v45 }
 0x5c6   : > { %3852 = vmatprep.subr.bf16.mxu0 %v4681_v61  ;;  %3893 = vmatprep.subr.bf16.mxu1 %v4683_v1  ;;  %v4637_v61 = vcombine.high %v3122_v31, %v3126_v43  ;;  %v4639_v1 = vcombine.high %v3123_v44, %v3127_v60  ;;  %v3087_v52 = vld [vmem:[%s7220_s6 + $0xb8] sm:$0xff] }
 0x5c9   : > { %3853 = vmatpush2.bf16.msra.mxu0 %v4680_v29  ;;  %3894 = vmatpush2.bf16.msra.mxu1 %v4682_v3  ;;  %v3119_v29 = vld [vmem:[%s7220_s6 + $0x1b8] sm:$0xff]  ;;  %v4636_v3 = vcombine.low %v3122_v31, %v3126_v43  ;;  %v3078_v31 = vld [vmem:[%s7220_s6 + $0x70] sm:$0xff] }
 0x5ca   : > { %3854 = vmatprep.subr.bf16.mxu0 %v4673_v18  ;;  %3895 = vmatprep.subr.bf16.mxu1 %v4675_v41  ;;  %v4638_v18 = vcombine.low %v3123_v44, %v3127_v60  ;;  %v4629_v41 = vcombine.high %v3114_v2, %v3118_v25  ;;  %v4631_v62 = vcombine.high %v3115_v49, %v3119_v29  ;;  %v3075_v43 = vld [vmem:[%s7220_s6 + $0x58] sm:$0xff] }
 0x5cb   : > { %v3079_v44 = vld [vmem:[%s7220_s6 + $0x78] sm:$0xff] }
 0x5cd   : > { %3855 = vmatpush2.bf16.msra.mxu0 %v4672_v8  ;;  %3896 = vmatpush2.bf16.msra.mxu1 %v4674_v30  ;;  %v4628_v8 = vcombine.low %v3114_v2, %v3118_v25  ;;  %v4630_v30 = vcombine.low %v3115_v49, %v3119_v29  ;;  %v3070_v2 = vld [vmem:[%s7220_s6 + $0x30] sm:$0xff]  ;;  %v3067_v25 = vld [vmem:[%s7220_s6 + $0x18] sm:$0xff] }
 0x5ce   : > { %3856 = vmatprep.subr.bf16.mxu0 %v4665_v11  ;;  %3897 = vmatprep.subr.bf16.mxu1 %v4667_v42  ;;  %v4621_v11 = vcombine.high %v3106_v34, %v3110_v14  ;;  %v4623_v42 = vcombine.high %v3107_v23, %v3111_v5  ;;  %v3071_v49 = vld [vmem:[%s7220_s6 + $0x38] sm:$0xff] }
 0x5d1   : > { %3857 = vmatpush2.bf16.msra.mxu0 %v4664_v0  ;;  %3898 = vmatpush2.bf16.msra.mxu1 %v4666_v20  ;;  %v4620_v0 = vcombine.low %v3106_v34, %v3110_v14  ;;  %v4622_v20 = vcombine.low %v3107_v23, %v3111_v5  ;;  %v3190_v34 = vld [vmem:[%s7220_s6 + $0x3f0] sm:$0xff]  ;;  %v3187_v14 = vld [vmem:[%s7220_s6 + $0x3d8] sm:$0xff] }
 0x5d2   : > { %3858 = vmatprep.subr.bf16.mxu0 %v4657_v21  ;;  %3899 = vmatprep.subr.bf16.mxu1 %v4659_v4  ;;  %v4613_v21 = vcombine.high %v3098_v56, %v3102_v33  ;;  %v4615_v4 = vcombine.high %v3099_v36, %v3103_v37  ;;  %v3191_v23 = vld [vmem:[%s7220_s6 + $0x3f8] sm:$0xff]  ;;  %v3182_v56 = vld [vmem:[%s7220_s6 + $0x3b0] sm:$0xff] }
 0x5d3   : > { %v3179_v33 = vld [vmem:[%s7220_s6 + $0x398] sm:$0xff] }
 0x5d5   : > { %3859 = vmatpush2.bf16.msra.mxu0 %v4656_v39  ;;  %3900 = vmatpush2.bf16.msra.mxu1 %v4658_v53  ;;  %v4614_v39 = vcombine.low %v3099_v36, %v3103_v37  ;;  %v4605_v53 = vcombine.high %v3090_v10, %v3094_v45  ;;  %v3183_v36 = vld [vmem:[%s7220_s6 + $0x3b8] sm:$0xff]  ;;  %v3174_v10 = vld [vmem:[%s7220_s6 + $0x370] sm:$0xff] }
 0x5d6   : > { %3860 = vmatprep.subr.bf16.mxu0 %v4649_v28  ;;  %3901 = vmatprep.subr.bf16.mxu1 %v4651_v16  ;;  %v3082_v16 = vld [vmem:[%s7220_s6 + $0x90] sm:$0xff]  ;;  %v3171_v45 = vld [vmem:[%s7220_s6 + $0x358] sm:$0xff] }
 0x5d7   : > { %v4596_v60 = vcombine.low %v3082_v16, %v3086_v40 }
 0x5d9   : > { %3861 = vmatpush2.bf16.msra.mxu0 %v4648_v9  ;;  %3902 = vmatpush2.bf16.msra.mxu1 %v4650_v13  ;;  %v4597_v13 = vcombine.high %v3082_v16, %v3086_v40  ;;  %v3166_v16 = vld [vmem:[%s7220_s6 + $0x330] sm:$0xff]  ;;  %v3163_v40 = vld [vmem:[%s7220_s6 + $0x318] sm:$0xff] }
 0x5da   : > { %3862 = vmatprep.subr.bf16.mxu0 %v4641_v54  ;;  %3903 = vmatprep.subr.bf16.mxu1 %v4643_v35  ;;  %v4599_v54 = vcombine.high %v3083_v19, %v3087_v52  ;;  %v3074_v35 = vld [vmem:[%s7220_s6 + $0x50] sm:$0xff] }
 0x5db   : > { %v4588_v29 = vcombine.low %v3074_v35, %v3078_v31 }
 0x5dd   : > { %3863 = vmatpush2.bf16.msra.mxu0 %v4640_v51  ;;  %3904 = vmatpush2.bf16.msra.mxu1 %v4642_v58  ;;  %v4598_v51 = vcombine.low %v3083_v19, %v3087_v52  ;;  %v4589_v58 = vcombine.high %v3074_v35, %v3078_v31  ;;  %v3167_v19 = vld [vmem:[%s7220_s6 + $0x338] sm:$0xff]  ;;  %v3158_v35 = vld [vmem:[%s7220_s6 + $0x2f0] sm:$0xff] }
 0x5de   : > { %3914 = vmatprep.subr.bf16.mxu0 %v4637_v61  ;;  %3955 = vmatprep.subr.bf16.mxu1 %v4639_v1  ;;  %v4591_v61 = vcombine.high %v3075_v43, %v3079_v44  ;;  %v3066_v1 = vld [vmem:[%s7220_s6 + $0x10] sm:$0xff]  ;;  %v3155_v31 = vld [vmem:[%s7220_s6 + $0x2d8] sm:$0xff] }
 0x5df   : > { %v4580_v5 = vcombine.low %v3066_v1, %v3070_v2 }
 0x5e0   : > { %3865 = vmatmul.mubr.bf16.vlgmr.msra.gmra.mxu0 %v6698_v27  ;;  %3906 = vmatmul.mubr.bf16.vlgmr.msra.gmra.mxu1 %v6698_v27 }
 0x5e1   : > { %3915 = vmatpush1.bf16.msra.mxu0 %v4636_v3  ;;  %3956 = vmatpush1.bf16.msra.mxu1 %v4638_v18  ;;  %v4590_v3 = vcombine.low %v3075_v43, %v3079_v44  ;;  %v4581_v18 = vcombine.high %v3066_v1, %v3070_v2  ;;  %v3159_v43 = vld [vmem:[%s7220_s6 + $0x2f8] sm:$0xff]  ;;  %v3150_v1 = vld [vmem:[%s7220_s6 + $0x2b0] sm:$0xff] }
 0x5e2   : > { %3916 = vmatprep.subr.bf16.mxu0 %v4629_v41  ;;  %3957 = vmatprep.subr.bf16.mxu1 %v4631_v62  ;;  %v4583_v41 = vcombine.high %v3067_v25, %v3071_v49  ;;  %v3186_v62 = vld [vmem:[%s7220_s6 + $0x3d0] sm:$0xff]  ;;  %v3147_v2 = vld [vmem:[%s7220_s6 + $0x298] sm:$0xff] }
 0x5e3   : > { %3946 = vmatprep.mubr.bf16.mxu0 %v6510_v7  ;;  %3987 = vmatprep.mubr.bf16.mxu1 %v6510_v7  ;;  %v3091_v7 = vld [vmem:[%s7220_s6 + $0xd8] sm:$0xff]  ;;  %v4700_v37 = vcombine.low %v3186_v62, %v3190_v34 }
 0x5e4   : > { %v4607_v28 = vcombine.high %v3091_v7, %v3095_v47  ;;  %v4606_v9 = vcombine.low %v3091_v7, %v3095_v47  ;;  %v3175_v7 = vld [vmem:[%s7220_s6 + $0x378] sm:$0xff] }
 0x5e5   : > { %3917 = vmatpush1.bf16.msra.mxu0 %v4628_v8  ;;  %3958 = vmatpush1.bf16.msra.mxu1 %v4630_v30  ;;  %v4582_v8 = vcombine.low %v3067_v25, %v3071_v49  ;;  %v4701_v30 = vcombine.high %v3186_v62, %v3190_v34  ;;  %v3151_v25 = vld [vmem:[%s7220_s6 + $0x2b8] sm:$0xff]  ;;  %v3142_v62 = vld [vmem:[%s7220_s6 + $0x270] sm:$0xff] }
 0x5e6   : > { %3918 = vmatprep.subr.bf16.mxu0 %v4621_v11  ;;  %3959 = vmatprep.subr.bf16.mxu1 %v4623_v42  ;;  %v4703_v11 = vcombine.high %v3187_v14, %v3191_v23  ;;  %v3178_v42 = vld [vmem:[%s7220_s6 + $0x390] sm:$0xff]  ;;  %v3139_v34 = vld [vmem:[%s7220_s6 + $0x258] sm:$0xff] }
 0x5e7   : > { %v4692_v47 = vcombine.low %v3178_v42, %v3182_v56 }
 0x5e9   : > { %3919 = vmatpush1.bf16.msra.mxu0 %v4620_v0  ;;  %3960 = vmatpush1.bf16.msra.mxu1 %v4622_v20  ;;  %v4702_v0 = vcombine.low %v3187_v14, %v3191_v23  ;;  %v4693_v20 = vcombine.high %v3178_v42, %v3182_v56  ;;  %v3143_v14 = vld [vmem:[%s7220_s6 + $0x278] sm:$0xff]  ;;  %v3134_v42 = vld [vmem:[%s7220_s6 + $0x230] sm:$0xff] }
 0x5ea   : > { %3920 = vmatprep.subr.bf16.mxu0 %v4613_v21  ;;  %3961 = vmatprep.subr.bf16.mxu1 %v4615_v4  ;;  %v4695_v21 = vcombine.high %v3179_v33, %v3183_v36  ;;  %v3170_v4 = vld [vmem:[%s7220_s6 + $0x350] sm:$0xff]  ;;  %v3131_v56 = vld [vmem:[%s7220_s6 + $0x218] sm:$0xff] }
 0x5eb   : > { %v4684_v52 = vcombine.low %v3170_v4, %v3174_v10 }
 0x5ed   : > { %3921 = vmatpush1.bf16.msra.mxu0 %v4612_v12  ;;  %3962 = vmatpush1.bf16.msra.mxu1 %v4614_v39  ;;  %v4694_v12 = vcombine.low %v3179_v33, %v3183_v36  ;;  %v4685_v39 = vcombine.high %v3170_v4, %v3174_v10  ;;  %v3135_v33 = vld [vmem:[%s7220_s6 + $0x238] sm:$0xff] }
 0x5ee   : > { %3922 = vmatprep.subr.bf16.mxu0 %v4605_v53  ;;  %3963 = vmatprep.subr.bf16.mxu1 %v4607_v28  ;;  %v4687_v53 = vcombine.high %v3171_v45, %v3175_v7  ;;  %v3162_v28 = vld [vmem:[%s7220_s6 + $0x310] sm:$0xff]  ;;  %v4646_v4 = vcombine.low %v3131_v56, %v3135_v33 }
 0x5ef   : > { %v4676_v44 = vcombine.low %v3162_v28, %v3166_v16 }
 0x5f1   : > { %3923 = vmatpush1.bf16.msra.mxu0 %v4604_v6  ;;  %3964 = vmatpush1.bf16.msra.mxu1 %v4606_v9  ;;  %v4686_v6 = vcombine.low %v3171_v45, %v3175_v7  ;;  %v4677_v9 = vcombine.high %v3162_v28, %v3166_v16  ;;  %v1852_v16 = vld [vmem:[%s1850_s2] ss:$8 sm:$0xf0] }
 0x5f2   : > { %3924 = vmatprep.subr.bf16.mxu0 %v4597_v13  ;;  %3965 = vmatprep.subr.bf16.mxu1 %v4599_v54  ;;  %v4679_v13 = vcombine.high %v3163_v40, %v3167_v19  ;;  %v3154_v54 = vld [vmem:[%s7220_s6 + $0x2d0] sm:$0xff] }
 0x5f3   : > { %v4668_v49 = vcombine.low %v3154_v54, %v3158_v35 }
 0x5f5   : > { %3925 = vmatpush1.bf16.msra.mxu0 %v4596_v60  ;;  %3966 = vmatpush1.bf16.msra.mxu1 %v4598_v51  ;;  %v4678_v60 = vcombine.low %v3163_v40, %v3167_v19  ;;  %v4669_v51 = vcombine.high %v3154_v54, %v3158_v35  ;;  %v1863_v40 = vld [vmem:[%s1862_s12] ss:$8 sm:$0xf] }
 0x5f6   : > { %3926 = vmatprep.subr.bf16.mxu0 %v4589_v58  ;;  %3967 = vmatprep.subr.bf16.mxu1 %v4591_v61  ;;  %v4671_v58 = vcombine.high %v3155_v31, %v3159_v43  ;;  %v3146_v61 = vld [vmem:[%s7220_s6 + $0x290] sm:$0xff] }
 0x5f7   : > { %v4660_v23 = vcombine.low %v3146_v61, %v3150_v1  ;;  %v1864_v19 = vld [vmem:[%s1862_s12] ss:$8 sm:$0xf0] }
 0x5f9   : > { %3927 = vmatpush1.bf16.msra.mxu0 %v4588_v29  ;;  %3968 = vmatpush1.bf16.msra.mxu1 %v4590_v3  ;;  %v4670_v29 = vcombine.low %v3155_v31, %v3159_v43  ;;  %v4661_v3 = vcombine.high %v3146_v61, %v3150_v1 }
 0x5fa   : > { %3928 = vmatprep.subr.bf16.mxu0 %v4581_v18  ;;  %3969 = vmatprep.subr.bf16.mxu1 %v4583_v41  ;;  %v4663_v18 = vcombine.high %v3147_v2, %v3151_v25  ;;  %v3138_v41 = vld [vmem:[%s7220_s6 + $0x250] sm:$0xff] }
 0x5fb   : > { %v4652_v36 = vcombine.low %v3138_v41, %v3142_v62 }
 0x5fd   : > { %3929 = vmatpush1.bf16.msra.mxu0 %v4580_v5  ;;  %3970 = vmatpush1.bf16.msra.mxu1 %v4582_v8  ;;  %v4662_v5 = vcombine.low %v3147_v2, %v3151_v25  ;;  %v4653_v8 = vcombine.high %v3138_v41, %v3142_v62 }
 0x5fe   : > { %3930 = vmatprep.subr.bf16.mxu0 %v4701_v30  ;;  %3971 = vmatprep.subr.bf16.mxu1 %v4703_v11  ;;  %v4655_v30 = vcombine.high %v3139_v34, %v3143_v14  ;;  %v3130_v11 = vld [vmem:[%s7220_s6 + $0x210] sm:$0xff] }
 0x601   : > { %3931 = vmatpush2.bf16.msra.mxu0 %v4700_v37  ;;  %3972 = vmatpush2.bf16.msra.mxu1 %v4702_v0  ;;  %v4654_v37 = vcombine.low %v3139_v34, %v3143_v14  ;;  %v4645_v0 = vcombine.high %v3130_v11, %v3134_v42 }
 0x602   : > { %3932 = vmatprep.subr.bf16.mxu0 %v4693_v20  ;;  %3973 = vmatprep.subr.bf16.mxu1 %v4695_v21  ;;  %v4647_v20 = vcombine.high %v3131_v56, %v3135_v33  ;;  %v4644_v21 = vcombine.low %v3130_v11, %v3134_v42 }
 0x605   : > { %3933 = vmatpush2.bf16.msra.mxu0 %v4692_v47  ;;  %3974 = vmatpush2.bf16.msra.mxu1 %v4694_v12 }
 0x606   : > { %3934 = vmatprep.subr.bf16.mxu0 %v4685_v39  ;;  %3975 = vmatprep.subr.bf16.mxu1 %v4687_v53 }
 0x609   : > { %3935 = vmatpush2.bf16.msra.mxu0 %v4684_v52  ;;  %3976 = vmatpush2.bf16.msra.mxu1 %v4686_v6  ;;  %v1865_v6 = vor.u32 %v1864_v19, %v1863_v40 }
 0x60a   : > { %3936 = vmatprep.subr.bf16.mxu0 %v4677_v9  ;;  %3977 = vmatprep.subr.bf16.mxu1 %v4679_v13 }
 0x60b   : > { %v1911_v13 = vrot.slane %v1865_v6, %v5462_v38  ;;  %v1919_v35 = vrot.slane %v1865_v6, %v5465_v26  ;;  %v1923_v43 = vrot.slane %v1865_v6, %v5476_v24  ;;  %v1935_v11 = vrot.slane %v1865_v6, %v5780_v63 }
 0x60c   : > { %v1931_v33 = vrot.slane %v1865_v6, %v5785_v17 }
 0x60d   : > { %3937 = vmatpush2.bf16.msra.mxu0 %v4676_v44  ;;  %3978 = vmatpush2.bf16.msra.mxu1 %v4678_v60 }
 0x60e   : > { %3938 = vmatprep.subr.bf16.mxu0 %v4669_v51  ;;  %3979 = vmatprep.subr.bf16.mxu1 %v4671_v58  ;;  %v1915_v51 = vrot.slane %v1865_v6, %v5473_v50 }
 0x611   : > { %3939 = vmatpush2.bf16.msra.mxu0 %v4668_v49  ;;  %3980 = vmatpush2.bf16.msra.mxu1 %v4670_v29 }
 0x612   : > { %3940 = vmatprep.subr.bf16.mxu0 %v4661_v3  ;;  %3981 = vmatprep.subr.bf16.mxu1 %v4663_v18 }
 0x615   : > { %3941 = vmatpush2.bf16.msra.mxu0 %v4660_v23  ;;  %3982 = vmatpush2.bf16.msra.mxu1 %v4662_v5  ;;  %v1927_v5 = vrot.slane %v1865_v6, %v5777_v59 }
 0x616   : > { %3942 = vmatprep.subr.bf16.mxu0 %v4653_v8  ;;  %3983 = vmatprep.subr.bf16.mxu1 %v4655_v30 }
 0x619   : > { %3943 = vmatpush2.bf16.msra.mxu0 %v4652_v36  ;;  %3984 = vmatpush2.bf16.msra.mxu1 %v4654_v37 }
 0x61a   : > { %3944 = vmatprep.subr.bf16.mxu0 %v4645_v0  ;;  %3985 = vmatprep.subr.bf16.mxu1 %v4647_v20  ;;  %v1939_v20 = vrot.slane %v1865_v6, %v5788_v46 }
 0x61d   : > { %3945 = vmatpush2.bf16.msra.mxu0 %v4644_v21  ;;  %3986 = vmatpush2.bf16.msra.mxu1 %v4646_v4 }
 0x620   : > { %v2876_v10 = vpop.f32.mrf.mxu0  ;;  %3947 = vmatmul.mubr.bf16.vlgmr.msra.gmra.mxu0 %v6698_v27  ;;  %v2917_v45 = vpop.f32.mrf.mxu1  ;;  %3988 = vmatmul.mubr.bf16.vlgmr.msra.gmra.mxu1 %v6698_v27  ;;  %v1851_v27 = vld [vmem:[%s1850_s2] ss:$8 sm:$0xf] }
 0x621   : > { %v1853_v52 = vor.u32 %v1852_v16, %v1851_v27 }
 0x622   : > { %v2878_v7 = vpop.f32.mrf.mxu0  ;;  %v2919_v47 = vpop.f32.mrf.mxu1 }
 0x623   : > { %v1870_v9 = vrot.slane %v1853_v52, %v5462_v38  ;;  %v1878_v54 = vrot.slane %v1853_v52, %v5465_v26  ;;  %v1882_v31 = vrot.slane %v1853_v52, %v5476_v24  ;;  %v1874_v60 = vrot.slane %v1853_v52, %v5473_v50 }
 0x624   : > { %v2880_v12 = vpop.f32.mrf.mxu0  ;;  %v2921_v39 = vpop.f32.mrf.mxu1  ;;  %v1886_v23 = vrot.slane %v1853_v52, %v5777_v59  ;;  %v1894_v30 = vrot.slane %v1853_v52, %v5780_v63  ;;  %v1890_v56 = vrot.slane %v1853_v52, %v5785_v17  ;;  %v1898_v0 = vrot.slane %v1853_v52, %v5788_v46 }
 0x625   : > { %v1949_v44 = vsel %vm1948_vm2, %v1870_v9, %v1911_v13  ;;  %v1951_v58 = vsel %vm1948_vm2, %v1878_v54, %v1919_v35  ;;  %v1952_v61 = vsel %vm1948_vm2, %v1882_v31, %v1923_v43  ;;  %v1950_v25 = vsel %vm1948_vm2, %v1874_v60, %v1915_v51 }
 0x626   : > { %v2881_v53 = vpop.f32.mrf.mxu0  ;;  %v2922_v28 = vpop.f32.mrf.mxu1  ;;  %v3006_v1 = vadd.f32 %v2876_v10, %v1949_v44  ;;  %v3008_v2 = vadd.f32 %v2917_v45, %v1951_v58  ;;  %v3009_v49 = vadd.f32 %v2919_v47, %v1952_v61  ;;  %v3007_v3 = vadd.f32 %v2878_v7, %v1950_v25 }
 0x627   : > { %v1953_v4 = vsel %vm1948_vm2, %v1886_v23, %v1927_v5  ;;  %v1955_v10 = vsel %vm1948_vm2, %v1894_v30, %v1935_v11  ;;  %v1954_v47 = vsel %vm1948_vm2, %v1890_v56, %v1931_v33  ;;  %v1956_v53 = vsel %vm1948_vm2, %v1898_v0, %v1939_v20 }
 0x628   : > { %v4570_v29 = vmul.f32 -1.442695, %v3006_v1  ;;  %v4572_v18 = vmul.f32 -1.442695, %v3008_v2  ;;  %v4573_v41 = vmul.f32 -1.442695, %v3009_v49 }
 0x629   : > { %v4571_v62 = vmul.f32 -1.442695, %v3007_v3 }
 0x62a   : > { %4874 = vpow2.f32 %v4570_v29 }
 0x62b   : > { %4876 = vpow2.f32 %v4572_v18 }
 0x62c   : > { %4878 = vpow2.f32 %v4573_v41  ;;  %v5011_v41 = vmov 1966171168  }
 0x62d   : > { %4880 = vpow2.f32 %v4571_v62  ;;  %v4056_v62 = vunpack.c.l.s4 %v5011_v41 }
 0x637   : > { %v4875_v34 = vpop.eup %4874 }
 0x638   : > { %v4877_v14 = vpop.eup %4876  ;;  %v3020_v42 = vadd.f32 1.0, %v4875_v34 }
 0x639   : > { %v4879_v8 = vpop.eup %4878  ;;  %v3032_v37 = vadd.f32 1.0, %v4877_v14  ;;  %v4057_v14 = vunpack.c.0.s8 %v4056_v62 }
 0x63a   : > { %v4881_v36 = vpop.eup %4880  ;;  %v3033_v21 = vadd.f32 1.0, %v4879_v8  ;;  %4882 = vrcp.f32 %v3020_v42 }
 0x63b   : > { %v3021_v45 = vadd.f32 1.0, %v4881_v36  ;;  %4884 = vrcp.f32 %v3032_v37  ;;  %v6932_v30 = vsub.s32 %v4057_v14, %v5459_v22 }
 0x63c   : > { %4886 = vrcp.f32 %v3033_v21 }
 0x647   : > { %v4883_v31 = vpop.eup %4882 }
 0x648   : > { %v4885_v43 = vpop.eup %4884 }
 0x649   : > { %v4887_v44 = vpop.eup %4886  ;;  %v3052_v58 = vmul.f32 %v4996_v57, %v4885_v43 }
 0x64a   : > { %v3053_v25 = vmul.f32 %v4992_v55, %v4887_v44 }
 0x660   : > { %v2958_v7 = vpop.f32.mrf.mxu0  ;;  %v2999_v39 = vpop.f32.mrf.mxu1 }
 0x661   : > { %v3010_v12 = vadd.f32 %v2958_v7, %v1953_v4  ;;  %v3012_v28 = vadd.f32 %v2999_v39, %v1955_v10  ;;  %v4437_v39 = vld [vmem:[%s4276_s28 + $0x40] ss:$8 sm:$0xf0] }
 0x662   : > { %v2960_v27 = vpop.f32.mrf.mxu0  ;;  %v3001_v40 = vpop.f32.mrf.mxu1 }
 0x663   : > { %4888 = vtanh.f32 %v3010_v12  ;;  %v3011_v16 = vadd.f32 %v2960_v27, %v1954_v47  ;;  %v4574_v19 = vmul.f32 -1.442695, %v3012_v28  ;;  %v3013_v52 = vadd.f32 %v3001_v40, %v1956_v53  ;;  %v4436_v12 = vld [vmem:[%s4276_s28 + $0x40] ss:$8 sm:$0xf] }
 0x664   : > { %4890 = vrcp.f32 %v3021_v45  ;;  %v2962_v6 = vpop.f32.mrf.mxu0  ;;  %v3003_v9 = vpop.f32.mrf.mxu1  ;;  %v4440_v53 = vld [vmem:[%s4281_s29 + $0x40] ss:$8 sm:$0xf] }
 0x665   : > { %4892 = vtanh.f32 %v3011_v16  ;;  %v4575_v13 = vmul.f32 -1.442695, %v3013_v52  ;;  %v4441_v27 = vld [vmem:[%s4281_s29 + $0x40] ss:$8 sm:$0xf0]  ;;  %v1968_v16 = vor.u32 %v4437_v39, %v4436_v12 }
 0x666   : > { %4894 = vpow2.f32 %v4574_v19  ;;  %v2963_v54 = vpop.f32.mrf.mxu0  ;;  %v3004_v35 = vpop.f32.mrf.mxu1  ;;  %v1981_v40 = vor.u32 %v4441_v27, %v4440_v53 }
 0x667   : > { %4896 = vpow2.f32 %v4575_v13  ;;  %v1986_v19 = vrot.slane %v1968_v16, %v5462_v38  ;;  %v1994_v6 = vrot.slane %v1968_v16, %v5465_v26  ;;  %v1998_v13 = vrot.slane %v1968_v16, %v5476_v24 }
 0x668   : > { %v2027_v52 = vrot.slane %v1981_v40, %v5462_v38  ;;  %v2035_v9 = vrot.slane %v1981_v40, %v5465_v26  ;;  %v2039_v35 = vrot.slane %v1981_v40, %v5476_v24  ;;  %v1990_v43 = vrot.slane %v1968_v16, %v5473_v50 }
 0x669   : > { %v2031_v44 = vrot.slane %v1981_v40, %v5473_v50  ;;  %v2043_v14 = vrot.slane %v1981_v40, %v5777_v59 }
 0x670   : > { %v4889_v60 = vpop.eup %4888 }
 0x671   : > { %v4891_v51 = vpop.eup %4890  ;;  %v3054_v61 = vmul.f32 %v4889_v60, %v4883_v31  ;;  %v2064_v31 = vsel %vm1948_vm2, %v1986_v19, %v2027_v52  ;;  %v2066_v60 = vsel %vm1948_vm2, %v1994_v6, %v2035_v9 }
 0x672   : > { %v4893_v1 = vpop.eup %4892 }
 0x673   : > { %v4895_v2 = vpop.eup %4894  ;;  %v6918_v57 = vadd.f32 %v3054_v61, %v3052_v58   ;;  %v3055_v49 = vmul.f32 %v4893_v1, %v4891_v51  ;;  %v2067_v51 = vsel %vm1948_vm2, %v1998_v13, %v2039_v35  ;;  %v2065_v1 = vsel %vm1948_vm2, %v1990_v43, %v2031_v44 }
 0x674   : > { %v3046_v29 = vadd.f32 1.0, %v4895_v2  ;;  %v4897_v3 = vpop.eup %4896 }
 0x675   : > { %4898 = vtanh.f32 %v6918_v57  ;;  %v6922_v55 = vadd.f32 %v3055_v49, %v3053_v25   ;;  %v3047_v18 = vadd.f32 1.0, %v4897_v3 }
 0x676   : > { %4900 = vrcp.f32 %v3046_v29 }
 0x677   : > { %4902 = vtanh.f32 %v6922_v55 }
 0x678   : > { %4904 = vrcp.f32 %v3047_v18 }
 0x682   : > { %v4899_v34 = vpop.eup %4898 }
 0x683   : > { %v4901_v23 = vpop.eup %4900 }
 0x684   : > { %v4903_v5 = vpop.eup %4902  ;;  %v6927_v54 = vmul.f32 %v4901_v23, %v4899_v34   ;;  %v2002_v34 = vrot.slane %v1968_v16, %v5777_v59 }
 0x685   : > { %v4905_v8 = vpop.eup %4904 }
 0x686   : > { %v6929_v28 = vmul.f32 %v4905_v8, %v4903_v5   ;;  %v2010_v5 = vrot.slane %v1968_v16, %v5780_v63  ;;  %v2051_v8 = vrot.slane %v1981_v40, %v5780_v63 }
 0x688   : > { %v4054_v11 = vcombine.low %v6927_v54, %v6929_v28 }
 0x68a   : > { %v4061_v42 = vrot.slane %v4054_v11, %v6932_v30 }
 0x68c   : > { %v4068_v33 = vrot.slane %v4061_v42, %v6932_v30  ;;  %v4104_v36 = vcombine.high %v4061_v42, %v4061_v42  ;;  %v2006_v42 = vrot.slane %v1968_v16, %v5785_v17 }
 0x68e   : > { %4078 = vst.msk [vmem:[%s4077_s17] ss:$8 sm:$0x3] %vm6942_vm3, %v4068_v33  ;;  %v4111_v37 = vrot.slane %v4104_v36, %v6932_v30  ;;  %v2047_v33 = vrot.slane %v1981_v40, %v5785_v17 }
 0x690   : > { %4117 = vst.msk [vmem:[%s4116_s18] ss:$8 sm:$0x3] %vm6942_vm3, %v4111_v37 }
 0x697   :  { %v4135_v56 = vld [vmem:[#allocation3 + $0x8] sm:$0xff] (%p1830_p0)  ;;  %v4138_v54 = vld [vmem:[#allocation3 + $0x20] sm:$0xff] (%p1830_p0)  ;;  %v4140_v48 = vld [vmem:[#allocation3 + $0x30] sm:$0xff] (%p1830_p0) }
 0x698   :  { %4151 = vst [vmem:[%s7221_s7 + $0x8] sm:$0xff] (%p1830_p0), %v4135_v56  ;;  %4154 = vst [vmem:[%s7221_s7 + $0x40] sm:$0xff] (%p1830_p0), %v4138_v54  ;;  %v4141_v22 = vld [vmem:[#allocation3 + $0x38] sm:$0xff] (%p1830_p0)  ;;  %v4142_v38 = vld [vmem:[#allocation3 + $0x40] sm:$0xff] (%p1830_p0) }
 0x699   :  { %4156 = vst [vmem:[%s7221_s7 + $0x60] sm:$0xff] (%p1830_p0), %v4140_v48  ;;  %4157 = vst [vmem:[%s7221_s7 + $0x68] sm:$0xff] (%p1830_p0), %v4141_v22  ;;  %v4143_v26 = vld [vmem:[#allocation3 + $0x48] sm:$0xff] (%p1830_p0)  ;;  %v4144_v50 = vld [vmem:[#allocation3 + $0x50] sm:$0xff] (%p1830_p0) }
 0x69a   :  { %4158 = vst [vmem:[%s7221_s7 + $0x80] sm:$0xff] (%p1830_p0), %v4142_v38  ;;  %v4145_v24 = vld [vmem:[#allocation3 + $0x58] sm:$0xff] (%p1830_p0)  ;;  %4159 = vst [vmem:[%s7221_s7 + $0x88] sm:$0xff] (%p1830_p0), %v4143_v26  ;;  %v4146_v59 = vld [vmem:[#allocation3 + $0x60] sm:$0xff] (%p1830_p0) }
 0x69b   :  { %4160 = vst [vmem:[%s7221_s7 + $0xa0] sm:$0xff] (%p1830_p0), %v4144_v50  ;;  %4161 = vst [vmem:[%s7221_s7 + $0xa8] sm:$0xff] (%p1830_p0), %v4145_v24  ;;  %v4147_v63 = vld [vmem:[#allocation3 + $0x68] sm:$0xff] (%p1830_p0)  ;;  %v4148_v17 = vld [vmem:[#allocation3 + $0x70] sm:$0xff] (%p1830_p0) }
 0x69c   :  { %4162 = vst [vmem:[%s7221_s7 + $0xc0] sm:$0xff] (%p1830_p0), %v4146_v59  ;;  %4163 = vst [vmem:[%s7221_s7 + $0xc8] sm:$0xff] (%p1830_p0), %v4147_v63 }
 0x69d   :  { %4164 = vst [vmem:[%s7221_s7 + $0xe0] sm:$0xff] (%p1830_p0), %v4148_v17 }
 0x6a0   : > { %v3866_v0 = vpop.f32.mrf.mxu0  ;;  %v3907_v20 = vpop.f32.mrf.mxu1 }
 0x6a1   : > { %v3996_v58 = vadd.f32 %v3866_v0, %v2064_v31  ;;  %v3998_v61 = vadd.f32 %v3907_v20, %v2066_v60  ;;  %v2014_v0 = vrot.slane %v1968_v16, %v5788_v46  ;;  %v2055_v20 = vrot.slane %v1981_v40, %v5788_v46  ;;  %v4149_v46 = vld [vmem:[#allocation3 + $0x78] sm:$0xff] (%p1830_p0) }
 0x6a2   : > { %v3868_v21 = vpop.f32.mrf.mxu0  ;;  %v3909_v4 = vpop.f32.mrf.mxu1  ;;  %4165 = vst [vmem:[%s7221_s7 + $0xe8] sm:$0xff] (%p1830_p0), %v4149_v46 }
 0x6a3   : > { %v3999_v2 = vadd.f32 %v3909_v4, %v2067_v51  ;;  %v4704_v25 = vmul.f32 -1.442695, %v3996_v58  ;;  %v3997_v49 = vadd.f32 %v3868_v21, %v2065_v1  ;;  %v4706_v29 = vmul.f32 -1.442695, %v3998_v61 }
 0x6a4   : > { %v3870_v10 = vpop.f32.mrf.mxu0  ;;  %v3911_v45 = vpop.f32.mrf.mxu1  ;;  %v2068_v4 = vsel %vm1948_vm2, %v2002_v34, %v2043_v14  ;;  %v2071_v53 = vsel %vm1948_vm2, %v2014_v0, %v2055_v20  ;;  %v4137_v0 = vld [vmem:[#allocation3 + $0x18] sm:$0xff] (%p1830_p0)  ;;  %v4139_v20 = vld [vmem:[#allocation3 + $0x28] sm:$0xff] (%p1830_p0) }
 0x6a5   : > { %v4707_v3 = vmul.f32 -1.442695, %v3999_v2  ;;  %4906 = vpow2.f32 %v4704_v25  ;;  %v4705_v18 = vmul.f32 -1.442695, %v3997_v49  ;;  %v2070_v10 = vsel %vm1948_vm2, %v2010_v5, %v2051_v8  ;;  %4153 = vst [vmem:[%s7221_s7 + $0x28] sm:$0xff] (%p1830_p0), %v4137_v0  ;;  %4155 = vst [vmem:[%s7221_s7 + $0x48] sm:$0xff] (%p1830_p0), %v4139_v20 }
 0x6a6   : > { %v3871_v7 = vpop.f32.mrf.mxu0  ;;  %v3912_v47 = vpop.f32.mrf.mxu1  ;;  %4908 = vpow2.f32 %v4706_v29 }
 0x6a7   : > { %4910 = vpow2.f32 %v4707_v3  ;;  %v2069_v47 = vsel %vm1948_vm2, %v2006_v42, %v2047_v33 }
 0x6a8   : > { %4912 = vpow2.f32 %v4705_v18 }
 0x6b2   : > { %v4907_v41 = vpop.eup %4906 }
 0x6b3   : > { %v4909_v62 = vpop.eup %4908  ;;  %v4010_v11 = vadd.f32 1.0, %v4907_v41 }
 0x6b4   : > { %v4911_v23 = vpop.eup %4910  ;;  %v4022_v37 = vadd.f32 1.0, %v4909_v62 }
 0x6b5   : > { %v4913_v36 = vpop.eup %4912  ;;  %v4023_v21 = vadd.f32 1.0, %v4911_v23  ;;  %4914 = vrcp.f32 %v4010_v11 }
 0x6b6   : > { %v4011_v45 = vadd.f32 1.0, %v4913_v36  ;;  %4916 = vrcp.f32 %v4022_v37  ;;  %v4136_v37 = vld [vmem:[#allocation3 + $0x10] sm:$0xff] (%p1830_p0) }
 0x6b7   : > { %4918 = vrcp.f32 %v4023_v21  ;;  %4152 = vst [vmem:[%s7221_s7 + $0x20] sm:$0xff] (%p1830_p0), %v4136_v37 }
 0x6c2   : > { %v4915_v44 = vpop.eup %4914 }
 0x6c3   : > { %v4917_v60 = vpop.eup %4916 }
 0x6c4   : > { %v4919_v51 = vpop.eup %4918  ;;  %v4042_v1 = vmul.f32 %v4980_v32, %v4917_v60  ;;  %v4208_v60 = vld [vmem:[#allocation3 + $0xd0] sm:$0xff] (%p1830_p0) }
 0x6c5   : > { %v4043_v29 = vmul.f32 %v4976_v15, %v4919_v51  ;;  %v4209_v51 = vld [vmem:[#allocation3 + $0xd8] sm:$0xff] (%p1830_p0)  ;;  %4728 = vst [vmem:[%s7221_s7 + $0x1a0] sm:$0xff] (%p1830_p0), %v4208_v60 }
 0x6c6   :  { %4729 = vst [vmem:[%s7221_s7 + $0x1a8] sm:$0xff] (%p1830_p0), %v4209_v51 }
 0x6e0   : > { %v3948_v7 = vpop.f32.mrf.mxu0  ;;  %v3989_v39 = vpop.f32.mrf.mxu1 }
 0x6e1   : > { %v4000_v12 = vadd.f32 %v3948_v7, %v2068_v4  ;;  %v4002_v27 = vadd.f32 %v3989_v39, %v2070_v10 }
 0x6e2   : > { %v3950_v16 = vpop.f32.mrf.mxu0  ;;  %v3991_v19 = vpop.f32.mrf.mxu1 }
 0x6e3   : > { %4920 = vtanh.f32 %v4000_v12  ;;  %v4001_v40 = vadd.f32 %v3950_v16, %v2069_v47  ;;  %v4708_v52 = vmul.f32 -1.442695, %v4002_v27  ;;  %v4003_v6 = vadd.f32 %v3991_v19, %v2071_v53  ;;  %v4199_v19 = vld [vmem:[#allocation3 + $0x88] sm:$0xff] (%p1830_p0) }
 0x6e4   : > { %4922 = vrcp.f32 %v4011_v45  ;;  %v3952_v9 = vpop.f32.mrf.mxu0  ;;  %v3993_v13 = vpop.f32.mrf.mxu1  ;;  %4719 = vst [vmem:[%s7221_s7 + $0x108] sm:$0xff] (%p1830_p0), %v4199_v19 }
 0x6e5   : > { %4924 = vtanh.f32 %v4001_v40  ;;  %v4709_v35 = vmul.f32 -1.442695, %v4003_v6  ;;  %v4198_v40 = vld [vmem:[#allocation3 + $0x80] sm:$0xff] (%p1830_p0)  ;;  %v4201_v6 = vld [vmem:[#allocation3 + $0x98] sm:$0xff] (%p1830_p0)  ;;  %v4203_v13 = vld [vmem:[#allocation3 + $0xa8] sm:$0xff] (%p1830_p0) }
 0x6e6   : > { %4926 = vpow2.f32 %v4708_v52  ;;  %v3953_v31 = vpop.f32.mrf.mxu0  ;;  %v3994_v43 = vpop.f32.mrf.mxu1  ;;  %4718 = vst [vmem:[%s7221_s7 + $0x100] sm:$0xff] (%p1830_p0), %v4198_v40  ;;  %v4200_v52 = vld [vmem:[#allocation3 + $0x90] sm:$0xff] (%p1830_p0)  ;;  %4721 = vst [vmem:[%s7221_s7 + $0x128] sm:$0xff] (%p1830_p0), %v4201_v6  ;;  %v4202_v9 = vld [vmem:[#allocation3 + $0xa0] sm:$0xff] (%p1830_p0) }
 0x6e7   : > { %4928 = vpow2.f32 %v4709_v35  ;;  %4720 = vst [vmem:[%s7221_s7 + $0x120] sm:$0xff] (%p1830_p0), %v4200_v52  ;;  %v4204_v35 = vld [vmem:[#allocation3 + $0xb0] sm:$0xff] (%p1830_p0)  ;;  %4722 = vst [vmem:[%s7221_s7 + $0x140] sm:$0xff] (%p1830_p0), %v4202_v9  ;;  %v4205_v31 = vld [vmem:[#allocation3 + $0xb8] sm:$0xff] (%p1830_p0) }
 0x6e8   :  { %4723 = vst [vmem:[%s7221_s7 + $0x148] sm:$0xff] (%p1830_p0), %v4203_v13  ;;  %4724 = vst [vmem:[%s7221_s7 + $0x160] sm:$0xff] (%p1830_p0), %v4204_v35  ;;  %v4206_v43 = vld [vmem:[#allocation3 + $0xc0] sm:$0xff] (%p1830_p0) }
 0x6e9   :  { %4725 = vst [vmem:[%s7221_s7 + $0x168] sm:$0xff] (%p1830_p0), %v4205_v31  ;;  %4726 = vst [vmem:[%s7221_s7 + $0x180] sm:$0xff] (%p1830_p0), %v4206_v43 }
 0x6f0   : > { %v4921_v58 = vpop.eup %4920 }
 0x6f1   : > { %v4923_v61 = vpop.eup %4922  ;;  %v4044_v2 = vmul.f32 %v4921_v58, %v4915_v44  ;;  %v4207_v44 = vld [vmem:[#allocation3 + $0xc8] sm:$0xff] (%p1830_p0)  ;;  %v4210_v58 = vld [vmem:[#allocation3 + $0xe0] sm:$0xff] (%p1830_p0) }
 0x6f2   : > { %v4925_v25 = vpop.eup %4924  ;;  %4727 = vst [vmem:[%s7221_s7 + $0x188] sm:$0xff] (%p1830_p0), %v4207_v44  ;;  %4730 = vst [vmem:[%s7221_s7 + $0x1c0] sm:$0xff] (%p1830_p0), %v4210_v58 }
 0x6f3   : > { %v4927_v49 = vpop.eup %4926  ;;  %v4046_v32 = vadd.f32 %v4044_v2, %v4042_v1   ;;  %v4045_v3 = vmul.f32 %v4925_v25, %v4923_v61  ;;  %v4211_v61 = vld [vmem:[#allocation3 + $0xe8] sm:$0xff] (%p1830_p0)  ;;  %v4212_v1 = vld [vmem:[#allocation3 + $0xf0] sm:$0xff] (%p1830_p0)  ;;  %v4213_v2 = vld [vmem:[#allocation3 + $0xf8] sm:$0xff] (%p1830_p0) }
 0x6f4   : > { %v4036_v18 = vadd.f32 1.0, %v4927_v49  ;;  %v4929_v41 = vpop.eup %4928  ;;  %4731 = vst [vmem:[%s7221_s7 + $0x1c8] sm:$0xff] (%p1830_p0), %v4211_v61  ;;  %4732 = vst [vmem:[%s7221_s7 + $0x1e0] sm:$0xff] (%p1830_p0), %v4212_v1 }
 0x6f5   : > { %4930 = vtanh.f32 %v4046_v32  ;;  %v4047_v15 = vadd.f32 %v4045_v3, %v4043_v29   ;;  %v4037_v62 = vadd.f32 1.0, %v4929_v41  ;;  %4733 = vst [vmem:[%s7221_s7 + $0x1e8] sm:$0xff] (%p1830_p0), %v4213_v2 }
 0x6f6   : > { %4932 = vrcp.f32 %v4036_v18 }
 0x6f7   : > { %4934 = vtanh.f32 %v4047_v15 }
 0x6f8   : > { %4936 = vrcp.f32 %v4037_v62 }
 0x702   : > { %v4931_v34 = vpop.eup %4930 }
 0x703   : > { %v4933_v14 = vpop.eup %4932 }
 0x704   : > { %v4935_v23 = vpop.eup %4934  ;;  %v4050_v34 = vmul.f32 %v4933_v14, %v4931_v34  }
 0x705   : > { %v4937_v5 = vpop.eup %4936 }
 0x706   : > { %v4051_v16 = vmul.f32 %v4937_v5, %v4935_v23  }
 0x708   : > { %v4082_v8 = vcombine.low %v4050_v34, %v4051_v16 }
 0x70a   : > { %v4089_v11 = vrot.slane %v4082_v8, %v6932_v30 }
 0x70c   : > { %v4096_v42 = vrot.slane %v4089_v11, %v6932_v30  ;;  %v4119_v33 = vcombine.high %v4089_v11, %v4089_v11  ;;  %1832 = sbr.rel (!%p1830_p0) target bundleno = 1308 (0x51c), region = 64 }
 0x70e   : > { %4102 = vst.msk [vmem:[%s4101_s1] ss:$8 sm:$0x3] %vm6942_vm3, %v4096_v42  ;;  %v4126_v36 = vrot.slane %v4119_v33, %v6932_v30  ;;  %v4134_v30 = vld [vmem:[#allocation3] sm:$0xff] (%p1830_p0) }
 0x70f   :  { %4150 = vst [vmem:[%s7221_s7] sm:$0xff] (%p1830_p0), %v4134_v30 }
 0x710   : > { %4132 = vst.msk [vmem:[%s4131_s11] ss:$8 sm:$0x3] %vm6942_vm3, %v4126_v36 }
 0x717   :  { %v4166_v15 = vld [vmem:[#allocation4] sm:$0xff]  ;;  %v4167_v32 = vld [vmem:[#allocation4 + $0x8] sm:$0xff]  ;;  %v4168_v55 = vld [vmem:[#allocation4 + $0x10] sm:$0xff] }
 0x718   :  { %4182 = vst [vmem:[%s7221_s7 + $0x10] sm:$0xff] %v4166_v15  ;;  %4183 = vst [vmem:[%s7221_s7 + $0x18] sm:$0xff] %v4167_v32  ;;  %v4169_v57 = vld [vmem:[#allocation4 + $0x18] sm:$0xff]  ;;  %v4170_v28 = vld [vmem:[#allocation4 + $0x20] sm:$0xff] }
 0x719   :  { %4184 = vst [vmem:[%s7221_s7 + $0x30] sm:$0xff] %v4168_v55  ;;  %4185 = vst [vmem:[%s7221_s7 + $0x38] sm:$0xff] %v4169_v57  ;;  %v4171_v21 = vld [vmem:[#allocation4 + $0x28] sm:$0xff]  ;;  %v4172_v4 = vld [vmem:[#allocation4 + $0x30] sm:$0xff] }
 0x71a   :  { %4186 = vst [vmem:[%s7221_s7 + $0x50] sm:$0xff] %v4170_v28  ;;  %v4173_v10 = vld [vmem:[#allocation4 + $0x38] sm:$0xff]  ;;  %4187 = vst [vmem:[%s7221_s7 + $0x58] sm:$0xff] %v4171_v21  ;;  %v4174_v45 = vld [vmem:[#allocation4 + $0x40] sm:$0xff] }
 0x71b   :  { %4188 = vst [vmem:[%s7221_s7 + $0x70] sm:$0xff] %v4172_v4  ;;  %4189 = vst [vmem:[%s7221_s7 + $0x78] sm:$0xff] %v4173_v10  ;;  %v4175_v7 = vld [vmem:[#allocation4 + $0x48] sm:$0xff]  ;;  %v4176_v47 = vld [vmem:[#allocation4 + $0x50] sm:$0xff] }
 0x71c   :  { %4190 = vst [vmem:[%s7221_s7 + $0x90] sm:$0xff] %v4174_v45  ;;  %4191 = vst [vmem:[%s7221_s7 + $0x98] sm:$0xff] %v4175_v7  ;;  %v4177_v12 = vld [vmem:[#allocation4 + $0x58] sm:$0xff]  ;;  %v4178_v39 = vld [vmem:[#allocation4 + $0x60] sm:$0xff] }
 0x71d   :  { %4192 = vst [vmem:[%s7221_s7 + $0xb0] sm:$0xff] %v4176_v47  ;;  %v4179_v53 = vld [vmem:[#allocation4 + $0x68] sm:$0xff]  ;;  %4193 = vst [vmem:[%s7221_s7 + $0xb8] sm:$0xff] %v4177_v12  ;;  %v4180_v27 = vld [vmem:[#allocation4 + $0x70] sm:$0xff] }
 0x71e   :  { %4194 = vst [vmem:[%s7221_s7 + $0xd0] sm:$0xff] %v4178_v39  ;;  %4195 = vst [vmem:[%s7221_s7 + $0xd8] sm:$0xff] %v4179_v53  ;;  %v4181_v16 = vld [vmem:[#allocation4 + $0x78] sm:$0xff]  ;;  %v4231_v25 = vld [vmem:[#allocation4 + $0x80] sm:$0xff] }
 0x71f   :  { %4196 = vst [vmem:[%s7221_s7 + $0xf0] sm:$0xff] %v4180_v27  ;;  %4197 = vst [vmem:[%s7221_s7 + $0xf8] sm:$0xff] %v4181_v16  ;;  %v4232_v49 = vld [vmem:[#allocation4 + $0x88] sm:$0xff]  ;;  %v4233_v29 = vld [vmem:[#allocation4 + $0x90] sm:$0xff] }
 0x720   :  { %4734 = vst [vmem:[%s7221_s7 + $0x110] sm:$0xff] %v4231_v25  ;;  %4735 = vst [vmem:[%s7221_s7 + $0x118] sm:$0xff] %v4232_v49  ;;  %v4234_v3 = vld [vmem:[#allocation4 + $0x98] sm:$0xff]  ;;  %v4235_v18 = vld [vmem:[#allocation4 + $0xa0] sm:$0xff] }
 0x721   :  { %4736 = vst [vmem:[%s7221_s7 + $0x130] sm:$0xff] %v4233_v29  ;;  %v4236_v41 = vld [vmem:[#allocation4 + $0xa8] sm:$0xff]  ;;  %4737 = vst [vmem:[%s7221_s7 + $0x138] sm:$0xff] %v4234_v3  ;;  %v4237_v62 = vld [vmem:[#allocation4 + $0xb0] sm:$0xff] }
 0x722   :  { %4738 = vst [vmem:[%s7221_s7 + $0x150] sm:$0xff] %v4235_v18  ;;  %4739 = vst [vmem:[%s7221_s7 + $0x158] sm:$0xff] %v4236_v41  ;;  %v4238_v34 = vld [vmem:[#allocation4 + $0xb8] sm:$0xff]  ;;  %v4239_v14 = vld [vmem:[#allocation4 + $0xc0] sm:$0xff] }
 0x723   :  { %4740 = vst [vmem:[%s7221_s7 + $0x170] sm:$0xff] %v4237_v62  ;;  %4741 = vst [vmem:[%s7221_s7 + $0x178] sm:$0xff] %v4238_v34  ;;  %v4240_v23 = vld [vmem:[#allocation4 + $0xc8] sm:$0xff]  ;;  %v4241_v5 = vld [vmem:[#allocation4 + $0xd0] sm:$0xff] }
 0x724   :  { %4742 = vst [vmem:[%s7221_s7 + $0x190] sm:$0xff] %v4239_v14  ;;  %v4242_v8 = vld [vmem:[#allocation4 + $0xd8] sm:$0xff]  ;;  %4743 = vst [vmem:[%s7221_s7 + $0x198] sm:$0xff] %v4240_v23  ;;  %v4243_v11 = vld [vmem:[#allocation4 + $0xe0] sm:$0xff] }
 0x725   :  { %4744 = vst [vmem:[%s7221_s7 + $0x1b0] sm:$0xff] %v4241_v5  ;;  %4745 = vst [vmem:[%s7221_s7 + $0x1b8] sm:$0xff] %v4242_v8  ;;  %v4244_v42 = vld [vmem:[#allocation4 + $0xe8] sm:$0xff]  ;;  %v4245_v33 = vld [vmem:[#allocation4 + $0xf0] sm:$0xff] }
 0x726   :  { %4746 = vst [vmem:[%s7221_s7 + $0x1d0] sm:$0xff] %v4243_v11  ;;  %4747 = vst [vmem:[%s7221_s7 + $0x1d8] sm:$0xff] %v4244_v42  ;;  %v4246_v36 = vld [vmem:[#allocation4 + $0xf8] sm:$0xff] }
 0x727   :  { %4748 = vst [vmem:[%s7221_s7 + $0x1f0] sm:$0xff] %v4245_v33  ;;  %4749 = vst [vmem:[%s7221_s7 + $0x1f8] sm:$0xff] %v4246_v36 }

// kernel: forward.3
= control target key start
LH: loop header
LB: loop body
LE: loop exit
PB: predicated region body
PF: predicated region fallthrough
CT: control target
= control target key end

     0   :  { %s12718_s0 = inlined_call_operand.vmem [shape: f32[2,64,512], index: 0, kind: input, shape index: {}]   ;;  %s12719_s1 = inlined_call_operand.vmem [shape: f32[64,512], index: 1, kind: input, shape index: {}]   ;;  %s12720_s2 = inlined_call_operand.vmem [shape: f32[64,512], index: 2, kind: input, shape index: {}]   ;;  %s12721_s3 = inlined_call_operand.vmem [shape: bf16[512,1536], index: 3, kind: input, shape index: {}]   ;;  %s12722_s4 = inlined_call_operand.vmem [shape: f32[1,1536], index: 4, kind: input, shape index: {}]   ;;  %s12723_s5 = inlined_call_operand.vmem [shape: bf16[512,512], index: 5, kind: input, shape index: {}]   ;;  %s12724_s6 = inlined_call_operand.vmem [shape: f32[1,512], index: 6, kind: input, shape index: {}]   ;;  %s12725_s7 = inlined_call_operand.vmem [shape: f32[512,4], index: 7, kind: input, shape index: {}]   ;;  %s12726_s8 = inlined_call_operand.vmem [shape: f32[1,4], index: 8, kind: input, shape index: {}]   ;;  %s12727_s9 = inlined_call_operand.hbm [shape: f32[2,1,4], index: 9, kind: output, shape index: {0}]   ;;  %s12728_s10 = inlined_call_operand.hbm [shape: f32[2,1,4], index: 10, kind: output, shape index: {1}]  }
   0x1   :  { %12748 = sst [smem:[#allocation37_spill]] %s12718_s0 }
   0x2   :  { %12749 = sst [smem:[#allocation38_spill]] %s12719_s1 }
   0x3   :  { %16 = vsyncpa [#allocation3], 0 }
   0x4   :  { %18 = vsyncpa [#allocation3 + $0x1], 0 }
   0x5   :  { %19 = vsyncpa [#allocation5], 0 }
   0x6   :  { %21 = vsyncpa [#allocation5 + $0x1], 0  ;;  %s8785_s13 = smov 0   ;;  %s8787_s14 = smov 0  }
   0x7   :  { %s8789_s15 = smov 0   ;;  %s8791_s16 = smov 0  }
   0x8 LB: > { %s8806_s17 = sadd.s32 4294967295, %s8726_s16   ;;  %s6756_s18 = sadd.s32 4294967294, %s8726_s16   ;;  %s8726_s16 = sphi %s8791_s16, %s12824_s16   ;;  %s8722_s15 = sphi %s8789_s15, %s12823_s15   ;;  %s8718_s14 = sphi %s8787_s14, %s12822_s14   ;;  %s8714_s13 = sphi %s8785_s13, %s12821_s13  }
   0x9   : > { %s8810_s19 = sadd.s32 1, %s8726_s16   ;;  %s228_s20 = sadd.s32 1, %s8722_s15 }
   0xa   : > { %s225_s21 = ssub.s32 %s8726_s16, %s8810_s19  ;;  %p238_p0 = scmp.ne.s32.totalorder %s8722_s15, %s8718_s14 }
   0xb   : > { %p226_p1 = scmp.eq.s32.totalorder %s225_s21, 0  ;;  %p239_p2 = scmp.eq.s32.totalorder %s8806_s17, 1 }
   0xc   : > { %p244_p3 = scmp.ne.s32.totalorder %s8718_s14, %s8714_s13  ;;  %p245_p4 = scmp.eq.s32.totalorder %s6756_s18, 1 }
   0xd   : > { %s8821_s22 = scalar_select %p226_p1, %s8722_s15, %s228_s20  }
   0xe   : > { %p8823_p5 = por %p239_p2, %p238_p0  ;;  %p8827_p6 = por %p245_p4, %p244_p3 }
   0xf   : > { %12750 = sst [smem:[#allocation8_spill]] %s8821_s22  ;;  %p6759_p7 = scmp.ge.s32.totalorder %s8726_s16, 1 }
  0x10   : > { %p321_p8 = scmp.lt.s32.totalorder %s8726_s16, 3 }
  0x12   : > { %p322_p9 = pnand %p6759_p7, %p321_p8 }
  0x14   : > { %325 = sbr.rel (%p322_p9) target bundleno = 4248 (0x1098), region = 56 }
  0x19   : > { %p362_p10 = scmp.lt.s32.totalorder %s8806_s17, 1  ;;  %s12753_s0 = sld [smem:[#allocation37_spill]]  ;;  %vm4056_vm0 = vcmask 523264   ;;  %vm6626_vm1 = vcmask 24576  }
  0x1a   : > { %s12754_s1 = sld [smem:[#allocation38_spill]]  ;;  %s8728_s18 = smov [#allocation2]  }
  0x1b   : > { %s363_s25 = scalar_select %p362_p10, %s8806_s17, 1 }
  0x1c   : > { %s8640_s20 = sshll.u32 %s8728_s18, 4  ;;  %s8641_s20 = int_to_ptr.vmem [resolvable:$false] %s8640_s20 }
  0x1d   : > { %s7294_s26 = sshll.u32 %s363_s25, 8 }
  0x1f   : > { %s8838_s29 = scalar_lea.vmem %s12753_s0, %s7294_s26 }
  0x20   : > { %v368_v0 = vld [vmem:[%s8838_s29] sm:$0xff]  ;;  %v369_v1 = vld [vmem:[%s8838_s29 + $0x8] sm:$0xff]  ;;  %v370_v2 = vld [vmem:[%s8838_s29 + $0x10] sm:$0xff] }
  0x21   : > { %v464_v3 = vadd.f32 %v369_v1, %v368_v0  ;;  %v371_v4 = vld [vmem:[%s8838_s29 + $0x18] sm:$0xff]  ;;  %v372_v6 = vld [vmem:[%s8838_s29 + $0x20] sm:$0xff]  ;;  %v373_v8 = vld [vmem:[%s8838_s29 + $0x28] sm:$0xff] }
  0x22   : > { %v374_v10 = vld [vmem:[%s8838_s29 + $0x30] sm:$0xff]  ;;  %v375_v12 = vld [vmem:[%s8838_s29 + $0x38] sm:$0xff]  ;;  %v376_v13 = vld [vmem:[%s8838_s29 + $0x40] sm:$0xff] }
  0x23   : > { %v465_v5 = vadd.f32 %v464_v3, %v370_v2  ;;  %v377_v15 = vld [vmem:[%s8838_s29 + $0x48] sm:$0xff]  ;;  %v378_v17 = vld [vmem:[%s8838_s29 + $0x50] sm:$0xff]  ;;  %v379_v19 = vld [vmem:[%s8838_s29 + $0x58] sm:$0xff] }
  0x24   : > { %v380_v21 = vld [vmem:[%s8838_s29 + $0x60] sm:$0xff]  ;;  %v381_v23 = vld [vmem:[%s8838_s29 + $0x68] sm:$0xff]  ;;  %v382_v25 = vld [vmem:[%s8838_s29 + $0x70] sm:$0xff] }
  0x25   : > { %v466_v7 = vadd.f32 %v465_v5, %v371_v4  ;;  %v383_v27 = vld [vmem:[%s8838_s29 + $0x78] sm:$0xff]  ;;  %v384_v29 = vld [vmem:[%s8838_s29 + $0x80] sm:$0xff]  ;;  %v385_v31 = vld [vmem:[%s8838_s29 + $0x88] sm:$0xff] }
  0x26   : > { %v386_v33 = vld [vmem:[%s8838_s29 + $0x90] sm:$0xff]  ;;  %v387_v35 = vld [vmem:[%s8838_s29 + $0x98] sm:$0xff]  ;;  %v388_v37 = vld [vmem:[%s8838_s29 + $0xa0] sm:$0xff] }
  0x27   : > { %v467_v9 = vadd.f32 %v466_v7, %v372_v6  ;;  %v389_v39 = vld [vmem:[%s8838_s29 + $0xa8] sm:$0xff]  ;;  %v390_v41 = vld [vmem:[%s8838_s29 + $0xb0] sm:$0xff]  ;;  %v391_v43 = vld [vmem:[%s8838_s29 + $0xb8] sm:$0xff] }
  0x28   : > { %v8865_v45 = vld [vmem:[%s8838_s29 + $0xc0] sm:$0xff]  ;;  %v8868_v47 = vld [vmem:[%s8838_s29 + $0xc8] sm:$0xff]  ;;  %v8871_v49 = vld [vmem:[%s8838_s29 + $0xd0] sm:$0xff] }
  0x29   : > { %v468_v11 = vadd.f32 %v467_v9, %v373_v8  ;;  %v8875_v51 = vld [vmem:[%s8838_s29 + $0xd8] sm:$0xff]  ;;  %v8879_v53 = vld [vmem:[%s8838_s29 + $0xe0] sm:$0xff]  ;;  %v8883_v55 = vld [vmem:[%s8838_s29 + $0xe8] sm:$0xff] }
  0x2a   : > { %v8887_v57 = vld [vmem:[%s8838_s29 + $0xf0] sm:$0xff]  ;;  %v8891_v59 = vld [vmem:[%s8838_s29 + $0xf8] sm:$0xff]  ;;  %v8515_v8 = vld [vmem:[%s8838_s29] sm:$0xff] }
  0x2b   : > { %v469_v14 = vadd.f32 %v468_v11, %v374_v10  ;;  %v8516_v10 = vld [vmem:[%s8838_s29 + $0x8] sm:$0xff] }
  0x2d   : > { %v470_v16 = vadd.f32 %v469_v14, %v375_v12  ;;  %v8517_v12 = vld [vmem:[%s8838_s29 + $0x10] sm:$0xff] }
  0x2f   : > { %v471_v18 = vadd.f32 %v470_v16, %v376_v13  ;;  %v8518_v16 = vld [vmem:[%s8838_s29 + $0x18] sm:$0xff] }
  0x31   : > { %v472_v20 = vadd.f32 %v471_v18, %v377_v15  ;;  %v8519_v18 = vld [vmem:[%s8838_s29 + $0x20] sm:$0xff] }
  0x33   : > { %v473_v22 = vadd.f32 %v472_v20, %v378_v17 }
  0x35   : > { %v474_v24 = vadd.f32 %v473_v22, %v379_v19  ;;  %v8520_v22 = vld [vmem:[%s8838_s29 + $0x28] sm:$0xff] }
  0x37   : > { %v475_v26 = vadd.f32 %v474_v24, %v380_v21 }
  0x39   : > { %v476_v28 = vadd.f32 %v475_v26, %v381_v23  ;;  %v8521_v26 = vld [vmem:[%s8838_s29 + $0x30] sm:$0xff] }
  0x3b   : > { %v477_v30 = vadd.f32 %v476_v28, %v382_v25 }
  0x3d   : > { %v478_v32 = vadd.f32 %v477_v30, %v383_v27  ;;  %v8522_v30 = vld [vmem:[%s8838_s29 + $0x38] sm:$0xff] }
  0x3f   : > { %v479_v34 = vadd.f32 %v478_v32, %v384_v29 }
  0x41   : > { %v480_v36 = vadd.f32 %v479_v34, %v385_v31  ;;  %v8523_v34 = vld [vmem:[%s8838_s29 + $0x40] sm:$0xff] }
  0x43   : > { %v481_v38 = vadd.f32 %v480_v36, %v386_v33 }
  0x45   : > { %v482_v40 = vadd.f32 %v481_v38, %v387_v35  ;;  %v8524_v38 = vld [vmem:[%s8838_s29 + $0x48] sm:$0xff] }
  0x47   : > { %v483_v42 = vadd.f32 %v482_v40, %v388_v37 }
  0x49   : > { %v484_v44 = vadd.f32 %v483_v42, %v389_v39  ;;  %v8525_v42 = vld [vmem:[%s8838_s29 + $0x50] sm:$0xff] }
  0x4b   : > { %v485_v46 = vadd.f32 %v484_v44, %v390_v41 }
  0x4d   : > { %v486_v48 = vadd.f32 %v485_v46, %v391_v43 }
  0x4f   : > { %v487_v50 = vadd.f32 %v486_v48, %v8865_v45  ;;  %v8526_v48 = vld [vmem:[%s8838_s29 + $0x58] sm:$0xff] }
  0x51   : > { %v488_v52 = vadd.f32 %v487_v50, %v8868_v47 }
  0x53   : > { %v489_v54 = vadd.f32 %v488_v52, %v8871_v49 }
  0x55   : > { %v490_v56 = vadd.f32 %v489_v54, %v8875_v51 }
  0x57   : > { %v491_v58 = vadd.f32 %v490_v56, %v8879_v53  ;;  %v8527_v56 = vld [vmem:[%s8838_s29 + $0x60] sm:$0xff] }
  0x59   : > { %v492_v60 = vadd.f32 %v491_v58, %v8883_v55 }
  0x5b   : > { %v493_v61 = vadd.f32 %v492_v60, %v8887_v57 }
  0x5d   : > { %v494_v62 = vadd.f32 %v493_v61, %v8891_v59 }
  0x5f   : > { %495 = vadd.xlane.f32.xlu0 %v494_v62  ;;  %v8528_v62 = vld [vmem:[%s8838_s29 + $0x68] sm:$0xff] }
  0xe8   : > { %v496_v63 = vpop.xlane.xlu0 %495 }
  0xe9   : > { %v497_v0 = vrot.slane %v496_v63, 4 }
  0xeb   : > { %v498_v1 = vadd.f32 %v497_v0, %v496_v63 }
  0xed   : > { %v499_v2 = vrot.slane %v498_v1, 2 }
  0xef   : > { %v500_v3 = vadd.f32 %v499_v2, %v498_v1  ;;  %v8529_v2 = vld [vmem:[%s8838_s29 + $0x70] sm:$0xff] }
  0xf1   : > { %v501_v4 = vrot.slane %v500_v3, 1 }
  0xf3   : > { %v502_v5 = vadd.f32 %v501_v4, %v500_v3 }
  0xf5   : > { %7557 = vpush %v502_v5 }
 0x126   : > { %s7558_s30 = spop %7557 }
 0x127   : > { %v504_v6 = vstv %s7558_s30 }
 0x128   : > { %v8896_v7 = vmul.f32 3.0517578e-05, %v504_v6  ;;  %v8530_v6 = vld [vmem:[%s8838_s29 + $0x78] sm:$0xff] }
 0x12a   : > { %v8900_v9 = vsub.f32 %v8515_v8, %v8896_v7  ;;  %v8904_v11 = vsub.f32 %v8516_v10, %v8896_v7  ;;  %v8908_v13 = vsub.f32 %v8517_v12, %v8896_v7  ;;  %v8916_v17 = vsub.f32 %v8518_v16, %v8896_v7 }
 0x12b   : > { %v8920_v19 = vsub.f32 %v8519_v18, %v8896_v7  ;;  %v8926_v23 = vsub.f32 %v8520_v22, %v8896_v7  ;;  %v8932_v27 = vsub.f32 %v8521_v26, %v8896_v7  ;;  %v8938_v31 = vsub.f32 %v8522_v30, %v8896_v7  ;;  %v8534_v30 = vld [vmem:[%s8838_s29 + $0x98] sm:$0xff] }
 0x12c   : > { %v539_v14 = vmul.f32 %v8900_v9, %v8900_v9  ;;  %v540_v15 = vmul.f32 %v8904_v11, %v8904_v11  ;;  %v541_v20 = vmul.f32 %v8908_v13, %v8908_v13  ;;  %v542_v24 = vmul.f32 %v8916_v17, %v8916_v17 }
 0x12d   : > { %v543_v28 = vmul.f32 %v8920_v19, %v8920_v19  ;;  %v544_v32 = vmul.f32 %v8926_v23, %v8926_v23  ;;  %v8944_v35 = vsub.f32 %v8523_v34, %v8896_v7  ;;  %v545_v36 = vmul.f32 %v8932_v27, %v8932_v27 }
 0x12e   : > { %v571_v21 = vadd.f32 %v540_v15, %v539_v14  ;;  %v8950_v39 = vsub.f32 %v8524_v38, %v8896_v7  ;;  %v546_v40 = vmul.f32 %v8938_v31, %v8938_v31  ;;  %v8956_v43 = vsub.f32 %v8525_v42, %v8896_v7  ;;  %v8531_v14 = vld [vmem:[%s8838_s29 + $0x80] sm:$0xff] }
 0x12f   : > { %v547_v44 = vmul.f32 %v8944_v35, %v8944_v35  ;;  %v8962_v50 = vsub.f32 %v8526_v48, %v8896_v7  ;;  %v8968_v58 = vsub.f32 %v8527_v56, %v8896_v7  ;;  %v8974_v63 = vsub.f32 %v8528_v62, %v8896_v7  ;;  %v8537_v48 = vld [vmem:[%s8838_s29 + $0xb0] sm:$0xff] }
 0x130   : > { %v572_v25 = vadd.f32 %v571_v21, %v541_v20  ;;  %v548_v52 = vmul.f32 %v8950_v39, %v8950_v39  ;;  %v549_v60 = vmul.f32 %v8956_v43, %v8956_v43  ;;  %v8980_v3 = vsub.f32 %v8529_v2, %v8896_v7  ;;  %v8532_v20 = vld [vmem:[%s8838_s29 + $0x88] sm:$0xff] }
 0x131   : > { %v550_v0 = vmul.f32 %v8962_v50, %v8962_v50  ;;  %v551_v4 = vmul.f32 %v8968_v58, %v8968_v58  ;;  %v8986_v8 = vsub.f32 %v8530_v6, %v8896_v7  ;;  %v552_v10 = vmul.f32 %v8974_v63, %v8974_v63 }
 0x132   : > { %v573_v29 = vadd.f32 %v572_v25, %v542_v24  ;;  %v8992_v15 = vsub.f32 %v8531_v14, %v8896_v7  ;;  %v553_v16 = vmul.f32 %v8980_v3, %v8980_v3  ;;  %v8998_v21 = vsub.f32 %v8532_v20, %v8896_v7  ;;  %v8533_v25 = vld [vmem:[%s8838_s29 + $0x90] sm:$0xff] }
 0x133   : > { %v554_v22 = vmul.f32 %v8986_v8, %v8986_v8  ;;  %v9004_v26 = vsub.f32 %v8533_v25, %v8896_v7  ;;  %v9064_v20 = vsub.f32 %v8879_v53, %v8896_v7 }
 0x134   : > { %v574_v33 = vadd.f32 %v573_v29, %v543_v28  ;;  %v555_v28 = vmul.f32 %v8992_v15, %v8992_v15 }
 0x135   : > { %v557_v38 = vmul.f32 %v9004_v26, %v9004_v26  ;;  %v567_v53 = vmul.f32 %v9064_v20, %v9064_v20 }
 0x136   : > { %v575_v37 = vadd.f32 %v574_v33, %v544_v32  ;;  %v9010_v32 = vsub.f32 %v8534_v30, %v8896_v7  ;;  %v556_v33 = vmul.f32 %v8998_v21, %v8998_v21  ;;  %v9082_v30 = vsub.f32 %v8891_v59, %v8896_v7  ;;  %v7611_v59 = vld [vmem:[%s12721_s3 + $0x8a4] ss:$48 sps:$4 sm:$0xff]  }
 0x137   : > { %3168 = vmatprep.subr.bf16.mxu1 %v7611_v59  ;;  %v7659_v59 = vld [vmem:[%s12721_s3 + $0xba4] ss:$48 sps:$4 sm:$0xff]  }
 0x138   : > { %v576_v41 = vadd.f32 %v575_v37, %v545_v36  ;;  %v8535_v36 = vld [vmem:[%s8838_s29 + $0xa0] sm:$0xff] }
 0x139   : > { %v9016_v37 = vsub.f32 %v8535_v36, %v8896_v7 }
 0x13a   : > { %v577_v46 = vadd.f32 %v576_v41, %v546_v40  ;;  %v8536_v41 = vld [vmem:[%s8838_s29 + $0xa8] sm:$0xff] }
 0x13b   : > { %v9022_v42 = vsub.f32 %v8536_v41, %v8896_v7  ;;  %v7609_v41 = vld [vmem:[%s12721_s3 + $0x2a4] ss:$48 sps:$4 sm:$0xff]  }
 0x13c   : > { %v578_v54 = vadd.f32 %v577_v46, %v547_v44  ;;  %v558_v44 = vmul.f32 %v9010_v32, %v9010_v32  ;;  %3095 = vmatprep.subr.bf16.mxu0 %v7609_v41  ;;  %v7657_v41 = vld [vmem:[%s12721_s3 + $0x5a4] ss:$48 sps:$4 sm:$0xff]  }
 0x13d   : > { %v560_v62 = vmul.f32 %v9022_v42, %v9022_v42 }
 0x13e   : > { %v579_v61 = vadd.f32 %v578_v54, %v548_v52  ;;  %v9028_v52 = vsub.f32 %v8537_v48, %v8896_v7  ;;  %v559_v54 = vmul.f32 %v9016_v37, %v9016_v37  ;;  %v7617_v48 = vld [vmem:[%s12721_s3 + $0x844] ss:$48 sps:$4 sm:$0xff]  }
 0x140   : > { %v580_v1 = vadd.f32 %v579_v61, %v549_v60  ;;  %v8538_v60 = vld [vmem:[%s8838_s29 + $0xb8] sm:$0xff]  ;;  %v561_v2 = vmul.f32 %v9028_v52, %v9028_v52 }
 0x141   : > { %v9034_v61 = vsub.f32 %v8538_v60, %v8896_v7  ;;  %v7621_v60 = vld [vmem:[%s12721_s3 + $0x1e4] ss:$48 sps:$4 sm:$0xff]  }
 0x142   : > { %v581_v5 = vadd.f32 %v580_v1, %v550_v0  ;;  %v9040_v1 = vsub.f32 %v8865_v45, %v8896_v7 }
 0x143   : > { %v562_v6 = vmul.f32 %v9034_v61, %v9034_v61 }
 0x144   : > { %v582_v12 = vadd.f32 %v581_v5, %v551_v4  ;;  %v9046_v5 = vsub.f32 %v8868_v47, %v8896_v7  ;;  %v563_v45 = vmul.f32 %v9040_v1, %v9040_v1 }
 0x146   : > { %v583_v18 = vadd.f32 %v582_v12, %v552_v10  ;;  %v9052_v12 = vsub.f32 %v8871_v49, %v8896_v7  ;;  %v564_v47 = vmul.f32 %v9046_v5, %v9046_v5 }
 0x148   : > { %v584_v24 = vadd.f32 %v583_v18, %v553_v16  ;;  %v9058_v16 = vsub.f32 %v8875_v51, %v8896_v7  ;;  %v565_v49 = vmul.f32 %v9052_v12, %v9052_v12 }
 0x14a   : > { %v585_v29 = vadd.f32 %v584_v24, %v554_v22  ;;  %v9070_v24 = vsub.f32 %v8883_v55, %v8896_v7  ;;  %v566_v51 = vmul.f32 %v9058_v16, %v9058_v16 }
 0x14c   : > { %v586_v34 = vadd.f32 %v585_v29, %v555_v28  ;;  %v9076_v28 = vsub.f32 %v8887_v57, %v8896_v7  ;;  %v568_v55 = vmul.f32 %v9070_v24, %v9070_v24  ;;  %v570_v57 = vmul.f32 %v9082_v30, %v9082_v30  ;;  %v7613_v7 = vld [vmem:[%s12721_s3 + $0x2a0] ss:$48 sps:$4 sm:$0xff]  }
 0x14d   : > { %3096 = vmatpush1.bf16.msra.mxu0 %v7613_v7  ;;  %v7661_v7 = vld [vmem:[%s12721_s3 + $0x5a0] ss:$48 sps:$4 sm:$0xff]  }
 0x14e   : > { %v587_v40 = vadd.f32 %v586_v34, %v556_v33  ;;  %v569_v34 = vmul.f32 %v9076_v28, %v9076_v28 }
 0x150   : > { %v588_v46 = vadd.f32 %v587_v40, %v557_v38 }
 0x152   : > { %v589_v56 = vadd.f32 %v588_v46, %v558_v44  ;;  %v7614_v44 = vld [vmem:[%s12721_s3 + $0x8a0] ss:$48 sps:$4 sm:$0xff]   ;;  %v7615_v46 = vld [vmem:[%s12721_s3 + $0x244] ss:$48 sps:$4 sm:$0xff]  }
 0x153   : > { %3169 = vmatpush1.bf16.msra.mxu1 %v7614_v44  ;;  %3097 = vmatprep.subr.bf16.mxu0 %v7615_v46  ;;  %v7662_v44 = vld [vmem:[%s12721_s3 + $0xba0] ss:$48 sps:$4 sm:$0xff]   ;;  %v7663_v46 = vld [vmem:[%s12721_s3 + $0x544] ss:$48 sps:$4 sm:$0xff]  }
 0x154   : > { %v590_v0 = vadd.f32 %v589_v56, %v559_v54  ;;  %v7619_v54 = vld [vmem:[%s12721_s3 + $0x240] ss:$48 sps:$4 sm:$0xff]   ;;  %3170 = vmatprep.subr.bf16.mxu1 %v7617_v48  ;;  %v7665_v48 = vld [vmem:[%s12721_s3 + $0xb44] ss:$48 sps:$4 sm:$0xff]  }
 0x155   : > { %v7620_v56 = vld [vmem:[%s12721_s3 + $0x840] ss:$48 sps:$4 sm:$0xff]   ;;  %3098 = vmatpush1.bf16.msra.mxu0 %v7619_v54 }
 0x156   : > { %v591_v4 = vadd.f32 %v590_v0, %v560_v62  ;;  %v7623_v62 = vld [vmem:[%s12721_s3 + $0x7e4] ss:$48 sps:$4 sm:$0xff]   ;;  %v7625_v0 = vld [vmem:[%s12721_s3 + $0x1e0] ss:$48 sps:$4 sm:$0xff]   ;;  %3099 = vmatprep.subr.bf16.mxu0 %v7621_v60 }
 0x157   : > { %3171 = vmatpush1.bf16.msra.mxu1 %v7620_v56  ;;  %v7667_v54 = vld [vmem:[%s12721_s3 + $0x540] ss:$48 sps:$4 sm:$0xff]   ;;  %v7669_v60 = vld [vmem:[%s12721_s3 + $0x4e4] ss:$48 sps:$4 sm:$0xff]  }
 0x158   : > { %v592_v10 = vadd.f32 %v591_v4, %v561_v2  ;;  %v7626_v2 = vld [vmem:[%s12721_s3 + $0x7e0] ss:$48 sps:$4 sm:$0xff]   ;;  %3172 = vmatprep.subr.bf16.mxu1 %v7623_v62  ;;  %v7627_v4 = vld [vmem:[%s12721_s3 + $0x184] ss:$48 sps:$4 sm:$0xff]  }
 0x159   : > { %3100 = vmatpush1.bf16.msra.mxu0 %v7625_v0  ;;  %v7668_v56 = vld [vmem:[%s12721_s3 + $0xb40] ss:$48 sps:$4 sm:$0xff]   ;;  %v7671_v62 = vld [vmem:[%s12721_s3 + $0xae4] ss:$48 sps:$4 sm:$0xff]  }
 0x15a   : > { %v593_v14 = vadd.f32 %v592_v10, %v562_v6  ;;  %v7629_v6 = vld [vmem:[%s12721_s3 + $0x784] ss:$48 sps:$4 sm:$0xff]   ;;  %v7631_v10 = vld [vmem:[%s12721_s3 + $0x180] ss:$48 sps:$4 sm:$0xff]   ;;  %3101 = vmatprep.subr.bf16.mxu0 %v7627_v4 }
 0x15b   : > { %3173 = vmatpush1.bf16.msra.mxu1 %v7626_v2  ;;  %v7673_v0 = vld [vmem:[%s12721_s3 + $0x4e0] ss:$48 sps:$4 sm:$0xff]   ;;  %v7675_v4 = vld [vmem:[%s12721_s3 + $0x484] ss:$48 sps:$4 sm:$0xff]  }
 0x15c   : > { %v594_v18 = vadd.f32 %v593_v14, %v563_v45  ;;  %v7632_v45 = vld [vmem:[%s12721_s3 + $0x780] ss:$48 sps:$4 sm:$0xff]   ;;  %3174 = vmatprep.subr.bf16.mxu1 %v7629_v6  ;;  %v7633_v14 = vld [vmem:[%s12721_s3 + $0x124] ss:$48 sps:$4 sm:$0xff]  }
 0x15d   : > { %3102 = vmatpush1.bf16.msra.mxu0 %v7631_v10  ;;  %v7674_v2 = vld [vmem:[%s12721_s3 + $0xae0] ss:$48 sps:$4 sm:$0xff]   ;;  %v7677_v6 = vld [vmem:[%s12721_s3 + $0xa84] ss:$48 sps:$4 sm:$0xff]  }
 0x15e   : > { %v595_v22 = vadd.f32 %v594_v18, %v564_v47  ;;  %v7635_v47 = vld [vmem:[%s12721_s3 + $0x724] ss:$48 sps:$4 sm:$0xff]   ;;  %v7637_v18 = vld [vmem:[%s12721_s3 + $0x120] ss:$48 sps:$4 sm:$0xff]   ;;  %3103 = vmatprep.subr.bf16.mxu0 %v7633_v14 }
 0x15f   : > { %3175 = vmatpush1.bf16.msra.mxu1 %v7632_v45  ;;  %v7679_v10 = vld [vmem:[%s12721_s3 + $0x480] ss:$48 sps:$4 sm:$0xff]   ;;  %v7681_v14 = vld [vmem:[%s12721_s3 + $0x424] ss:$48 sps:$4 sm:$0xff]  }
 0x160   : > { %v596_v25 = vadd.f32 %v595_v22, %v565_v49  ;;  %v7638_v49 = vld [vmem:[%s12721_s3 + $0x720] ss:$48 sps:$4 sm:$0xff]   ;;  %3176 = vmatprep.subr.bf16.mxu1 %v7635_v47  ;;  %v7639_v22 = vld [vmem:[%s12721_s3 + $0xc4] ss:$48 sps:$4 sm:$0xff]  }
 0x161   : > { %3104 = vmatpush1.bf16.msra.mxu0 %v7637_v18  ;;  %v7680_v45 = vld [vmem:[%s12721_s3 + $0xa80] ss:$48 sps:$4 sm:$0xff]   ;;  %v7683_v47 = vld [vmem:[%s12721_s3 + $0xa24] ss:$48 sps:$4 sm:$0xff]  }
 0x162   : > { %v597_v29 = vadd.f32 %v596_v25, %v566_v51  ;;  %v7641_v51 = vld [vmem:[%s12721_s3 + $0x6c4] ss:$48 sps:$4 sm:$0xff]   ;;  %v7643_v25 = vld [vmem:[%s12721_s3 + $0xc0] ss:$48 sps:$4 sm:$0xff]   ;;  %3105 = vmatprep.subr.bf16.mxu0 %v7639_v22 }
 0x163   : > { %3177 = vmatpush1.bf16.msra.mxu1 %v7638_v49  ;;  %v7685_v18 = vld [vmem:[%s12721_s3 + $0x420] ss:$48 sps:$4 sm:$0xff]   ;;  %v7687_v22 = vld [vmem:[%s12721_s3 + $0x3c4] ss:$48 sps:$4 sm:$0xff]  }
 0x164   : > { %v598_v33 = vadd.f32 %v597_v29, %v567_v53  ;;  %v7644_v53 = vld [vmem:[%s12721_s3 + $0x6c0] ss:$48 sps:$4 sm:$0xff]   ;;  %3178 = vmatprep.subr.bf16.mxu1 %v7641_v51  ;;  %v7645_v29 = vld [vmem:[%s12721_s3 + $0x64] ss:$48 sps:$4 sm:$0xff]  }
 0x165   : > { %3106 = vmatpush1.bf16.msra.mxu0 %v7643_v25  ;;  %v7686_v49 = vld [vmem:[%s12721_s3 + $0xa20] ss:$48 sps:$4 sm:$0xff]   ;;  %v7689_v51 = vld [vmem:[%s12721_s3 + $0x9c4] ss:$48 sps:$4 sm:$0xff]  }
 0x166   : > { %v599_v36 = vadd.f32 %v598_v33, %v568_v55  ;;  %v7647_v55 = vld [vmem:[%s12721_s3 + $0x664] ss:$48 sps:$4 sm:$0xff]   ;;  %v7649_v33 = vld [vmem:[%s12721_s3 + $0x60] ss:$48 sps:$4 sm:$0xff]   ;;  %3107 = vmatprep.subr.bf16.mxu0 %v7645_v29 }
 0x167   : > { %3179 = vmatpush1.bf16.msra.mxu1 %v7644_v53  ;;  %v7691_v25 = vld [vmem:[%s12721_s3 + $0x3c0] ss:$48 sps:$4 sm:$0xff]   ;;  %v7693_v29 = vld [vmem:[%s12721_s3 + $0x364] ss:$48 sps:$4 sm:$0xff]  }
 0x168   : > { %v600_v38 = vadd.f32 %v599_v36, %v569_v34  ;;  %v7650_v34 = vld [vmem:[%s12721_s3 + $0x660] ss:$48 sps:$4 sm:$0xff]   ;;  %3180 = vmatprep.subr.bf16.mxu1 %v7647_v55  ;;  %v7651_v36 = vld [vmem:[%s12721_s3 + $0x4] ss:$48 sps:$4 sm:$0xff]  }
 0x169   : > { %3108 = vmatpush1.bf16.msra.mxu0 %v7649_v33  ;;  %v7692_v53 = vld [vmem:[%s12721_s3 + $0x9c0] ss:$48 sps:$4 sm:$0xff]   ;;  %v7695_v55 = vld [vmem:[%s12721_s3 + $0x964] ss:$48 sps:$4 sm:$0xff]  }
 0x16a   : > { %v601_v40 = vadd.f32 %v600_v38, %v570_v57  ;;  %v7653_v57 = vld [vmem:[%s12721_s3 + $0x604] ss:$48 sps:$4 sm:$0xff]   ;;  %v7655_v38 = vld [vmem:[%s12721_s3] ss:$48 sps:$4 sm:$0xff]   ;;  %3109 = vmatprep.subr.bf16.mxu0 %v7651_v36 }
 0x16b   : > { %3181 = vmatpush1.bf16.msra.mxu1 %v7650_v34  ;;  %v7697_v33 = vld [vmem:[%s12721_s3 + $0x360] ss:$48 sps:$4 sm:$0xff]   ;;  %v7699_v36 = vld [vmem:[%s12721_s3 + $0x304] ss:$48 sps:$4 sm:$0xff]  }
 0x16c   : > { %602 = vadd.xlane.f32.xlu0 %v601_v40  ;;  %v7656_v40 = vld [vmem:[%s12721_s3 + $0x600] ss:$48 sps:$4 sm:$0xff]   ;;  %3182 = vmatprep.subr.bf16.mxu1 %v7653_v57  ;;  %v7701_v57 = vld [vmem:[%s12721_s3 + $0x904] ss:$48 sps:$4 sm:$0xff]  }
 0x16d   : > { %3110 = vmatpush1.bf16.msra.mxu0 %v7655_v38  ;;  %v7698_v34 = vld [vmem:[%s12721_s3 + $0x960] ss:$48 sps:$4 sm:$0xff]  }
 0x16e   : > { %3111 = vmatprep.subr.bf16.mxu0 %v7657_v41  ;;  %v7703_v38 = vld [vmem:[%s12721_s3 + $0x300] ss:$48 sps:$4 sm:$0xff]   ;;  %v7707_v41 = vld [vmem:[%s12721_s3 + $0x2ac] ss:$48 sps:$4 sm:$0xff]  }
 0x16f   : > { %3183 = vmatpush1.bf16.msra.mxu1 %v7656_v40  ;;  %v7704_v40 = vld [vmem:[%s12721_s3 + $0x900] ss:$48 sps:$4 sm:$0xff]  }
 0x170   : > { %3184 = vmatprep.subr.bf16.mxu1 %v7659_v59  ;;  %v7710_v59 = vld [vmem:[%s12721_s3 + $0x8ac] ss:$48 sps:$4 sm:$0xff]  }
 0x171   : > { %3112 = vmatpush2.bf16.msra.mxu0 %v7661_v7 }
 0x172   : > { %3113 = vmatprep.subr.bf16.mxu0 %v7663_v46 }
 0x173   : > { %3185 = vmatpush2.bf16.msra.mxu1 %v7662_v44 }
 0x174   : > { %3186 = vmatprep.subr.bf16.mxu1 %v7665_v48 }
 0x175   : > { %3114 = vmatpush2.bf16.msra.mxu0 %v7667_v54 }
 0x176   : > { %3115 = vmatprep.subr.bf16.mxu0 %v7669_v60 }
 0x177   : > { %3187 = vmatpush2.bf16.msra.mxu1 %v7668_v56 }
 0x178   : > { %3188 = vmatprep.subr.bf16.mxu1 %v7671_v62 }
 0x179   : > { %3116 = vmatpush2.bf16.msra.mxu0 %v7673_v0 }
 0x17a   : > { %3117 = vmatprep.subr.bf16.mxu0 %v7675_v4 }
 0x17b   : > { %3189 = vmatpush2.bf16.msra.mxu1 %v7674_v2 }
 0x17c   : > { %3190 = vmatprep.subr.bf16.mxu1 %v7677_v6 }
 0x17d   : > { %3118 = vmatpush2.bf16.msra.mxu0 %v7679_v10 }
 0x17e   : > { %3119 = vmatprep.subr.bf16.mxu0 %v7681_v14  ;;  %v401_v14 = vld [vmem:[%s12754_s1 + $0x8] sm:$0xff] }
 0x17f   : > { %3191 = vmatpush2.bf16.msra.mxu1 %v7680_v45 }
 0x180   : > { %3192 = vmatprep.subr.bf16.mxu1 %v7683_v47  ;;  %v405_v47 = vld [vmem:[%s12754_s1 + $0x28] sm:$0xff] }
 0x181   : > { %3120 = vmatpush2.bf16.msra.mxu0 %v7685_v18  ;;  %v425_v18 = vld [vmem:[%s12754_s1 + $0xc8] sm:$0xff] }
 0x182   : > { %3121 = vmatprep.subr.bf16.mxu0 %v7687_v22 }
 0x183   : > { %3193 = vmatpush2.bf16.msra.mxu1 %v7686_v49 }
 0x184   : > { %3194 = vmatprep.subr.bf16.mxu1 %v7689_v51 }
 0x185   : > { %3122 = vmatpush2.bf16.msra.mxu0 %v7691_v25 }
 0x186   : > { %3123 = vmatprep.subr.bf16.mxu0 %v7693_v29 }
 0x187   : > { %3195 = vmatpush2.bf16.msra.mxu1 %v7692_v53  ;;  %v433_v53 = vld [vmem:[%s12720_s2 + $0x8] sm:$0xff] }
 0x188   : > { %3196 = vmatprep.subr.bf16.mxu1 %v7695_v55 }
 0x189   : > { %3124 = vmatpush2.bf16.msra.mxu0 %v7697_v33  ;;  %v400_v33 = vld [vmem:[%s12754_s1] sm:$0xff] }
 0x18a   : > { %3125 = vmatprep.subr.bf16.mxu0 %v7699_v36 }
 0x18b   : > { %3197 = vmatpush2.bf16.msra.mxu1 %v7698_v34 }
 0x18c   : > { %3198 = vmatprep.subr.bf16.mxu1 %v7701_v57  ;;  %v439_v57 = vld [vmem:[%s12720_s2 + $0x38] sm:$0xff] }
 0x18d   : > { %3126 = vmatpush2.bf16.msra.mxu0 %v7703_v38 }
 0x18e   : > { %3241 = vmatprep.subr.bf16.mxu0 %v7707_v41 }
 0x18f   : > { %3199 = vmatpush2.bf16.msra.mxu1 %v7704_v40 }
 0x190   : > { %3314 = vmatprep.subr.bf16.mxu1 %v7710_v59 }
 0x1f5   : > { %v603_v7 = vpop.xlane.xlu0 %602 }
 0x1f6   : > { %v604_v44 = vrot.slane %v603_v7, 4 }
 0x1f8   : > { %v605_v46 = vadd.f32 %v604_v44, %v603_v7  ;;  %v404_v44 = vld [vmem:[%s12754_s1 + $0x20] sm:$0xff] }
 0x1fa   : > { %v606_v48 = vrot.slane %v605_v46, 2 }
 0x1fc   : > { %v607_v54 = vadd.f32 %v606_v48, %v605_v46  ;;  %v432_v46 = vld [vmem:[%s12720_s2] sm:$0xff] }
 0x1fe   : > { %v608_v56 = vrot.slane %v607_v54, 1 }
 0x200   : > { %v609_v60 = vadd.f32 %v608_v56, %v607_v54  ;;  %v406_v56 = vld [vmem:[%s12754_s1 + $0x30] sm:$0xff] }
 0x202   : > { %7559 = vpush %v609_v60 }
 0x233   : > { %s7560_s11 = spop %7559 }
 0x234   : > { %v611_v62 = vstv %s7560_s11 }
 0x235   : > { %v612_v0 = vmul.f32 3.0517578e-05, %v611_v62  ;;  %v409_v62 = vld [vmem:[%s12754_s1 + $0x48] sm:$0xff] }
 0x237   : > { %v613_v2 = vadd.f32 1e-05, %v612_v0 }
 0x239   : > { %8377 = vrsqrt.f32 %v613_v2 }
 0x246   : > { %v9288_v4 = vpop.eup %8377 }
 0x247   : > { %v616_v6 = vmul.f32 %v9288_v4, %v8904_v11  ;;  %v640_v10 = vmul.f32 %v9288_v4, %v9046_v5  ;;  %v642_v45 = vmul.f32 %v9288_v4, %v9058_v16  ;;  %v427_v11 = vld [vmem:[%s12754_s1 + $0xd8] sm:$0xff]  ;;  %v429_v5 = vld [vmem:[%s12754_s1 + $0xe8] sm:$0xff]  ;;  %v644_v16 = vmul.f32 %v9288_v4, %v9070_v24 }
 0x248   : > { %v620_v49 = vmul.f32 %v9288_v4, %v8926_v23  ;;  %v9317_v22 = vmul.f32 %v9288_v4, %v9034_v61  ;;  %v9321_v51 = vmul.f32 %v9288_v4, %v9040_v1  ;;  %v9325_v25 = vmul.f32 %v9288_v4, %v9064_v20  ;;  %v437_v23 = vld [vmem:[%s12720_s2 + $0x28] sm:$0xff]  ;;  %v403_v61 = vld [vmem:[%s12754_s1 + $0x18] sm:$0xff] }
 0x249   : > { %v9338_v1 = vmul.f32 %v9288_v4, %v9082_v30  ;;  %v648_v24 = vmul.f32 %v616_v6, %v401_v14  ;;  %v407_v20 = vld [vmem:[%s12754_s1 + $0x38] sm:$0xff]  ;;  %v618_v55 = vmul.f32 %v9288_v4, %v8916_v17  ;;  %v9348_v34 = vmul.f32 %v640_v10, %v425_v18  ;;  %v436_v6 = vld [vmem:[%s12720_s2 + $0x20] sm:$0xff] }
 0x24a   : > { %v652_v29 = vmul.f32 %v620_v49, %v405_v47  ;;  %v9350_v36 = vmul.f32 %v642_v45, %v427_v11  ;;  %v435_v30 = vld [vmem:[%s12720_s2 + $0x18] sm:$0xff]  ;;  %v622_v38 = vmul.f32 %v9288_v4, %v8938_v31  ;;  %v615_v17 = vmul.f32 %v9288_v4, %v8900_v9  ;;  %v402_v31 = vld [vmem:[%s12754_s1 + $0x10] sm:$0xff] }
 0x24b   : > { %v9362_v40 = vmul.f32 %v644_v16, %v429_v5  ;;  %v680_v41 = vadd.f32 %v648_v24, %v433_v53  ;;  %v650_v7 = vmul.f32 %v618_v55, %v403_v61  ;;  %v619_v9 = vmul.f32 %v9288_v4, %v8920_v19  ;;  %v434_v19 = vld [vmem:[%s12720_s2 + $0x10] sm:$0xff]  ;;  %v441_v16 = vld [vmem:[%s12720_s2 + $0x48] sm:$0xff]  ;;  %v415_v61 = vld [vmem:[%s12754_s1 + $0x78] sm:$0xff] }
 0x24c   : > { %v684_v59 = vadd.f32 %v652_v29, %v437_v23  ;;  %v654_v48 = vmul.f32 %v622_v38, %v407_v20  ;;  %v647_v54 = vmul.f32 %v615_v17, %v400_v33  ;;  %v617_v60 = vmul.f32 %v9288_v4, %v8908_v13  ;;  %v413_v13 = vld [vmem:[%s12754_s1 + $0x68] sm:$0xff]  ;;  %v438_v11 = vld [vmem:[%s12720_s2 + $0x30] sm:$0xff] }
 0x24d   : > { %v682_v2 = vadd.f32 %v650_v7, %v435_v30  ;;  %v621_v10 = vmul.f32 %v9288_v4, %v8932_v27  ;;  %v624_v45 = vmul.f32 %v9288_v4, %v8950_v39  ;;  %v651_v47 = vmul.f32 %v619_v9, %v404_v44  ;;  %v411_v27 = vld [vmem:[%s12754_s1 + $0x58] sm:$0xff]  ;;  %v408_v7 = vld [vmem:[%s12754_s1 + $0x40] sm:$0xff] }
 0x24e   : > { %v9383_v0 = vpack.c.bf16 %v684_v59, %v680_v41  ;;  %v686_v14 = vadd.f32 %v654_v48, %v439_v57  ;;  %v679_v18 = vadd.f32 %v647_v54, %v432_v46  ;;  %v649_v5 = vmul.f32 %v617_v60, %v402_v31  ;;  %v7705_v39 = vld [vmem:[%s12721_s3 + $0x2a8] ss:$48 sps:$4 sm:$0xff]   ;;  %v412_v44 = vld [vmem:[%s12754_s1 + $0x60] sm:$0xff]  ;;  %v7713_v31 = vld [vmem:[%s12721_s3 + $0x24c] ss:$48 sps:$4 sm:$0xff]  }
 0x24f   : > { %v653_v49 = vmul.f32 %v621_v10, %v406_v56  ;;  %v628_v53 = vmul.f32 %v9288_v4, %v8974_v63  ;;  %v656_v23 = vmul.f32 %v624_v45, %v409_v62  ;;  %v626_v24 = vmul.f32 %v9288_v4, %v8962_v50  ;;  %v7708_v20 = vld [vmem:[%s12721_s3 + $0x8a8] ss:$48 sps:$4 sm:$0xff]   ;;  %v440_v48 = vld [vmem:[%s12720_s2 + $0x40] sm:$0xff]  ;;  %v410_v56 = vld [vmem:[%s12754_s1 + $0x50] sm:$0xff] }
 0x250   : > { %3127 = vmatprep.mubr.bf16.mxu0 %v9383_v0  ;;  %v9418_v29 = vpack.c.bf16 %v686_v14, %v682_v2  ;;  %v683_v55 = vadd.f32 %v651_v47, %v436_v6  ;;  %v681_v33 = vadd.f32 %v649_v5, %v434_v19  ;;  %v445_v63 = vld [vmem:[%s12720_s2 + $0x68] sm:$0xff]  ;;  %v443_v30 = vld [vmem:[%s12720_s2 + $0x58] sm:$0xff]  ;;  %v630_v57 = vmul.f32 %v9288_v4, %v8986_v8  ;;  %v444_v19 = vld [vmem:[%s12720_s2 + $0x60] sm:$0xff] }
 0x251   : > { %v685_v50 = vadd.f32 %v653_v49, %v438_v11  ;;  %v660_v38 = vmul.f32 %v628_v53, %v413_v13  ;;  %v688_v17 = vadd.f32 %v656_v23, %v441_v16  ;;  %v447_v41 = vld [vmem:[%s12720_s2 + $0x78] sm:$0xff]  ;;  %v658_v59 = vmul.f32 %v626_v24, %v411_v27  ;;  %v442_v14 = vld [vmem:[%s12720_s2 + $0x50] sm:$0xff]  ;;  %v421_v27 = vld [vmem:[%s12754_s1 + $0xa8] sm:$0xff] }
 0x252   : > { %3200 = vmatprep.mubr.bf16.mxu1 %v9418_v29  ;;  %v9441_v46 = vpack.c.bf16 %v683_v55, %v679_v18  ;;  %v662_v8 = vmul.f32 %v630_v57, %v415_v61  ;;  %v623_v9 = vmul.f32 %v9288_v4, %v8944_v35  ;;  %v627_v54 = vmul.f32 %v9288_v4, %v8968_v58  ;;  %v7716_v6 = vld [vmem:[%s12721_s3 + $0x84c] ss:$48 sps:$4 sm:$0xff]   ;;  %v414_v35 = vld [vmem:[%s12754_s1 + $0x70] sm:$0xff]  ;;  %v7711_v5 = vld [vmem:[%s12721_s3 + $0x248] ss:$48 sps:$4 sm:$0xff]  }
 0x253   : > { %v9456_v60 = vpack.c.bf16 %v685_v50, %v681_v33  ;;  %v692_v62 = vadd.f32 %v660_v38, %v445_v63  ;;  %v690_v2 = vadd.f32 %v658_v59, %v443_v30  ;;  %v625_v58 = vmul.f32 %v9288_v4, %v8956_v43  ;;  %v446_v47 = vld [vmem:[%s12720_s2 + $0x70] sm:$0xff]  ;;  %v417_v43 = vld [vmem:[%s12754_s1 + $0x88] sm:$0xff]  ;;  %v423_v49 = vld [vmem:[%s12754_s1 + $0xb8] sm:$0xff] }
 0x254   : > { %3128 = vmatmul.mubr.bf16.vlgmr.msra.gmra.mxu0 %v9441_v46  ;;  %v694_v10 = vadd.f32 %v662_v8, %v447_v41  ;;  %v655_v13 = vmul.f32 %v623_v9, %v408_v7  ;;  %v659_v45 = vmul.f32 %v627_v54, %v412_v44  ;;  %v629_v18 = vmul.f32 %v9288_v4, %v8980_v3  ;;  %v7714_v53 = vld [vmem:[%s12721_s3 + $0x848] ss:$48 sps:$4 sm:$0xff]   ;;  %v7719_v23 = vld [vmem:[%s12721_s3 + $0x1ec] ss:$48 sps:$4 sm:$0xff]   ;;  %v416_v7 = vld [vmem:[%s12754_s1 + $0x80] sm:$0xff] }
 0x255   : > { %3201 = vmatmul.mubr.bf16.vlgmr.msra.gmra.mxu1 %v9456_v60  ;;  %3242 = vmatpush1.bf16.msra.mxu0 %v7705_v39  ;;  %v9482_v11 = vpack.c.bf16 %v692_v62, %v688_v17  ;;  %v657_v16 = vmul.f32 %v625_v58, %v410_v56  ;;  %v632_v3 = vmul.f32 %v9288_v4, %v8998_v21  ;;  %v449_v21 = vld [vmem:[%s12720_s2 + $0x88] sm:$0xff]  ;;  %v419_v57 = vld [vmem:[%s12754_s1 + $0x98] sm:$0xff]  ;;  %v420_v44 = vld [vmem:[%s12754_s1 + $0xa0] sm:$0xff] }
 0x256   : > { %3315 = vmatpush1.bf16.msra.mxu1 %v7708_v20  ;;  %v9495_v39 = vpack.c.bf16 %v694_v10, %v690_v2  ;;  %3243 = vmatprep.subr.bf16.mxu0 %v7713_v31  ;;  %v687_v61 = vadd.f32 %v655_v13, %v440_v48  ;;  %v691_v24 = vadd.f32 %v659_v45, %v444_v19  ;;  %v431_v20 = vld [vmem:[%s12754_s1 + $0xf8] sm:$0xff]  ;;  %v453_v17 = vld [vmem:[%s12720_s2 + $0xa8] sm:$0xff]  ;;  %v448_v19 = vld [vmem:[%s12720_s2 + $0x80] sm:$0xff] }
 0x257   : > { %3137 = vmatprep.mubr.bf16.mxu0 %v9482_v11  ;;  %3316 = vmatprep.subr.bf16.mxu1 %v7716_v6  ;;  %v7722_v55 = vld [vmem:[%s12721_s3 + $0x7ec] ss:$48 sps:$4 sm:$0xff]   ;;  %v661_v33 = vmul.f32 %v629_v18, %v414_v35  ;;  %v689_v63 = vadd.f32 %v657_v16, %v442_v14  ;;  %v636_v30 = vmul.f32 %v9288_v4, %v9022_v42  ;;  %v7717_v8 = vld [vmem:[%s12721_s3 + $0x1e8] ss:$48 sps:$4 sm:$0xff]   ;;  %v418_v45 = vld [vmem:[%s12754_s1 + $0x90] sm:$0xff] }
 0x258   : > { %v455_v50 = vld [vmem:[%s12720_s2 + $0xb8] sm:$0xff]  ;;  %3210 = vmatprep.mubr.bf16.mxu1 %v9495_v39  ;;  %v9522_v38 = vpack.c.bf16 %v691_v24, %v687_v61  ;;  %v664_v41 = vmul.f32 %v632_v3, %v417_v43  ;;  %v634_v42 = vmul.f32 %v9288_v4, %v9010_v32  ;;  %v670_v59 = vmul.f32 %v9317_v22, %v423_v49  ;;  %v422_v14 = vld [vmem:[%s12754_s1 + $0xb0] sm:$0xff]  ;;  %v461_v43 = vld [vmem:[%s12720_s2 + $0xe8] sm:$0xff] }
 0x259   : > { %3244 = vmatpush1.bf16.msra.mxu0 %v7711_v5  ;;  %v7720_v31 = vld [vmem:[%s12721_s3 + $0x7e8] ss:$48 sps:$4 sm:$0xff]   ;;  %v693_v32 = vadd.f32 %v661_v33, %v446_v47  ;;  %v668_v48 = vmul.f32 %v636_v30, %v421_v27  ;;  %v631_v9 = vmul.f32 %v9288_v4, %v8992_v15  ;;  %v635_v54 = vmul.f32 %v9288_v4, %v9016_v37  ;;  %v7725_v6 = vld [vmem:[%s12721_s3 + $0x18c] ss:$48 sps:$4 sm:$0xff]   ;;  %v452_v15 = vld [vmem:[%s12720_s2 + $0xa0] sm:$0xff] }
 0x25a   : > { %v451_v22 = vld [vmem:[%s12720_s2 + $0x98] sm:$0xff]  ;;  %3317 = vmatpush1.bf16.msra.mxu1 %v7714_v53  ;;  %3245 = vmatprep.subr.bf16.mxu0 %v7719_v23  ;;  %v696_v56 = vadd.f32 %v664_v41, %v449_v21  ;;  %v666_v62 = vmul.f32 %v634_v42, %v419_v57  ;;  %v702_v2 = vadd.f32 %v670_v59, %v455_v50  ;;  %v457_v47 = vld [vmem:[%s12720_s2 + $0xc8] sm:$0xff]  ;;  %v450_v61 = vld [vmem:[%s12720_s2 + $0x90] sm:$0xff] }
 0x25b   : > { %3318 = vmatprep.subr.bf16.mxu1 %v7722_v55  ;;  %v9558_v35 = vpack.c.bf16 %v693_v32, %v689_v63  ;;  %v700_v37 = vadd.f32 %v668_v48, %v453_v17  ;;  %v7728_v58 = vld [vmem:[%s12721_s3 + $0x78c] ss:$48 sps:$4 sm:$0xff]   ;;  %v663_v10 = vmul.f32 %v631_v9, %v416_v7  ;;  %v667_v13 = vmul.f32 %v635_v54, %v420_v44  ;;  %v7723_v53 = vld [vmem:[%s12721_s3 + $0x188] ss:$48 sps:$4 sm:$0xff]   ;;  %v428_v63 = vld [vmem:[%s12754_s1 + $0xe0] sm:$0xff] }
 0x25c   : > { %v459_v18 = vld [vmem:[%s12720_s2 + $0xd8] sm:$0xff]  ;;  %v678_v5 = vmul.f32 %v9338_v1, %v431_v20  ;;  %3138 = vmatmul.mubr.bf16.gmra.mxu0 %v9522_v38  ;;  %v698_v16 = vadd.f32 %v666_v62, %v451_v22  ;;  %v633_v27 = vmul.f32 %v9288_v4, %v9004_v26  ;;  %v637_v3 = vmul.f32 %v9288_v4, %v9028_v52  ;;  %v454_v26 = vld [vmem:[%s12720_s2 + $0xb0] sm:$0xff]  ;;  %v424_v17 = vld [vmem:[%s12754_s1 + $0xc0] sm:$0xff] }
 0x25d   : > { %3211 = vmatmul.mubr.bf16.gmra.mxu1 %v9558_v35  ;;  %3246 = vmatpush1.bf16.msra.mxu0 %v7717_v8  ;;  %v9585_v49 = vpack.c.bf16 %v700_v37, %v696_v56  ;;  %v695_v23 = vadd.f32 %v663_v10, %v448_v19  ;;  %v699_v1 = vadd.f32 %v667_v13, %v452_v15  ;;  %v463_v52 = vld [vmem:[%s12720_s2 + $0xf8] sm:$0xff]  ;;  %v426_v41 = vld [vmem:[%s12754_s1 + $0xd0] sm:$0xff]  ;;  %v456_v54 = vld [vmem:[%s12720_s2 + $0xc0] sm:$0xff] }
 0x25e   : > { %3319 = vmatpush1.bf16.msra.mxu1 %v7720_v31  ;;  %v9599_v24 = vpack.c.bf16 %v702_v2, %v698_v16  ;;  %3247 = vmatprep.subr.bf16.mxu0 %v7725_v6  ;;  %v7726_v21 = vld [vmem:[%s12721_s3 + $0x788] ss:$48 sps:$4 sm:$0xff]   ;;  %v7731_v20 = vld [vmem:[%s12721_s3 + $0x12c] ss:$48 sps:$4 sm:$0xff]   ;;  %v665_v55 = vmul.f32 %v633_v27, %v418_v45  ;;  %v669_v33 = vmul.f32 %v637_v3, %v422_v14  ;;  %v462_v56 = vld [vmem:[%s12720_s2 + $0xf0] sm:$0xff] }
 0x25f   : > { %v641_v30 = vmul.f32 %v9288_v4, %v9052_v12  ;;  %v645_v57 = vmul.f32 %v9288_v4, %v9076_v28  ;;  %3147 = vmatprep.mubr.bf16.mxu0 %v9585_v49  ;;  %3320 = vmatprep.subr.bf16.mxu1 %v7728_v58  ;;  %v7734_v50 = vld [vmem:[%s12721_s3 + $0x72c] ss:$48 sps:$4 sm:$0xff]   ;;  %v430_v12 = vld [vmem:[%s12754_s1 + $0xf0] sm:$0xff]  ;;  %v704_v28 = vadd.f32 %v9348_v34, %v457_v47  ;;  %v7729_v8 = vld [vmem:[%s12721_s3 + $0x128] ss:$48 sps:$4 sm:$0xff]  }
 0x260   : > { %v708_v4 = vadd.f32 %v9362_v40, %v461_v43  ;;  %3220 = vmatprep.mubr.bf16.mxu1 %v9599_v24  ;;  %v697_v42 = vadd.f32 %v665_v55, %v450_v61  ;;  %v701_v59 = vadd.f32 %v669_v33, %v454_v26  ;;  %v706_v7 = vadd.f32 %v9350_v36, %v459_v18  ;;  %v7732_v34 = vld [vmem:[%s12721_s3 + $0x728] ss:$48 sps:$4 sm:$0xff]   ;;  %v460_v36 = vld [vmem:[%s12720_s2 + $0xe0] sm:$0xff]  ;;  %v7740_v2 = vld [vmem:[%s12721_s3 + $0x6cc] ss:$48 sps:$4 sm:$0xff]  }
 0x261   : > { %v710_v44 = vadd.f32 %v678_v5, %v463_v52  ;;  %3248 = vmatpush1.bf16.msra.mxu0 %v7723_v53  ;;  %v675_v31 = vmul.f32 %v9325_v25, %v428_v63  ;;  %v9638_v40 = vpack.c.bf16 %v699_v1, %v695_v23  ;;  %v671_v32 = vmul.f32 %v9321_v51, %v424_v17  ;;  %v7737_v25 = vld [vmem:[%s12721_s3 + $0xcc] ss:$48 sps:$4 sm:$0xff]   ;;  %v458_v51 = vld [vmem:[%s12720_s2 + $0xd0] sm:$0xff]  ;;  %v7735_v19 = vld [vmem:[%s12721_s3 + $0xc8] ss:$48 sps:$4 sm:$0xff]  }
 0x262   : > { %3321 = vmatpush1.bf16.msra.mxu1 %v7726_v21  ;;  %3249 = vmatprep.subr.bf16.mxu0 %v7731_v20  ;;  %v673_v48 = vmul.f32 %v641_v30, %v426_v41  ;;  %v677_v22 = vmul.f32 %v645_v57, %v430_v12  ;;  %v9644_v9 = vpack.c.bf16 %v701_v59, %v697_v42  ;;  %v7738_v37 = vld [vmem:[%s12721_s3 + $0x6c8] ss:$48 sps:$4 sm:$0xff]   ;;  %v7743_v58 = vld [vmem:[%s12721_s3 + $0x6c] ss:$48 sps:$4 sm:$0xff]  }
 0x263   : > { %3322 = vmatprep.subr.bf16.mxu1 %v7734_v50  ;;  %v9658_v62 = vpack.c.bf16 %v708_v4, %v704_v28  ;;  %v9664_v6 = vpack.c.bf16 %v710_v44, %v706_v7  ;;  %v707_v15 = vadd.f32 %v675_v31, %v460_v36  ;;  %v703_v10 = vadd.f32 %v671_v32, %v456_v54  ;;  %v7746_v14 = vld [vmem:[%s12721_s3 + $0x66c] ss:$48 sps:$4 sm:$0xff]   ;;  %v7741_v47 = vld [vmem:[%s12721_s3 + $0x68] ss:$48 sps:$4 sm:$0xff]  }
 0x264   : > { %3148 = vmatmul.mubr.bf16.gmra.mxu0 %v9638_v40  ;;  %v705_v13 = vadd.f32 %v673_v48, %v458_v51  ;;  %v709_v45 = vadd.f32 %v677_v22, %v462_v56  ;;  %v7744_v18 = vld [vmem:[%s12721_s3 + $0x668] ss:$48 sps:$4 sm:$0xff]   ;;  %v7749_v16 = vld [vmem:[%s12721_s3 + $0xc] ss:$48 sps:$4 sm:$0xff]   ;;  %v7803_v56 = vld [vmem:[%s12721_s3 + $0x2b4] ss:$48 sps:$4 sm:$0xff]  }
 0x265   : > { %3221 = vmatmul.mubr.bf16.gmra.mxu1 %v9644_v9  ;;  %3250 = vmatpush1.bf16.msra.mxu0 %v7729_v8  ;;  %v9687_v43 = vpack.c.bf16 %v707_v15, %v703_v10  ;;  %v7752_v27 = vld [vmem:[%s12721_s3 + $0x60c] ss:$48 sps:$4 sm:$0xff]   ;;  %v7747_v3 = vld [vmem:[%s12721_s3 + $0x8] ss:$48 sps:$4 sm:$0xff]   ;;  %v7804_v15 = vld [vmem:[%s12721_s3 + $0x8b0] ss:$48 sps:$4 sm:$0xff]  }
 0x266   : > { %3323 = vmatpush1.bf16.msra.mxu1 %v7732_v34  ;;  %3157 = vmatprep.mubr.bf16.mxu0 %v9658_v62  ;;  %v9689_v5 = vpack.c.bf16 %v709_v45, %v705_v13  ;;  %v7750_v53 = vld [vmem:[%s12721_s3 + $0x608] ss:$48 sps:$4 sm:$0xff]   ;;  %v7755_v23 = vld [vmem:[%s12721_s3 + $0x5ac] ss:$48 sps:$4 sm:$0xff]   ;;  %v7807_v10 = vld [vmem:[%s12721_s3 + $0x250] ss:$48 sps:$4 sm:$0xff]  }
 0x267   : > { %3230 = vmatprep.mubr.bf16.mxu1 %v9664_v6  ;;  %3251 = vmatprep.subr.bf16.mxu0 %v7737_v25  ;;  %v7758_v1 = vld [vmem:[%s12721_s3 + $0xbac] ss:$48 sps:$4 sm:$0xff]   ;;  %v7753_v61 = vld [vmem:[%s12721_s3 + $0x5a8] ss:$48 sps:$4 sm:$0xff]   ;;  %v7810_v13 = vld [vmem:[%s12721_s3 + $0x850] ss:$48 sps:$4 sm:$0xff]  }
 0x268   : > { %3324 = vmatprep.subr.bf16.mxu1 %v7740_v2  ;;  %v7756_v26 = vld [vmem:[%s12721_s3 + $0xba8] ss:$48 sps:$4 sm:$0xff]   ;;  %v7761_v52 = vld [vmem:[%s12721_s3 + $0x54c] ss:$48 sps:$4 sm:$0xff]   ;;  %v7806_v2 = vld [vmem:[%s12721_s3 + $0x8b4] ss:$48 sps:$4 sm:$0xff]  }
 0x269   : > { %3252 = vmatpush1.bf16.msra.mxu0 %v7735_v19  ;;  %v7764_v21 = vld [vmem:[%s12721_s3 + $0xb4c] ss:$48 sps:$4 sm:$0xff]   ;;  %v7759_v20 = vld [vmem:[%s12721_s3 + $0x548] ss:$48 sps:$4 sm:$0xff]   ;;  %v7801_v19 = vld [vmem:[%s12721_s3 + $0x2b0] ss:$48 sps:$4 sm:$0xff]  }
 0x26a   : > { %3325 = vmatpush1.bf16.msra.mxu1 %v7738_v37  ;;  %3253 = vmatprep.subr.bf16.mxu0 %v7743_v58  ;;  %v7762_v55 = vld [vmem:[%s12721_s3 + $0xb48] ss:$48 sps:$4 sm:$0xff]   ;;  %v7767_v33 = vld [vmem:[%s12721_s3 + $0x4ec] ss:$48 sps:$4 sm:$0xff]   ;;  %v7809_v37 = vld [vmem:[%s12721_s3 + $0x254] ss:$48 sps:$4 sm:$0xff]  }
 0x26b   : > { %3326 = vmatprep.subr.bf16.mxu1 %v7746_v14  ;;  %v7770_v63 = vld [vmem:[%s12721_s3 + $0xaec] ss:$48 sps:$4 sm:$0xff]   ;;  %v7765_v30 = vld [vmem:[%s12721_s3 + $0x4e8] ss:$48 sps:$4 sm:$0xff]   ;;  %v7812_v58 = vld [vmem:[%s12721_s3 + $0x854] ss:$48 sps:$4 sm:$0xff]  }
 0x26c   : > { %3158 = vmatmul.mubr.bf16.gmra.mxu0 %v9687_v43  ;;  %v7768_v57 = vld [vmem:[%s12721_s3 + $0xae8] ss:$48 sps:$4 sm:$0xff]   ;;  %v7773_v50 = vld [vmem:[%s12721_s3 + $0x48c] ss:$48 sps:$4 sm:$0xff]   ;;  %v7815_v45 = vld [vmem:[%s12721_s3 + $0x1f4] ss:$48 sps:$4 sm:$0xff]  }
 0x26d   : > { %3231 = vmatmul.mubr.bf16.gmra.mxu1 %v9689_v5  ;;  %3254 = vmatpush1.bf16.msra.mxu0 %v7741_v47  ;;  %v7776_v17 = vld [vmem:[%s12721_s3 + $0xa8c] ss:$48 sps:$4 sm:$0xff]   ;;  %v7771_v41 = vld [vmem:[%s12721_s3 + $0x488] ss:$48 sps:$4 sm:$0xff]   ;;  %v7818_v14 = vld [vmem:[%s12721_s3 + $0x7f4] ss:$48 sps:$4 sm:$0xff]  }
 0x26e   : > { %3327 = vmatpush1.bf16.msra.mxu1 %v7744_v18  ;;  %3273 = vmatprep.mubr.bf16.mxu0 %v9383_v0  ;;  %v7774_v12 = vld [vmem:[%s12721_s3 + $0xa88] ss:$48 sps:$4 sm:$0xff]   ;;  %v7779_v28 = vld [vmem:[%s12721_s3 + $0x42c] ss:$48 sps:$4 sm:$0xff]   ;;  %v7813_v47 = vld [vmem:[%s12721_s3 + $0x1f0] ss:$48 sps:$4 sm:$0xff]  }
 0x26f   : > { %3346 = vmatprep.mubr.bf16.mxu1 %v9418_v29  ;;  %3255 = vmatprep.subr.bf16.mxu0 %v7749_v16  ;;  %v7782_v4 = vld [vmem:[%s12721_s3 + $0xa2c] ss:$48 sps:$4 sm:$0xff]   ;;  %v7777_v42 = vld [vmem:[%s12721_s3 + $0x428] ss:$48 sps:$4 sm:$0xff]   ;;  %v7816_v18 = vld [vmem:[%s12721_s3 + $0x7f0] ss:$48 sps:$4 sm:$0xff]  }
 0x270   : > { %3328 = vmatprep.subr.bf16.mxu1 %v7752_v27  ;;  %v7780_v59 = vld [vmem:[%s12721_s3 + $0xa28] ss:$48 sps:$4 sm:$0xff]   ;;  %v7785_v7 = vld [vmem:[%s12721_s3 + $0x3cc] ss:$48 sps:$4 sm:$0xff]   ;;  %v7821_v16 = vld [vmem:[%s12721_s3 + $0x194] ss:$48 sps:$4 sm:$0xff]  }
 0x271   : > { %3256 = vmatpush1.bf16.msra.mxu0 %v7747_v3  ;;  %v7788_v44 = vld [vmem:[%s12721_s3 + $0x9cc] ss:$48 sps:$4 sm:$0xff]   ;;  %v7783_v8 = vld [vmem:[%s12721_s3 + $0x3c8] ss:$48 sps:$4 sm:$0xff]   ;;  %v7824_v27 = vld [vmem:[%s12721_s3 + $0x794] ss:$48 sps:$4 sm:$0xff]  }
 0x272   : > { %3329 = vmatpush1.bf16.msra.mxu1 %v7750_v53  ;;  %3257 = vmatprep.subr.bf16.mxu0 %v7755_v23  ;;  %v7786_v31 = vld [vmem:[%s12721_s3 + $0x9c8] ss:$48 sps:$4 sm:$0xff]   ;;  %v7791_v34 = vld [vmem:[%s12721_s3 + $0x36c] ss:$48 sps:$4 sm:$0xff]   ;;  %v7819_v3 = vld [vmem:[%s12721_s3 + $0x190] ss:$48 sps:$4 sm:$0xff]  }
 0x273   : > { %3330 = vmatprep.subr.bf16.mxu1 %v7758_v1  ;;  %v7794_v32 = vld [vmem:[%s12721_s3 + $0x96c] ss:$48 sps:$4 sm:$0xff]   ;;  %v7789_v36 = vld [vmem:[%s12721_s3 + $0x368] ss:$48 sps:$4 sm:$0xff]   ;;  %v7822_v53 = vld [vmem:[%s12721_s3 + $0x790] ss:$48 sps:$4 sm:$0xff]  }
 0x274   : > { %v7792_v48 = vld [vmem:[%s12721_s3 + $0x968] ss:$48 sps:$4 sm:$0xff]   ;;  %v7797_v22 = vld [vmem:[%s12721_s3 + $0x30c] ss:$48 sps:$4 sm:$0xff]   ;;  %v7827_v23 = vld [vmem:[%s12721_s3 + $0x134] ss:$48 sps:$4 sm:$0xff]  }
 0x275   : > { %3258 = vmatpush2.bf16.msra.mxu0 %v7753_v61  ;;  %v7800_v25 = vld [vmem:[%s12721_s3 + $0x90c] ss:$48 sps:$4 sm:$0xff]   ;;  %v7795_v54 = vld [vmem:[%s12721_s3 + $0x308] ss:$48 sps:$4 sm:$0xff]   ;;  %v7830_v1 = vld [vmem:[%s12721_s3 + $0x734] ss:$48 sps:$4 sm:$0xff]  }
 0x276   : > { %3331 = vmatpush2.bf16.msra.mxu1 %v7756_v26  ;;  %3259 = vmatprep.subr.bf16.mxu0 %v7761_v52  ;;  %v7798_v51 = vld [vmem:[%s12721_s3 + $0x908] ss:$48 sps:$4 sm:$0xff]   ;;  %v7825_v61 = vld [vmem:[%s12721_s3 + $0x130] ss:$48 sps:$4 sm:$0xff]   ;;  %v7833_v52 = vld [vmem:[%s12721_s3 + $0xd4] ss:$48 sps:$4 sm:$0xff]  }
 0x277   : > { %3332 = vmatprep.subr.bf16.mxu1 %v7764_v21  ;;  %v7828_v26 = vld [vmem:[%s12721_s3 + $0x730] ss:$48 sps:$4 sm:$0xff]   ;;  %v7836_v21 = vld [vmem:[%s12721_s3 + $0x6d4] ss:$48 sps:$4 sm:$0xff]  }
 0x279   : > { %3260 = vmatpush2.bf16.msra.mxu0 %v7759_v20  ;;  %v7831_v20 = vld [vmem:[%s12721_s3 + $0xd0] ss:$48 sps:$4 sm:$0xff]  }
 0x27a   : > { %3333 = vmatpush2.bf16.msra.mxu1 %v7762_v55  ;;  %3261 = vmatprep.subr.bf16.mxu0 %v7767_v33  ;;  %v7834_v55 = vld [vmem:[%s12721_s3 + $0x6d0] ss:$48 sps:$4 sm:$0xff]   ;;  %v7839_v33 = vld [vmem:[%s12721_s3 + $0x74] ss:$48 sps:$4 sm:$0xff]  }
 0x27b   : > { %3334 = vmatprep.subr.bf16.mxu1 %v7770_v63  ;;  %v7842_v63 = vld [vmem:[%s12721_s3 + $0x674] ss:$48 sps:$4 sm:$0xff]  }
 0x27d   : > { %3262 = vmatpush2.bf16.msra.mxu0 %v7765_v30  ;;  %v7837_v30 = vld [vmem:[%s12721_s3 + $0x70] ss:$48 sps:$4 sm:$0xff]  }
 0x27e   : > { %3335 = vmatpush2.bf16.msra.mxu1 %v7768_v57  ;;  %3263 = vmatprep.subr.bf16.mxu0 %v7773_v50  ;;  %v7840_v57 = vld [vmem:[%s12721_s3 + $0x670] ss:$48 sps:$4 sm:$0xff]   ;;  %v7845_v50 = vld [vmem:[%s12721_s3 + $0x14] ss:$48 sps:$4 sm:$0xff]  }
 0x27f   : > { %3336 = vmatprep.subr.bf16.mxu1 %v7776_v17  ;;  %v7848_v17 = vld [vmem:[%s12721_s3 + $0x614] ss:$48 sps:$4 sm:$0xff]  }
 0x281   : > { %3264 = vmatpush2.bf16.msra.mxu0 %v7771_v41  ;;  %v7843_v41 = vld [vmem:[%s12721_s3 + $0x10] ss:$48 sps:$4 sm:$0xff]  }
 0x282   : > { %3337 = vmatpush2.bf16.msra.mxu1 %v7774_v12  ;;  %3265 = vmatprep.subr.bf16.mxu0 %v7779_v28  ;;  %v7846_v12 = vld [vmem:[%s12721_s3 + $0x610] ss:$48 sps:$4 sm:$0xff]   ;;  %v7851_v28 = vld [vmem:[%s12721_s3 + $0x5b4] ss:$48 sps:$4 sm:$0xff]  }
 0x283   : > { %3338 = vmatprep.subr.bf16.mxu1 %v7782_v4  ;;  %v7854_v4 = vld [vmem:[%s12721_s3 + $0xbb4] ss:$48 sps:$4 sm:$0xff]  }
 0x285   : > { %3266 = vmatpush2.bf16.msra.mxu0 %v7777_v42  ;;  %v7849_v42 = vld [vmem:[%s12721_s3 + $0x5b0] ss:$48 sps:$4 sm:$0xff]  }
 0x286   : > { %3339 = vmatpush2.bf16.msra.mxu1 %v7780_v59  ;;  %3267 = vmatprep.subr.bf16.mxu0 %v7785_v7  ;;  %v7852_v59 = vld [vmem:[%s12721_s3 + $0xbb0] ss:$48 sps:$4 sm:$0xff]   ;;  %v7857_v7 = vld [vmem:[%s12721_s3 + $0x554] ss:$48 sps:$4 sm:$0xff]  }
 0x287   : > { %3340 = vmatprep.subr.bf16.mxu1 %v7788_v44  ;;  %v7860_v44 = vld [vmem:[%s12721_s3 + $0xb54] ss:$48 sps:$4 sm:$0xff]  }
 0x289   : > { %3268 = vmatpush2.bf16.msra.mxu0 %v7783_v8  ;;  %v7855_v8 = vld [vmem:[%s12721_s3 + $0x550] ss:$48 sps:$4 sm:$0xff]  }
 0x28a   : > { %3341 = vmatpush2.bf16.msra.mxu1 %v7786_v31  ;;  %3269 = vmatprep.subr.bf16.mxu0 %v7791_v34  ;;  %v7858_v31 = vld [vmem:[%s12721_s3 + $0xb50] ss:$48 sps:$4 sm:$0xff]   ;;  %v7863_v34 = vld [vmem:[%s12721_s3 + $0x4f4] ss:$48 sps:$4 sm:$0xff]  }
 0x28b   : > { %3342 = vmatprep.subr.bf16.mxu1 %v7794_v32  ;;  %v7866_v32 = vld [vmem:[%s12721_s3 + $0xaf4] ss:$48 sps:$4 sm:$0xff]  }
 0x28d   : > { %3270 = vmatpush2.bf16.msra.mxu0 %v7789_v36  ;;  %v7861_v36 = vld [vmem:[%s12721_s3 + $0x4f0] ss:$48 sps:$4 sm:$0xff]  }
 0x28e   : > { %3343 = vmatpush2.bf16.msra.mxu1 %v7792_v48  ;;  %3271 = vmatprep.subr.bf16.mxu0 %v7797_v22  ;;  %v7864_v48 = vld [vmem:[%s12721_s3 + $0xaf0] ss:$48 sps:$4 sm:$0xff]   ;;  %v7869_v22 = vld [vmem:[%s12721_s3 + $0x494] ss:$48 sps:$4 sm:$0xff]  }
 0x28f   : > { %3344 = vmatprep.subr.bf16.mxu1 %v7800_v25  ;;  %v7872_v25 = vld [vmem:[%s12721_s3 + $0xa94] ss:$48 sps:$4 sm:$0xff]  }
 0x291   : > { %3272 = vmatpush2.bf16.msra.mxu0 %v7795_v54  ;;  %v7867_v54 = vld [vmem:[%s12721_s3 + $0x490] ss:$48 sps:$4 sm:$0xff]  }
 0x292   : > { %3345 = vmatpush2.bf16.msra.mxu1 %v7798_v51  ;;  %3387 = vmatprep.subr.bf16.mxu0 %v7803_v56  ;;  %v7870_v51 = vld [vmem:[%s12721_s3 + $0xa90] ss:$48 sps:$4 sm:$0xff]   ;;  %v7875_v56 = vld [vmem:[%s12721_s3 + $0x434] ss:$48 sps:$4 sm:$0xff]  }
 0x293   : > { %3460 = vmatprep.subr.bf16.mxu1 %v7806_v2  ;;  %v7878_v2 = vld [vmem:[%s12721_s3 + $0xa34] ss:$48 sps:$4 sm:$0xff]  }
 0x294   : > { %3274 = vmatmul.mubr.bf16.vlgmr.msra.gmra.mxu0 %v9441_v46 }
 0x295   : > { %3347 = vmatmul.mubr.bf16.vlgmr.msra.gmra.mxu1 %v9456_v60  ;;  %3283 = vmatprep.mubr.bf16.mxu0 %v9482_v11 }
 0x296   : > { %3356 = vmatprep.mubr.bf16.mxu1 %v9495_v39  ;;  %3388 = vmatpush1.bf16.msra.mxu0 %v7801_v19  ;;  %v7873_v19 = vld [vmem:[%s12721_s3 + $0x430] ss:$48 sps:$4 sm:$0xff]  }
 0x297   : > { %3461 = vmatpush1.bf16.msra.mxu1 %v7804_v15  ;;  %3389 = vmatprep.subr.bf16.mxu0 %v7809_v37  ;;  %v7876_v15 = vld [vmem:[%s12721_s3 + $0xa30] ss:$48 sps:$4 sm:$0xff]   ;;  %v7881_v37 = vld [vmem:[%s12721_s3 + $0x3d4] ss:$48 sps:$4 sm:$0xff]  }
 0x298   : > { %3462 = vmatprep.subr.bf16.mxu1 %v7812_v58  ;;  %v7884_v58 = vld [vmem:[%s12721_s3 + $0x9d4] ss:$48 sps:$4 sm:$0xff]  }
 0x29a   : > { %3390 = vmatpush1.bf16.msra.mxu0 %v7807_v10  ;;  %v7879_v10 = vld [vmem:[%s12721_s3 + $0x3d0] ss:$48 sps:$4 sm:$0xff]  }
 0x29b   : > { %3463 = vmatpush1.bf16.msra.mxu1 %v7810_v13  ;;  %3391 = vmatprep.subr.bf16.mxu0 %v7815_v45  ;;  %v7882_v13 = vld [vmem:[%s12721_s3 + $0x9d0] ss:$48 sps:$4 sm:$0xff]   ;;  %v7887_v45 = vld [vmem:[%s12721_s3 + $0x374] ss:$48 sps:$4 sm:$0xff]  }
 0x29c   : > { %3284 = vmatmul.mubr.bf16.gmra.mxu0 %v9522_v38  ;;  %3464 = vmatprep.subr.bf16.mxu1 %v7818_v14  ;;  %v7890_v14 = vld [vmem:[%s12721_s3 + $0x974] ss:$48 sps:$4 sm:$0xff]  }
 0x29d   : > { %3357 = vmatmul.mubr.bf16.gmra.mxu1 %v9558_v35  ;;  %3293 = vmatprep.mubr.bf16.mxu0 %v9585_v49 }
 0x29e   : > { %3366 = vmatprep.mubr.bf16.mxu1 %v9599_v24  ;;  %3392 = vmatpush1.bf16.msra.mxu0 %v7813_v47  ;;  %v7885_v47 = vld [vmem:[%s12721_s3 + $0x370] ss:$48 sps:$4 sm:$0xff]  }
 0x29f   : > { %3465 = vmatpush1.bf16.msra.mxu1 %v7816_v18  ;;  %3393 = vmatprep.subr.bf16.mxu0 %v7821_v16  ;;  %v7888_v18 = vld [vmem:[%s12721_s3 + $0x970] ss:$48 sps:$4 sm:$0xff]   ;;  %v7893_v16 = vld [vmem:[%s12721_s3 + $0x314] ss:$48 sps:$4 sm:$0xff]  }
 0x2a0   : > { %3466 = vmatprep.subr.bf16.mxu1 %v7824_v27  ;;  %v7896_v27 = vld [vmem:[%s12721_s3 + $0x914] ss:$48 sps:$4 sm:$0xff]  }
 0x2a2   : > { %3394 = vmatpush1.bf16.msra.mxu0 %v7819_v3  ;;  %v7891_v3 = vld [vmem:[%s12721_s3 + $0x310] ss:$48 sps:$4 sm:$0xff]  }
 0x2a3   : > { %3467 = vmatpush1.bf16.msra.mxu1 %v7822_v53  ;;  %3395 = vmatprep.subr.bf16.mxu0 %v7827_v23  ;;  %v7894_v53 = vld [vmem:[%s12721_s3 + $0x910] ss:$48 sps:$4 sm:$0xff]   ;;  %v7899_v23 = vld [vmem:[%s12721_s3 + $0x2bc] ss:$48 sps:$4 sm:$0xff]  }
 0x2a4   : > { %3294 = vmatmul.mubr.bf16.gmra.mxu0 %v9638_v40  ;;  %3468 = vmatprep.subr.bf16.mxu1 %v7830_v1  ;;  %v7902_v1 = vld [vmem:[%s12721_s3 + $0x8bc] ss:$48 sps:$4 sm:$0xff]  }
 0x2a5   : > { %3367 = vmatmul.mubr.bf16.gmra.mxu1 %v9644_v9  ;;  %3303 = vmatprep.mubr.bf16.mxu0 %v9658_v62 }
 0x2a6   : > { %3376 = vmatprep.mubr.bf16.mxu1 %v9664_v6  ;;  %3396 = vmatpush1.bf16.msra.mxu0 %v7825_v61  ;;  %v7897_v61 = vld [vmem:[%s12721_s3 + $0x2b8] ss:$48 sps:$4 sm:$0xff]  }
 0x2a7   : > { %3469 = vmatpush1.bf16.msra.mxu1 %v7828_v26  ;;  %3397 = vmatprep.subr.bf16.mxu0 %v7833_v52  ;;  %v7900_v26 = vld [vmem:[%s12721_s3 + $0x8b8] ss:$48 sps:$4 sm:$0xff]   ;;  %v7905_v52 = vld [vmem:[%s12721_s3 + $0x25c] ss:$48 sps:$4 sm:$0xff]  }
 0x2a8   : > { %3470 = vmatprep.subr.bf16.mxu1 %v7836_v21  ;;  %v7908_v21 = vld [vmem:[%s12721_s3 + $0x85c] ss:$48 sps:$4 sm:$0xff]  }
 0x2aa   : > { %3398 = vmatpush1.bf16.msra.mxu0 %v7831_v20  ;;  %v7903_v20 = vld [vmem:[%s12721_s3 + $0x258] ss:$48 sps:$4 sm:$0xff]  }
 0x2ab   : > { %3471 = vmatpush1.bf16.msra.mxu1 %v7834_v55  ;;  %3399 = vmatprep.subr.bf16.mxu0 %v7839_v33  ;;  %v7906_v55 = vld [vmem:[%s12721_s3 + $0x858] ss:$48 sps:$4 sm:$0xff]   ;;  %v7911_v33 = vld [vmem:[%s12721_s3 + $0x1fc] ss:$48 sps:$4 sm:$0xff]  }
 0x2ac   : > { %3304 = vmatmul.mubr.bf16.gmra.mxu0 %v9687_v43  ;;  %3472 = vmatprep.subr.bf16.mxu1 %v7842_v63  ;;  %v7914_v63 = vld [vmem:[%s12721_s3 + $0x7fc] ss:$48 sps:$4 sm:$0xff]  }
 0x2ad   : > { %3377 = vmatmul.mubr.bf16.gmra.mxu1 %v9689_v5  ;;  %3419 = vmatprep.mubr.bf16.mxu0 %v9383_v0 }
 0x2ae   : > { %3400 = vmatpush1.bf16.msra.mxu0 %v7837_v30  ;;  %3492 = vmatprep.mubr.bf16.mxu1 %v9418_v29  ;;  %v7909_v30 = vld [vmem:[%s12721_s3 + $0x1f8] ss:$48 sps:$4 sm:$0xff]  }
 0x2af   : > { %3473 = vmatpush1.bf16.msra.mxu1 %v7840_v57  ;;  %3401 = vmatprep.subr.bf16.mxu0 %v7845_v50  ;;  %v7912_v57 = vld [vmem:[%s12721_s3 + $0x7f8] ss:$48 sps:$4 sm:$0xff]   ;;  %v7917_v50 = vld [vmem:[%s12721_s3 + $0x19c] ss:$48 sps:$4 sm:$0xff]  }
 0x2b0   : > { %3474 = vmatprep.subr.bf16.mxu1 %v7848_v17  ;;  %v7920_v17 = vld [vmem:[%s12721_s3 + $0x79c] ss:$48 sps:$4 sm:$0xff]  }
 0x2b2   : > { %3402 = vmatpush1.bf16.msra.mxu0 %v7843_v41  ;;  %v7915_v41 = vld [vmem:[%s12721_s3 + $0x198] ss:$48 sps:$4 sm:$0xff]  }
 0x2b3   : > { %3475 = vmatpush1.bf16.msra.mxu1 %v7846_v12  ;;  %3403 = vmatprep.subr.bf16.mxu0 %v7851_v28  ;;  %v7918_v12 = vld [vmem:[%s12721_s3 + $0x798] ss:$48 sps:$4 sm:$0xff]   ;;  %v7923_v28 = vld [vmem:[%s12721_s3 + $0x13c] ss:$48 sps:$4 sm:$0xff]  }
 0x2b4   : > { %3476 = vmatprep.subr.bf16.mxu1 %v7854_v4  ;;  %v7926_v4 = vld [vmem:[%s12721_s3 + $0x73c] ss:$48 sps:$4 sm:$0xff]  }
 0x2b6   : > { %3404 = vmatpush2.bf16.msra.mxu0 %v7849_v42  ;;  %v7921_v42 = vld [vmem:[%s12721_s3 + $0x138] ss:$48 sps:$4 sm:$0xff]  }
 0x2b7   : > { %3477 = vmatpush2.bf16.msra.mxu1 %v7852_v59  ;;  %3405 = vmatprep.subr.bf16.mxu0 %v7857_v7  ;;  %v7924_v59 = vld [vmem:[%s12721_s3 + $0x738] ss:$48 sps:$4 sm:$0xff]   ;;  %v7929_v7 = vld [vmem:[%s12721_s3 + $0xdc] ss:$48 sps:$4 sm:$0xff]  }
 0x2b8   : > { %3478 = vmatprep.subr.bf16.mxu1 %v7860_v44  ;;  %v7932_v44 = vld [vmem:[%s12721_s3 + $0x6dc] ss:$48 sps:$4 sm:$0xff]  }
 0x2ba   : > { %3406 = vmatpush2.bf16.msra.mxu0 %v7855_v8  ;;  %v7927_v8 = vld [vmem:[%s12721_s3 + $0xd8] ss:$48 sps:$4 sm:$0xff]  }
 0x2bb   : > { %3479 = vmatpush2.bf16.msra.mxu1 %v7858_v31  ;;  %3407 = vmatprep.subr.bf16.mxu0 %v7863_v34  ;;  %v7930_v31 = vld [vmem:[%s12721_s3 + $0x6d8] ss:$48 sps:$4 sm:$0xff]   ;;  %v7935_v34 = vld [vmem:[%s12721_s3 + $0x7c] ss:$48 sps:$4 sm:$0xff]  }
 0x2bc   : > { %3480 = vmatprep.subr.bf16.mxu1 %v7866_v32  ;;  %v7938_v32 = vld [vmem:[%s12721_s3 + $0x67c] ss:$48 sps:$4 sm:$0xff]  }
 0x2be   : > { %3408 = vmatpush2.bf16.msra.mxu0 %v7861_v36  ;;  %v7933_v36 = vld [vmem:[%s12721_s3 + $0x78] ss:$48 sps:$4 sm:$0xff]  }
 0x2bf   : > { %3481 = vmatpush2.bf16.msra.mxu1 %v7864_v48  ;;  %3409 = vmatprep.subr.bf16.mxu0 %v7869_v22  ;;  %v7936_v48 = vld [vmem:[%s12721_s3 + $0x678] ss:$48 sps:$4 sm:$0xff]   ;;  %v7941_v22 = vld [vmem:[%s12721_s3 + $0x1c] ss:$48 sps:$4 sm:$0xff]  }
 0x2c0   : > { %3482 = vmatprep.subr.bf16.mxu1 %v7872_v25  ;;  %v7944_v25 = vld [vmem:[%s12721_s3 + $0x61c] ss:$48 sps:$4 sm:$0xff]  }
 0x2c2   : > { %3410 = vmatpush2.bf16.msra.mxu0 %v7867_v54  ;;  %v7939_v54 = vld [vmem:[%s12721_s3 + $0x18] ss:$48 sps:$4 sm:$0xff]  }
 0x2c3   : > { %3483 = vmatpush2.bf16.msra.mxu1 %v7870_v51  ;;  %3411 = vmatprep.subr.bf16.mxu0 %v7875_v56  ;;  %v7942_v51 = vld [vmem:[%s12721_s3 + $0x618] ss:$48 sps:$4 sm:$0xff]   ;;  %v7947_v56 = vld [vmem:[%s12721_s3 + $0x5bc] ss:$48 sps:$4 sm:$0xff]  }
 0x2c4   : > { %3484 = vmatprep.subr.bf16.mxu1 %v7878_v2  ;;  %v7950_v2 = vld [vmem:[%s12721_s3 + $0xbbc] ss:$48 sps:$4 sm:$0xff]  }
 0x2c6   : > { %3412 = vmatpush2.bf16.msra.mxu0 %v7873_v19  ;;  %v7945_v19 = vld [vmem:[%s12721_s3 + $0x5b8] ss:$48 sps:$4 sm:$0xff]  }
 0x2c7   : > { %3485 = vmatpush2.bf16.msra.mxu1 %v7876_v15  ;;  %3413 = vmatprep.subr.bf16.mxu0 %v7881_v37  ;;  %v7948_v15 = vld [vmem:[%s12721_s3 + $0xbb8] ss:$48 sps:$4 sm:$0xff]   ;;  %v7953_v37 = vld [vmem:[%s12721_s3 + $0x55c] ss:$48 sps:$4 sm:$0xff]  }
 0x2c8   : > { %3486 = vmatprep.subr.bf16.mxu1 %v7884_v58  ;;  %v7956_v58 = vld [vmem:[%s12721_s3 + $0xb5c] ss:$48 sps:$4 sm:$0xff]  }
 0x2ca   : > { %3414 = vmatpush2.bf16.msra.mxu0 %v7879_v10  ;;  %v7951_v10 = vld [vmem:[%s12721_s3 + $0x558] ss:$48 sps:$4 sm:$0xff]  }
 0x2cb   : > { %3487 = vmatpush2.bf16.msra.mxu1 %v7882_v13  ;;  %3415 = vmatprep.subr.bf16.mxu0 %v7887_v45  ;;  %v7954_v13 = vld [vmem:[%s12721_s3 + $0xb58] ss:$48 sps:$4 sm:$0xff]   ;;  %v7959_v45 = vld [vmem:[%s12721_s3 + $0x4fc] ss:$48 sps:$4 sm:$0xff]  }
 0x2cc   : > { %3488 = vmatprep.subr.bf16.mxu1 %v7890_v14  ;;  %v7962_v14 = vld [vmem:[%s12721_s3 + $0xafc] ss:$48 sps:$4 sm:$0xff]  }
 0x2ce   : > { %3416 = vmatpush2.bf16.msra.mxu0 %v7885_v47  ;;  %v7957_v47 = vld [vmem:[%s12721_s3 + $0x4f8] ss:$48 sps:$4 sm:$0xff]  }
 0x2cf   : > { %3489 = vmatpush2.bf16.msra.mxu1 %v7888_v18  ;;  %3417 = vmatprep.subr.bf16.mxu0 %v7893_v16  ;;  %v7960_v18 = vld [vmem:[%s12721_s3 + $0xaf8] ss:$48 sps:$4 sm:$0xff]   ;;  %v7965_v16 = vld [vmem:[%s12721_s3 + $0x49c] ss:$48 sps:$4 sm:$0xff]  }
 0x2d0   : > { %3490 = vmatprep.subr.bf16.mxu1 %v7896_v27  ;;  %v7968_v27 = vld [vmem:[%s12721_s3 + $0xa9c] ss:$48 sps:$4 sm:$0xff]  }
 0x2d2   : > { %3418 = vmatpush2.bf16.msra.mxu0 %v7891_v3  ;;  %v7963_v3 = vld [vmem:[%s12721_s3 + $0x498] ss:$48 sps:$4 sm:$0xff]  }
 0x2d3   : > { %3491 = vmatpush2.bf16.msra.mxu1 %v7894_v53  ;;  %3533 = vmatprep.subr.bf16.mxu0 %v7899_v23  ;;  %v7966_v53 = vld [vmem:[%s12721_s3 + $0xa98] ss:$48 sps:$4 sm:$0xff]   ;;  %v7971_v23 = vld [vmem:[%s12721_s3 + $0x43c] ss:$48 sps:$4 sm:$0xff]  }
 0x2d4   : > { %3606 = vmatprep.subr.bf16.mxu1 %v7902_v1  ;;  %v7974_v1 = vld [vmem:[%s12721_s3 + $0xa3c] ss:$48 sps:$4 sm:$0xff]  }
 0x2d5   : > { %3420 = vmatmul.mubr.bf16.vlgmr.msra.gmra.mxu0 %v9441_v46 }
 0x2d6   : > { %3493 = vmatmul.mubr.bf16.vlgmr.msra.gmra.mxu1 %v9456_v60  ;;  %3429 = vmatprep.mubr.bf16.mxu0 %v9482_v11 }
 0x2d7   : > { %3502 = vmatprep.mubr.bf16.mxu1 %v9495_v39  ;;  %3534 = vmatpush1.bf16.msra.mxu0 %v7897_v61  ;;  %v7969_v61 = vld [vmem:[%s12721_s3 + $0x438] ss:$48 sps:$4 sm:$0xff]  }
 0x2d8   : > { %3607 = vmatpush1.bf16.msra.mxu1 %v7900_v26  ;;  %3535 = vmatprep.subr.bf16.mxu0 %v7905_v52  ;;  %v7972_v26 = vld [vmem:[%s12721_s3 + $0xa38] ss:$48 sps:$4 sm:$0xff]   ;;  %v7977_v52 = vld [vmem:[%s12721_s3 + $0x3dc] ss:$48 sps:$4 sm:$0xff]  }
 0x2d9   : > { %3608 = vmatprep.subr.bf16.mxu1 %v7908_v21  ;;  %v7980_v21 = vld [vmem:[%s12721_s3 + $0x9dc] ss:$48 sps:$4 sm:$0xff]  }
 0x2db   : > { %3536 = vmatpush1.bf16.msra.mxu0 %v7903_v20  ;;  %v1115_v20 = vlaneseq }
 0x2dc   : > { %3609 = vmatpush1.bf16.msra.mxu1 %v7906_v55  ;;  %3537 = vmatprep.subr.bf16.mxu0 %v7911_v33  ;;  %v7975_v55 = vld [vmem:[%s12721_s3 + $0x3d8] ss:$48 sps:$4 sm:$0xff]  }
 0x2dd   : > { %3430 = vmatmul.mubr.bf16.gmra.mxu0 %v9522_v38  ;;  %3610 = vmatprep.subr.bf16.mxu1 %v7914_v63  ;;  %v7978_v33 = vld [vmem:[%s12721_s3 + $0x9d8] ss:$48 sps:$4 sm:$0xff]   ;;  %v7983_v63 = vld [vmem:[%s12721_s3 + $0x37c] ss:$48 sps:$4 sm:$0xff]  }
 0x2de   : > { %3503 = vmatmul.mubr.bf16.gmra.mxu1 %v9558_v35  ;;  %3439 = vmatprep.mubr.bf16.mxu0 %v9585_v49 }
 0x2df   : > { %3512 = vmatprep.mubr.bf16.mxu1 %v9599_v24  ;;  %3538 = vmatpush1.bf16.msra.mxu0 %v7909_v30  ;;  %v7986_v30 = vld [vmem:[%s12721_s3 + $0x97c] ss:$48 sps:$4 sm:$0xff]  }
 0x2e0   : > { %3611 = vmatpush1.bf16.msra.mxu1 %v7912_v57  ;;  %3539 = vmatprep.subr.bf16.mxu0 %v7917_v50  ;;  %v10201_v57 = vshrl.u32 %v1115_v20, 7  ;;  %v7981_v50 = vld [vmem:[%s12721_s3 + $0x378] ss:$48 sps:$4 sm:$0xff]  }
 0x2e1   : > { %3612 = vmatprep.subr.bf16.mxu1 %v7920_v17  ;;  %v7984_v17 = vld [vmem:[%s12721_s3 + $0x978] ss:$48 sps:$4 sm:$0xff]  }
 0x2e3   : > { %3540 = vmatpush1.bf16.msra.mxu0 %v7915_v41  ;;  %v7989_v41 = vld [vmem:[%s12721_s3 + $0x31c] ss:$48 sps:$4 sm:$0xff]  }
 0x2e4   : > { %3613 = vmatpush1.bf16.msra.mxu1 %v7918_v12  ;;  %3541 = vmatprep.subr.bf16.mxu0 %v7923_v28  ;;  %v7992_v12 = vld [vmem:[%s12721_s3 + $0x91c] ss:$48 sps:$4 sm:$0xff]   ;;  %v10216_v28 = vsub.s32 0, %v10201_v57 }
 0x2e5   : > { %3440 = vmatmul.mubr.bf16.gmra.mxu0 %v9638_v40  ;;  %3614 = vmatprep.subr.bf16.mxu1 %v7926_v4  ;;  %v10221_v4 = vld [vmem:[%s12722_s4] sm:$0xff] }
 0x2e6   : > { %3513 = vmatmul.mubr.bf16.gmra.mxu1 %v9644_v9  ;;  %3449 = vmatprep.mubr.bf16.mxu0 %v9658_v62  ;;  %12755 = vst [vmem:[#allocation9_spill] sm:$0xff] %v10216_v28 }
 0x2e7   : > { %3522 = vmatprep.mubr.bf16.mxu1 %v9664_v6  ;;  %3542 = vmatpush1.bf16.msra.mxu0 %v7921_v42  ;;  %v7987_v42 = vld [vmem:[%s12721_s3 + $0x318] ss:$48 sps:$4 sm:$0xff]  }
 0x2e8   : > { %3615 = vmatpush1.bf16.msra.mxu1 %v7924_v59  ;;  %3543 = vmatprep.subr.bf16.mxu0 %v7929_v7  ;;  %v10227_v59 = vsub.s32 1, %v10201_v57  ;;  %v7990_v7 = vld [vmem:[%s12721_s3 + $0x918] ss:$48 sps:$4 sm:$0xff]  }
 0x2e9   : > { %3616 = vmatprep.subr.bf16.mxu1 %v7932_v44  ;;  %v7995_v44 = vld [vmem:[%s12721_s3 + $0x2c4] ss:$48 sps:$4 sm:$0xff]  }
 0x2ea   : > { %12756 = vst [vmem:[#allocation10_spill] sm:$0xff] %v10227_v59 }
 0x2eb   : > { %3544 = vmatpush1.bf16.msra.mxu0 %v7927_v8  ;;  %v7998_v8 = vld [vmem:[%s12721_s3 + $0x8c4] ss:$48 sps:$4 sm:$0xff]  }
 0x2ec   : > { %3617 = vmatpush1.bf16.msra.mxu1 %v7930_v31  ;;  %3545 = vmatprep.subr.bf16.mxu0 %v7935_v34  ;;  %v10240_v31 = vrot.slane %v10221_v4, %v10216_v28  ;;  %v10244_v34 = vrot.slane %v10221_v4, %v10227_v59 }
 0x2ed   : > { %3450 = vmatmul.mubr.bf16.gmra.mxu0 %v9687_v43  ;;  %3618 = vmatprep.subr.bf16.mxu1 %v7938_v32  ;;  %v7993_v32 = vld [vmem:[%s12721_s3 + $0x2c0] ss:$48 sps:$4 sm:$0xff]  }
 0x2ee   : > { %3523 = vmatmul.mubr.bf16.gmra.mxu1 %v9689_v5  ;;  %3565 = vmatprep.mubr.bf16.mxu0 %v9383_v0 }
 0x2ef   : > { %3546 = vmatpush1.bf16.msra.mxu0 %v7933_v36  ;;  %3638 = vmatprep.mubr.bf16.mxu1 %v9418_v29 }
 0x2f0   : > { %3619 = vmatpush1.bf16.msra.mxu1 %v7936_v48  ;;  %3547 = vmatprep.subr.bf16.mxu0 %v7941_v22  ;;  %v7996_v48 = vld [vmem:[%s12721_s3 + $0x8c0] ss:$48 sps:$4 sm:$0xff]  }
 0x2f1   : > { %3620 = vmatprep.subr.bf16.mxu1 %v7944_v25 }
 0x2f3   : > { %3548 = vmatpush1.bf16.msra.mxu0 %v7939_v54  ;;  %v8001_v54 = vld [vmem:[%s12721_s3 + $0x264] ss:$48 sps:$4 sm:$0xff]  }
 0x2f4   : > { %3621 = vmatpush1.bf16.msra.mxu1 %v7942_v51  ;;  %3549 = vmatprep.subr.bf16.mxu0 %v7947_v56  ;;  %v8004_v56 = vld [vmem:[%s12721_s3 + $0x864] ss:$48 sps:$4 sm:$0xff]  }
 0x2f5   : > { %3622 = vmatprep.subr.bf16.mxu1 %v7950_v2 }
 0x2f7   : > { %3550 = vmatpush2.bf16.msra.mxu0 %v7945_v19 }
 0x2f8   : > { %3623 = vmatpush2.bf16.msra.mxu1 %v7948_v15  ;;  %3551 = vmatprep.subr.bf16.mxu0 %v7953_v37  ;;  %v7999_v37 = vld [vmem:[%s12721_s3 + $0x260] ss:$48 sps:$4 sm:$0xff]  }
 0x2f9   : > { %3624 = vmatprep.subr.bf16.mxu1 %v7956_v58 }
 0x2fb   : > { %3552 = vmatpush2.bf16.msra.mxu0 %v7951_v10 }
 0x2fc   : > { %3625 = vmatpush2.bf16.msra.mxu1 %v7954_v13  ;;  %3553 = vmatprep.subr.bf16.mxu0 %v7959_v45  ;;  %v8002_v13 = vld [vmem:[%s12721_s3 + $0x860] ss:$48 sps:$4 sm:$0xff]  }
 0x2fd   : > { %3626 = vmatprep.subr.bf16.mxu1 %v7962_v14 }
 0x2ff   : > { %3554 = vmatpush2.bf16.msra.mxu0 %v7957_v47  ;;  %v8007_v47 = vld [vmem:[%s12721_s3 + $0x204] ss:$48 sps:$4 sm:$0xff]  }
 0x300   : > { %3627 = vmatpush2.bf16.msra.mxu1 %v7960_v18  ;;  %3555 = vmatprep.subr.bf16.mxu0 %v7965_v16  ;;  %v8010_v16 = vld [vmem:[%s12721_s3 + $0x804] ss:$48 sps:$4 sm:$0xff]  }
 0x301   : > { %3628 = vmatprep.subr.bf16.mxu1 %v7968_v27 }
 0x303   : > { %3556 = vmatpush2.bf16.msra.mxu0 %v7963_v3 }
 0x304   : > { %3629 = vmatpush2.bf16.msra.mxu1 %v7966_v53  ;;  %3557 = vmatprep.subr.bf16.mxu0 %v7971_v23  ;;  %v8005_v53 = vld [vmem:[%s12721_s3 + $0x200] ss:$48 sps:$4 sm:$0xff]  }
 0x305   : > { %3630 = vmatprep.subr.bf16.mxu1 %v7974_v1 }
 0x307   : > { %3558 = vmatpush2.bf16.msra.mxu0 %v7969_v61  ;;  %v8008_v61 = vld [vmem:[%s12721_s3 + $0x800] ss:$48 sps:$4 sm:$0xff]  }
 0x308   : > { %3631 = vmatpush2.bf16.msra.mxu1 %v7972_v26  ;;  %3559 = vmatprep.subr.bf16.mxu0 %v7977_v52 }
 0x309   : > { %3632 = vmatprep.subr.bf16.mxu1 %v7980_v21  ;;  %v8013_v21 = vld [vmem:[%s12721_s3 + $0x1a4] ss:$48 sps:$4 sm:$0xff]  }
 0x30b   : > { %3560 = vmatpush2.bf16.msra.mxu0 %v7975_v55  ;;  %v8016_v55 = vld [vmem:[%s12721_s3 + $0x7a4] ss:$48 sps:$4 sm:$0xff]  }
 0x30c   : > { %3633 = vmatpush2.bf16.msra.mxu1 %v7978_v33  ;;  %3561 = vmatprep.subr.bf16.mxu0 %v7983_v63 }
 0x30d   : > { %3634 = vmatprep.subr.bf16.mxu1 %v7986_v30 }
 0x30f   : > { %3562 = vmatpush2.bf16.msra.mxu0 %v7981_v50  ;;  %v8011_v50 = vld [vmem:[%s12721_s3 + $0x1a0] ss:$48 sps:$4 sm:$0xff]  }
 0x310   : > { %3635 = vmatpush2.bf16.msra.mxu1 %v7984_v17  ;;  %3563 = vmatprep.subr.bf16.mxu0 %v7989_v41 }
 0x311   : > { %3636 = vmatprep.subr.bf16.mxu1 %v7992_v12  ;;  %v8014_v12 = vld [vmem:[%s12721_s3 + $0x7a0] ss:$48 sps:$4 sm:$0xff]  }
 0x313   : > { %3564 = vmatpush2.bf16.msra.mxu0 %v7987_v42 }
 0x314   : > { %3637 = vmatpush2.bf16.msra.mxu1 %v7990_v7  ;;  %3679 = vmatprep.subr.bf16.mxu0 %v7995_v44  ;;  %v3129_v36 = vpop.f32.mrf.mxu0  ;;  %v8019_v44 = vld [vmem:[%s12721_s3 + $0x144] ss:$48 sps:$4 sm:$0xff]  }
 0x315   : > { %3752 = vmatprep.subr.bf16.mxu1 %v7998_v8  ;;  %v3130_v22 = vadd.f32 %v3129_v36, %v10240_v31  ;;  %v3202_v25 = vpop.f32.mrf.mxu1 }
 0x316   : > { %3566 = vmatmul.mubr.bf16.vlgmr.msra.gmra.mxu0 %v9441_v46  ;;  %v3131_v51 = vpop.f32.mrf.mxu0 }
 0x317   : > { %3639 = vmatmul.mubr.bf16.vlgmr.msra.gmra.mxu1 %v9456_v60  ;;  %v10261_v2 = vadd.f32 %v3202_v25, %v3130_v22  ;;  %3575 = vmatprep.mubr.bf16.mxu0 %v9482_v11  ;;  %v3132_v19 = vadd.f32 %v3131_v51, %v10244_v34  ;;  %v3204_v15 = vpop.f32.mrf.mxu1  ;;  %v8017_v22 = vld [vmem:[%s12721_s3 + $0x140] ss:$48 sps:$4 sm:$0xff]  }
 0x318   : > { %3648 = vmatprep.mubr.bf16.mxu1 %v9495_v39  ;;  %3680 = vmatpush1.bf16.msra.mxu0 %v7993_v32  ;;  %v3133_v58 = vpop.f32.mrf.mxu0  ;;  %v8022_v32 = vld [vmem:[%s12721_s3 + $0x744] ss:$48 sps:$4 sm:$0xff]   ;;  %v8020_v51 = vld [vmem:[%s12721_s3 + $0x740] ss:$48 sps:$4 sm:$0xff]  }
 0x319   : > { %3753 = vmatpush1.bf16.msra.mxu1 %v7996_v48  ;;  %v10269_v10 = vadd.f32 %v3204_v15, %v3132_v19  ;;  %3681 = vmatprep.subr.bf16.mxu0 %v8001_v54  ;;  %v3134_v45 = vadd.f32 %v3133_v58, %v10240_v31  ;;  %v3206_v14 = vpop.f32.mrf.mxu1  ;;  %v8025_v15 = vld [vmem:[%s12721_s3 + $0xe4] ss:$48 sps:$4 sm:$0xff]   ;;  %v8110_v54 = vld [vmem:[%s12721_s3 + $0x7a8] ss:$48 sps:$4 sm:$0xff]  }
 0x31a   : > { %3754 = vmatprep.subr.bf16.mxu1 %v8004_v56  ;;  %v10278_v18 = vpop.f32.mrf.mxu0  ;;  %v8028_v58 = vld [vmem:[%s12721_s3 + $0x6e4] ss:$48 sps:$4 sm:$0xff]  }
 0x31b   : > { %v10283_v27 = vadd.f32 %v3206_v14, %v3134_v45  ;;  %v10285_v3 = vpop.f32.mrf.mxu1 }
 0x31c   : > { %3682 = vmatpush1.bf16.msra.mxu0 %v7999_v37  ;;  %v3139_v23 = vpop.f32.mrf.mxu0 }
 0x31d   : > { %3755 = vmatpush1.bf16.msra.mxu1 %v8002_v13  ;;  %3683 = vmatprep.subr.bf16.mxu0 %v8007_v47  ;;  %v3140_v26 = vadd.f32 %v3139_v23, %v10240_v31  ;;  %v3212_v52 = vpop.f32.mrf.mxu1  ;;  %v8023_v47 = vld [vmem:[%s12721_s3 + $0xe0] ss:$48 sps:$4 sm:$0xff]  }
 0x31e   : > { %3576 = vmatmul.mubr.bf16.gmra.mxu0 %v9522_v38  ;;  %3756 = vmatprep.subr.bf16.mxu1 %v8010_v16  ;;  %v3141_v20 = vpop.f32.mrf.mxu0  ;;  %v8026_v23 = vld [vmem:[%s12721_s3 + $0x6e0] ss:$48 sps:$4 sm:$0xff]  }
 0x31f   : > { %3649 = vmatmul.mubr.bf16.gmra.mxu1 %v9558_v35  ;;  %v10304_v33 = vadd.f32 %v3212_v52, %v3140_v26  ;;  %3585 = vmatprep.mubr.bf16.mxu0 %v9585_v49  ;;  %v3142_v63 = vadd.f32 %v3141_v20, %v10244_v34  ;;  %v3214_v30 = vpop.f32.mrf.mxu1  ;;  %v8031_v52 = vld [vmem:[%s12721_s3 + $0x84] ss:$48 sps:$4 sm:$0xff]  }
 0x320   : > { %3658 = vmatprep.mubr.bf16.mxu1 %v9599_v24  ;;  %3684 = vmatpush1.bf16.msra.mxu0 %v8005_v53  ;;  %v3143_v17 = vpop.f32.mrf.mxu0  ;;  %v8034_v20 = vld [vmem:[%s12721_s3 + $0x684] ss:$48 sps:$4 sm:$0xff]  }
 0x321   : > { %3757 = vmatpush1.bf16.msra.mxu1 %v8008_v61  ;;  %v10312_v41 = vadd.f32 %v3214_v30, %v3142_v63  ;;  %3685 = vmatprep.subr.bf16.mxu0 %v8013_v21  ;;  %v3144_v42 = vadd.f32 %v3143_v17, %v10240_v31  ;;  %v3216_v7 = vpop.f32.mrf.mxu1  ;;  %v8029_v30 = vld [vmem:[%s12721_s3 + $0x80] ss:$48 sps:$4 sm:$0xff]   ;;  %v8109_v17 = vld [vmem:[%s12721_s3 + $0x1ac] ss:$48 sps:$4 sm:$0xff]  }
 0x322   : > { %3758 = vmatprep.subr.bf16.mxu1 %v8016_v55  ;;  %v10321_v8 = vpop.f32.mrf.mxu0 }
 0x323   : > { %v10326_v36 = vadd.f32 %v3216_v7, %v3144_v42  ;;  %v10328_v48 = vpop.f32.mrf.mxu1 }
 0x324   : > { %3686 = vmatpush1.bf16.msra.mxu0 %v8011_v50  ;;  %v3149_v25 = vpop.f32.mrf.mxu0 }
 0x325   : > { %3759 = vmatpush1.bf16.msra.mxu1 %v8014_v12  ;;  %3687 = vmatprep.subr.bf16.mxu0 %v8019_v44  ;;  %v3150_v56 = vadd.f32 %v3149_v25, %v10240_v31  ;;  %v3222_v19 = vpop.f32.mrf.mxu1  ;;  %v8032_v12 = vld [vmem:[%s12721_s3 + $0x680] ss:$48 sps:$4 sm:$0xff]   ;;  %v8037_v44 = vld [vmem:[%s12721_s3 + $0x24] ss:$48 sps:$4 sm:$0xff]  }
 0x326   : > { %3586 = vmatmul.mubr.bf16.gmra.mxu0 %v9638_v40  ;;  %3760 = vmatprep.subr.bf16.mxu1 %v8022_v32  ;;  %v3151_v37 = vpop.f32.mrf.mxu0 }
 0x327   : > { %3659 = vmatmul.mubr.bf16.gmra.mxu1 %v9644_v9  ;;  %v10347_v13 = vadd.f32 %v3222_v19, %v3150_v56  ;;  %3595 = vmatprep.mubr.bf16.mxu0 %v9658_v62  ;;  %v3152_v45 = vadd.f32 %v3151_v37, %v10244_v34  ;;  %v3224_v14 = vpop.f32.mrf.mxu1  ;;  %v8035_v19 = vld [vmem:[%s12721_s3 + $0x20] ss:$48 sps:$4 sm:$0xff]  }
 0x328   : > { %3668 = vmatprep.mubr.bf16.mxu1 %v9664_v6  ;;  %3688 = vmatpush1.bf16.msra.mxu0 %v8017_v22  ;;  %v3153_v16 = vpop.f32.mrf.mxu0  ;;  %v8040_v22 = vld [vmem:[%s12721_s3 + $0x624] ss:$48 sps:$4 sm:$0xff]  }
 0x329   : > { %3761 = vmatpush1.bf16.msra.mxu1 %v8020_v51  ;;  %v10355_v53 = vadd.f32 %v3224_v14, %v3152_v45  ;;  %3689 = vmatprep.subr.bf16.mxu0 %v8025_v15  ;;  %v3154_v61 = vadd.f32 %v3153_v16, %v10240_v31  ;;  %v3226_v26 = vpop.f32.mrf.mxu1  ;;  %v8043_v14 = vld [vmem:[%s12721_s3 + $0x5c4] ss:$48 sps:$4 sm:$0xff]  }
 0x32a   : > { %3762 = vmatprep.subr.bf16.mxu1 %v8028_v58  ;;  %v10364_v21 = vpop.f32.mrf.mxu0  ;;  %v8038_v58 = vld [vmem:[%s12721_s3 + $0x620] ss:$48 sps:$4 sm:$0xff]   ;;  %v8046_v16 = vld [vmem:[%s12721_s3 + $0xbc4] ss:$48 sps:$4 sm:$0xff]  }
 0x32b   : > { %12757 = vst [vmem:[#allocation11_spill] sm:$0xff] %v10355_v53  ;;  %v10369_v55 = vadd.f32 %v3226_v26, %v3154_v61  ;;  %v10371_v63 = vpop.f32.mrf.mxu1  ;;  %v8041_v61 = vld [vmem:[%s12721_s3 + $0x5c0] ss:$48 sps:$4 sm:$0xff]  }
 0x32c   : > { %3690 = vmatpush1.bf16.msra.mxu0 %v8023_v47  ;;  %v3159_v50 = vpop.f32.mrf.mxu0  ;;  %v8044_v26 = vld [vmem:[%s12721_s3 + $0xbc0] ss:$48 sps:$4 sm:$0xff]  }
 0x32d   : > { %3763 = vmatpush1.bf16.msra.mxu1 %v8026_v23  ;;  %3691 = vmatprep.subr.bf16.mxu0 %v8031_v52  ;;  %v3160_v42 = vadd.f32 %v3159_v50, %v10240_v31  ;;  %v3232_v7 = vpop.f32.mrf.mxu1  ;;  %v8049_v52 = vld [vmem:[%s12721_s3 + $0x564] ss:$48 sps:$4 sm:$0xff]   ;;  %v8050_v50 = vld [vmem:[%s12721_s3 + $0xb60] ss:$48 sps:$4 sm:$0xff]  }
 0x32e   : > { %3596 = vmatmul.mubr.bf16.gmra.mxu0 %v9687_v43  ;;  %3764 = vmatprep.subr.bf16.mxu1 %v8034_v20  ;;  %v3161_v32 = vpop.f32.mrf.mxu0  ;;  %v8052_v20 = vld [vmem:[%s12721_s3 + $0xb64] ss:$48 sps:$4 sm:$0xff]  }
 0x32f   : > { %3669 = vmatmul.mubr.bf16.gmra.mxu1 %v9689_v5  ;;  %v10390_v25 = vadd.f32 %v3232_v7, %v3160_v42  ;;  %3711 = vmatprep.mubr.bf16.mxu0 %v9383_v0  ;;  %v3162_v51 = vadd.f32 %v3161_v32, %v10244_v34  ;;  %v3234_v56 = vpop.f32.mrf.mxu1  ;;  %v8058_v42 = vld [vmem:[%s12721_s3 + $0xb04] ss:$48 sps:$4 sm:$0xff]   ;;  %v8053_v7 = vld [vmem:[%s12721_s3 + $0x500] ss:$48 sps:$4 sm:$0xff]  }
 0x330   : > { %3692 = vmatpush1.bf16.msra.mxu0 %v8029_v30  ;;  %3784 = vmatprep.mubr.bf16.mxu1 %v9418_v29  ;;  %v3163_v15 = vpop.f32.mrf.mxu0  ;;  %v8047_v30 = vld [vmem:[%s12721_s3 + $0x560] ss:$48 sps:$4 sm:$0xff]   ;;  %v8061_v32 = vld [vmem:[%s12721_s3 + $0x4a4] ss:$48 sps:$4 sm:$0xff]  }
 0x331   : > { %3765 = vmatpush1.bf16.msra.mxu1 %v8032_v12  ;;  %v10398_v37 = vadd.f32 %v3234_v56, %v3162_v51  ;;  %3693 = vmatprep.subr.bf16.mxu0 %v8037_v44  ;;  %v3164_v45 = vadd.f32 %v3163_v15, %v10240_v31  ;;  %v3236_v47 = vpop.f32.mrf.mxu1  ;;  %v8055_v12 = vld [vmem:[%s12721_s3 + $0x504] ss:$48 sps:$4 sm:$0xff]   ;;  %v8056_v44 = vld [vmem:[%s12721_s3 + $0xb00] ss:$48 sps:$4 sm:$0xff]  }
 0x332   : > { %3766 = vmatprep.subr.bf16.mxu1 %v8040_v22  ;;  %v8064_v22 = vld [vmem:[%s12721_s3 + $0xaa4] ss:$48 sps:$4 sm:$0xff]   ;;  %v8059_v51 = vld [vmem:[%s12721_s3 + $0x4a0] ss:$48 sps:$4 sm:$0xff]  }
 0x333   : > { %12758 = vst [vmem:[#allocation12_spill] sm:$0xff] %v10398_v37  ;;  %v10410_v23 = vadd.f32 %v3236_v47, %v3164_v45  ;;  %v8062_v56 = vld [vmem:[%s12721_s3 + $0xaa0] ss:$48 sps:$4 sm:$0xff]   ;;  %v8070_v15 = vld [vmem:[%s12721_s3 + $0xa44] ss:$48 sps:$4 sm:$0xff]  }
 0x334   : > { %3694 = vmatpush1.bf16.msra.mxu0 %v8035_v19  ;;  %v8067_v19 = vld [vmem:[%s12721_s3 + $0x444] ss:$48 sps:$4 sm:$0xff]   ;;  %v8068_v45 = vld [vmem:[%s12721_s3 + $0xa40] ss:$48 sps:$4 sm:$0xff]  }
 0x335   : > { %3767 = vmatpush1.bf16.msra.mxu1 %v8038_v58  ;;  %3695 = vmatprep.subr.bf16.mxu0 %v8043_v14  ;;  %v8065_v58 = vld [vmem:[%s12721_s3 + $0x440] ss:$48 sps:$4 sm:$0xff]   ;;  %v8073_v14 = vld [vmem:[%s12721_s3 + $0x3e4] ss:$48 sps:$4 sm:$0xff]  }
 0x336   : > { %3768 = vmatprep.subr.bf16.mxu1 %v8046_v16  ;;  %v8076_v47 = vld [vmem:[%s12721_s3 + $0x9e4] ss:$48 sps:$4 sm:$0xff]   ;;  %v8071_v16 = vld [vmem:[%s12721_s3 + $0x3e0] ss:$48 sps:$4 sm:$0xff]  }
 0x338   : > { %3696 = vmatpush2.bf16.msra.mxu0 %v8041_v61  ;;  %v8074_v61 = vld [vmem:[%s12721_s3 + $0x9e0] ss:$48 sps:$4 sm:$0xff]  }
 0x339   : > { %3769 = vmatpush2.bf16.msra.mxu1 %v8044_v26  ;;  %3697 = vmatprep.subr.bf16.mxu0 %v8049_v52  ;;  %v8079_v26 = vld [vmem:[%s12721_s3 + $0x384] ss:$48 sps:$4 sm:$0xff]  }
 0x33a   : > { %3770 = vmatprep.subr.bf16.mxu1 %v8052_v20  ;;  %v8082_v52 = vld [vmem:[%s12721_s3 + $0x984] ss:$48 sps:$4 sm:$0xff]   ;;  %v8077_v20 = vld [vmem:[%s12721_s3 + $0x380] ss:$48 sps:$4 sm:$0xff]  }
 0x33c   : > { %3698 = vmatpush2.bf16.msra.mxu0 %v8047_v30  ;;  %v8080_v30 = vld [vmem:[%s12721_s3 + $0x980] ss:$48 sps:$4 sm:$0xff]  }
 0x33d   : > { %3771 = vmatpush2.bf16.msra.mxu1 %v8050_v50  ;;  %3699 = vmatprep.subr.bf16.mxu0 %v8055_v12  ;;  %v8085_v50 = vld [vmem:[%s12721_s3 + $0x324] ss:$48 sps:$4 sm:$0xff]   ;;  %v10496_v12 = vsub.s32 2, %v10201_v57 }
 0x33e   : > { %3772 = vmatprep.subr.bf16.mxu1 %v8058_v42  ;;  %v8088_v42 = vld [vmem:[%s12721_s3 + $0x924] ss:$48 sps:$4 sm:$0xff]  }
 0x33f   : > { %12759 = vst [vmem:[#allocation13_spill] sm:$0xff] %v10496_v12 }
 0x340   : > { %3700 = vmatpush2.bf16.msra.mxu0 %v8053_v7  ;;  %v10502_v7 = vsub.s32 3, %v10201_v57 }
 0x341   : > { %3773 = vmatpush2.bf16.msra.mxu1 %v8056_v44  ;;  %3701 = vmatprep.subr.bf16.mxu0 %v8061_v32  ;;  %v8083_v44 = vld [vmem:[%s12721_s3 + $0x320] ss:$48 sps:$4 sm:$0xff]  }
 0x342   : > { %3774 = vmatprep.subr.bf16.mxu1 %v8064_v22  ;;  %12760 = vst [vmem:[#allocation14_spill] sm:$0xff] %v10502_v7  ;;  %v8086_v32 = vld [vmem:[%s12721_s3 + $0x920] ss:$48 sps:$4 sm:$0xff]   ;;  %v10512_v22 = vrot.slane %v10221_v4, %v10496_v12 }
 0x344   : > { %3702 = vmatpush2.bf16.msra.mxu0 %v8059_v51  ;;  %v8091_v51 = vld [vmem:[%s12721_s3 + $0x2cc] ss:$48 sps:$4 sm:$0xff]  }
 0x345   : > { %3775 = vmatpush2.bf16.msra.mxu1 %v8062_v56  ;;  %3703 = vmatprep.subr.bf16.mxu0 %v8067_v19  ;;  %v10517_v56 = vpop.f32.mrf.mxu0  ;;  %v8094_v19 = vld [vmem:[%s12721_s3 + $0x8cc] ss:$48 sps:$4 sm:$0xff]  }
 0x346   : > { %3776 = vmatprep.subr.bf16.mxu1 %v8070_v15  ;;  %v10522_v15 = vpop.f32.mrf.mxu1 }
 0x347   : > { %12761 = vst [vmem:[#allocation15_spill] sm:$0xff] %v10522_v15 }
 0x348   : > { %3704 = vmatpush2.bf16.msra.mxu0 %v8065_v58  ;;  %v10526_v58 = vrot.slane %v10221_v4, %v10502_v7 }
 0x349   : > { %3777 = vmatpush2.bf16.msra.mxu1 %v8068_v45  ;;  %3705 = vmatprep.subr.bf16.mxu0 %v8073_v14 }
 0x34a   : > { %3778 = vmatprep.subr.bf16.mxu1 %v8076_v47  ;;  %12762 = vst [vmem:[#allocation16_spill] sm:$0xff] %v10526_v58 }
 0x34c   : > { %3706 = vmatpush2.bf16.msra.mxu0 %v8071_v16  ;;  %v8089_v16 = vld [vmem:[%s12721_s3 + $0x2c8] ss:$48 sps:$4 sm:$0xff]  }
 0x34d   : > { %3779 = vmatpush2.bf16.msra.mxu1 %v8074_v61  ;;  %3707 = vmatprep.subr.bf16.mxu0 %v8079_v26  ;;  %v8092_v61 = vld [vmem:[%s12721_s3 + $0x8c8] ss:$48 sps:$4 sm:$0xff]  }
 0x34e   : > { %3780 = vmatprep.subr.bf16.mxu1 %v8082_v52  ;;  %v8097_v52 = vld [vmem:[%s12721_s3 + $0x26c] ss:$48 sps:$4 sm:$0xff]  }
 0x350   : > { %3708 = vmatpush2.bf16.msra.mxu0 %v8077_v20 }
 0x351   : > { %3781 = vmatpush2.bf16.msra.mxu1 %v8080_v30  ;;  %3709 = vmatprep.subr.bf16.mxu0 %v8085_v50 }
 0x352   : > { %3782 = vmatprep.subr.bf16.mxu1 %v8088_v42  ;;  %v8100_v42 = vld [vmem:[%s12721_s3 + $0x86c] ss:$48 sps:$4 sm:$0xff]  }
 0x354   : > { %3710 = vmatpush2.bf16.msra.mxu0 %v8083_v44  ;;  %v3275_v45 = vpop.f32.mrf.mxu0 }
 0x355   : > { %3783 = vmatpush2.bf16.msra.mxu1 %v8086_v32  ;;  %v3276_v14 = vadd.f32 %v3275_v45, %v10512_v22  ;;  %v3348_v47 = vpop.f32.mrf.mxu1  ;;  %3825 = vmatprep.subr.bf16.mxu0 %v8091_v51  ;;  %v8095_v45 = vld [vmem:[%s12721_s3 + $0x268] ss:$48 sps:$4 sm:$0xff]  }
 0x356   : > { %3898 = vmatprep.subr.bf16.mxu1 %v8094_v19  ;;  %v3277_v26 = vpop.f32.mrf.mxu0 }
 0x357   : > { %v10538_v20 = vadd.f32 %v3348_v47, %v3276_v14  ;;  %3712 = vmatmul.mubr.bf16.vlgmr.msra.gmra.mxu0 %v9441_v46  ;;  %v3278_v30 = vadd.f32 %v3277_v26, %v10526_v58  ;;  %v3350_v50 = vpop.f32.mrf.mxu1  ;;  %v8098_v14 = vld [vmem:[%s12721_s3 + $0x868] ss:$48 sps:$4 sm:$0xff]  }
 0x358   : > { %3785 = vmatmul.mubr.bf16.vlgmr.msra.gmra.mxu1 %v9456_v60  ;;  %3721 = vmatprep.mubr.bf16.mxu0 %v9482_v11  ;;  %v3279_v44 = vpop.f32.mrf.mxu0 }
 0x359   : > { %12763 = vst [vmem:[#allocation17_spill] sm:$0xff] %v10538_v20  ;;  %3794 = vmatprep.mubr.bf16.mxu1 %v9495_v39  ;;  %3826 = vmatpush1.bf16.msra.mxu0 %v8089_v16  ;;  %v10548_v32 = vadd.f32 %v3350_v50, %v3278_v30  ;;  %v3280_v51 = vadd.f32 %v3279_v44, %v10512_v22  ;;  %v3352_v19 = vpop.f32.mrf.mxu1  ;;  %v8103_v16 = vld [vmem:[%s12721_s3 + $0x20c] ss:$48 sps:$4 sm:$0xff]  }
 0x35a   : > { %3899 = vmatpush1.bf16.msra.mxu1 %v8092_v61  ;;  %3827 = vmatprep.subr.bf16.mxu0 %v8097_v52  ;;  %v10557_v47 = vpop.f32.mrf.mxu0  ;;  %v8106_v61 = vld [vmem:[%s12721_s3 + $0x80c] ss:$48 sps:$4 sm:$0xff]  }
 0x35b   : > { %12764 = vst [vmem:[#allocation18_spill] sm:$0xff] %v10548_v32  ;;  %12765 = vst [vmem:[#allocation19_spill] sm:$0xff] %v10557_v47  ;;  %v10562_v26 = vadd.f32 %v3352_v19, %v3280_v51  ;;  %3900 = vmatprep.subr.bf16.mxu1 %v8100_v42  ;;  %v10564_v30 = vpop.f32.mrf.mxu1  ;;  %v8101_v51 = vld [vmem:[%s12721_s3 + $0x208] ss:$48 sps:$4 sm:$0xff]  }
 0x35c   : > { %12767 = vst [vmem:[#allocation21_spill] sm:$0xff] %v10564_v30  ;;  %v3285_v52 = vpop.f32.mrf.mxu0  ;;  %v8104_v42 = vld [vmem:[%s12721_s3 + $0x808] ss:$48 sps:$4 sm:$0xff]  }
 0x35d   : > { %12766 = vst [vmem:[#allocation20_spill] sm:$0xff] %v10562_v26  ;;  %3828 = vmatpush1.bf16.msra.mxu0 %v8095_v45  ;;  %v3286_v44 = vadd.f32 %v3285_v52, %v10512_v22  ;;  %v3358_v31 = vpop.f32.mrf.mxu1  ;;  %v8122_v32 = vld [vmem:[%s12721_s3 + $0x6e8] ss:$48 sps:$4 sm:$0xff]  }
 0x35e   : > { %3901 = vmatpush1.bf16.msra.mxu1 %v8098_v14  ;;  %3829 = vmatprep.subr.bf16.mxu0 %v8103_v16  ;;  %v3287_v19 = vpop.f32.mrf.mxu0  ;;  %v8112_v14 = vld [vmem:[%s12721_s3 + $0x7ac] ss:$48 sps:$4 sm:$0xff]   ;;  %v8134_v47 = vld [vmem:[%s12721_s3 + $0x628] ss:$48 sps:$4 sm:$0xff]  }
 0x35f   : > { %v10581_v50 = vadd.f32 %v3358_v31, %v3286_v44  ;;  %3722 = vmatmul.mubr.bf16.gmra.mxu0 %v9522_v38  ;;  %3902 = vmatprep.subr.bf16.mxu1 %v8106_v61  ;;  %v3288_v45 = vadd.f32 %v3287_v19, %v10526_v58  ;;  %v3360_v52 = vpop.f32.mrf.mxu1  ;;  %v8107_v19 = vld [vmem:[%s12721_s3 + $0x1a8] ss:$48 sps:$4 sm:$0xff]  }
 0x360   : > { %3795 = vmatmul.mubr.bf16.gmra.mxu1 %v9558_v35  ;;  %3731 = vmatprep.mubr.bf16.mxu0 %v9585_v49  ;;  %v3289_v16 = vpop.f32.mrf.mxu0 }
 0x361   : > { %12768 = vst [vmem:[#allocation22_spill] sm:$0xff] %v10581_v50  ;;  %3804 = vmatprep.mubr.bf16.mxu1 %v9599_v24  ;;  %3830 = vmatpush1.bf16.msra.mxu0 %v8101_v51  ;;  %v10591_v31 = vadd.f32 %v3360_v52, %v3288_v45  ;;  %v3290_v44 = vadd.f32 %v3289_v16, %v10512_v22  ;;  %v3362_v61 = vpop.f32.mrf.mxu1  ;;  %v8115_v51 = vld [vmem:[%s12721_s3 + $0x14c] ss:$48 sps:$4 sm:$0xff]  }
 0x362   : > { %3903 = vmatpush1.bf16.msra.mxu1 %v8104_v42  ;;  %3831 = vmatprep.subr.bf16.mxu0 %v8109_v17  ;;  %v10600_v1 = vpop.f32.mrf.mxu0  ;;  %v8118_v42 = vld [vmem:[%s12721_s3 + $0x74c] ss:$48 sps:$4 sm:$0xff]  }
 0x363   : > { %12769 = vst [vmem:[#allocation23_spill] sm:$0xff] %v10591_v31  ;;  %12770 = vst [vmem:[#allocation24_spill] sm:$0xff] %v10600_v1  ;;  %v10605_v45 = vadd.f32 %v3362_v61, %v3290_v44  ;;  %3904 = vmatprep.subr.bf16.mxu1 %v8112_v14  ;;  %v10607_v52 = vpop.f32.mrf.mxu1  ;;  %v8113_v44 = vld [vmem:[%s12721_s3 + $0x148] ss:$48 sps:$4 sm:$0xff]  }
 0x364   : > { %12772 = vst [vmem:[#allocation26_spill] sm:$0xff] %v10607_v52  ;;  %v3295_v17 = vpop.f32.mrf.mxu0  ;;  %v8116_v14 = vld [vmem:[%s12721_s3 + $0x748] ss:$48 sps:$4 sm:$0xff]   ;;  %v8121_v52 = vld [vmem:[%s12721_s3 + $0xec] ss:$48 sps:$4 sm:$0xff]  }
 0x365   : > { %12771 = vst [vmem:[#allocation25_spill] sm:$0xff] %v10605_v45  ;;  %3832 = vmatpush1.bf16.msra.mxu0 %v8107_v19  ;;  %v3296_v31 = vadd.f32 %v3295_v17, %v10512_v22  ;;  %v3368_v1 = vpop.f32.mrf.mxu1 }
 0x366   : > { %3905 = vmatpush1.bf16.msra.mxu1 %v8110_v54  ;;  %3833 = vmatprep.subr.bf16.mxu0 %v8115_v51  ;;  %v3297_v61 = vpop.f32.mrf.mxu0  ;;  %v8124_v54 = vld [vmem:[%s12721_s3 + $0x6ec] ss:$48 sps:$4 sm:$0xff]  }
 0x367   : > { %v10624_v16 = vadd.f32 %v3368_v1, %v3296_v31  ;;  %3732 = vmatmul.mubr.bf16.gmra.mxu0 %v9638_v40  ;;  %3906 = vmatprep.subr.bf16.mxu1 %v8118_v42  ;;  %v3298_v19 = vadd.f32 %v3297_v61, %v10526_v58  ;;  %v3370_v17 = vpop.f32.mrf.mxu1  ;;  %v8119_v61 = vld [vmem:[%s12721_s3 + $0xe8] ss:$48 sps:$4 sm:$0xff]  }
 0x368   : > { %3805 = vmatmul.mubr.bf16.gmra.mxu1 %v9644_v9  ;;  %3741 = vmatprep.mubr.bf16.mxu0 %v9658_v62  ;;  %v3299_v51 = vpop.f32.mrf.mxu0 }
 0x369   : > { %12773 = vst [vmem:[#allocation27_spill] sm:$0xff] %v10624_v16  ;;  %3814 = vmatprep.mubr.bf16.mxu1 %v9664_v6  ;;  %3834 = vmatpush1.bf16.msra.mxu0 %v8113_v44  ;;  %v10634_v1 = vadd.f32 %v3370_v17, %v3298_v19  ;;  %v3300_v31 = vadd.f32 %v3299_v51, %v10512_v22  ;;  %v3372_v42 = vpop.f32.mrf.mxu1  ;;  %v8127_v44 = vld [vmem:[%s12721_s3 + $0x8c] ss:$48 sps:$4 sm:$0xff]  }
 0x36a   : > { %3907 = vmatpush1.bf16.msra.mxu1 %v8116_v14  ;;  %3835 = vmatprep.subr.bf16.mxu0 %v8121_v52  ;;  %v10643_v30 = vpop.f32.mrf.mxu0  ;;  %v8130_v14 = vld [vmem:[%s12721_s3 + $0x68c] ss:$48 sps:$4 sm:$0xff]  }
 0x36b   : > { %12774 = vst [vmem:[#allocation28_spill] sm:$0xff] %v10634_v1  ;;  %12775 = vst [vmem:[#allocation29_spill] sm:$0xff] %v10643_v30  ;;  %v10648_v19 = vadd.f32 %v3372_v42, %v3300_v31  ;;  %3908 = vmatprep.subr.bf16.mxu1 %v8124_v54  ;;  %v10650_v17 = vpop.f32.mrf.mxu1  ;;  %v8125_v31 = vld [vmem:[%s12721_s3 + $0x88] ss:$48 sps:$4 sm:$0xff]  }
 0x36c   : > { %12777 = vst [vmem:[#allocation31_spill] sm:$0xff] %v10650_v17  ;;  %v3305_v52 = vpop.f32.mrf.mxu0  ;;  %v8128_v54 = vld [vmem:[%s12721_s3 + $0x688] ss:$48 sps:$4 sm:$0xff]   ;;  %v8133_v17 = vld [vmem:[%s12721_s3 + $0x2c] ss:$48 sps:$4 sm:$0xff]  }
 0x36d   : > { %12776 = vst [vmem:[#allocation30_spill] sm:$0xff] %v10648_v19  ;;  %3836 = vmatpush1.bf16.msra.mxu0 %v8119_v61  ;;  %v3306_v1 = vadd.f32 %v3305_v52, %v10512_v22  ;;  %v3378_v30 = vpop.f32.mrf.mxu1 }
 0x36e   : > { %3909 = vmatpush1.bf16.msra.mxu1 %v8122_v32  ;;  %3837 = vmatprep.subr.bf16.mxu0 %v8127_v44  ;;  %v3307_v42 = vpop.f32.mrf.mxu0  ;;  %v8136_v32 = vld [vmem:[%s12721_s3 + $0x62c] ss:$48 sps:$4 sm:$0xff]  }
 0x36f   : > { %v10667_v51 = vadd.f32 %v3378_v30, %v3306_v1  ;;  %3742 = vmatmul.mubr.bf16.gmra.mxu0 %v9687_v43  ;;  %3910 = vmatprep.subr.bf16.mxu1 %v8130_v14  ;;  %v3308_v61 = vadd.f32 %v3307_v42, %v10526_v58  ;;  %v3380_v52 = vpop.f32.mrf.mxu1  ;;  %v8131_v14 = vld [vmem:[%s12721_s3 + $0x28] ss:$48 sps:$4 sm:$0xff]  }
 0x370   : > { %3815 = vmatmul.mubr.bf16.gmra.mxu1 %v9689_v5  ;;  %3857 = vmatprep.mubr.bf16.mxu0 %v9383_v0  ;;  %v3309_v44 = vpop.f32.mrf.mxu0  ;;  %v8139_v0 = vld [vmem:[%s12721_s3 + $0x5cc] ss:$48 sps:$4 sm:$0xff]  }
 0x371   : > { %12778 = vst [vmem:[#allocation32_spill] sm:$0xff] %v10667_v51  ;;  %3838 = vmatpush1.bf16.msra.mxu0 %v8125_v31  ;;  %3930 = vmatprep.mubr.bf16.mxu1 %v9418_v29  ;;  %v10677_v30 = vadd.f32 %v3380_v52, %v3308_v61  ;;  %v3310_v1 = vadd.f32 %v3309_v44, %v10512_v22  ;;  %v3382_v42 = vpop.f32.mrf.mxu1  ;;  %v8142_v22 = vld [vmem:[%s12721_s3 + $0xbcc] ss:$48 sps:$4 sm:$0xff]  }
 0x372   : > { %3911 = vmatpush1.bf16.msra.mxu1 %v8128_v54  ;;  %3839 = vmatprep.subr.bf16.mxu0 %v8133_v17  ;;  %v8137_v17 = vld [vmem:[%s12721_s3 + $0x5c8] ss:$48 sps:$4 sm:$0xff]   ;;  %v8145_v61 = vld [vmem:[%s12721_s3 + $0x56c] ss:$48 sps:$4 sm:$0xff]  }
 0x373   : > { %12779 = vst [vmem:[#allocation33_spill] sm:$0xff] %v10677_v30  ;;  %v10689_v29 = vadd.f32 %v3382_v42, %v3310_v1  ;;  %3912 = vmatprep.subr.bf16.mxu1 %v8136_v32  ;;  %v8140_v54 = vld [vmem:[%s12721_s3 + $0xbc8] ss:$48 sps:$4 sm:$0xff]   ;;  %v8148_v52 = vld [vmem:[%s12721_s3 + $0xb6c] ss:$48 sps:$4 sm:$0xff]  }
 0x374   : > { %v8143_v32 = vld [vmem:[%s12721_s3 + $0x568] ss:$48 sps:$4 sm:$0xff]   ;;  %v8151_v44 = vld [vmem:[%s12721_s3 + $0x50c] ss:$48 sps:$4 sm:$0xff]  }
 0x375   : > { %12780 = vst [vmem:[#allocation34_spill] sm:$0xff] %v10689_v29  ;;  %3840 = vmatpush1.bf16.msra.mxu0 %v8131_v14  ;;  %v8154_v1 = vld [vmem:[%s12721_s3 + $0xb0c] ss:$48 sps:$4 sm:$0xff]   ;;  %v8149_v14 = vld [vmem:[%s12721_s3 + $0x508] ss:$48 sps:$4 sm:$0xff]  }
 0x376   : > { %3913 = vmatpush1.bf16.msra.mxu1 %v8134_v47  ;;  %3841 = vmatprep.subr.bf16.mxu0 %v8139_v0  ;;  %v8146_v47 = vld [vmem:[%s12721_s3 + $0xb68] ss:$48 sps:$4 sm:$0xff]   ;;  %v8157_v0 = vld [vmem:[%s12721_s3 + $0x4ac] ss:$48 sps:$4 sm:$0xff]  }
 0x377   : > { %3914 = vmatprep.subr.bf16.mxu1 %v8142_v22  ;;  %v8152_v42 = vld [vmem:[%s12721_s3 + $0xb08] ss:$48 sps:$4 sm:$0xff]   ;;  %v8160_v22 = vld [vmem:[%s12721_s3 + $0xaac] ss:$48 sps:$4 sm:$0xff]  }
 0x379   : > { %3842 = vmatpush2.bf16.msra.mxu0 %v8137_v17  ;;  %v8155_v17 = vld [vmem:[%s12721_s3 + $0x4a8] ss:$48 sps:$4 sm:$0xff]  }
 0x37a   : > { %3915 = vmatpush2.bf16.msra.mxu1 %v8140_v54  ;;  %3843 = vmatprep.subr.bf16.mxu0 %v8145_v61  ;;  %v8158_v54 = vld [vmem:[%s12721_s3 + $0xaa8] ss:$48 sps:$4 sm:$0xff]   ;;  %v8163_v61 = vld [vmem:[%s12721_s3 + $0x44c] ss:$48 sps:$4 sm:$0xff]  }
 0x37b   : > { %3916 = vmatprep.subr.bf16.mxu1 %v8148_v52  ;;  %v8166_v52 = vld [vmem:[%s12721_s3 + $0xa4c] ss:$48 sps:$4 sm:$0xff]  }
 0x37d   : > { %3844 = vmatpush2.bf16.msra.mxu0 %v8143_v32  ;;  %v8161_v32 = vld [vmem:[%s12721_s3 + $0x448] ss:$48 sps:$4 sm:$0xff]  }
 0x37e   : > { %3917 = vmatpush2.bf16.msra.mxu1 %v8146_v47  ;;  %3845 = vmatprep.subr.bf16.mxu0 %v8151_v44  ;;  %v8164_v47 = vld [vmem:[%s12721_s3 + $0xa48] ss:$48 sps:$4 sm:$0xff]   ;;  %v8169_v44 = vld [vmem:[%s12721_s3 + $0x3ec] ss:$48 sps:$4 sm:$0xff]  }
 0x37f   : > { %3918 = vmatprep.subr.bf16.mxu1 %v8154_v1  ;;  %v8172_v1 = vld [vmem:[%s12721_s3 + $0x9ec] ss:$48 sps:$4 sm:$0xff]  }
 0x381   : > { %3846 = vmatpush2.bf16.msra.mxu0 %v8149_v14  ;;  %v8167_v14 = vld [vmem:[%s12721_s3 + $0x3e8] ss:$48 sps:$4 sm:$0xff]  }
 0x382   : > { %3919 = vmatpush2.bf16.msra.mxu1 %v8152_v42  ;;  %3847 = vmatprep.subr.bf16.mxu0 %v8157_v0  ;;  %v8170_v42 = vld [vmem:[%s12721_s3 + $0x9e8] ss:$48 sps:$4 sm:$0xff]   ;;  %v8175_v0 = vld [vmem:[%s12721_s3 + $0x38c] ss:$48 sps:$4 sm:$0xff]  }
 0x383   : > { %3920 = vmatprep.subr.bf16.mxu1 %v8160_v22  ;;  %v8178_v22 = vld [vmem:[%s12721_s3 + $0x98c] ss:$48 sps:$4 sm:$0xff]  }
 0x385   : > { %3848 = vmatpush2.bf16.msra.mxu0 %v8155_v17  ;;  %v8173_v17 = vld [vmem:[%s12721_s3 + $0x388] ss:$48 sps:$4 sm:$0xff]  }
 0x386   : > { %3921 = vmatpush2.bf16.msra.mxu1 %v8158_v54  ;;  %3849 = vmatprep.subr.bf16.mxu0 %v8163_v61  ;;  %v8176_v54 = vld [vmem:[%s12721_s3 + $0x988] ss:$48 sps:$4 sm:$0xff]   ;;  %v8181_v61 = vld [vmem:[%s12721_s3 + $0x32c] ss:$48 sps:$4 sm:$0xff]  }
 0x387   : > { %3922 = vmatprep.subr.bf16.mxu1 %v8166_v52  ;;  %v8184_v52 = vld [vmem:[%s12721_s3 + $0x92c] ss:$48 sps:$4 sm:$0xff]  }
 0x389   : > { %3850 = vmatpush2.bf16.msra.mxu0 %v8161_v32  ;;  %v1137_v32 = vsub.s32 5, %v10201_v57 }
 0x38a   : > { %3923 = vmatpush2.bf16.msra.mxu1 %v8164_v47  ;;  %3851 = vmatprep.subr.bf16.mxu0 %v8169_v44  ;;  %v8179_v47 = vld [vmem:[%s12721_s3 + $0x328] ss:$48 sps:$4 sm:$0xff]  }
 0x38b   : > { %3924 = vmatprep.subr.bf16.mxu1 %v8172_v1  ;;  %v8182_v44 = vld [vmem:[%s12721_s3 + $0x928] ss:$48 sps:$4 sm:$0xff]   ;;  %v10787_v1 = vpop.f32.mrf.mxu0 }
 0x38c   : > { %12781 = vst [vmem:[#allocation35_spill] sm:$0xff] %v10787_v1 }
 0x38d   : > { %3852 = vmatpush2.bf16.msra.mxu0 %v8167_v14  ;;  %v10789_v14 = vpop.f32.mrf.mxu1 }
 0x38e   : > { %3925 = vmatpush2.bf16.msra.mxu1 %v8170_v42  ;;  %3853 = vmatprep.subr.bf16.mxu0 %v8175_v0  ;;  %12782 = vst [vmem:[#allocation36_spill] sm:$0xff] %v10789_v14  ;;  %v10792_v42 = vrot.slane %v10221_v4, %v1137_v32 }
 0x38f   : > { %3926 = vmatprep.subr.bf16.mxu1 %v8178_v22 }
 0x391   : > { %3854 = vmatpush2.bf16.msra.mxu0 %v8173_v17 }
 0x392   : > { %3927 = vmatpush2.bf16.msra.mxu1 %v8176_v54  ;;  %3855 = vmatprep.subr.bf16.mxu0 %v8181_v61 }
 0x393   : > { %3928 = vmatprep.subr.bf16.mxu1 %v8184_v52 }
 0x395   : > { %3856 = vmatpush2.bf16.msra.mxu0 %v8179_v47  ;;  %v10794_v0 = vpop.f32.mrf.mxu0 }
 0x396   : > { %3929 = vmatpush2.bf16.msra.mxu1 %v8182_v44  ;;  %v10796_v22 = vpop.f32.mrf.mxu1 }
 0x397   : > { %v3423_v17 = vpop.f32.mrf.mxu0 }
 0x398   : > { %3858 = vmatmul.mubr.bf16.vlgmr.msra.gmra.mxu0 %v9441_v46  ;;  %v3424_v54 = vadd.f32 %v3423_v17, %v10792_v42  ;;  %v3496_v61 = vpop.f32.mrf.mxu1 }
 0x399   : > { %3931 = vmatmul.mubr.bf16.vlgmr.msra.gmra.mxu1 %v9456_v60  ;;  %3867 = vmatprep.mubr.bf16.mxu0 %v9482_v11  ;;  %v3425_v52 = vpop.f32.mrf.mxu0 }
 0x39a   : > { %3940 = vmatprep.mubr.bf16.mxu1 %v9495_v39  ;;  %v10803_v32 = vadd.f32 %v3496_v61, %v3424_v54  ;;  %v3498_v47 = vpop.f32.mrf.mxu1 }
 0x39b   : > { %v10805_v31 = vpop.f32.mrf.mxu0 }
 0x39c   : > { %v10807_v44 = vpop.f32.mrf.mxu1 }
 0x39d   : > { %v3431_v30 = vpop.f32.mrf.mxu0 }
 0x39e   : > { %v3504_v14 = vpop.f32.mrf.mxu1 }
 0x39f   : > { %v10809_v46 = vpop.f32.mrf.mxu0 }
 0x3a0   : > { %3868 = vmatmul.mubr.bf16.gmra.mxu0 %v9522_v38  ;;  %v10812_v17 = vpop.f32.mrf.mxu1 }
 0x3a1   : > { %3941 = vmatmul.mubr.bf16.gmra.mxu1 %v9558_v35  ;;  %3877 = vmatprep.mubr.bf16.mxu0 %v9585_v49  ;;  %v3435_v60 = vpop.f32.mrf.mxu0  ;;  %v1133_v49 = vsub.s32 4, %v10201_v57 }
 0x3a2   : > { %3950 = vmatprep.mubr.bf16.mxu1 %v9599_v24  ;;  %v3508_v11 = vpop.f32.mrf.mxu1 }
 0x3a3   : > { %v10817_v39 = vpop.f32.mrf.mxu0  ;;  %v1134_v19 = vrot.slane %v10221_v4, %v1133_v49 }
 0x3a4   : > { %v10819_v54 = vpop.f32.mrf.mxu1 }
 0x3a5   : > { %v3441_v61 = vpop.f32.mrf.mxu0  ;;  %v3426_v53 = vadd.f32 %v3425_v52, %v1134_v19 }
 0x3a6   : > { %v3514_v1 = vpop.f32.mrf.mxu1  ;;  %v3442_v26 = vadd.f32 %v3441_v61, %v1134_v19 }
 0x3a7   : > { %v3443_v58 = vpop.f32.mrf.mxu0  ;;  %v3499_v61 = vadd.f32 %v3498_v47, %v3426_v53 }
 0x3a8   : > { %3878 = vmatmul.mubr.bf16.gmra.mxu0 %v9638_v40  ;;  %v10822_v38 = vpop.f32.mrf.mxu1  ;;  %v3515_v49 = vadd.f32 %v3514_v1, %v3442_v26  ;;  %v3444_v53 = vadd.f32 %v3443_v58, %v10792_v42 }
 0x3a9   : > { %3951 = vmatmul.mubr.bf16.gmra.mxu1 %v9644_v9  ;;  %3887 = vmatprep.mubr.bf16.mxu0 %v9658_v62  ;;  %v3445_v35 = vpop.f32.mrf.mxu0  ;;  %v12783_v62 = vpack.c.bf16 %v10283_v27, %v10261_v2  ;;  %v3422_v27 = vadd.f32 %v10794_v0, %v1134_v19  ;;  %v3136_v0 = vadd.f32 %v10278_v18, %v10244_v34 }
 0x3aa   : > { %3960 = vmatprep.mubr.bf16.mxu1 %v9664_v6  ;;  %v3518_v24 = vpop.f32.mrf.mxu1  ;;  %v3446_v40 = vadd.f32 %v3445_v35, %v1134_v19  ;;  %v3436_v35 = vadd.f32 %v3435_v60, %v1134_v19  ;;  %v3438_v60 = vadd.f32 %v10817_v39, %v10792_v42  ;;  %v12785_v18 = vpack.c.bf16 %v10369_v55, %v10347_v13 }
 0x3ab   : > { %v3447_v51 = vpop.f32.mrf.mxu0 }
 0x3ac   : > { %v3520_v29 = vpop.f32.mrf.mxu1  ;;  %v3519_v28 = vadd.f32 %v3518_v24, %v3446_v40 }
 0x3ad   : > { %v3451_v16 = vpop.f32.mrf.mxu0 }
 0x3ae   : > { %v3524_v50 = vpop.f32.mrf.mxu1  ;;  %v3452_v20 = vadd.f32 %v3451_v16, %v1134_v19  ;;  %v3977_v16 = vpack.c.bf16 %v3519_v28, %v3515_v49 }
 0x3af   : > { %v3453_v45 = vpop.f32.mrf.mxu0 }
 0x3b0   : > { %3888 = vmatmul.mubr.bf16.gmra.mxu0 %v9687_v43  ;;  %v3526_v9 = vpop.f32.mrf.mxu1  ;;  %v3525_v59 = vadd.f32 %v3524_v50, %v3452_v20  ;;  %v3432_v43 = vadd.f32 %v3431_v30, %v1134_v19  ;;  %v3454_v28 = vadd.f32 %v3453_v45, %v10792_v42  ;;  %v3448_v50 = vadd.f32 %v3447_v51, %v10792_v42  ;;  %v8539_v30 = vld [vmem:[%s12722_s4] sm:$0xff] }
 0x3b1   : > { %3961 = vmatmul.mubr.bf16.gmra.mxu1 %v9689_v5  ;;  %7437 = vmatprep.mubr.bf16.mxu0 %v12783_v62  ;;  %v3455_v6 = vpop.f32.mrf.mxu0  ;;  %v3509_v5 = vadd.f32 %v3508_v11, %v3436_v35  ;;  %v1145_v45 = vsub.s32 7, %v10201_v57  ;;  %v3434_v62 = vadd.f32 %v10809_v46, %v10792_v42 }
 0x3b2   : > { %v3456_v12 = vadd.f32 %v3455_v6, %v1134_v19  ;;  %v3528_v7 = vpop.f32.mrf.mxu1  ;;  %v3505_v15 = vadd.f32 %v3504_v14, %v3432_v43  ;;  %v3527_v26 = vadd.f32 %v3526_v9, %v3454_v28  ;;  %v3521_v14 = vadd.f32 %v3520_v29, %v3448_v50 }
 0x3b3   : > { %v3457_v24 = vpop.f32.mrf.mxu0  ;;  %v10851_v58 = vrot.slane %v8539_v30, %v1145_v45 }
 0x3b4   : > { %v3529_v4 = vadd.f32 %v3528_v7, %v3456_v12  ;;  %v3976_v2 = vpack.c.bf16 %v3509_v5, %v3505_v15  ;;  %v3495_v12 = vadd.f32 %v10796_v22, %v3422_v27  ;;  %v1141_v15 = vsub.s32 6, %v10201_v57 }
 0x3b5   : > { %v3517_v22 = vadd.f32 %v10822_v38, %v3444_v53  ;;  %v12784_v57 = vpack.c.bf16 %v10326_v36, %v10304_v33  ;;  %v3209_v38 = vadd.f32 %v10285_v3, %v3136_v0  ;;  %v3511_v36 = vadd.f32 %v10819_v54, %v3438_v60 }
 0x3b6   : > { %v3978_v37 = vpack.c.bf16 %v3529_v4, %v3525_v59  ;;  %v3975_v7 = vpack.c.bf16 %v3499_v61, %v3495_v12  ;;  %v3458_v59 = vadd.f32 %v3457_v24, %v10792_v42  ;;  %v10844_v1 = vrot.slane %v8539_v30, %v1141_v15 }
 0x3b7   : > { %v4232_v11 = vpack.c.bf16 %v3521_v14, %v3517_v22  ;;  %v3507_v3 = vadd.f32 %v10812_v17, %v3434_v62  ;;  %v3428_v54 = vadd.f32 %v10805_v31, %v10792_v42 }
 0x3b8   : > { %7429 = vmatprep.subr.bf16.mxu0 %v3978_v37 }
 0x3b9   : > { %7430 = vmatpush3.bf16.xpose.msra.mxu0 %v3978_v37  ;;  %v3530_v37 = vpop.f32.mrf.mxu1  ;;  %v4231_v24 = vpack.c.bf16 %v3511_v36, %v3507_v3  ;;  %v3501_v42 = vadd.f32 %v10807_v44, %v3428_v54 }
 0x3ba   : > { %7431 = vmatprep.subr.bf16.mxu0 %v3977_v16  ;;  %v3531_v20 = vadd.f32 %v3530_v37, %v3458_v59 }
 0x3bb   : > { %v4230_v0 = vpack.c.bf16 %v3501_v42, %v10803_v32  ;;  %v3146_v32 = vadd.f32 %v10321_v8, %v10244_v34 }
 0x3bc   : > { %v4233_v19 = vpack.c.bf16 %v3531_v20, %v3527_v26 }
 0x3bd   : > { %v3219_v8 = vadd.f32 %v10328_v48, %v3146_v32 }
 0x3c1   : > { %7432 = vmatpush3.bf16.xpose.msra.mxu0 %v3977_v16  ;;  %v4226_v16 = vpack.c.bf16 %v3209_v38, %v10269_v10 }
 0x3c2   : > { %7433 = vmatprep.subr.bf16.mxu0 %v3976_v2 }
 0x3c9   : > { %7434 = vmatpush3.bf16.xpose.msra.mxu0 %v3976_v2 }
 0x3ca   : > { %7435 = vmatprep.subr.bf16.mxu0 %v3975_v7 }
 0x3d1   : > { %7436 = vmatpush3.bf16.xpose.msra.mxu0 %v3975_v7  ;;  %v12786_v7 = vpack.c.bf16 %v10410_v23, %v10390_v25 }
 0x3d2   : > { %7461 = vmatprep.subr.bf16.mxu0 %v4233_v19 }
 0x3d6   : > { %v3567_v51 = vpop.f32.mrf.mxu0 }
 0x3d7   : > { %v3568_v52 = vadd.f32 %v3567_v51, %v10844_v1  ;;  %v3640_v47 = vpop.f32.mrf.mxu1 }
 0x3d8   : > { %v3569_v40 = vpop.f32.mrf.mxu0  ;;  %7438 = vmatmul.mubr.bf16.vlgmr.msra.gmra.mxu0 %v12784_v57 }
 0x3d9   : > { %v3641_v29 = vadd.f32 %v3640_v47, %v3568_v52  ;;  %v3642_v9 = vpop.f32.mrf.mxu1  ;;  %7441 = vmatprep.mubr.bf16.mxu0 %v12785_v18  ;;  %7462 = vmatpush3.bf16.xpose.msra.mxu0 %v4233_v19  ;;  %v3570_v39 = vadd.f32 %v3569_v40, %v10851_v58 }
 0x3da   : > { %v3571_v6 = vpop.f32.mrf.mxu0  ;;  %7463 = vmatprep.subr.bf16.mxu0 %v4232_v11 }
 0x3db   : > { %v3572_v4 = vadd.f32 %v3571_v6, %v10844_v1  ;;  %v3644_v33 = vpop.f32.mrf.mxu1  ;;  %v3643_v46 = vadd.f32 %v3642_v9, %v3570_v39  ;;  %v3156_v6 = vadd.f32 %v10364_v21, %v10244_v34 }
 0x3dc   : > { %v3573_v49 = vpop.f32.mrf.mxu0 }
 0x3dd   : > { %v3645_v35 = vadd.f32 %v3644_v33, %v3572_v4  ;;  %v3574_v13 = vadd.f32 %v3573_v49, %v10851_v58  ;;  %v3646_v55 = vpop.f32.mrf.mxu1 }
 0x3de   : > { %v3577_v43 = vpop.f32.mrf.mxu0 }
 0x3df   : > { %v10870_v5 = vpack.c.bf16 %v3645_v35, %v3641_v29  ;;  %v3647_v2 = vadd.f32 %v3646_v55, %v3574_v13  ;;  %v3578_v27 = vadd.f32 %v3577_v43, %v10844_v1  ;;  %v3650_v61 = vpop.f32.mrf.mxu1  ;;  %v3229_v43 = vadd.f32 %v10371_v63, %v3156_v6 }
 0x3e0   : > { %v3579_v12 = vpop.f32.mrf.mxu0  ;;  %7442 = vmatmul.mubr.bf16.gmra.mxu0 %v12786_v7 }
 0x3e1   : > { %v10878_v10 = vpack.c.bf16 %v3647_v2, %v3643_v46  ;;  %v3651_v17 = vadd.f32 %v3650_v61, %v3578_v27  ;;  %v3580_v59 = vadd.f32 %v3579_v12, %v10851_v58  ;;  %v3652_v28 = vpop.f32.mrf.mxu1  ;;  %7464 = vmatpush3.bf16.xpose.msra.mxu0 %v4232_v11  ;;  %7469 = vmatprep.mubr.bf16.mxu0 %v4226_v16 }
 0x3e2   : > { %v3581_v37 = vpop.f32.mrf.mxu0  ;;  %7465 = vmatprep.subr.bf16.mxu0 %v4231_v24  ;;  %v3166_v12 = vadd.f32 %v10517_v56, %v10244_v34  ;;  %v12790_v34 = vld [vmem:[#allocation10_spill] sm:$0xff] }
 0x3e3   : > { %v3653_v20 = vadd.f32 %v3652_v28, %v3580_v59  ;;  %v3582_v26 = vadd.f32 %v3581_v37, %v10844_v1  ;;  %v3654_v31 = vpop.f32.mrf.mxu1 }
 0x3e4   : > { %v3583_v15 = vpop.f32.mrf.mxu0 }
 0x3e5   : > { %v3655_v50 = vadd.f32 %v3654_v31, %v3582_v26  ;;  %v3584_v25 = vadd.f32 %v3583_v15, %v10851_v58  ;;  %v3656_v23 = vpop.f32.mrf.mxu1 }
 0x3e6   : > { %v3587_v19 = vpop.f32.mrf.mxu0 }
 0x3e7   : > { %v10884_v53 = vpack.c.bf16 %v3655_v50, %v3651_v17  ;;  %v3657_v30 = vadd.f32 %v3656_v23, %v3584_v25  ;;  %v3588_v45 = vadd.f32 %v3587_v19, %v10844_v1  ;;  %v3660_v14 = vpop.f32.mrf.mxu1  ;;  %v12787_v17 = vld [vmem:[#allocation11_spill] sm:$0xff] }
 0x3e8   : > { %v3589_v22 = vpop.f32.mrf.mxu0  ;;  %v4228_v59 = vpack.c.bf16 %v3229_v43, %v12787_v17 }
 0x3e9   : > { %v10888_v51 = vpack.c.bf16 %v3657_v30, %v3653_v20  ;;  %v3661_v52 = vadd.f32 %v3660_v14, %v3588_v45  ;;  %v3590_v44 = vadd.f32 %v3589_v22, %v10851_v58  ;;  %v3662_v47 = vpop.f32.mrf.mxu1  ;;  %7466 = vmatpush3.bf16.xpose.msra.mxu0 %v4231_v24  ;;  %v4227_v24 = vpack.c.bf16 %v3219_v8, %v10312_v41  ;;  %v12789_v20 = vld [vmem:[#allocation12_spill] sm:$0xff]  ;;  %v10920_v41 = vld [vmem:[%s12722_s4 + $0x8] sm:$0xf] }
 0x3ea   : > { %v3591_v60 = vpop.f32.mrf.mxu0  ;;  %7467 = vmatprep.subr.bf16.mxu0 %v4230_v0  ;;  %v10924_v56 = vrot.slane %v10920_v41, %v12790_v34 }
 0x3eb   : > { %v3663_v11 = vadd.f32 %v3662_v47, %v3590_v44  ;;  %v3592_v40 = vadd.f32 %v3591_v60, %v10844_v1  ;;  %v3664_v57 = vpop.f32.mrf.mxu1 }
 0x3ec   : > { %v3593_v29 = vpop.f32.mrf.mxu0 }
 0x3ed   : > { %v3665_v9 = vadd.f32 %v3664_v57, %v3592_v40  ;;  %v3594_v18 = vadd.f32 %v3593_v29, %v10851_v58  ;;  %v3666_v38 = vpop.f32.mrf.mxu1 }
 0x3ee   : > { %v3597_v62 = vpop.f32.mrf.mxu0 }
 0x3ef   : > { %v10897_v39 = vpack.c.bf16 %v3665_v9, %v3661_v52  ;;  %v3667_v4 = vadd.f32 %v3666_v38, %v3594_v18  ;;  %v3598_v33 = vadd.f32 %v3597_v62, %v10844_v1  ;;  %v3670_v36 = vpop.f32.mrf.mxu1 }
 0x3f0   : > { %v3599_v49 = vpop.f32.mrf.mxu0 }
 0x3f1   : > { %v10900_v35 = vpack.c.bf16 %v3667_v4, %v3663_v11  ;;  %v3671_v13 = vadd.f32 %v3670_v36, %v3598_v33  ;;  %v3600_v55 = vadd.f32 %v3599_v49, %v10851_v58  ;;  %v3672_v16 = vpop.f32.mrf.mxu1  ;;  %7468 = vmatpush3.bf16.xpose.msra.mxu0 %v4230_v0 }
 0x3f2   : > { %v3601_v3 = vpop.f32.mrf.mxu0 }
 0x3f3   : > { %v3673_v21 = vadd.f32 %v3672_v16, %v3600_v55  ;;  %v3602_v46 = vadd.f32 %v3601_v3, %v10844_v1  ;;  %v3674_v2 = vpop.f32.mrf.mxu1  ;;  %v12788_v1 = vld [vmem:[#allocation15_spill] sm:$0xff] }
 0x3f4   : > { %v3603_v27 = vpop.f32.mrf.mxu0  ;;  %v3239_v37 = vadd.f32 %v12788_v1, %v3166_v12 }
 0x3f5   : > { %v3675_v61 = vadd.f32 %v3674_v2, %v3602_v46  ;;  %v3604_v54 = vadd.f32 %v3603_v27, %v10851_v58  ;;  %v3676_v7 = vpop.f32.mrf.mxu1  ;;  %v12791_v46 = vld [vmem:[#allocation9_spill] sm:$0xff] }
 0x3f6   : > { %v4229_v26 = vpack.c.bf16 %v3239_v37, %v12789_v20  ;;  %v1150_v2 = vrot.slane %v10920_v41, %v12791_v46 }
 0x3f7   : > { %v10911_v48 = vpack.c.bf16 %v3675_v61, %v3671_v13  ;;  %v3677_v28 = vadd.f32 %v3676_v7, %v3604_v54 }
 0x3f8   : > { %7470 = vmatmul.mubr.bf16.vlgmr.msra.gmra.mxu0 %v4227_v24 }
 0x3f9   : > { %v10913_v63 = vpack.c.bf16 %v3677_v28, %v3673_v21  ;;  %7473 = vmatprep.mubr.bf16.mxu0 %v4228_v59 }
 0x400   : > { %7474 = vmatmul.mubr.bf16.gmra.mxu0 %v4229_v26 }
 0x417   : > { %v10926_v58 = vpop.f32.mrf.mxu0 }
 0x418   : > { %v10928_v31 = vpop.f32.mrf.mxu1 }
 0x419   : > { %v3715_v42 = vpop.f32.mrf.mxu0 }
 0x41a   : > { %v3716_v15 = vadd.f32 %v3715_v42, %v10924_v56  ;;  %v3788_v50 = vpop.f32.mrf.mxu1 }
 0x41b   : > { %v3717_v25 = vpop.f32.mrf.mxu0 }
 0x41c   : > { %v3789_v23 = vadd.f32 %v3788_v50, %v3716_v15  ;;  %v3790_v19 = vpop.f32.mrf.mxu1 }
 0x41d   : > { %v3719_v30 = vpop.f32.mrf.mxu0 }
 0x41e   : > { %v3720_v45 = vadd.f32 %v3719_v30, %v10924_v56  ;;  %v3792_v14 = vpop.f32.mrf.mxu1 }
 0x41f   : > { %v3723_v0 = vpop.f32.mrf.mxu0 }
 0x420   : > { %v3793_v22 = vadd.f32 %v3792_v14, %v3720_v45  ;;  %v3796_v52 = vpop.f32.mrf.mxu1  ;;  %v3724_v50 = vadd.f32 %v3723_v0, %v1150_v2  ;;  %v3718_v45 = vadd.f32 %v3717_v25, %v1150_v2 }
 0x421   : > { %v3725_v44 = vpop.f32.mrf.mxu0 }
 0x422   : > { %v10932_v47 = vpack.c.bf16 %v3793_v22, %v3789_v23  ;;  %v3726_v60 = vadd.f32 %v3725_v44, %v10924_v56  ;;  %v3798_v11 = vpop.f32.mrf.mxu1 }
 0x423   : > { %v3727_v40 = vpop.f32.mrf.mxu0 }
 0x424   : > { %v3799_v57 = vadd.f32 %v3798_v11, %v3726_v60  ;;  %v3800_v29 = vpop.f32.mrf.mxu1  ;;  %v3728_v20 = vadd.f32 %v3727_v40, %v1150_v2  ;;  %v3714_v60 = vadd.f32 %v10926_v58, %v1150_v2  ;;  %v3797_v11 = vadd.f32 %v3796_v52, %v3724_v50  ;;  %v12792_v58 = vld [vmem:[#allocation14_spill] sm:$0xff] }
 0x425   : > { %v3729_v9 = vpop.f32.mrf.mxu0 }
 0x426   : > { %v3730_v18 = vadd.f32 %v3729_v9, %v10924_v56  ;;  %v3802_v38 = vpop.f32.mrf.mxu1  ;;  %v3801_v14 = vadd.f32 %v3800_v29, %v3728_v20 }
 0x427   : > { %v3733_v32 = vpop.f32.mrf.mxu0 }
 0x428   : > { %v3803_v62 = vadd.f32 %v3802_v38, %v3730_v18  ;;  %v3806_v6 = vpop.f32.mrf.mxu1  ;;  %v3734_v28 = vadd.f32 %v3733_v32, %v1150_v2  ;;  %v3980_v9 = vpack.c.bf16 %v3801_v14, %v3797_v11  ;;  %v3787_v18 = vadd.f32 %v10928_v31, %v3714_v60 }
 0x429   : > { %v3735_v4 = vpop.f32.mrf.mxu0 }
 0x42a   : > { %v10936_v33 = vpack.c.bf16 %v3803_v62, %v3799_v57  ;;  %v3736_v36 = vadd.f32 %v3735_v4, %v10924_v56  ;;  %v3808_v49 = vpop.f32.mrf.mxu1  ;;  %v3807_v23 = vadd.f32 %v3806_v6, %v3734_v28  ;;  %v3791_v57 = vadd.f32 %v3790_v19, %v3718_v45 }
 0x42b   : > { %v3737_v13 = vpop.f32.mrf.mxu0  ;;  %v1162_v19 = vrot.slane %v10920_v41, %v12792_v58 }
 0x42c   : > { %v3809_v55 = vadd.f32 %v3808_v49, %v3736_v36  ;;  %v3810_v16 = vpop.f32.mrf.mxu1  ;;  %v3738_v24 = vadd.f32 %v3737_v13, %v1150_v2  ;;  %v3979_v29 = vpack.c.bf16 %v3791_v57, %v3787_v18  ;;  %v12793_v57 = vld [vmem:[#allocation13_spill] sm:$0xff] }
 0x42d   : > { %v3739_v8 = vpop.f32.mrf.mxu0 }
 0x42e   : > { %v3740_v3 = vadd.f32 %v3739_v8, %v10924_v56  ;;  %v3812_v43 = vpop.f32.mrf.mxu1  ;;  %v3811_v26 = vadd.f32 %v3810_v16, %v3738_v24 }
 0x42f   : > { %v3743_v21 = vpop.f32.mrf.mxu0 }
 0x430   : > { %v3813_v27 = vadd.f32 %v3812_v43, %v3740_v3  ;;  %v3816_v61 = vpop.f32.mrf.mxu1  ;;  %v3744_v7 = vadd.f32 %v3743_v21, %v1150_v2  ;;  %v3981_v22 = vpack.c.bf16 %v3811_v26, %v3807_v23 }
 0x431   : > { %v3745_v54 = vpop.f32.mrf.mxu0 }
 0x432   : > { %v10942_v12 = vpack.c.bf16 %v3813_v27, %v3809_v55  ;;  %v3818_v17 = vpop.f32.mrf.mxu1  ;;  %v3817_v42 = vadd.f32 %v3816_v61, %v3744_v7  ;;  %v3746_v0 = vadd.f32 %v3745_v54, %v10924_v56 }
 0x433   : > { %v3747_v59 = vpop.f32.mrf.mxu0 }
 0x434   : > { %v3748_v1 = vadd.f32 %v3747_v59, %v1150_v2  ;;  %v3820_v37 = vpop.f32.mrf.mxu1  ;;  %v3819_v32 = vadd.f32 %v3818_v17, %v3746_v0 }
 0x435   : > { %v3749_v44 = vpop.f32.mrf.mxu0 }
 0x436   : > { %v3821_v15 = vadd.f32 %v3820_v37, %v3748_v1  ;;  %v3750_v40 = vadd.f32 %v3749_v44, %v10924_v56  ;;  %v3822_v25 = vpop.f32.mrf.mxu1 }
 0x438   : > { %v3982_v30 = vpack.c.bf16 %v3821_v15, %v3817_v42  ;;  %v3823_v38 = vadd.f32 %v3822_v25, %v3750_v40 }
 0x43a   : > { %7445 = vmatprep.subr.bf16.mxu1 %v3982_v30  ;;  %v10948_v62 = vpack.c.bf16 %v3823_v38, %v3819_v32 }
 0x43b   : > { %7446 = vmatpush3.bf16.msra.mxu1 %v3982_v30 }
 0x43c   : > { %7447 = vmatprep.subr.bf16.mxu1 %v3981_v22 }
 0x43f   : > { %7448 = vmatpush3.bf16.msra.mxu1 %v3981_v22 }
 0x440   : > { %7449 = vmatprep.subr.bf16.mxu1 %v3980_v9 }
 0x443   : > { %7450 = vmatpush3.bf16.msra.mxu1 %v3980_v9  ;;  %v1158_v9 = vrot.slane %v10920_v41, %v12793_v57 }
 0x444   : > { %7451 = vmatprep.subr.bf16.mxu1 %v3979_v29 }
 0x447   : > { %7452 = vmatpush3.bf16.msra.mxu1 %v3979_v29 }
 0x448   : > { %7477 = vmatprep.subr.bf16.mxu1 %v10948_v62 }
 0x458   : > { %v10953_v52 = vpop.f32.mrf.mxu0 }
 0x459   : > { %v10955_v31 = vpop.f32.mrf.mxu1 }
 0x45a   : > { %v3861_v56 = vpop.f32.mrf.mxu0 }
 0x45b   : > { %v3862_v6 = vadd.f32 %v3861_v56, %v1162_v19  ;;  %v3934_v4 = vpop.f32.mrf.mxu1 }
 0x45c   : > { %v3863_v36 = vpop.f32.mrf.mxu0 }
 0x45d   : > { %v3935_v49 = vadd.f32 %v3934_v4, %v3862_v6  ;;  %v10957_v13 = vpop.f32.mrf.mxu1 }
 0x45e   : > { %v3865_v55 = vpop.f32.mrf.mxu0 }
 0x45f   : > { %v3866_v16 = vadd.f32 %v3865_v55, %v1162_v19  ;;  %v3938_v8 = vpop.f32.mrf.mxu1 }
 0x460   : > { %v3869_v3 = vpop.f32.mrf.mxu0 }
 0x461   : > { %v3939_v43 = vadd.f32 %v3938_v8, %v3866_v16  ;;  %v3942_v21 = vpop.f32.mrf.mxu1 }
 0x462   : > { %v3871_v2 = vpop.f32.mrf.mxu0 }
 0x463   : > { %v10959_v27 = vpack.c.bf16 %v3939_v43, %v3935_v49  ;;  %v3872_v61 = vadd.f32 %v3871_v2, %v1162_v19  ;;  %v3944_v54 = vpop.f32.mrf.mxu1 }
 0x464   : > { %v3873_v24 = vpop.f32.mrf.mxu0 }
 0x465   : > { %v3945_v7 = vadd.f32 %v3944_v54, %v3872_v61  ;;  %v3946_v17 = vpop.f32.mrf.mxu1  ;;  %v3874_v8 = vadd.f32 %v3873_v24, %v1158_v9 }
 0x466   : > { %v3875_v59 = vpop.f32.mrf.mxu0 }
 0x467   : > { %v3876_v28 = vadd.f32 %v3875_v59, %v1162_v19  ;;  %v3948_v1 = vpop.f32.mrf.mxu1  ;;  %v3870_v59 = vadd.f32 %v3869_v3, %v1158_v9 }
 0x468   : > { %v3879_v37 = vpop.f32.mrf.mxu0 }
 0x469   : > { %v3949_v20 = vadd.f32 %v3948_v1, %v3876_v28  ;;  %v3952_v26 = vpop.f32.mrf.mxu1  ;;  %v3880_v4 = vadd.f32 %v3879_v37, %v1158_v9  ;;  %v3860_v37 = vadd.f32 %v10953_v52, %v1158_v9  ;;  %v3943_v24 = vadd.f32 %v3942_v21, %v3870_v59 }
 0x46a   : > { %v3881_v42 = vpop.f32.mrf.mxu0 }
 0x46b   : > { %v10961_v15 = vpack.c.bf16 %v3949_v20, %v3945_v7  ;;  %v3882_v50 = vadd.f32 %v3881_v42, %v1162_v19  ;;  %v3954_v23 = vpop.f32.mrf.mxu1  ;;  %v3953_v28 = vadd.f32 %v3952_v26, %v3880_v4  ;;  %v3864_v42 = vadd.f32 %v3863_v36, %v1158_v9 }
 0x46c   : > { %v3883_v30 = vpop.f32.mrf.mxu0 }
 0x46d   : > { %v3955_v45 = vadd.f32 %v3954_v23, %v3882_v50  ;;  %v3956_v14 = vpop.f32.mrf.mxu1  ;;  %v3884_v25 = vadd.f32 %v3883_v30, %v1158_v9  ;;  %v3947_v50 = vadd.f32 %v3946_v17, %v3874_v8 }
 0x46e   : > { %v3885_v22 = vpop.f32.mrf.mxu0 }
 0x46f   : > { %v3886_v44 = vadd.f32 %v3885_v22, %v1162_v19  ;;  %v3958_v60 = vpop.f32.mrf.mxu1  ;;  %v3957_v2 = vadd.f32 %v3956_v14, %v3884_v25  ;;  %v4489_v14 = vpack.c.bf16 %v3947_v50, %v3943_v24 }
 0x470   : > { %v3889_v11 = vpop.f32.mrf.mxu0 }
 0x471   : > { %v3959_v40 = vadd.f32 %v3958_v60, %v3886_v44  ;;  %v3962_v18 = vpop.f32.mrf.mxu1  ;;  %v3890_v38 = vadd.f32 %v3889_v11, %v1158_v9  ;;  %v4490_v23 = vpack.c.bf16 %v3957_v2, %v3953_v28 }
 0x472   : > { %v3891_v0 = vpop.f32.mrf.mxu0 }
 0x473   : > { %v10965_v29 = vpack.c.bf16 %v3959_v40, %v3955_v45  ;;  %v3892_v32 = vadd.f32 %v3891_v0, %v1162_v19  ;;  %v3964_v56 = vpop.f32.mrf.mxu1  ;;  %v3963_v61 = vadd.f32 %v3962_v18, %v3890_v38  ;;  %v3937_v45 = vadd.f32 %v10957_v13, %v3864_v42 }
 0x474   : > { %v3893_v6 = vpop.f32.mrf.mxu0 }
 0x475   : > { %v3965_v49 = vadd.f32 %v3964_v56, %v3892_v32  ;;  %v3894_v55 = vadd.f32 %v3893_v6, %v1158_v9  ;;  %v3966_v16 = vpop.f32.mrf.mxu1 }
 0x476   : > { %v3895_v43 = vpop.f32.mrf.mxu0 }
 0x477   : > { %v3967_v54 = vadd.f32 %v3966_v16, %v3894_v55  ;;  %v3896_v41 = vadd.f32 %v3895_v43, %v1162_v19  ;;  %v3968_v7 = vpop.f32.mrf.mxu1  ;;  %v3933_v19 = vadd.f32 %v10955_v31, %v3860_v37 }
 0x479   : > { %v4491_v1 = vpack.c.bf16 %v3967_v54, %v3963_v61  ;;  %v3969_v20 = vadd.f32 %v3968_v7, %v3896_v41  ;;  %v4488_v3 = vpack.c.bf16 %v3937_v45, %v3933_v19 }
 0x47b   : > { %v10967_v30 = vpack.c.bf16 %v3969_v20, %v3965_v49  ;;  %7509 = vmatprep.subr.bf16.mxu0 %v4491_v1 }
 0x47c   : > { %7510 = vmatpush3.bf16.msra.mxu0 %v4491_v1 }
 0x47d   : > { %7511 = vmatprep.subr.bf16.mxu0 %v4490_v23 }
 0x480   : > { %7512 = vmatpush3.bf16.msra.mxu0 %v4490_v23 }
 0x481   : > { %7513 = vmatprep.subr.bf16.mxu0 %v4489_v14 }
 0x484   : > { %7514 = vmatpush3.bf16.msra.mxu0 %v4489_v14 }
 0x485   : > { %7515 = vmatprep.subr.bf16.mxu0 %v4488_v3 }
 0x488   : > { %7516 = vmatpush3.bf16.msra.mxu0 %v4488_v3 }
 0x489   : > { %7525 = vmatprep.subr.bf16.mxu0 %v10913_v63 }
 0x498   : > { %v7439_v36 = vpop.f32.mrf.mxu0 }
 0x499   : > { %v10973_v17 = vmul.f32 0.088388346, %v7439_v36 }
 0x49a   : > { %v4017_v52 = vpop.f32.mrf.mxu0 }
 0x49b   : > { %v10975_v21 = vmul.f32 0.088388346, %v4017_v52  ;;  %v4063_v13 = vsel %vm4056_vm0, %v10973_v17, -inf }
 0x49c   : > { %4064 = vmax.xlane.f32.xlu0 %v4063_v13  ;;  %v7440_v26 = vpop.f32.mrf.mxu0 }
 0x49d   : > { %v4057_v31 = vsel %vm4056_vm0, %v10975_v21, -inf  ;;  %v10983_v11 = vmul.f32 0.088388346, %v7440_v26 }
 0x49e   : > { %4058 = vmax.xlane.f32.xlu1 %v4057_v31  ;;  %v4020_v22 = vpop.f32.mrf.mxu0 }
 0x49f   : > { %v10981_v44 = vmul.f32 0.088388346, %v4020_v22  ;;  %v4066_v38 = vsel %vm4056_vm0, %v10983_v11, -inf }
 0x4a0   : > { %v7443_v60 = vpop.f32.mrf.mxu0 }
 0x4a1   : > { %v4060_v9 = vsel %vm4056_vm0, %v10981_v44, -inf  ;;  %v10989_v25 = vmul.f32 0.088388346, %v7443_v60 }
 0x4a2   : > { %4061 = vmax.xlane.f32.xlu1 %v4060_v9  ;;  %v4033_v40 = vpop.f32.mrf.mxu0 }
 0x4a3   : > { %v10987_v18 = vmul.f32 0.088388346, %v4033_v40  ;;  %v4075_v49 = vsel %vm4056_vm0, %v10989_v25, -inf }
 0x4a4   : > { %v7444_v0 = vpop.f32.mrf.mxu0 }
 0x4a5   : > { %v4069_v32 = vsel %vm4056_vm0, %v10987_v18, -inf  ;;  %v10997_v4 = vmul.f32 0.088388346, %v7444_v0 }
 0x4a6   : > { %4067 = vmax.xlane.f32.xlu1 %v4066_v38  ;;  %4070 = vmax.xlane.f32.xlu0 %v4069_v32  ;;  %v4036_v56 = vpop.f32.mrf.mxu0 }
 0x4a7   : > { %v10995_v6 = vmul.f32 0.088388346, %v4036_v56  ;;  %v4078_v16 = vsel %vm4056_vm0, %v10997_v4, -inf }
 0x4a9   : > { %v4072_v55 = vsel %vm4056_vm0, %v10995_v6, -inf }
 0x4aa   : > { %4076 = vmax.xlane.f32.xlu0 %v4075_v49  ;;  %4073 = vmax.xlane.f32.xlu1 %v4072_v55 }
 0x4ae   : > { %4079 = vmax.xlane.f32.xlu1 %v4078_v16 }
 0x4b8   : > { %v7471_v8 = vpop.f32.mrf.mxu0 }
 0x4b9   : > { %v11007_v54 = vmul.f32 0.088388346, %v7471_v8 }
 0x4ba   : > { %v4272_v43 = vpop.f32.mrf.mxu0 }
 0x4bb   : > { %v11005_v2 = vmul.f32 0.088388346, %v4272_v43  ;;  %v4317_v20 = vsel %vm4056_vm0, %v11007_v54, -inf }
 0x4bc   : > { %v7472_v61 = vpop.f32.mrf.mxu0 }
 0x4bd   : > { %v4311_v41 = vsel %vm4056_vm0, %v11005_v2, -inf  ;;  %v11013_v1 = vmul.f32 0.088388346, %v7472_v61 }
 0x4be   : > { %4312 = vmax.xlane.f32.xlu0 %v4311_v41  ;;  %v4275_v7 = vpop.f32.mrf.mxu0 }
 0x4bf   : > { %v11011_v59 = vmul.f32 0.088388346, %v4275_v7  ;;  %v4320_v14 = vsel %vm4056_vm0, %v11013_v1, -inf }
 0x4c0   : > { %v7475_v28 = vpop.f32.mrf.mxu0 }
 0x4c1   : > { %v4314_v42 = vsel %vm4056_vm0, %v11011_v59, -inf  ;;  %v11021_v24 = vmul.f32 0.088388346, %v7475_v28 }
 0x4c2   : > { %4318 = vmax.xlane.f32.xlu0 %v4317_v20  ;;  %v4288_v50 = vpop.f32.mrf.mxu0  ;;  %4315 = vmax.xlane.f32.xlu1 %v4314_v42 }
 0x4c3   : > { %v11019_v23 = vmul.f32 0.088388346, %v4288_v50  ;;  %v4329_v52 = vsel %vm4056_vm0, %v11021_v24, -inf }
 0x4c4   : > { %v7476_v37 = vpop.f32.mrf.mxu0 }
 0x4c5   : > { %v4323_v45 = vsel %vm4056_vm0, %v11019_v23, -inf  ;;  %v11029_v36 = vmul.f32 0.088388346, %v7476_v37 }
 0x4c6   : > { %4324 = vmax.xlane.f32.xlu0 %v4323_v45  ;;  %v4291_v19 = vpop.f32.mrf.mxu0  ;;  %4321 = vmax.xlane.f32.xlu1 %v4320_v14 }
 0x4c7   : > { %v11027_v3 = vmul.f32 0.088388346, %v4291_v19  ;;  %v4332_v26 = vsel %vm4056_vm0, %v11029_v36, -inf }
 0x4c9   : > { %v4326_v13 = vsel %vm4056_vm0, %v11027_v3, -inf }
 0x4ca   : > { %4330 = vmax.xlane.f32.xlu0 %v4329_v52  ;;  %4327 = vmax.xlane.f32.xlu1 %v4326_v13 }
 0x4ce   : > { %4333 = vmax.xlane.f32.xlu1 %v4332_v26 }
 0x525   : > { %v4065_v31 = vpop.xlane.xlu0 %4064 }
 0x526   : > { %v4083_v22 = vsub.f32 %v10973_v17, %v4065_v31 }
 0x527   : > { %v4059_v60 = vpop.xlane.xlu1 %4058 }
 0x528   : > { %v4081_v9 = vsub.f32 %v10975_v21, %v4059_v60  ;;  %v4093_v40 = vmul.f32 1.442695, %v4083_v22 }
 0x52a   : > { %v4089_v0 = vmul.f32 1.442695, %v4081_v9 }
 0x52b   : > { %v4062_v38 = vpop.xlane.xlu1 %4061 }
 0x52c   : > { %8379 = vpow2.f32 %v4089_v0  ;;  %v4082_v32 = vsub.f32 %v10981_v44, %v4062_v38 }
 0x52d   : > { %8381 = vpow2.f32 %v4093_v40 }
 0x52e   : > { %v4091_v56 = vmul.f32 1.442695, %v4082_v32 }
 0x52f   : > { %v4068_v49 = vpop.xlane.xlu1 %4067  ;;  %v4071_v55 = vpop.xlane.xlu0 %4070 }
 0x530   : > { %8383 = vpow2.f32 %v4091_v56  ;;  %v4084_v16 = vsub.f32 %v10983_v11, %v4068_v49  ;;  %v4085_v8 = vsub.f32 %v10987_v18, %v4071_v55 }
 0x532   : > { %v4095_v43 = vmul.f32 1.442695, %v4084_v16  ;;  %v4097_v17 = vmul.f32 1.442695, %v4085_v8 }
 0x533   : > { %v4077_v61 = vpop.xlane.xlu0 %4076  ;;  %v4074_v41 = vpop.xlane.xlu1 %4073 }
 0x534   : > { %8385 = vpow2.f32 %v4095_v43  ;;  %v4087_v21 = vsub.f32 %v10989_v25, %v4077_v61  ;;  %v4086_v7 = vsub.f32 %v10995_v6, %v4074_v41 }
 0x535   : > { %8387 = vpow2.f32 %v4097_v17 }
 0x536   : > { %v4101_v44 = vmul.f32 1.442695, %v4087_v21  ;;  %v4099_v28 = vmul.f32 1.442695, %v4086_v7 }
 0x537   : > { %v4080_v20 = vpop.xlane.xlu1 %4079 }
 0x538   : > { %8389 = vpow2.f32 %v4101_v44  ;;  %v4088_v42 = vsub.f32 %v10997_v4, %v4080_v20 }
 0x539   : > { %v11045_v50 = vpop.eup %8379  ;;  %8391 = vpow2.f32 %v4099_v28 }
 0x53a   : > { %v4103_v11 = vmul.f32 1.442695, %v4088_v42  ;;  %v4105_v18 = vsel %vm4056_vm0, %v11045_v50, 0.0  ;;  %v11049_v37 = vpop.eup %8381 }
 0x53b   : > { %4106 = vadd.xlane.f32.xlu0 %v4105_v18  ;;  %v4111_v6 = vsel %vm4056_vm0, %v11049_v37, 0.0 }
 0x53c   : > { %8393 = vpow2.f32 %v4103_v11 }
 0x53d   : > { %v11051_v25 = vpop.eup %8383 }
 0x53e   : > { %v4108_v45 = vsel %vm4056_vm0, %v11051_v25, 0.0 }
 0x53f   : > { %4112 = vadd.xlane.f32.xlu0 %v4111_v6  ;;  %4109 = vadd.xlane.f32.xlu1 %v4108_v45 }
 0x541   : > { %v11057_v4 = vpop.eup %8385 }
 0x542   : > { %v11059_v14 = vpop.eup %8387  ;;  %v4114_v19 = vsel %vm4056_vm0, %v11057_v4, 0.0 }
 0x543   : > { %v4117_v52 = vsel %vm4056_vm0, %v11059_v14, 0.0  ;;  %4115 = vadd.xlane.f32.xlu1 %v4114_v19 }
 0x544   : > { %4118 = vadd.xlane.f32.xlu0 %v4117_v52 }
 0x545   : > { %v11065_v13 = vpop.eup %8389 }
 0x546   : > { %v11067_v26 = vpop.eup %8391  ;;  %v4123_v31 = vsel %vm4056_vm0, %v11065_v13, 0.0 }
 0x547   : > { %v4313_v22 = vpop.xlane.xlu0 %4312  ;;  %v4120_v60 = vsel %vm4056_vm0, %v11067_v26, 0.0 }
 0x548   : > { %v4335_v9 = vsub.f32 %v11005_v2, %v4313_v22  ;;  %4124 = vadd.xlane.f32.xlu0 %v4123_v31  ;;  %4121 = vadd.xlane.f32.xlu1 %v4120_v60 }
 0x549   : > { %v11074_v40 = vpop.eup %8393 }
 0x54a   : > { %v4343_v0 = vmul.f32 1.442695, %v4335_v9  ;;  %v4126_v38 = vsel %vm4056_vm0, %v11074_v40, 0.0 }
 0x54b   : > { %v4319_v32 = vpop.xlane.xlu0 %4318  ;;  %v4316_v56 = vpop.xlane.xlu1 %4315 }
 0x54c   : > { %8395 = vpow2.f32 %v4343_v0  ;;  %v4337_v49 = vsub.f32 %v11007_v54, %v4319_v32  ;;  %4127 = vadd.xlane.f32.xlu1 %v4126_v38  ;;  %v4336_v55 = vsub.f32 %v11011_v59, %v4316_v56 }
 0x54e   : > { %v4347_v16 = vmul.f32 1.442695, %v4337_v49  ;;  %v4345_v8 = vmul.f32 1.442695, %v4336_v55 }
 0x54f   : > { %v4325_v43 = vpop.xlane.xlu0 %4324  ;;  %v4322_v2 = vpop.xlane.xlu1 %4321 }
 0x550   : > { %8397 = vpow2.f32 %v4347_v16  ;;  %v4339_v17 = vsub.f32 %v11019_v23, %v4325_v43  ;;  %v4338_v61 = vsub.f32 %v11013_v1, %v4322_v2 }
 0x551   : > { %8399 = vpow2.f32 %v4345_v8 }
 0x552   : > { %v4351_v41 = vmul.f32 1.442695, %v4339_v17  ;;  %v4349_v21 = vmul.f32 1.442695, %v4338_v61 }
 0x553   : > { %v4331_v7 = vpop.xlane.xlu0 %4330  ;;  %v4328_v44 = vpop.xlane.xlu1 %4327 }
 0x554   : > { %8401 = vpow2.f32 %v4351_v41  ;;  %v4341_v54 = vsub.f32 %v11021_v24, %v4331_v7  ;;  %v4340_v28 = vsub.f32 %v11027_v3, %v4328_v44 }
 0x555   : > { %8403 = vpow2.f32 %v4349_v21 }
 0x556   : > { %v4355_v59 = vmul.f32 1.442695, %v4341_v54  ;;  %v4353_v20 = vmul.f32 1.442695, %v4340_v28 }
 0x557   : > { %v4334_v42 = vpop.xlane.xlu1 %4333 }
 0x558   : > { %8405 = vpow2.f32 %v4355_v59  ;;  %v4342_v11 = vsub.f32 %v11029_v36, %v4334_v42 }
 0x559   : > { %v11085_v23 = vpop.eup %8395  ;;  %8407 = vpow2.f32 %v4353_v20 }
 0x55a   : > { %v4357_v1 = vmul.f32 1.442695, %v4342_v11  ;;  %v4359_v18 = vsel %vm4056_vm0, %v11085_v23, 0.0 }
 0x55b   : > { %4360 = vadd.xlane.f32.xlu0 %v4359_v18 }
 0x55c   : > { %8409 = vpow2.f32 %v4357_v1 }
 0x55d   : > { %v11089_v6 = vpop.eup %8397 }
 0x55e   : > { %v11091_v24 = vpop.eup %8399  ;;  %v4365_v3 = vsel %vm4056_vm0, %v11089_v6, 0.0 }
 0x55f   : > { %4366 = vadd.xlane.f32.xlu0 %v4365_v3  ;;  %v4362_v36 = vsel %vm4056_vm0, %v11091_v24, 0.0 }
 0x560   : > { %4363 = vadd.xlane.f32.xlu1 %v4362_v36 }
 0x561   : > { %v11097_v45 = vpop.eup %8401 }
 0x562   : > { %v11099_v19 = vpop.eup %8403  ;;  %v4371_v52 = vsel %vm4056_vm0, %v11097_v45, 0.0 }
 0x563   : > { %4372 = vadd.xlane.f32.xlu0 %v4371_v52  ;;  %v4368_v31 = vsel %vm4056_vm0, %v11099_v19, 0.0 }
 0x564   : > { %4369 = vadd.xlane.f32.xlu1 %v4368_v31 }
 0x565   : > { %v11105_v22 = vpop.eup %8405 }
 0x566   : > { %v11107_v60 = vpop.eup %8407  ;;  %v4377_v9 = vsel %vm4056_vm0, %v11105_v22, 0.0 }
 0x567   : > { %4378 = vadd.xlane.f32.xlu0 %v4377_v9  ;;  %v4374_v0 = vsel %vm4056_vm0, %v11107_v60, 0.0 }
 0x568   : > { %4375 = vadd.xlane.f32.xlu1 %v4374_v0 }
 0x569   : > { %v11113_v38 = vpop.eup %8409 }
 0x56a   : > { %v4380_v32 = vsel %vm4056_vm0, %v11113_v38, 0.0 }
 0x56c   : > { %4381 = vadd.xlane.f32.xlu1 %v4380_v32 }
 0x5c4   : > { %v4107_v56 = vpop.xlane.xlu0 %4106 }
 0x5c5   : > { %8411 = vrcp.f32 %v4107_v56 }
 0x5c8   : > { %v4113_v49 = vpop.xlane.xlu0 %4112  ;;  %v4110_v55 = vpop.xlane.xlu1 %4109 }
 0x5c9   : > { %8413 = vrcp.f32 %v4110_v55 }
 0x5ca   : > { %8415 = vrcp.f32 %v4113_v49 }
 0x5cc   : > { %v4116_v16 = vpop.xlane.xlu1 %4115 }
 0x5cd   : > { %v4119_v8 = vpop.xlane.xlu0 %4118  ;;  %8417 = vrcp.f32 %v4116_v16 }
 0x5ce   : > { %8419 = vrcp.f32 %v4119_v8 }
 0x5d1   : > { %v4125_v43 = vpop.xlane.xlu0 %4124  ;;  %v4122_v2 = vpop.xlane.xlu1 %4121 }
 0x5d2   : > { %8421 = vrcp.f32 %v4122_v2  ;;  %v8412_v17 = vpop.eup %8411 }
 0x5d3   : > { %8423 = vrcp.f32 %v4125_v43  ;;  %v4137_v7 = vmul.f32 %v8412_v17, %v11045_v50 }
 0x5d5   : > { %v4128_v61 = vpop.xlane.xlu1 %4127 }
 0x5d6   : > { %8425 = vrcp.f32 %v4128_v61  ;;  %v8414_v41 = vpop.eup %8413 }
 0x5d7   : > { %v8416_v21 = vpop.eup %8415  ;;  %v4138_v44 = vmul.f32 %v8414_v41, %v11051_v25 }
 0x5d8   : > { %v4139_v59 = vmul.f32 %v8416_v21, %v11049_v37 }
 0x5d9   : > { %v4145_v28 = vpack.c.bf16 %v4138_v44, %v4137_v7 }
 0x5da   : > { %v8418_v54 = vpop.eup %8417 }
 0x5db   : > { %v4140_v20 = vmul.f32 %v8418_v54, %v11057_v4  ;;  %7453 = vmatprep.mubr.msk.bf16.mxu1 %vm4056_vm0, %v4145_v28  ;;  %v8420_v11 = vpop.eup %8419  ;;  %v12800_v54 = vld [vmem:[#allocation30_spill] sm:$0xff] }
 0x5dc   : > { %v4141_v50 = vmul.f32 %v8420_v11, %v11059_v14 }
 0x5dd   : > { %v4146_v42 = vpack.c.bf16 %v4140_v20, %v4139_v59 }
 0x5df   : > { %7454 = vmatmul.mubr.msk.bf16.vlgmr.msra.gmra.mxu1 %vm4056_vm0, %v4146_v42  ;;  %v8422_v1 = vpop.eup %8421 }
 0x5e0   : > { %7478 = vmatpush3.bf16.msra.mxu1 %v10948_v62  ;;  %v8424_v18 = vpop.eup %8423  ;;  %v4142_v25 = vmul.f32 %v8422_v1, %v11067_v26 }
 0x5e1   : > { %7479 = vmatprep.subr.bf16.mxu1 %v10942_v12  ;;  %v4143_v36 = vmul.f32 %v8424_v18, %v11065_v13 }
 0x5e2   : > { %v4147_v37 = vpack.c.bf16 %v4142_v25, %v4141_v50 }
 0x5e3   : > { %v8426_v3 = vpop.eup %8425 }
 0x5e4   : > { %7480 = vmatpush3.bf16.msra.mxu1 %v10942_v12  ;;  %v4361_v4 = vpop.xlane.xlu0 %4360  ;;  %v4144_v52 = vmul.f32 %v8426_v3, %v11074_v40  ;;  %7457 = vmatprep.mubr.msk.bf16.mxu1 %vm4056_vm0, %v4147_v37 }
 0x5e5   : > { %7481 = vmatprep.subr.bf16.mxu1 %v10936_v33  ;;  %8427 = vrcp.f32 %v4361_v4 }
 0x5e6   : > { %v4148_v62 = vpack.c.bf16 %v4144_v52, %v4143_v36 }
 0x5e8   : > { %7458 = vmatmul.mubr.msk.bf16.gmra.mxu1 %vm4056_vm0, %v4148_v62  ;;  %v4367_v14 = vpop.xlane.xlu0 %4366 }
 0x5e9   : > { %7482 = vmatpush3.bf16.msra.mxu1 %v10936_v33  ;;  %v4364_v26 = vpop.xlane.xlu1 %4363 }
 0x5ea   : > { %7483 = vmatprep.subr.bf16.mxu1 %v10932_v47  ;;  %8429 = vrcp.f32 %v4364_v26 }
 0x5eb   : > { %8431 = vrcp.f32 %v4367_v14 }
 0x5ec   : > { %v4373_v12 = vpop.xlane.xlu0 %4372 }
 0x5ed   : > { %7484 = vmatpush3.bf16.msra.mxu1 %v10932_v47  ;;  %v4370_v13 = vpop.xlane.xlu1 %4369 }
 0x5ee   : > { %7493 = vmatprep.subr.bf16.mxu1 %v10911_v48  ;;  %8433 = vrcp.f32 %v4370_v13 }
 0x5ef   : > { %8435 = vrcp.f32 %v4373_v12 }
 0x5f0   : > { %v4379_v40 = vpop.xlane.xlu0 %4378 }
 0x5f1   : > { %v4376_v31 = vpop.xlane.xlu1 %4375 }
 0x5f2   : > { %8437 = vrcp.f32 %v4376_v31  ;;  %v8428_v9 = vpop.eup %8427 }
 0x5f3   : > { %8439 = vrcp.f32 %v4379_v40  ;;  %v4391_v32 = vmul.f32 %v8428_v9, %v11085_v23 }
 0x5f5   : > { %v4382_v0 = vpop.xlane.xlu1 %4381 }
 0x5f6   : > { %8441 = vrcp.f32 %v4382_v0 }
 0x5f7   : > { %v8430_v33 = vpop.eup %8429 }
 0x5f8   : > { %v4392_v56 = vmul.f32 %v8430_v33, %v11091_v24  ;;  %v8432_v49 = vpop.eup %8431 }
 0x5f9   : > { %v4393_v16 = vmul.f32 %v8432_v49, %v11089_v6 }
 0x5fa   : > { %v4399_v55 = vpack.c.bf16 %v4392_v56, %v4391_v32 }
 0x5fb   : > { %v8434_v47 = vpop.eup %8433 }
 0x5fc   : > { %v4394_v8 = vmul.f32 %v8434_v47, %v11099_v19  ;;  %7485 = vmatprep.mubr.msk.bf16.mxu1 %vm4056_vm0, %v4399_v55  ;;  %v8436_v43 = vpop.eup %8435 }
 0x5fd   : > { %v4395_v61 = vmul.f32 %v8436_v43, %v11097_v45  ;;  %v12794_v45 = vld [vmem:[#allocation20_spill] sm:$0xff] }
 0x5fe   : > { %v4400_v2 = vpack.c.bf16 %v4394_v8, %v4393_v16 }
 0x5ff   : > { %v8438_v17 = vpop.eup %8437 }
 0x600   : > { %7486 = vmatmul.mubr.msk.bf16.vlgmr.msra.gmra.mxu1 %vm4056_vm0, %v4400_v2  ;;  %v4396_v23 = vmul.f32 %v8438_v17, %v11107_v60  ;;  %v8440_v41 = vpop.eup %8439  ;;  %v12795_v60 = vld [vmem:[#allocation17_spill] sm:$0xff] }
 0x601   : > { %7494 = vmatpush3.bf16.xpose.msra.mxu1 %v10911_v48  ;;  %v4397_v19 = vmul.f32 %v8440_v41, %v11105_v22  ;;  %v12796_v44 = vpack.c.bf16 %v12794_v45, %v12795_v60  ;;  %v12797_v48 = vld [vmem:[#allocation25_spill] sm:$0xff]  ;;  %v12798_v22 = vld [vmem:[#allocation22_spill] sm:$0xff] }
 0x602   : > { %7495 = vmatprep.subr.bf16.mxu1 %v10897_v39  ;;  %v4401_v24 = vpack.c.bf16 %v4396_v23, %v4395_v61 }
 0x603   : > { %v8442_v6 = vpop.eup %8441 }
 0x604   : > { %7489 = vmatprep.mubr.msk.bf16.mxu1 %vm4056_vm0, %v4401_v24  ;;  %v4398_v21 = vmul.f32 %v8442_v6, %v11113_v38  ;;  %v12799_v38 = vpack.c.bf16 %v12797_v48, %v12798_v22 }
 0x606   : > { %v4402_v7 = vpack.c.bf16 %v4398_v21, %v4397_v19 }
 0x608   : > { %7490 = vmatmul.mubr.msk.bf16.gmra.mxu1 %vm4056_vm0, %v4402_v7 }
 0x609   : > { %7496 = vmatpush3.bf16.xpose.msra.mxu1 %v10897_v39  ;;  %7501 = vmatprep.mubr.bf16.mxu1 %v12796_v44  ;;  %v12801_v39 = vld [vmem:[#allocation27_spill] sm:$0xff] }
 0x60a   : > { %7497 = vmatprep.subr.bf16.mxu1 %v10884_v53  ;;  %v12802_v28 = vpack.c.bf16 %v12800_v54, %v12801_v39 }
 0x611   : > { %7498 = vmatpush3.bf16.xpose.msra.mxu1 %v10884_v53  ;;  %v12803_v53 = vld [vmem:[#allocation34_spill] sm:$0xff] }
 0x612   : > { %7499 = vmatprep.subr.bf16.mxu1 %v10870_v5 }
 0x619   : > { %7500 = vmatpush3.bf16.xpose.msra.mxu1 %v10870_v5  ;;  %v12804_v5 = vld [vmem:[#allocation32_spill] sm:$0xff] }
 0x61a   : > { %7541 = vmatprep.subr.bf16.mxu1 %v10967_v30  ;;  %v12805_v59 = vpack.c.bf16 %v12803_v53, %v12804_v5 }
 0x620   : > { %7502 = vmatmul.mubr.bf16.vlgmr.msra.gmra.mxu1 %v12799_v38 }
 0x621   : > { %7505 = vmatprep.mubr.bf16.mxu1 %v12802_v28  ;;  %7542 = vmatpush3.bf16.msra.mxu1 %v10967_v30 }
 0x622   : > { %7543 = vmatprep.subr.bf16.mxu1 %v10965_v29 }
 0x625   : > { %7544 = vmatpush3.bf16.msra.mxu1 %v10965_v29 }
 0x626   : > { %7545 = vmatprep.subr.bf16.mxu1 %v10961_v15 }
 0x628   : > { %7506 = vmatmul.mubr.bf16.gmra.mxu1 %v12805_v59 }
 0x629   : > { %7546 = vmatpush3.bf16.msra.mxu1 %v10961_v15 }
 0x62a   : > { %7547 = vmatprep.subr.bf16.mxu1 %v10959_v27 }
 0x62d   : > { %7548 = vmatpush3.bf16.msra.mxu1 %v10959_v27 }
 0x69f   : > { %v7455_v20 = vpop.f32.mrf.mxu1 }
 0x6a1   : > { %v4195_v42 = vpop.f32.mrf.mxu1 }
 0x6a3   : > { %v7456_v11 = vpop.f32.mrf.mxu1 }
 0x6a4   : > { %v11176_v30 = vpack.c.bf16 %v7456_v11, %v7455_v20 }
 0x6a5   : > { %v4198_v1 = vpop.f32.mrf.mxu1 }
 0x6a6   : > { %v11178_v18 = vpack.c.bf16 %v4198_v1, %v4195_v42 }
 0x6a8   : > { %v7459_v29 = vpop.f32.mrf.mxu1 }
 0x6aa   : > { %v4211_v50 = vpop.f32.mrf.mxu1 }
 0x6ac   : > { %v7460_v25 = vpop.f32.mrf.mxu1 }
 0x6ad   : > { %v11180_v3 = vpack.c.bf16 %v7460_v25, %v7459_v29 }
 0x6ae   : > { %v4214_v37 = vpop.f32.mrf.mxu1 }
 0x6af   : > { %v11182_v4 = vpack.c.bf16 %v4214_v37, %v4211_v50 }
 0x6c0   : > { %v7487_v15 = vpop.f32.mrf.mxu1 }
 0x6c2   : > { %v4449_v36 = vpop.f32.mrf.mxu1 }
 0x6c4   : > { %v7488_v52 = vpop.f32.mrf.mxu1 }
 0x6c5   : > { %v11184_v27 = vpack.c.bf16 %v7488_v52, %v7487_v15 }
 0x6c6   : > { %v4452_v62 = vpop.f32.mrf.mxu1 }
 0x6c7   : > { %v11186_v14 = vpack.c.bf16 %v4452_v62, %v4449_v36 }
 0x6c8   : > { %v7491_v26 = vpop.f32.mrf.mxu1 }
 0x6ca   : > { %v4465_v12 = vpop.f32.mrf.mxu1 }
 0x6cc   : > { %v7492_v13 = vpop.f32.mrf.mxu1 }
 0x6cd   : > { %v11188_v40 = vpack.c.bf16 %v7492_v13, %v7491_v26 }
 0x6ce   : > { %v4468_v31 = vpop.f32.mrf.mxu1 }
 0x6cf   : > { %v11190_v9 = vpack.c.bf16 %v4468_v31, %v4465_v12 }
 0x6e0   : > { %v7503_v0 = vpop.f32.mrf.mxu1 }
 0x6e1   : > { %v4559_v49 = vmul.f32 0.088388346, %v7503_v0 }
 0x6e2   : > { %v4526_v33 = vpop.f32.mrf.mxu1 }
 0x6e3   : > { %v4557_v32 = vmul.f32 0.088388346, %v4526_v33  ;;  %v4571_v2 = vsel %vm4056_vm0, %v4559_v49, -inf }
 0x6e4   : > { %v7504_v56 = vpop.f32.mrf.mxu1 }
 0x6e5   : > { %v4565_v55 = vsel %vm4056_vm0, %v4557_v32, -inf  ;;  %v4560_v43 = vmul.f32 0.088388346, %v7504_v56 }
 0x6e6   : > { %4566 = vmax.xlane.f32.xlu0 %v4565_v55  ;;  %v4529_v47 = vpop.f32.mrf.mxu1 }
 0x6e7   : > { %v4558_v16 = vmul.f32 0.088388346, %v4529_v47  ;;  %v4574_v6 = vsel %vm4056_vm0, %v4560_v43, -inf }
 0x6e8   : > { %v7507_v8 = vpop.f32.mrf.mxu1 }
 0x6e9   : > { %v4568_v17 = vsel %vm4056_vm0, %v4558_v16, -inf  ;;  %v4563_v24 = vmul.f32 0.088388346, %v7507_v8 }
 0x6ea   : > { %4572 = vmax.xlane.f32.xlu0 %v4571_v2  ;;  %4569 = vmax.xlane.f32.xlu1 %v4568_v17  ;;  %v4542_v61 = vpop.f32.mrf.mxu1 }
 0x6eb   : > { %v4561_v23 = vmul.f32 0.088388346, %v4542_v61  ;;  %v4583_v60 = vsel %vm4056_vm0, %v4563_v24, -inf }
 0x6ec   : > { %v7508_v41 = vpop.f32.mrf.mxu1 }
 0x6ed   : > { %v4577_v19 = vsel %vm4056_vm0, %v4561_v23, -inf  ;;  %v4564_v45 = vmul.f32 0.088388346, %v7508_v41 }
 0x6ee   : > { %4575 = vmax.xlane.f32.xlu1 %v4574_v6  ;;  %4578 = vmax.xlane.f32.xlu0 %v4577_v19  ;;  %v4545_v21 = vpop.f32.mrf.mxu1 }
 0x6ef   : > { %v4562_v7 = vmul.f32 0.088388346, %v4545_v21  ;;  %v4586_v48 = vsel %vm4056_vm0, %v4564_v45, -inf }
 0x6f1   : > { %v4580_v44 = vsel %vm4056_vm0, %v4562_v7, -inf }
 0x6f2   : > { %4584 = vmax.xlane.f32.xlu0 %v4583_v60  ;;  %4581 = vmax.xlane.f32.xlu1 %v4580_v44 }
 0x6f6   : > { %4587 = vmax.xlane.f32.xlu1 %v4586_v48 }
 0x76f   : > { %v4567_v22 = vpop.xlane.xlu0 %4566 }
 0x770   : > { %v4589_v38 = vsub.f32 %v4557_v32, %v4567_v22 }
 0x772   : > { %v4597_v54 = vmul.f32 1.442695, %v4589_v38 }
 0x773   : > { %v4573_v39 = vpop.xlane.xlu0 %4572  ;;  %v4570_v28 = vpop.xlane.xlu1 %4569 }
 0x774   : > { %8443 = vpow2.f32 %v4597_v54  ;;  %v4591_v53 = vsub.f32 %v4559_v49, %v4573_v39  ;;  %v4590_v5 = vsub.f32 %v4558_v16, %v4570_v28 }
 0x776   : > { %v4601_v59 = vmul.f32 1.442695, %v4591_v53  ;;  %v4599_v20 = vmul.f32 1.442695, %v4590_v5 }
 0x777   : > { %v4576_v42 = vpop.xlane.xlu1 %4575  ;;  %v4579_v11 = vpop.xlane.xlu0 %4578 }
 0x778   : > { %8445 = vpow2.f32 %v4601_v59  ;;  %v4592_v1 = vsub.f32 %v4560_v43, %v4576_v42  ;;  %v4593_v29 = vsub.f32 %v4561_v23, %v4579_v11 }
 0x779   : > { %8447 = vpow2.f32 %v4599_v20 }
 0x77a   : > { %v4603_v50 = vmul.f32 1.442695, %v4592_v1  ;;  %v4605_v25 = vmul.f32 1.442695, %v4593_v29  ;;  %v12806_v29 = vld [vmem:[#allocation16_spill] sm:$0xff] }
 0x77b   : > { %v4585_v37 = vpop.xlane.xlu0 %4584  ;;  %v4582_v15 = vpop.xlane.xlu1 %4581 }
 0x77c   : > { %8449 = vpow2.f32 %v4603_v50  ;;  %v4595_v36 = vsub.f32 %v4563_v24, %v4585_v37  ;;  %v4594_v52 = vsub.f32 %v4562_v7, %v4582_v15  ;;  %v12807_v50 = vld [vmem:[#allocation19_spill] sm:$0xff] }
 0x77d   : > { %8451 = vpow2.f32 %v4605_v25  ;;  %v3282_v25 = vadd.f32 %v12807_v50, %v12806_v29 }
 0x77e   : > { %v4609_v62 = vmul.f32 1.442695, %v4595_v36  ;;  %v4607_v26 = vmul.f32 1.442695, %v4594_v52 }
 0x77f   : > { %v4588_v12 = vpop.xlane.xlu1 %4587 }
 0x780   : > { %8453 = vpow2.f32 %v4609_v62  ;;  %v4596_v13 = vsub.f32 %v4564_v45, %v4588_v12 }
 0x781   : > { %v8444_v31 = vpop.eup %8443  ;;  %8455 = vpow2.f32 %v4607_v26  ;;  %v12808_v26 = vld [vmem:[#allocation21_spill] sm:$0xff] }
 0x782   : > { %v4611_v0 = vmul.f32 1.442695, %v4596_v13  ;;  %v4613_v33 = vsel %vm4056_vm0, %v8444_v31, 0.0  ;;  %v3355_v12 = vadd.f32 %v12808_v26, %v3282_v25 }
 0x783   : > { %4614 = vadd.xlane.f32.xlu0 %v4613_v33  ;;  %v12809_v33 = vld [vmem:[#allocation18_spill] sm:$0xff] }
 0x784   : > { %8457 = vpow2.f32 %v4611_v0 }
 0x785   : > { %v8446_v32 = vpop.eup %8445 }
 0x786   : > { %v8448_v56 = vpop.eup %8447  ;;  %v4619_v49 = vsel %vm4056_vm0, %v8446_v32, 0.0 }
 0x787   : > { %4620 = vadd.xlane.f32.xlu0 %v4619_v49  ;;  %v4616_v55 = vsel %vm4056_vm0, %v8448_v56, 0.0  ;;  %v12811_v49 = vld [vmem:[#allocation29_spill] sm:$0xff] }
 0x788   : > { %4617 = vadd.xlane.f32.xlu1 %v4616_v55  ;;  %v3302_v55 = vadd.f32 %v12811_v49, %v12806_v29 }
 0x789   : > { %v8450_v47 = vpop.eup %8449 }
 0x78a   : > { %v8452_v16 = vpop.eup %8451  ;;  %v4622_v8 = vsel %vm4056_vm0, %v8450_v47, 0.0 }
 0x78b   : > { %v4625_v43 = vsel %vm4056_vm0, %v8452_v16, 0.0 }
 0x78c   : > { %4626 = vadd.xlane.f32.xlu0 %v4625_v43  ;;  %4623 = vadd.xlane.f32.xlu1 %v4622_v8  ;;  %v12813_v8 = vld [vmem:[#allocation31_spill] sm:$0xff] }
 0x78d   : > { %v8454_v2 = vpop.eup %8453  ;;  %v3375_v43 = vadd.f32 %v12813_v8, %v3302_v55 }
 0x78e   : > { %v8456_v17 = vpop.eup %8455  ;;  %v4631_v61 = vsel %vm4056_vm0, %v8454_v2, 0.0 }
 0x78f   : > { %v4628_v23 = vsel %vm4056_vm0, %v8456_v17, 0.0 }
 0x790   : > { %4632 = vadd.xlane.f32.xlu0 %v4631_v61  ;;  %4629 = vadd.xlane.f32.xlu1 %v4628_v23 }
 0x791   : > { %v8458_v41 = vpop.eup %8457 }
 0x792   : > { %v4634_v24 = vsel %vm4056_vm0, %v8458_v41, 0.0 }
 0x794   : > { %4635 = vadd.xlane.f32.xlu1 %v4634_v24 }
 0x80c   : > { %v4615_v6 = vpop.xlane.xlu0 %4614 }
 0x80d   : > { %8459 = vrcp.f32 %v4615_v6  ;;  %v12818_v6 = vld [vmem:[#allocation33_spill] sm:$0xff] }
 0x810   : > { %v4621_v19 = vpop.xlane.xlu0 %4620 }
 0x811   : > { %v4618_v21 = vpop.xlane.xlu1 %4617 }
 0x812   : > { %8461 = vrcp.f32 %v4618_v21 }
 0x813   : > { %8463 = vrcp.f32 %v4621_v19 }
 0x815   : > { %v4627_v7 = vpop.xlane.xlu0 %4626  ;;  %v4624_v45 = vpop.xlane.xlu1 %4623 }
 0x816   : > { %8465 = vrcp.f32 %v4624_v45 }
 0x817   : > { %8467 = vrcp.f32 %v4627_v7 }
 0x819   : > { %v4633_v60 = vpop.xlane.xlu0 %4632  ;;  %v4630_v44 = vpop.xlane.xlu1 %4629 }
 0x81a   : > { %8469 = vrcp.f32 %v4630_v44  ;;  %v8460_v48 = vpop.eup %8459 }
 0x81b   : > { %8471 = vrcp.f32 %v4633_v60  ;;  %v4645_v54 = vmul.f32 %v8460_v48, %v8444_v31 }
 0x81d   : > { %v4636_v22 = vpop.xlane.xlu1 %4635 }
 0x81e   : > { %8473 = vrcp.f32 %v4636_v22 }
 0x81f   : > { %v8462_v38 = vpop.eup %8461 }
 0x820   : > { %v4646_v39 = vmul.f32 %v8462_v38, %v8448_v56  ;;  %v8464_v28 = vpop.eup %8463 }
 0x821   : > { %v4647_v59 = vmul.f32 %v8464_v28, %v8446_v32  ;;  %v4734_v32 = vpack.c.bf16 %v3355_v12, %v12809_v33 }
 0x822   : > { %v4653_v53 = vpack.c.bf16 %v4646_v39, %v4645_v54 }
 0x823   : > { %v8466_v5 = vpop.eup %8465 }
 0x824   : > { %7517 = vmatprep.mubr.msk.bf16.mxu0 %vm4056_vm0, %v4653_v53  ;;  %v4648_v20 = vmul.f32 %v8466_v5, %v8450_v47  ;;  %v8468_v42 = vpop.eup %8467  ;;  %v12812_v47 = vld [vmem:[#allocation26_spill] sm:$0xff] }
 0x825   : > { %v4649_v15 = vmul.f32 %v8468_v42, %v8452_v16 }
 0x826   : > { %v4654_v11 = vpack.c.bf16 %v4648_v20, %v4647_v59 }
 0x827   : > { %v8470_v1 = vpop.eup %8469 }
 0x828   : > { %v8472_v37 = vpop.eup %8471  ;;  %7518 = vmatmul.mubr.msk.bf16.vlgmr.msra.gmra.mxu0 %vm4056_vm0, %v4654_v11  ;;  %v4650_v36 = vmul.f32 %v8470_v1, %v8456_v17  ;;  %v12815_v17 = vld [vmem:[#allocation35_spill] sm:$0xff] }
 0x829   : > { %7526 = vmatpush3.bf16.xpose.msra.mxu0 %v10913_v63  ;;  %v4651_v13 = vmul.f32 %v8472_v37, %v8454_v2  ;;  %v12810_v63 = vld [vmem:[#allocation24_spill] sm:$0xff]  ;;  %v3312_v61 = vadd.f32 %v12815_v17, %v12806_v29 }
 0x82a   : > { %7527 = vmatprep.subr.bf16.mxu0 %v10900_v35  ;;  %v4655_v62 = vpack.c.bf16 %v4650_v36, %v4649_v15  ;;  %v3292_v56 = vadd.f32 %v12810_v63, %v12806_v29 }
 0x82b   : > { %v8474_v52 = vpop.eup %8473 }
 0x82c   : > { %v4652_v31 = vmul.f32 %v8474_v52, %v8458_v41  ;;  %7521 = vmatprep.mubr.msk.bf16.mxu0 %vm4056_vm0, %v4655_v62  ;;  %v3365_v16 = vadd.f32 %v12812_v47, %v3292_v56  ;;  %v12817_v41 = vld [vmem:[#allocation36_spill] sm:$0xff] }
 0x82d   : > { %v3385_v24 = vadd.f32 %v12817_v41, %v3312_v61 }
 0x82e   : > { %v4656_v0 = vpack.c.bf16 %v4652_v31, %v4651_v13 }
 0x82f   : > { %v4737_v19 = vpack.c.bf16 %v3385_v24, %v12818_v6 }
 0x830   : > { %7522 = vmatmul.mubr.msk.bf16.gmra.mxu0 %vm4056_vm0, %v4656_v0 }
 0x831   : > { %7528 = vmatpush3.bf16.xpose.msra.mxu0 %v10900_v35  ;;  %7533 = vmatprep.mubr.bf16.mxu0 %v4734_v32  ;;  %v12814_v35 = vld [vmem:[#allocation23_spill] sm:$0xff] }
 0x832   : > { %7529 = vmatprep.subr.bf16.mxu0 %v10888_v51  ;;  %v4735_v2 = vpack.c.bf16 %v3365_v16, %v12814_v35 }
 0x839   : > { %7530 = vmatpush3.bf16.xpose.msra.mxu0 %v10888_v51  ;;  %v12816_v51 = vld [vmem:[#allocation28_spill] sm:$0xff] }
 0x83a   : > { %7531 = vmatprep.subr.bf16.mxu0 %v10878_v10  ;;  %v4736_v23 = vpack.c.bf16 %v3375_v43, %v12816_v51 }
 0x841   : > { %7532 = vmatpush3.bf16.xpose.msra.mxu0 %v10878_v10 }
 0x848   : > { %7534 = vmatmul.mubr.bf16.vlgmr.msra.gmra.mxu0 %v4735_v2 }
 0x849   : > { %7537 = vmatprep.mubr.bf16.mxu0 %v4736_v23 }
 0x850   : > { %7538 = vmatmul.mubr.bf16.gmra.mxu0 %v4737_v19 }
 0x8e8   : > { %v7519_v21 = vpop.f32.mrf.mxu0 }
 0x8ea   : > { %v4703_v10 = vpop.f32.mrf.mxu0 }
 0x8ec   : > { %v7520_v7 = vpop.f32.mrf.mxu0 }
 0x8ed   : > { %v11235_v45 = vpack.c.bf16 %v7520_v7, %v7519_v21 }
 0x8ee   : > { %v4706_v60 = vpop.f32.mrf.mxu0 }
 0x8ef   : > { %v11237_v44 = vpack.c.bf16 %v4706_v60, %v4703_v10 }
 0x8f0   : > { %v7523_v48 = vpop.f32.mrf.mxu0 }
 0x8f2   : > { %v4719_v22 = vpop.f32.mrf.mxu0 }
 0x8f4   : > { %v7524_v38 = vpop.f32.mrf.mxu0 }
 0x8f5   : > { %v11239_v54 = vpack.c.bf16 %v7524_v38, %v7523_v48 }
 0x8f6   : > { %v4722_v39 = vpop.f32.mrf.mxu0 }
 0x8f7   : > { %v11241_v28 = vpack.c.bf16 %v4722_v39, %v4719_v22 }
 0x908   : > { %v7535_v53 = vpop.f32.mrf.mxu0 }
 0x909   : > { %v4813_v42 = vmul.f32 0.088388346, %v7535_v53 }
 0x90a   : > { %v4780_v5 = vpop.f32.mrf.mxu0 }
 0x90b   : > { %v4811_v59 = vmul.f32 0.088388346, %v4780_v5  ;;  %v4825_v37 = vsel %vm4056_vm0, %v4813_v42, -inf }
 0x90c   : > { %v7536_v20 = vpop.f32.mrf.mxu0 }
 0x90d   : > { %v4819_v11 = vsel %vm4056_vm0, %v4811_v59, -inf  ;;  %v4814_v25 = vmul.f32 0.088388346, %v7536_v20 }
 0x90e   : > { %4820 = vmax.xlane.f32.xlu0 %v4819_v11  ;;  %v4783_v1 = vpop.f32.mrf.mxu0 }
 0x90f   : > { %v4812_v29 = vmul.f32 0.088388346, %v4783_v1  ;;  %v4828_v12 = vsel %vm4056_vm0, %v4814_v25, -inf }
 0x910   : > { %v7539_v50 = vpop.f32.mrf.mxu0 }
 0x911   : > { %v4822_v15 = vsel %vm4056_vm0, %v4812_v29, -inf  ;;  %v4817_v26 = vmul.f32 0.088388346, %v7539_v50 }
 0x912   : > { %4826 = vmax.xlane.f32.xlu0 %v4825_v37  ;;  %4823 = vmax.xlane.f32.xlu1 %v4822_v15  ;;  %v4796_v36 = vpop.f32.mrf.mxu0 }
 0x913   : > { %v4815_v52 = vmul.f32 0.088388346, %v4796_v36  ;;  %v4837_v32 = vsel %vm4056_vm0, %v4817_v26, -inf }
 0x914   : > { %v7540_v62 = vpop.f32.mrf.mxu0 }
 0x915   : > { %v4831_v13 = vsel %vm4056_vm0, %v4815_v52, -inf  ;;  %v4818_v33 = vmul.f32 0.088388346, %v7540_v62 }
 0x916   : > { %4829 = vmax.xlane.f32.xlu1 %v4828_v12  ;;  %4832 = vmax.xlane.f32.xlu0 %v4831_v13  ;;  %v4799_v31 = vpop.f32.mrf.mxu0  ;;  %v8187_v12 = vld [vmem:[%s12723_s5 + $0xe4] ss:$16 sps:$4 sm:$0xff]  }
 0x917   : > { %v4816_v0 = vmul.f32 0.088388346, %v4799_v31  ;;  %v4840_v56 = vsel %vm4056_vm0, %v4818_v33, -inf  ;;  %5794 = vmatprep.subr.bf16.mxu1 %v8187_v12  ;;  %v8290_v12 = vld [vmem:[%s12723_s5 + $0x280] ss:$16 sps:$4 sm:$0xff]  }
 0x919   : > { %v4834_v63 = vsel %vm4056_vm0, %v4816_v0, -inf }
 0x91a   : > { %4838 = vmax.xlane.f32.xlu0 %v4837_v32  ;;  %4835 = vmax.xlane.f32.xlu1 %v4834_v63 }
 0x91e   : > { %4841 = vmax.xlane.f32.xlu1 %v4840_v56 }
 0x997   : > { %v4821_v49 = vpop.xlane.xlu0 %4820 }
 0x998   : > { %v4843_v55 = vsub.f32 %v4811_v59, %v4821_v49 }
 0x99a   : > { %v4851_v47 = vmul.f32 1.442695, %v4843_v55 }
 0x99b   : > { %v4827_v16 = vpop.xlane.xlu0 %4826  ;;  %v4824_v8 = vpop.xlane.xlu1 %4823 }
 0x99c   : > { %8475 = vpow2.f32 %v4851_v47  ;;  %v4845_v43 = vsub.f32 %v4813_v42, %v4827_v16  ;;  %v4844_v35 = vsub.f32 %v4812_v29, %v4824_v8 }
 0x99e   : > { %v4855_v2 = vmul.f32 1.442695, %v4845_v43  ;;  %v4853_v17 = vmul.f32 1.442695, %v4844_v35 }
 0x99f   : > { %v4830_v61 = vpop.xlane.xlu1 %4829  ;;  %v4833_v51 = vpop.xlane.xlu0 %4832 }
 0x9a0   : > { %8477 = vpow2.f32 %v4855_v2  ;;  %v4846_v23 = vsub.f32 %v4814_v25, %v4830_v61  ;;  %v4847_v41 = vsub.f32 %v4815_v52, %v4833_v51 }
 0x9a1   : > { %8479 = vpow2.f32 %v4853_v17 }
 0x9a2   : > { %v4857_v24 = vmul.f32 1.442695, %v4846_v23  ;;  %v4859_v6 = vmul.f32 1.442695, %v4847_v41  ;;  %v8185_v23 = vld [vmem:[%s12723_s5 + $0xe0] ss:$16 sps:$4 sm:$0xff]  }
 0x9a3   : > { %v4839_v19 = vpop.xlane.xlu0 %4838  ;;  %v4836_v21 = vpop.xlane.xlu1 %4835 }
 0x9a4   : > { %8481 = vpow2.f32 %v4857_v24  ;;  %v4849_v10 = vsub.f32 %v4817_v26, %v4839_v19  ;;  %v4848_v7 = vsub.f32 %v4816_v0, %v4836_v21  ;;  %v8190_v24 = vld [vmem:[%s12723_s5 + $0xc4] ss:$16 sps:$4 sm:$0xff]  }
 0x9a5   : > { %8483 = vpow2.f32 %v4859_v6 }
 0x9a6   : > { %v4863_v60 = vmul.f32 1.442695, %v4849_v10  ;;  %v4861_v48 = vmul.f32 1.442695, %v4848_v7  ;;  %v8188_v7 = vld [vmem:[%s12723_s5 + $0xc0] ss:$16 sps:$4 sm:$0xff]  }
 0x9a7   : > { %v4842_v22 = vpop.xlane.xlu1 %4841 }
 0x9a8   : > { %8485 = vpow2.f32 %v4863_v60  ;;  %v4850_v38 = vsub.f32 %v4818_v33, %v4842_v22  ;;  %v8193_v22 = vld [vmem:[%s12723_s5 + $0xa4] ss:$16 sps:$4 sm:$0xff]  }
 0x9a9   : > { %v8476_v39 = vpop.eup %8475  ;;  %8487 = vpow2.f32 %v4861_v48 }
 0x9aa   : > { %v4865_v53 = vmul.f32 1.442695, %v4850_v38  ;;  %v4867_v5 = vsel %vm4056_vm0, %v8476_v39, 0.0 }
 0x9ab   : > { %4868 = vadd.xlane.f32.xlu0 %v4867_v5 }
 0x9ac   : > { %8489 = vpow2.f32 %v4865_v53  ;;  %v8191_v53 = vld [vmem:[%s12723_s5 + $0xa0] ss:$16 sps:$4 sm:$0xff]  }
 0x9ad   : > { %v8478_v59 = vpop.eup %8477 }
 0x9ae   : > { %v8480_v20 = vpop.eup %8479  ;;  %v4873_v42 = vsel %vm4056_vm0, %v8478_v59, 0.0 }
 0x9af   : > { %4874 = vadd.xlane.f32.xlu0 %v4873_v42  ;;  %v4870_v11 = vsel %vm4056_vm0, %v8480_v20, 0.0  ;;  %v8281_v42 = vld [vmem:[%s12723_s5 + $0x2e0] ss:$16 sps:$4 sm:$0xff]  }
 0x9b0   : > { %4871 = vadd.xlane.f32.xlu1 %v4870_v11  ;;  %v8283_v11 = vld [vmem:[%s12723_s5 + $0x2e4] ss:$16 sps:$4 sm:$0xff]  }
 0x9b1   : > { %v8482_v1 = vpop.eup %8481  ;;  %5867 = vmatprep.subr.bf16.mxu0 %v8283_v11  ;;  %v8230_v11 = vld [vmem:[%s12723_s5 + $0x100] ss:$16 sps:$4 sm:$0xff]  }
 0x9b2   : > { %v8484_v29 = vpop.eup %8483  ;;  %v4876_v50 = vsel %vm4056_vm0, %v8482_v1, 0.0  ;;  %5868 = vmatpush1.bf16.msra.mxu0 %v8281_v42  ;;  %v8317_v42 = vld [vmem:[%s12723_s5 + $0x360] ss:$16 sps:$4 sm:$0xff]  }
 0x9b3   : > { %v4879_v25 = vsel %vm4056_vm0, %v8484_v29, 0.0 }
 0x9b4   : > { %4880 = vadd.xlane.f32.xlu0 %v4879_v25  ;;  %4877 = vadd.xlane.f32.xlu1 %v4876_v50  ;;  %v8284_v50 = vld [vmem:[%s12723_s5 + $0x2c0] ss:$16 sps:$4 sm:$0xff]  }
 0x9b5   : > { %v8486_v37 = vpop.eup %8485  ;;  %v8197_v25 = vld [vmem:[%s12723_s5 + $0x60] ss:$16 sps:$4 sm:$0xff]  }
 0x9b6   : > { %v8488_v15 = vpop.eup %8487  ;;  %v4885_v36 = vsel %vm4056_vm0, %v8486_v37, 0.0 }
 0x9b7   : > { %v4882_v52 = vsel %vm4056_vm0, %v8488_v15, 0.0 }
 0x9b8   : > { %4886 = vadd.xlane.f32.xlu0 %v4885_v36  ;;  %4883 = vadd.xlane.f32.xlu1 %v4882_v52  ;;  %v8287_v36 = vld [vmem:[%s12723_s5 + $0x2a0] ss:$16 sps:$4 sm:$0xff]   ;;  %v8289_v52 = vld [vmem:[%s12723_s5 + $0x2a4] ss:$16 sps:$4 sm:$0xff]  }
 0x9b9   : > { %v8490_v62 = vpop.eup %8489 }
 0x9ba   : > { %v4888_v26 = vsel %vm4056_vm0, %v8490_v62, 0.0 }
 0x9bc   : > { %4889 = vadd.xlane.f32.xlu1 %v4888_v26  ;;  %v8292_v26 = vld [vmem:[%s12723_s5 + $0x284] ss:$16 sps:$4 sm:$0xff]  }
 0xa34   : > { %v4869_v13 = vpop.xlane.xlu0 %4868 }
 0xa35   : > { %8491 = vrcp.f32 %v4869_v13  ;;  %v8203_v13 = vld [vmem:[%s12723_s5 + $0x20] ss:$16 sps:$4 sm:$0xff]  }
 0xa38   : > { %v4875_v31 = vpop.xlane.xlu0 %4874 }
 0xa39   : > { %v4872_v0 = vpop.xlane.xlu1 %4871 }
 0xa3a   : > { %8493 = vrcp.f32 %v4872_v0  ;;  %v8293_v0 = vld [vmem:[%s12723_s5 + $0x260] ss:$16 sps:$4 sm:$0xff]  }
 0xa3b   : > { %8495 = vrcp.f32 %v4875_v31  ;;  %v8208_v31 = vld [vmem:[%s12723_s5 + $0x4] ss:$16 sps:$4 sm:$0xff]  }
 0xa3d   : > { %v4881_v33 = vpop.xlane.xlu0 %4880  ;;  %v4878_v32 = vpop.xlane.xlu1 %4877 }
 0xa3e   : > { %8497 = vrcp.f32 %v4878_v32  ;;  %v8206_v32 = vld [vmem:[%s12723_s5] ss:$16 sps:$4 sm:$0xff]  }
 0xa3f   : > { %8499 = vrcp.f32 %v4881_v33  ;;  %v8295_v33 = vld [vmem:[%s12723_s5 + $0x264] ss:$16 sps:$4 sm:$0xff]  }
 0xa41   : > { %v4887_v63 = vpop.xlane.xlu0 %4886  ;;  %v4884_v56 = vpop.xlane.xlu1 %4883 }
 0xa42   : > { %8501 = vrcp.f32 %v4884_v56  ;;  %v8492_v49 = vpop.eup %8491  ;;  %v8211_v56 = vld [vmem:[%s12723_s5 + $0x1e4] ss:$16 sps:$4 sm:$0xff]  }
 0xa43   : > { %8503 = vrcp.f32 %v4887_v63  ;;  %v4899_v16 = vmul.f32 %v8492_v49, %v8476_v39  ;;  %v8298_v63 = vld [vmem:[%s12723_s5 + $0x244] ss:$16 sps:$4 sm:$0xff]   ;;  %v8296_v49 = vld [vmem:[%s12723_s5 + $0x240] ss:$16 sps:$4 sm:$0xff]  }
 0xa45   : > { %v4890_v55 = vpop.xlane.xlu1 %4889 }
 0xa46   : > { %8505 = vrcp.f32 %v4890_v55  ;;  %v8209_v55 = vld [vmem:[%s12723_s5 + $0x1e0] ss:$16 sps:$4 sm:$0xff]  }
 0xa47   : > { %v8494_v47 = vpop.eup %8493 }
 0xa48   : > { %v4900_v8 = vmul.f32 %v8494_v47, %v8480_v20  ;;  %v8496_v43 = vpop.eup %8495  ;;  %v8194_v20 = vld [vmem:[%s12723_s5 + $0x80] ss:$16 sps:$4 sm:$0xff]   ;;  %v8301_v47 = vld [vmem:[%s12723_s5 + $0x224] ss:$16 sps:$4 sm:$0xff]  }
 0xa49   : > { %v4901_v17 = vmul.f32 %v8496_v43, %v8478_v59  ;;  %v8196_v59 = vld [vmem:[%s12723_s5 + $0x84] ss:$16 sps:$4 sm:$0xff]   ;;  %v8212_v43 = vld [vmem:[%s12723_s5 + $0x1c0] ss:$16 sps:$4 sm:$0xff]  }
 0xa4a   : > { %v4907_v35 = vpack.c.bf16 %v4900_v8, %v4899_v16  ;;  %v8214_v16 = vld [vmem:[%s12723_s5 + $0x1c4] ss:$16 sps:$4 sm:$0xff]   ;;  %v8299_v8 = vld [vmem:[%s12723_s5 + $0x220] ss:$16 sps:$4 sm:$0xff]  }
 0xa4b   : > { %v8498_v2 = vpop.eup %8497 }
 0xa4c   : > { %7549 = vmatprep.mubr.msk.bf16.mxu1 %vm4056_vm0, %v4907_v35  ;;  %v4902_v61 = vmul.f32 %v8498_v2, %v8482_v1  ;;  %v8500_v51 = vpop.eup %8499  ;;  %v8199_v1 = vld [vmem:[%s12723_s5 + $0x64] ss:$16 sps:$4 sm:$0xff]  }
 0xa4d   : > { %v4903_v21 = vmul.f32 %v8500_v51, %v8484_v29  ;;  %v8286_v29 = vld [vmem:[%s12723_s5 + $0x2c4] ss:$16 sps:$4 sm:$0xff]  }
 0xa4e   : > { %v4908_v41 = vpack.c.bf16 %v4902_v61, %v4901_v17  ;;  %5869 = vmatprep.subr.bf16.mxu0 %v8286_v29  ;;  %v8304_v35 = vld [vmem:[%s12723_s5 + $0x204] ss:$16 sps:$4 sm:$0xff]   ;;  %v8302_v17 = vld [vmem:[%s12723_s5 + $0x200] ss:$16 sps:$4 sm:$0xff]   ;;  %v8235_v29 = vld [vmem:[%s12723_s5 + $0xec] ss:$16 sps:$4 sm:$0xff]  }
 0xa4f   : > { %v8502_v6 = vpop.eup %8501  ;;  %5870 = vmatpush1.bf16.msra.mxu0 %v8284_v50  ;;  %v8217_v2 = vld [vmem:[%s12723_s5 + $0x1a4] ss:$16 sps:$4 sm:$0xff]   ;;  %v8215_v61 = vld [vmem:[%s12723_s5 + $0x1a0] ss:$16 sps:$4 sm:$0xff]  }
 0xa50   : > { %v8504_v19 = vpop.eup %8503  ;;  %7550 = vmatmul.mubr.msk.bf16.vlgmr.msra.gmra.mxu1 %vm4056_vm0, %v4908_v41  ;;  %v4904_v10 = vmul.f32 %v8502_v6, %v8488_v15  ;;  %v8200_v15 = vld [vmem:[%s12723_s5 + $0x40] ss:$16 sps:$4 sm:$0xff]   ;;  %5871 = vmatprep.subr.bf16.mxu0 %v8289_v52  ;;  %v8307_v51 = vld [vmem:[%s12723_s5 + $0x3e4] ss:$16 sps:$4 sm:$0xff]   ;;  %v8236_v52 = vld [vmem:[%s12723_s5 + $0xc8] ss:$16 sps:$4 sm:$0xff]  }
 0xa51   : > { %5795 = vmatpush1.bf16.msra.mxu1 %v8185_v23  ;;  %v4905_v38 = vmul.f32 %v8504_v19, %v8486_v37  ;;  %v8202_v37 = vld [vmem:[%s12723_s5 + $0x44] ss:$16 sps:$4 sm:$0xff]   ;;  %v8305_v41 = vld [vmem:[%s12723_s5 + $0x3e0] ss:$16 sps:$4 sm:$0xff]  }
 0xa52   : > { %5796 = vmatprep.subr.bf16.mxu1 %v8190_v24  ;;  %v4909_v48 = vpack.c.bf16 %v4904_v10, %v4903_v21  ;;  %v8220_v23 = vld [vmem:[%s12723_s5 + $0x184] ss:$16 sps:$4 sm:$0xff]   ;;  %v8218_v24 = vld [vmem:[%s12723_s5 + $0x180] ss:$16 sps:$4 sm:$0xff]  }
 0xa53   : > { %v8506_v60 = vpop.eup %8505  ;;  %5872 = vmatpush1.bf16.msra.mxu0 %v8287_v36  ;;  %v8310_v6 = vld [vmem:[%s12723_s5 + $0x3c4] ss:$16 sps:$4 sm:$0xff]   ;;  %v8308_v21 = vld [vmem:[%s12723_s5 + $0x3c0] ss:$16 sps:$4 sm:$0xff]  }
 0xa54   : > { %v4906_v39 = vmul.f32 %v8506_v60, %v8490_v62  ;;  %7553 = vmatprep.mubr.msk.bf16.mxu1 %vm4056_vm0, %v4909_v48  ;;  %v8205_v62 = vld [vmem:[%s12723_s5 + $0x24] ss:$16 sps:$4 sm:$0xff]   ;;  %5873 = vmatprep.subr.bf16.mxu0 %v8292_v26  ;;  %v8221_v10 = vld [vmem:[%s12723_s5 + $0x160] ss:$16 sps:$4 sm:$0xff]   ;;  %v8239_v26 = vld [vmem:[%s12723_s5 + $0xa8] ss:$16 sps:$4 sm:$0xff]  }
 0xa55   : > { %5797 = vmatpush1.bf16.msra.mxu1 %v8188_v7  ;;  %v8223_v19 = vld [vmem:[%s12723_s5 + $0x164] ss:$16 sps:$4 sm:$0xff]   ;;  %v8311_v48 = vld [vmem:[%s12723_s5 + $0x3a0] ss:$16 sps:$4 sm:$0xff]  }
 0xa56   : > { %v4910_v5 = vpack.c.bf16 %v4906_v39, %v4905_v38  ;;  %5798 = vmatprep.subr.bf16.mxu1 %v8193_v22  ;;  %v8313_v7 = vld [vmem:[%s12723_s5 + $0x3a4] ss:$16 sps:$4 sm:$0xff]   ;;  %v8224_v22 = vld [vmem:[%s12723_s5 + $0x140] ss:$16 sps:$4 sm:$0xff]  }
 0xa57   : > { %5874 = vmatpush1.bf16.msra.mxu0 %v8290_v12  ;;  %v8226_v60 = vld [vmem:[%s12723_s5 + $0x144] ss:$16 sps:$4 sm:$0xff]   ;;  %v8320_v50 = vld [vmem:[%s12723_s5 + $0x340] ss:$16 sps:$4 sm:$0xff]  }
 0xa58   : > { %7554 = vmatmul.mubr.msk.bf16.gmra.mxu1 %vm4056_vm0, %v4910_v5  ;;  %5875 = vmatprep.subr.bf16.mxu0 %v8295_v33  ;;  %v8316_v38 = vld [vmem:[%s12723_s5 + $0x384] ss:$16 sps:$4 sm:$0xff]   ;;  %v8227_v5 = vld [vmem:[%s12723_s5 + $0x120] ss:$16 sps:$4 sm:$0xff]   ;;  %v8331_v33 = vld [vmem:[%s12723_s5 + $0x2ec] ss:$16 sps:$4 sm:$0xff]  }
 0xa59   : > { %5799 = vmatpush1.bf16.msra.mxu1 %v8191_v53  ;;  %5826 = vmatprep.mubr.bf16.mxu1 %v11186_v14  ;;  %v8229_v39 = vld [vmem:[%s12723_s5 + $0x124] ss:$16 sps:$4 sm:$0xff]   ;;  %v8314_v53 = vld [vmem:[%s12723_s5 + $0x380] ss:$16 sps:$4 sm:$0xff]  }
 0xa5a   : > { %5800 = vmatprep.subr.bf16.mxu1 %v8196_v59  ;;  %v8319_v59 = vld [vmem:[%s12723_s5 + $0x364] ss:$16 sps:$4 sm:$0xff]   ;;  %v8326_v12 = vld [vmem:[%s12723_s5 + $0x300] ss:$16 sps:$4 sm:$0xff]  }
 0xa5b   : > { %5876 = vmatpush1.bf16.msra.mxu0 %v8293_v0  ;;  %v8325_v36 = vld [vmem:[%s12723_s5 + $0x324] ss:$16 sps:$4 sm:$0xff]   ;;  %v8242_v0 = vld [vmem:[%s12723_s5 + $0x88] ss:$16 sps:$4 sm:$0xff]  }
 0xa5c   : > { %5877 = vmatprep.subr.bf16.mxu0 %v8298_v63  ;;  %v8245_v63 = vld [vmem:[%s12723_s5 + $0x68] ss:$16 sps:$4 sm:$0xff]  }
 0xa5d   : > { %5801 = vmatpush1.bf16.msra.mxu1 %v8194_v20  ;;  %v8232_v20 = vld [vmem:[%s12723_s5 + $0x104] ss:$16 sps:$4 sm:$0xff]  }
 0xa5e   : > { %5802 = vmatprep.subr.bf16.mxu1 %v8199_v1  ;;  %v8322_v1 = vld [vmem:[%s12723_s5 + $0x344] ss:$16 sps:$4 sm:$0xff]  }
 0xa5f   : > { %5878 = vmatpush1.bf16.msra.mxu0 %v8296_v49  ;;  %v8248_v49 = vld [vmem:[%s12723_s5 + $0x48] ss:$16 sps:$4 sm:$0xff]  }
 0xa60   : > { %5879 = vmatprep.subr.bf16.mxu0 %v8301_v47  ;;  %v8251_v47 = vld [vmem:[%s12723_s5 + $0x28] ss:$16 sps:$4 sm:$0xff]  }
 0xa61   : > { %5803 = vmatpush1.bf16.msra.mxu1 %v8197_v25  ;;  %v8233_v25 = vld [vmem:[%s12723_s5 + $0xe8] ss:$16 sps:$4 sm:$0xff]  }
 0xa62   : > { %5804 = vmatprep.subr.bf16.mxu1 %v8202_v37  ;;  %v8238_v37 = vld [vmem:[%s12723_s5 + $0xcc] ss:$16 sps:$4 sm:$0xff]  }
 0xa63   : > { %5880 = vmatpush1.bf16.msra.mxu0 %v8299_v8  ;;  %v8254_v8 = vld [vmem:[%s12723_s5 + $0x8] ss:$16 sps:$4 sm:$0xff]  }
 0xa64   : > { %5881 = vmatprep.subr.bf16.mxu0 %v8304_v35  ;;  %v8257_v35 = vld [vmem:[%s12723_s5 + $0x1e8] ss:$16 sps:$4 sm:$0xff]  }
 0xa65   : > { %5805 = vmatpush1.bf16.msra.mxu1 %v8200_v15  ;;  %v8323_v15 = vld [vmem:[%s12723_s5 + $0x320] ss:$16 sps:$4 sm:$0xff]  }
 0xa66   : > { %5806 = vmatprep.subr.bf16.mxu1 %v8205_v62  ;;  %v8241_v62 = vld [vmem:[%s12723_s5 + $0xac] ss:$16 sps:$4 sm:$0xff]  }
 0xa67   : > { %5882 = vmatpush1.bf16.msra.mxu0 %v8302_v17  ;;  %v8265_v17 = vld [vmem:[%s12723_s5 + $0x1ac] ss:$16 sps:$4 sm:$0xff]  }
 0xa68   : > { %5883 = vmatprep.subr.bf16.mxu0 %v8307_v51  ;;  %v8268_v51 = vld [vmem:[%s12723_s5 + $0x18c] ss:$16 sps:$4 sm:$0xff]  }
 0xa69   : > { %5807 = vmatpush1.bf16.msra.mxu1 %v8203_v13  ;;  %v8328_v13 = vld [vmem:[%s12723_s5 + $0x304] ss:$16 sps:$4 sm:$0xff]  }
 0xa6a   : > { %5808 = vmatprep.subr.bf16.mxu1 %v8208_v31  ;;  %v8244_v31 = vld [vmem:[%s12723_s5 + $0x8c] ss:$16 sps:$4 sm:$0xff]  }
 0xa6b   : > { %5884 = vmatpush2.bf16.msra.mxu0 %v8305_v41  ;;  %v8271_v41 = vld [vmem:[%s12723_s5 + $0x16c] ss:$16 sps:$4 sm:$0xff]  }
 0xa6c   : > { %5885 = vmatprep.subr.bf16.mxu0 %v8310_v6  ;;  %v8274_v6 = vld [vmem:[%s12723_s5 + $0x14c] ss:$16 sps:$4 sm:$0xff]  }
 0xa6d   : > { %5809 = vmatpush1.bf16.msra.mxu1 %v8206_v32  ;;  %v8247_v32 = vld [vmem:[%s12723_s5 + $0x6c] ss:$16 sps:$4 sm:$0xff]  }
 0xa6e   : > { %5810 = vmatprep.subr.bf16.mxu1 %v8211_v56  ;;  %v8250_v56 = vld [vmem:[%s12723_s5 + $0x4c] ss:$16 sps:$4 sm:$0xff]  }
 0xa6f   : > { %5886 = vmatpush2.bf16.msra.mxu0 %v8308_v21  ;;  %v8277_v21 = vld [vmem:[%s12723_s5 + $0x12c] ss:$16 sps:$4 sm:$0xff]  }
 0xa70   : > { %5887 = vmatprep.subr.bf16.mxu0 %v8313_v7  ;;  %v8280_v7 = vld [vmem:[%s12723_s5 + $0x10c] ss:$16 sps:$4 sm:$0xff]  }
 0xa71   : > { %5811 = vmatpush2.bf16.msra.mxu1 %v8209_v55  ;;  %v8253_v55 = vld [vmem:[%s12723_s5 + $0x2c] ss:$16 sps:$4 sm:$0xff]  }
 0xa72   : > { %5812 = vmatprep.subr.bf16.mxu1 %v8214_v16  ;;  %v8256_v16 = vld [vmem:[%s12723_s5 + $0xc] ss:$16 sps:$4 sm:$0xff]  }
 0xa73   : > { %5888 = vmatpush2.bf16.msra.mxu0 %v8311_v48 }
 0xa74   : > { %5889 = vmatprep.subr.bf16.mxu0 %v8316_v38 }
 0xa75   : > { %5813 = vmatpush2.bf16.msra.mxu1 %v8212_v43  ;;  %v8259_v43 = vld [vmem:[%s12723_s5 + $0x1ec] ss:$16 sps:$4 sm:$0xff]  }
 0xa76   : > { %5814 = vmatprep.subr.bf16.mxu1 %v8217_v2  ;;  %v8262_v2 = vld [vmem:[%s12723_s5 + $0x1cc] ss:$16 sps:$4 sm:$0xff]  }
 0xa77   : > { %5890 = vmatpush2.bf16.msra.mxu0 %v8314_v53 }
 0xa78   : > { %5891 = vmatprep.subr.bf16.mxu0 %v8319_v59 }
 0xa79   : > { %5815 = vmatpush2.bf16.msra.mxu1 %v8215_v61  ;;  %v8263_v61 = vld [vmem:[%s12723_s5 + $0x1a8] ss:$16 sps:$4 sm:$0xff]  }
 0xa7a   : > { %5816 = vmatprep.subr.bf16.mxu1 %v8220_v23  ;;  %v8266_v23 = vld [vmem:[%s12723_s5 + $0x188] ss:$16 sps:$4 sm:$0xff]  }
 0xa7b   : > { %5892 = vmatpush2.bf16.msra.mxu0 %v8317_v42  ;;  %v8340_v42 = vld [vmem:[%s12723_s5 + $0x28c] ss:$16 sps:$4 sm:$0xff]  }
 0xa7c   : > { %5893 = vmatprep.subr.bf16.mxu0 %v8322_v1  ;;  %v8338_v1 = vld [vmem:[%s12723_s5 + $0x288] ss:$16 sps:$4 sm:$0xff]  }
 0xa7d   : > { %5817 = vmatpush2.bf16.msra.mxu1 %v8218_v24  ;;  %v8269_v24 = vld [vmem:[%s12723_s5 + $0x168] ss:$16 sps:$4 sm:$0xff]  }
 0xa7e   : > { %5818 = vmatprep.subr.bf16.mxu1 %v8223_v19  ;;  %v8272_v19 = vld [vmem:[%s12723_s5 + $0x148] ss:$16 sps:$4 sm:$0xff]  }
 0xa7f   : > { %5894 = vmatpush2.bf16.msra.mxu0 %v8320_v50  ;;  %v8341_v50 = vld [vmem:[%s12723_s5 + $0x268] ss:$16 sps:$4 sm:$0xff]  }
 0xa80   : > { %5895 = vmatprep.subr.bf16.mxu0 %v8325_v36  ;;  %v8349_v36 = vld [vmem:[%s12723_s5 + $0x22c] ss:$16 sps:$4 sm:$0xff]  }
 0xa81   : > { %5819 = vmatpush2.bf16.msra.mxu1 %v8221_v10  ;;  %v8275_v10 = vld [vmem:[%s12723_s5 + $0x128] ss:$16 sps:$4 sm:$0xff]  }
 0xa82   : > { %5820 = vmatprep.subr.bf16.mxu1 %v8226_v60  ;;  %v8278_v60 = vld [vmem:[%s12723_s5 + $0x108] ss:$16 sps:$4 sm:$0xff]  }
 0xa83   : > { %5896 = vmatpush2.bf16.msra.mxu0 %v8323_v15  ;;  %v8344_v15 = vld [vmem:[%s12723_s5 + $0x248] ss:$16 sps:$4 sm:$0xff]  }
 0xa84   : > { %5897 = vmatprep.subr.bf16.mxu0 %v8328_v13  ;;  %v8353_v13 = vld [vmem:[%s12723_s5 + $0x3e8] ss:$16 sps:$4 sm:$0xff]  }
 0xa85   : > { %5821 = vmatpush2.bf16.msra.mxu1 %v8224_v22 }
 0xa86   : > { %5822 = vmatprep.subr.bf16.mxu1 %v8229_v39 }
 0xa87   : > { %5898 = vmatpush2.bf16.msra.mxu0 %v8326_v12  ;;  %v8355_v12 = vld [vmem:[%s12723_s5 + $0x3ec] ss:$16 sps:$4 sm:$0xff]  }
 0xa88   : > { %6013 = vmatprep.subr.bf16.mxu0 %v8331_v33  ;;  %v8361_v33 = vld [vmem:[%s12723_s5 + $0x3ac] ss:$16 sps:$4 sm:$0xff]  }
 0xa89   : > { %5823 = vmatpush2.bf16.msra.mxu1 %v8227_v5  ;;  %v8337_v5 = vld [vmem:[%s12723_s5 + $0x2ac] ss:$16 sps:$4 sm:$0xff]  }
 0xa8a   : > { %5824 = vmatprep.subr.bf16.mxu1 %v8232_v20  ;;  %v8335_v20 = vld [vmem:[%s12723_s5 + $0x2a8] ss:$16 sps:$4 sm:$0xff]  }
 0xa8d   : > { %5825 = vmatpush2.bf16.msra.mxu1 %v8230_v11 }
 0xa8e   : > { %5940 = vmatprep.subr.bf16.mxu1 %v8235_v29  ;;  %v8343_v29 = vld [vmem:[%s12723_s5 + $0x26c] ss:$16 sps:$4 sm:$0xff]  }
 0xa90   : > { %5827 = vmatmul.mubr.bf16.vlgmr.msra.gmra.mxu1 %v11178_v18 }
 0xa91   : > { %5836 = vmatprep.mubr.bf16.mxu1 %v11184_v27  ;;  %5941 = vmatpush1.bf16.msra.mxu1 %v8233_v25  ;;  %v8346_v25 = vld [vmem:[%s12723_s5 + $0x24c] ss:$16 sps:$4 sm:$0xff]  }
 0xa92   : > { %5942 = vmatprep.subr.bf16.mxu1 %v8238_v37 }
 0xa95   : > { %5943 = vmatpush1.bf16.msra.mxu1 %v8236_v52  ;;  %v8347_v52 = vld [vmem:[%s12723_s5 + $0x228] ss:$16 sps:$4 sm:$0xff]  }
 0xa96   : > { %5944 = vmatprep.subr.bf16.mxu1 %v8241_v62  ;;  %v8352_v62 = vld [vmem:[%s12723_s5 + $0x20c] ss:$16 sps:$4 sm:$0xff]  }
 0xa98   : > { %5837 = vmatmul.mubr.bf16.gmra.mxu1 %v11176_v30 }
 0xa99   : > { %5846 = vmatprep.mubr.bf16.mxu1 %v11190_v9  ;;  %5945 = vmatpush1.bf16.msra.mxu1 %v8239_v26  ;;  %v8350_v26 = vld [vmem:[%s12723_s5 + $0x208] ss:$16 sps:$4 sm:$0xff]  }
 0xa9a   : > { %5946 = vmatprep.subr.bf16.mxu1 %v8244_v31  ;;  %v8358_v31 = vld [vmem:[%s12723_s5 + $0x3cc] ss:$16 sps:$4 sm:$0xff]  }
 0xa9d   : > { %5947 = vmatpush1.bf16.msra.mxu1 %v8242_v0  ;;  %v8356_v0 = vld [vmem:[%s12723_s5 + $0x3c8] ss:$16 sps:$4 sm:$0xff]  }
 0xa9e   : > { %5948 = vmatprep.subr.bf16.mxu1 %v8247_v32  ;;  %v8359_v32 = vld [vmem:[%s12723_s5 + $0x3a8] ss:$16 sps:$4 sm:$0xff]  }
 0xaa0   : > { %5847 = vmatmul.mubr.bf16.gmra.mxu1 %v11182_v4 }
 0xaa1   : > { %5856 = vmatprep.mubr.bf16.mxu1 %v11188_v40  ;;  %5949 = vmatpush1.bf16.msra.mxu1 %v8245_v63  ;;  %v8364_v63 = vld [vmem:[%s12723_s5 + $0x38c] ss:$16 sps:$4 sm:$0xff]  }
 0xaa2   : > { %5950 = vmatprep.subr.bf16.mxu1 %v8250_v56  ;;  %v8362_v56 = vld [vmem:[%s12723_s5 + $0x388] ss:$16 sps:$4 sm:$0xff]  }
 0xaa5   : > { %5951 = vmatpush1.bf16.msra.mxu1 %v8248_v49  ;;  %v8367_v49 = vld [vmem:[%s12723_s5 + $0x36c] ss:$16 sps:$4 sm:$0xff]  }
 0xaa6   : > { %5952 = vmatprep.subr.bf16.mxu1 %v8253_v55  ;;  %v8365_v55 = vld [vmem:[%s12723_s5 + $0x368] ss:$16 sps:$4 sm:$0xff]  }
 0xaa8   : > { %5857 = vmatmul.mubr.bf16.gmra.mxu1 %v11180_v3 }
 0xaa9   : > { %5953 = vmatpush1.bf16.msra.mxu1 %v8251_v47  ;;  %5972 = vmatprep.mubr.bf16.mxu1 %v11186_v14  ;;  %v8260_v14 = vld [vmem:[%s12723_s5 + $0x1c8] ss:$16 sps:$4 sm:$0xff]   ;;  %v8370_v47 = vld [vmem:[%s12723_s5 + $0x34c] ss:$16 sps:$4 sm:$0xff]  }
 0xaaa   : > { %5954 = vmatprep.subr.bf16.mxu1 %v8256_v16  ;;  %v8368_v16 = vld [vmem:[%s12723_s5 + $0x348] ss:$16 sps:$4 sm:$0xff]  }
 0xaad   : > { %5955 = vmatpush1.bf16.msra.mxu1 %v8254_v8  ;;  %v8373_v8 = vld [vmem:[%s12723_s5 + $0x32c] ss:$16 sps:$4 sm:$0xff]  }
 0xaae   : > { %5956 = vmatprep.subr.bf16.mxu1 %v8259_v43  ;;  %v8371_v43 = vld [vmem:[%s12723_s5 + $0x328] ss:$16 sps:$4 sm:$0xff]  }
 0xab1   : > { %5957 = vmatpush2.bf16.msra.mxu1 %v8257_v35  ;;  %v8376_v35 = vld [vmem:[%s12723_s5 + $0x30c] ss:$16 sps:$4 sm:$0xff]  }
 0xab2   : > { %5958 = vmatprep.subr.bf16.mxu1 %v8262_v2  ;;  %v8374_v2 = vld [vmem:[%s12723_s5 + $0x308] ss:$16 sps:$4 sm:$0xff]  }
 0xab5   : > { %5959 = vmatpush2.bf16.msra.mxu1 %v8260_v14 }
 0xab6   : > { %5960 = vmatprep.subr.bf16.mxu1 %v8265_v17 }
 0xab9   : > { %5961 = vmatpush2.bf16.msra.mxu1 %v8263_v61 }
 0xaba   : > { %5962 = vmatprep.subr.bf16.mxu1 %v8268_v51 }
 0xabd   : > { %5963 = vmatpush2.bf16.msra.mxu1 %v8266_v23 }
 0xabe   : > { %5964 = vmatprep.subr.bf16.mxu1 %v8271_v41 }
 0xac1   : > { %5965 = vmatpush2.bf16.msra.mxu1 %v8269_v24 }
 0xac2   : > { %5966 = vmatprep.subr.bf16.mxu1 %v8274_v6 }
 0xac5   : > { %5967 = vmatpush2.bf16.msra.mxu1 %v8272_v19 }
 0xac6   : > { %5968 = vmatprep.subr.bf16.mxu1 %v8277_v21 }
 0xac9   : > { %5969 = vmatpush2.bf16.msra.mxu1 %v8275_v10 }
 0xaca   : > { %5970 = vmatprep.subr.bf16.mxu1 %v8280_v7 }
 0xacd   : > { %5971 = vmatpush2.bf16.msra.mxu1 %v8278_v60 }
 0xad0   : > { %5973 = vmatmul.mubr.bf16.vlgmr.msra.gmra.mxu1 %v11178_v18  ;;  %v8329_v18 = vld [vmem:[%s12723_s5 + $0x2e8] ss:$16 sps:$4 sm:$0xff]  }
 0xad1   : > { %5982 = vmatprep.mubr.bf16.mxu1 %v11184_v27 }
 0xad8   : > { %5983 = vmatmul.mubr.bf16.gmra.mxu1 %v11176_v30  ;;  %v8334_v30 = vld [vmem:[%s12723_s5 + $0x2cc] ss:$16 sps:$4 sm:$0xff]  }
 0xad9   : > { %5992 = vmatprep.mubr.bf16.mxu1 %v11190_v9 }
 0xae0   : > { %5993 = vmatmul.mubr.bf16.gmra.mxu1 %v11182_v4 }
 0xae1   : > { %6002 = vmatprep.mubr.bf16.mxu1 %v11188_v40 }
 0xae8   : > { %6003 = vmatmul.mubr.bf16.gmra.mxu1 %v11180_v3  ;;  %v8332_v3 = vld [vmem:[%s12723_s5 + $0x2c8] ss:$16 sps:$4 sm:$0xff]  }
 0xb10   : > { %v7551_v48 = vpop.f32.mrf.mxu1 }
 0xb12   : > { %v4957_v22 = vpop.f32.mrf.mxu1 }
 0xb14   : > { %v7552_v38 = vpop.f32.mrf.mxu1 }
 0xb15   : > { %v11576_v9 = vpack.c.bf16 %v7552_v38, %v7551_v48 }
 0xb16   : > { %v4960_v39 = vpop.f32.mrf.mxu1 }
 0xb17   : > { %v4991_v53 = vpack.c.bf16 %v4960_v39, %v4957_v22 }
 0xb18   : > { %v7555_v27 = vpop.f32.mrf.mxu1 }
 0xb19   : > { %5899 = vmatprep.mubr.bf16.mxu0 %v4991_v53 }
 0xb1a   : > { %v4973_v4 = vpop.f32.mrf.mxu1  ;;  %5900 = vmatmul.mubr.bf16.vlgmr.msra.gmra.mxu0 %v11237_v44 }
 0xb1b   : > { %6014 = vmatpush1.bf16.msra.mxu0 %v8329_v18  ;;  %5909 = vmatprep.mubr.bf16.mxu0 %v11576_v9 }
 0xb1c   : > { %v7556_v40 = vpop.f32.mrf.mxu1  ;;  %6015 = vmatprep.subr.bf16.mxu0 %v8334_v30 }
 0xb1d   : > { %v5003_v37 = vpack.c.bf16 %v7556_v40, %v7555_v27  ;;  %v5132_v40 = vld [vmem:[%s12724_s6] sm:$0xf] }
 0xb1e   : > { %v4976_v59 = vpop.f32.mrf.mxu1 }
 0xb1f   : > { %6016 = vmatpush1.bf16.msra.mxu0 %v8332_v3  ;;  %v4999_v11 = vpack.c.bf16 %v4976_v59, %v4973_v4 }
 0xb20   : > { %6017 = vmatprep.subr.bf16.mxu0 %v8337_v5  ;;  %v11719_v5 = vrot.slane %v5132_v40, %v12790_v34 }
 0xb22   : > { %5910 = vmatmul.mubr.bf16.gmra.mxu0 %v11235_v45 }
 0xb23   : > { %6018 = vmatpush1.bf16.msra.mxu0 %v8335_v20  ;;  %5919 = vmatprep.mubr.bf16.mxu0 %v4999_v11 }
 0xb24   : > { %6019 = vmatprep.subr.bf16.mxu0 %v8340_v42  ;;  %v11726_v42 = vrot.slane %v5132_v40, %v12791_v46 }
 0xb27   : > { %6020 = vmatpush1.bf16.msra.mxu0 %v8338_v1 }
 0xb28   : > { %6021 = vmatprep.subr.bf16.mxu0 %v8343_v29 }
 0xb2a   : > { %5920 = vmatmul.mubr.bf16.gmra.mxu0 %v11241_v28 }
 0xb2b   : > { %6022 = vmatpush1.bf16.msra.mxu0 %v8341_v50  ;;  %5929 = vmatprep.mubr.bf16.mxu0 %v5003_v37 }
 0xb2c   : > { %6023 = vmatprep.subr.bf16.mxu0 %v8346_v25  ;;  %v11733_v25 = vrot.slane %v5132_v40, %v12793_v57 }
 0xb2f   : > { %6024 = vmatpush1.bf16.msra.mxu0 %v8344_v15  ;;  %v11736_v15 = vrot.slane %v5132_v40, %v12792_v58 }
 0xb30   : > { %6025 = vmatprep.subr.bf16.mxu0 %v8349_v36 }
 0xb32   : > { %5930 = vmatmul.mubr.bf16.gmra.mxu0 %v11239_v54 }
 0xb33   : > { %6026 = vmatpush1.bf16.msra.mxu0 %v8347_v52  ;;  %6045 = vmatprep.mubr.bf16.mxu0 %v4991_v53 }
 0xb34   : > { %6027 = vmatprep.subr.bf16.mxu0 %v8352_v62  ;;  %v8540_v62 = vld [vmem:[%s8838_s29 + $0x8] sm:$0xff] }
 0xb37   : > { %6028 = vmatpush1.bf16.msra.mxu0 %v8350_v26 }
 0xb38   : > { %6029 = vmatprep.subr.bf16.mxu0 %v8355_v12 }
 0xb3b   : > { %6030 = vmatpush2.bf16.msra.mxu0 %v8353_v13 }
 0xb3c   : > { %6031 = vmatprep.subr.bf16.mxu0 %v8358_v31 }
 0xb3f   : > { %6032 = vmatpush2.bf16.msra.mxu0 %v8356_v0  ;;  %v8541_v0 = vld [vmem:[%s8838_s29] sm:$0xff] }
 0xb40   : > { %6033 = vmatprep.subr.bf16.mxu0 %v8361_v33 }
 0xb43   : > { %6034 = vmatpush2.bf16.msra.mxu0 %v8359_v32 }
 0xb44   : > { %6035 = vmatprep.subr.bf16.mxu0 %v8364_v63 }
 0xb47   : > { %6036 = vmatpush2.bf16.msra.mxu0 %v8362_v56 }
 0xb48   : > { %6037 = vmatprep.subr.bf16.mxu0 %v8367_v49 }
 0xb4b   : > { %6038 = vmatpush2.bf16.msra.mxu0 %v8365_v55  ;;  %v8542_v55 = vld [vmem:[%s8838_s29 + $0x10] sm:$0xff] }
 0xb4c   : > { %6039 = vmatprep.subr.bf16.mxu0 %v8370_v47 }
 0xb4f   : > { %6040 = vmatpush2.bf16.msra.mxu0 %v8368_v16 }
 0xb50   : > { %6041 = vmatprep.subr.bf16.mxu0 %v8373_v8  ;;  %v5828_v14 = vpop.f32.mrf.mxu1 }
 0xb51   : > { %v5829_v50 = vadd.f32 %v5828_v14, %v11726_v42 }
 0xb52   : > { %v5830_v17 = vpop.f32.mrf.mxu1 }
 0xb53   : > { %6042 = vmatpush2.bf16.msra.mxu0 %v8371_v43  ;;  %v5831_v1 = vadd.f32 %v5830_v17, %v11719_v5  ;;  %v8543_v17 = vld [vmem:[%s8838_s29 + $0x18] sm:$0xff] }
 0xb54   : > { %6043 = vmatprep.subr.bf16.mxu0 %v8376_v35  ;;  %v5832_v61 = vpop.f32.mrf.mxu1 }
 0xb55   : > { %v5833_v31 = vadd.f32 %v5832_v61, %v11726_v42 }
 0xb56   : > { %v5834_v23 = vpop.f32.mrf.mxu1 }
 0xb57   : > { %6044 = vmatpush2.bf16.msra.mxu0 %v8374_v2  ;;  %v5835_v32 = vadd.f32 %v5834_v23, %v11719_v5 }
 0xb58   : > { %v11675_v24 = vpop.f32.mrf.mxu1 }
 0xb5a   : > { %6046 = vmatmul.mubr.bf16.vlgmr.msra.gmra.mxu0 %v11237_v44  ;;  %v11677_v44 = vpop.f32.mrf.mxu1 }
 0xb5b   : > { %6055 = vmatprep.mubr.bf16.mxu0 %v11576_v9 }
 0xb5c   : > { %v11679_v21 = vpop.f32.mrf.mxu1 }
 0xb62   : > { %6056 = vmatmul.mubr.bf16.gmra.mxu0 %v11235_v45 }
 0xb63   : > { %6065 = vmatprep.mubr.bf16.mxu0 %v4999_v11 }
 0xb6a   : > { %6066 = vmatmul.mubr.bf16.gmra.mxu0 %v11241_v28  ;;  %v11683_v28 = vpop.f32.mrf.mxu1 }
 0xb6b   : > { %6075 = vmatprep.mubr.bf16.mxu0 %v5003_v37 }
 0xb72   : > { %6076 = vmatmul.mubr.bf16.gmra.mxu0 %v11239_v54  ;;  %v11687_v54 = vpop.f32.mrf.mxu1 }
 0xb74   : > { %v11691_v60 = vpop.f32.mrf.mxu1 }
 0xb76   : > { %v11695_v22 = vpop.f32.mrf.mxu1 }
 0xb78   : > { %v11699_v39 = vpop.f32.mrf.mxu1 }
 0xb7a   : > { %v11703_v18 = vpop.f32.mrf.mxu1 }
 0xb7c   : > { %v11707_v30 = vpop.f32.mrf.mxu1 }
 0xb7e   : > { %v11711_v4 = vpop.f32.mrf.mxu1 }
 0xb80   : > { %v11721_v59 = vpop.f32.mrf.mxu1 }
 0xb90   : > { %v5974_v11 = vpop.f32.mrf.mxu1 }
 0xb91   : > { %v5975_v52 = vadd.f32 %v5974_v11, %v11733_v25 }
 0xb92   : > { %v5976_v37 = vpop.f32.mrf.mxu1 }
 0xb93   : > { %v5977_v57 = vadd.f32 %v5976_v37, %v11736_v15 }
 0xb94   : > { %v5978_v12 = vpop.f32.mrf.mxu1 }
 0xb95   : > { %v5979_v35 = vadd.f32 %v5978_v12, %v11733_v25 }
 0xb96   : > { %v5980_v8 = vpop.f32.mrf.mxu1 }
 0xb97   : > { %v5981_v23 = vadd.f32 %v5980_v8, %v11736_v15 }
 0xbda   : > { %v5901_v51 = vpop.f32.mrf.mxu0 }
 0xbdb   : > { %v5902_v36 = vadd.f32 %v5901_v51, %v5829_v50  ;;  %v8545_v50 = vld [vmem:[%s8838_s29 + $0x28] sm:$0xff] }
 0xbdc   : > { %v5903_v41 = vpop.f32.mrf.mxu0 }
 0xbdd   : > { %v5904_v34 = vadd.f32 %v5903_v41, %v5831_v1  ;;  %v11747_v33 = vadd.f32 %v8541_v0, %v5902_v36  ;;  %v8544_v41 = vld [vmem:[%s8838_s29 + $0x20] sm:$0xff]  ;;  %v5984_v1 = vpop.f32.mrf.mxu1 }
 0xbde   : > { %v5905_v6 = vpop.f32.mrf.mxu0  ;;  %v5985_v0 = vadd.f32 %v5984_v1, %v11733_v25 }
 0xbdf   : > { %v11742_v26 = vadd.f32 %v8540_v62, %v5904_v34  ;;  %v5906_v49 = vadd.f32 %v5905_v6, %v5833_v31  ;;  %v5841_v62 = vadd.f32 %v11677_v44, %v11719_v5 }
 0xbe0   : > { %v5907_v19 = vpop.f32.mrf.mxu0 }
 0xbe1   : > { %v6118_v56 = vadd.f32 %v11742_v26, %v11747_v33  ;;  %v5908_v2 = vadd.f32 %v5907_v19, %v5835_v32  ;;  %v11762_v6 = vadd.f32 %v8544_v41, %v5906_v49  ;;  %v5839_v19 = vadd.f32 %v11675_v24, %v11726_v42  ;;  %v5986_v24 = vpop.f32.mrf.mxu1  ;;  %v8548_v49 = vld [vmem:[%s8838_s29 + $0x40] sm:$0xff] }
 0xbe2   : > { %v11681_v45 = vpop.f32.mrf.mxu0 }
 0xbe3   : > { %v11768_v34 = vadd.f32 %v8545_v50, %v5908_v2  ;;  %v5912_v12 = vadd.f32 %v11681_v45, %v5839_v19  ;;  %v5987_v45 = vadd.f32 %v5986_v24, %v11736_v15 }
 0xbe4   : > { %v11685_v10 = vpop.f32.mrf.mxu0 }
 0xbe6   : > { %v11689_v7 = vpop.f32.mrf.mxu0 }
 0xbe8   : > { %v11693_v48 = vpop.f32.mrf.mxu0 }
 0xbea   : > { %v11697_v38 = vpop.f32.mrf.mxu0 }
 0xbec   : > { %v11701_v53 = vpop.f32.mrf.mxu0 }
 0xbee   : > { %v11705_v27 = vpop.f32.mrf.mxu0 }
 0xbf0   : > { %v11709_v9 = vpop.f32.mrf.mxu0 }
 0xbf2   : > { %v11713_v3 = vpop.f32.mrf.mxu0 }
 0xbf4   : > { %v11723_v20 = vpop.f32.mrf.mxu0 }
 0xbf6   : > { %v11729_v29 = vpop.f32.mrf.mxu0 }
 0xbf8   : > { %v11738_v46 = vpop.f32.mrf.mxu0 }
 0xc1a   : > { %v6047_v13 = vpop.f32.mrf.mxu0 }
 0xc1b   : > { %v6048_v58 = vadd.f32 %v6047_v13, %v5975_v52  ;;  %v8546_v13 = vld [vmem:[%s8838_s29 + $0x30] sm:$0xff] }
 0xc1c   : > { %v6049_v63 = vpop.f32.mrf.mxu0 }
 0xc1d   : > { %v11753_v47 = vadd.f32 %v8542_v55, %v6048_v58  ;;  %v6050_v16 = vadd.f32 %v6049_v63, %v5977_v57  ;;  %v5914_v58 = vadd.f32 %v11685_v10, %v5841_v62  ;;  %v8547_v63 = vld [vmem:[%s8838_s29 + $0x38] sm:$0xff]  ;;  %v11786_v55 = vadd.f32 %v8548_v49, %v5912_v12  ;;  %v8552_v62 = vld [vmem:[%s8838_s29 + $0x60] sm:$0xff] }
 0xc1e   : > { %v6051_v43 = vpop.f32.mrf.mxu0  ;;  %v5843_v10 = vadd.f32 %v11679_v21, %v11726_v42 }
 0xc1f   : > { %v6119_v14 = vadd.f32 %v6118_v56, %v11753_v47  ;;  %v11758_v61 = vadd.f32 %v8543_v17, %v6050_v16  ;;  %v6052_v11 = vadd.f32 %v6051_v43, %v5979_v35  ;;  %v5988_v43 = vpop.f32.mrf.mxu1  ;;  %v8549_v35 = vld [vmem:[%s8838_s29 + $0x48] sm:$0xff] }
 0xc20   : > { %v6053_v51 = vpop.f32.mrf.mxu0  ;;  %v11792_v2 = vadd.f32 %v8549_v35, %v5914_v58  ;;  %v5916_v41 = vadd.f32 %v11689_v7, %v5843_v10  ;;  %v5989_v19 = vadd.f32 %v5988_v43, %v11733_v25 }
 0xc21   : > { %v6120_v40 = vadd.f32 %v6119_v14, %v11758_v61  ;;  %v6054_v36 = vadd.f32 %v6053_v51, %v5981_v23  ;;  %v11775_v31 = vadd.f32 %v8546_v13, %v6052_v11  ;;  %v5845_v23 = vadd.f32 %v11683_v28, %v11719_v5  ;;  %v5990_v21 = vpop.f32.mrf.mxu1 }
 0xc22   : > { %v6057_v52 = vpop.f32.mrf.mxu0  ;;  %v5991_v7 = vadd.f32 %v5990_v21, %v11736_v15  ;;  %v11810_v12 = vadd.f32 %v8552_v62, %v5916_v41 }
 0xc23   : > { %v6121_v37 = vadd.f32 %v6120_v40, %v11762_v6  ;;  %v11782_v56 = vadd.f32 %v8547_v63, %v6054_v36  ;;  %v6058_v8 = vadd.f32 %v6057_v52, %v5985_v0  ;;  %v8550_v40 = vld [vmem:[%s8838_s29 + $0x50] sm:$0xff]  ;;  %v5918_v50 = vadd.f32 %v11693_v48, %v5845_v23  ;;  %v8551_v36 = vld [vmem:[%s8838_s29 + $0x58] sm:$0xff]  ;;  %v5994_v24 = vpop.f32.mrf.mxu1  ;;  %v8553_v0 = vld [vmem:[%s8838_s29 + $0x68] sm:$0xff] }
 0xc24   : > { %v6059_v44 = vpop.f32.mrf.mxu0  ;;  %v5849_v48 = vadd.f32 %v11687_v54, %v11726_v42  ;;  %v5995_v10 = vadd.f32 %v5994_v24, %v11733_v25  ;;  %v8556_v23 = vld [vmem:[%s8838_s29 + $0x80] sm:$0xff] }
 0xc25   : > { %v6122_v57 = vadd.f32 %v6121_v37, %v11768_v34  ;;  %v6060_v17 = vadd.f32 %v6059_v44, %v5987_v45  ;;  %v11799_v11 = vadd.f32 %v8550_v40, %v6058_v8  ;;  %v11816_v58 = vadd.f32 %v8553_v0, %v5918_v50  ;;  %v5996_v54 = vpop.f32.mrf.mxu1 }
 0xc26   : > { %v6061_v51 = vpop.f32.mrf.mxu0  ;;  %v5851_v45 = vadd.f32 %v11691_v60, %v11719_v5  ;;  %v5922_v49 = vadd.f32 %v11697_v38, %v5849_v48  ;;  %v5997_v38 = vadd.f32 %v5996_v54, %v11736_v15 }
 0xc27   : > { %v6123_v32 = vadd.f32 %v6122_v57, %v11775_v31  ;;  %v11806_v52 = vadd.f32 %v8551_v36, %v6060_v17  ;;  %v6062_v57 = vadd.f32 %v6061_v51, %v5989_v19  ;;  %v8555_v17 = vld [vmem:[%s8838_s29 + $0x78] sm:$0xff]  ;;  %v5998_v21 = vpop.f32.mrf.mxu1  ;;  %v8557_v19 = vld [vmem:[%s8838_s29 + $0x88] sm:$0xff] }
 0xc28   : > { %v6063_v28 = vpop.f32.mrf.mxu0  ;;  %v5924_v35 = vadd.f32 %v11701_v53, %v5851_v45  ;;  %v11834_v41 = vadd.f32 %v8556_v23, %v5922_v49  ;;  %v5853_v53 = vadd.f32 %v11695_v22, %v11726_v42  ;;  %v5999_v48 = vadd.f32 %v5998_v21, %v11733_v25  ;;  %v8560_v45 = vld [vmem:[%s8838_s29 + $0xa0] sm:$0xff] }
 0xc29   : > { %v6124_v16 = vadd.f32 %v6123_v32, %v11782_v56  ;;  %v6064_v63 = vadd.f32 %v6063_v28, %v5991_v7  ;;  %v5855_v7 = vadd.f32 %v11699_v39, %v11719_v5  ;;  %v6000_v22 = vpop.f32.mrf.mxu1 }
 0xc2a   : > { %v6067_v44 = vpop.f32.mrf.mxu0  ;;  %v11840_v50 = vadd.f32 %v8557_v19, %v5924_v35  ;;  %v5926_v62 = vadd.f32 %v11705_v27, %v5853_v53  ;;  %v6001_v27 = vadd.f32 %v6000_v22, %v11736_v15 }
 0xc2b   : > { %v6125_v14 = vadd.f32 %v6124_v16, %v11786_v55  ;;  %v8554_v16 = vld [vmem:[%s8838_s29 + $0x70] sm:$0xff]  ;;  %v11830_v51 = vadd.f32 %v8555_v17, %v6064_v63  ;;  %v5928_v0 = vadd.f32 %v11709_v9, %v5855_v7  ;;  %v8559_v63 = vld [vmem:[%s8838_s29 + $0x98] sm:$0xff]  ;;  %v6004_v54 = vpop.f32.mrf.mxu1  ;;  %v5859_v9 = vadd.f32 %v11703_v18, %v11726_v42  ;;  %v8564_v7 = vld [vmem:[%s8838_s29 + $0xc0] sm:$0xff] }
 0xc2c   : > { %v11823_v8 = vadd.f32 %v8554_v16, %v6062_v57  ;;  %v6069_v60 = vpop.f32.mrf.mxu0  ;;  %v11858_v49 = vadd.f32 %v8560_v45, %v5926_v62  ;;  %v6005_v53 = vadd.f32 %v6004_v54, %v11733_v25 }
 0xc2d   : > { %v6126_v1 = vadd.f32 %v6125_v14, %v11792_v2  ;;  %v6070_v36 = vadd.f32 %v6069_v60, %v5997_v38  ;;  %v5861_v38 = vadd.f32 %v11707_v30, %v11719_v5  ;;  %v5932_v23 = vadd.f32 %v11713_v3, %v5859_v9  ;;  %v6006_v18 = vpop.f32.mrf.mxu1 }
 0xc2e   : > { %v6071_v28 = vpop.f32.mrf.mxu0  ;;  %v6007_v3 = vadd.f32 %v6006_v18, %v11736_v15  ;;  %v8570_v18 = vld [vmem:[%s8838_s29 + $0xf0] sm:$0xff] }
 0xc2f   : > { %v6127_v37 = vadd.f32 %v6126_v1, %v11799_v11  ;;  %v6068_v1 = vadd.f32 %v6067_v44, %v5995_v10  ;;  %v11854_v44 = vadd.f32 %v8559_v63, %v6070_v36  ;;  %v8561_v10 = vld [vmem:[%s8838_s29 + $0xa8] sm:$0xff]  ;;  %v5934_v19 = vadd.f32 %v11723_v20, %v5861_v38  ;;  %v8563_v36 = vld [vmem:[%s8838_s29 + $0xb8] sm:$0xff]  ;;  %v6008_v22 = vpop.f32.mrf.mxu1 }
 0xc30   : > { %v6073_v39 = vpop.f32.mrf.mxu0  ;;  %v11864_v35 = vadd.f32 %v8561_v10, %v5928_v0  ;;  %v11882_v62 = vadd.f32 %v8564_v7, %v5932_v23  ;;  %v5863_v20 = vadd.f32 %v11711_v4, %v11726_v42  ;;  %v6009_v42 = vadd.f32 %v6008_v22, %v11733_v25 }
 0xc31   : > { %v6128_v13 = vadd.f32 %v6127_v37, %v11806_v52  ;;  %v6074_v17 = vadd.f32 %v6073_v39, %v6001_v27  ;;  %v5865_v27 = vadd.f32 %v11721_v59, %v11719_v5  ;;  %v6010_v4 = vpop.f32.mrf.mxu1 }
 0xc32   : > { %v6077_v60 = vpop.f32.mrf.mxu0  ;;  %v5936_v45 = vadd.f32 %v11729_v29, %v5863_v20  ;;  %v6011_v59 = vadd.f32 %v6010_v4, %v11736_v15  ;;  %v8568_v29 = vld [vmem:[%s8838_s29 + $0xe0] sm:$0xff] }
 0xc33   : > { %v6129_v32 = vadd.f32 %v6128_v13, %v11810_v12  ;;  %v8558_v13 = vld [vmem:[%s8838_s29 + $0x90] sm:$0xff]  ;;  %v5938_v9 = vadd.f32 %v11738_v46, %v5865_v27 }
 0xc34   : > { %v11847_v57 = vadd.f32 %v8558_v13, %v6068_v1  ;;  %v6079_v30 = vpop.f32.mrf.mxu0 }
 0xc35   : > { %v6130_v43 = vadd.f32 %v6129_v32, %v11816_v58  ;;  %v6080_v63 = vadd.f32 %v6079_v30, %v6007_v3 }
 0xc36   : > { %v6081_v39 = vpop.f32.mrf.mxu0 }
 0xc37   : > { %v6131_v14 = vadd.f32 %v6130_v43, %v11823_v8  ;;  %v6072_v43 = vadd.f32 %v6071_v28, %v5999_v48  ;;  %v11878_v28 = vadd.f32 %v8563_v36, %v6074_v17  ;;  %v8565_v48 = vld [vmem:[%s8838_s29 + $0xc8] sm:$0xff]  ;;  %v6082_v23 = vadd.f32 %v6081_v39, %v6009_v42 }
 0xc38   : > { %v11888_v0 = vadd.f32 %v8565_v48, %v5934_v19  ;;  %v6083_v5 = vpop.f32.mrf.mxu0 }
 0xc39   : > { %v6132_v40 = vadd.f32 %v6131_v14, %v11830_v51  ;;  %v6084_v46 = vadd.f32 %v6083_v5, %v6011_v59 }
 0xc3b   : > { %v6133_v37 = vadd.f32 %v6132_v40, %v11834_v41  ;;  %v8562_v40 = vld [vmem:[%s8838_s29 + $0xb0] sm:$0xff] }
 0xc3c   : > { %v11871_v1 = vadd.f32 %v8562_v40, %v6072_v43  ;;  %v8569_v40 = vld [vmem:[%s8838_s29 + $0xe8] sm:$0xff] }
 0xc3d   : > { %v6134_v24 = vadd.f32 %v6133_v37, %v11840_v50 }
 0xc3f   : > { %v6135_v32 = vadd.f32 %v6134_v24, %v11847_v57  ;;  %v6078_v24 = vadd.f32 %v6077_v60, %v6005_v53  ;;  %v11906_v60 = vadd.f32 %v8568_v29, %v5936_v45  ;;  %v11914_v53 = vadd.f32 %v8570_v18, %v6082_v23 }
 0xc41   : > { %v6136_v16 = vadd.f32 %v6135_v32, %v11854_v44 }
 0xc43   : > { %v6137_v14 = vadd.f32 %v6136_v16, %v11858_v49  ;;  %v8566_v16 = vld [vmem:[%s8838_s29 + $0xd0] sm:$0xff] }
 0xc44   : > { %v11895_v43 = vadd.f32 %v8566_v16, %v6078_v24 }
 0xc45   : > { %v6138_v21 = vadd.f32 %v6137_v14, %v11864_v35  ;;  %v8567_v14 = vld [vmem:[%s8838_s29 + $0xd8] sm:$0xff] }
 0xc46   : > { %v11902_v17 = vadd.f32 %v8567_v14, %v6080_v63 }
 0xc47   : > { %v6139_v37 = vadd.f32 %v6138_v21, %v11871_v1  ;;  %v11910_v21 = vadd.f32 %v8569_v40, %v5938_v9 }
 0xc49   : > { %v6140_v13 = vadd.f32 %v6139_v37, %v11878_v28  ;;  %v8571_v37 = vld [vmem:[%s8838_s29 + $0xf8] sm:$0xff]  ;;  %s7290_s29 = sshll.u32 %s8806_s17, 4 }
 0xc4a   : > { %v11918_v36 = vadd.f32 %v8571_v37, %v6084_v46  ;;  %s12644_s21 = scalar_lea.hbm %s12727_s9, %s7290_s29  ;;  %s12652_s0 = scalar_lea.hbm %s12728_s10, %s7290_s29 }
 0xc4b   : > { %v6141_v32 = vadd.f32 %v6140_v13, %v11882_v62 }
 0xc4d   : > { %v6142_v54 = vadd.f32 %v6141_v32, %v11888_v0 }
 0xc4f   : > { %v6143_v10 = vadd.f32 %v6142_v54, %v11895_v43 }
 0xc51   : > { %v6144_v38 = vadd.f32 %v6143_v10, %v11902_v17 }
 0xc53   : > { %v6145_v25 = vadd.f32 %v6144_v38, %v11906_v60 }
 0xc55   : > { %v6146_v19 = vadd.f32 %v6145_v25, %v11910_v21 }
 0xc57   : > { %v6147_v15 = vadd.f32 %v6146_v19, %v11914_v53 }
 0xc59   : > { %v6148_v30 = vadd.f32 %v6147_v15, %v11918_v36 }
 0xc5b   : > { %6149 = vadd.xlane.f32.xlu0 %v6148_v30 }
 0xce4   : > { %v6150_v3 = vpop.xlane.xlu0 %6149 }
 0xce5   : > { %v6151_v7 = vrot.slane %v6150_v3, 4 }
 0xce7   : > { %v6152_v13 = vadd.f32 %v6151_v7, %v6150_v3 }
 0xce9   : > { %v6153_v24 = vrot.slane %v6152_v13, 2 }
 0xceb   : > { %v6154_v22 = vadd.f32 %v6153_v24, %v6152_v13 }
 0xced   : > { %v6155_v20 = vrot.slane %v6154_v22, 1 }
 0xcef   : > { %v6156_v48 = vadd.f32 %v6155_v20, %v6154_v22 }
 0xcf1   : > { %7561 = vpush %v6156_v48 }
 0xd22   : > { %s7562_s27 = spop %7561 }
 0xd23   : > { %v6158_v32 = vstv %s7562_s27  ;;  %s12634_s27 = sand.u32 1, %s8718_s14  }
 0xd24   : > { %v11922_v63 = vmul.f32 3.0517578e-05, %v6158_v32  ;;  %s355_s28 = scalar_lea.vmem [#allocation2], %s12634_s27  ;;  %s12747_s11 = scalar_lea.vmem [#allocation4], %s12634_s27 }
 0xd25   : > { %s6660_s30 = sshll.u32 %s355_s28, 4  ;;  %s6673_s12 = sshll.u32 %s12747_s11, 4  ;;  %s12646_s30 = int_to_ptr.vmem [resolvable:$true] %s6660_s30  ;;  %s12654_s12 = int_to_ptr.vmem [resolvable:$true] %s6673_s12 }
 0xd26   : > { %v11926_v39 = vsub.f32 %v11747_v33, %v11922_v63  ;;  %v11930_v27 = vsub.f32 %v11742_v26, %v11922_v63  ;;  %v11934_v45 = vsub.f32 %v11753_v47, %v11922_v63  ;;  %v11942_v4 = vsub.f32 %v11758_v61, %v11922_v63  ;;  %s6644_s22 = scalar_lea.sflag [#allocation3], %s12634_s27  ;;  %s8642_s11 = scalar_lea.vmem %s8641_s20, 32 }
 0xd27   : > { %v11946_v33 = vsub.f32 %v11762_v6, %v11922_v63  ;;  %v11952_v47 = vsub.f32 %v11768_v34, %v11922_v63  ;;  %v11958_v61 = vsub.f32 %v11775_v31, %v11922_v63  ;;  %v11964_v5 = vsub.f32 %v11782_v56, %v11922_v63  ;;  %p8643_p0 = scmp.lt.s32.totalorder %s12646_s30, %s8641_s20 }
 0xd28   : > { %v6192_v16 = vmul.f32 %v11926_v39, %v11926_v39  ;;  %v6193_v54 = vmul.f32 %v11930_v27, %v11930_v27  ;;  %v6194_v26 = vmul.f32 %v11934_v45, %v11934_v45  ;;  %v6195_v9 = vmul.f32 %v11942_v4, %v11942_v4 }
 0xd29   : > { %v6196_v6 = vmul.f32 %v11946_v33, %v11946_v33  ;;  %v6197_v34 = vmul.f32 %v11952_v47, %v11952_v47  ;;  %v11970_v29 = vsub.f32 %v11786_v55, %v11922_v63  ;;  %v6198_v31 = vmul.f32 %v11958_v61, %v11958_v61 }
 0xd2a   : > { %v6224_v42 = vadd.f32 %v6193_v54, %v6192_v16  ;;  %v11976_v23 = vsub.f32 %v11792_v2, %v11922_v63  ;;  %v6199_v56 = vmul.f32 %v11964_v5, %v11964_v5  ;;  %v11982_v25 = vsub.f32 %v11799_v11, %v11922_v63 }
 0xd2b   : > { %v6200_v55 = vmul.f32 %v11970_v29, %v11970_v29  ;;  %v11988_v18 = vsub.f32 %v11806_v52, %v11922_v63  ;;  %v11994_v37 = vsub.f32 %v11810_v12, %v11922_v63  ;;  %v12000_v30 = vsub.f32 %v11816_v58, %v11922_v63 }
 0xd2c   : > { %v6225_v10 = vadd.f32 %v6224_v42, %v6194_v26  ;;  %v6201_v2 = vmul.f32 %v11976_v23, %v11976_v23  ;;  %v6202_v11 = vmul.f32 %v11982_v25, %v11982_v25  ;;  %v12006_v7 = vsub.f32 %v11823_v8, %v11922_v63 }
 0xd2d   : > { %v6203_v52 = vmul.f32 %v11988_v18, %v11988_v18  ;;  %v6204_v12 = vmul.f32 %v11994_v37, %v11994_v37  ;;  %v12012_v24 = vsub.f32 %v11830_v51, %v11922_v63  ;;  %v6205_v58 = vmul.f32 %v12000_v30, %v12000_v30 }
 0xd2e   : > { %v6226_v14 = vadd.f32 %v6225_v10, %v6195_v9  ;;  %v12018_v20 = vsub.f32 %v11834_v41, %v11922_v63  ;;  %v6206_v8 = vmul.f32 %v12006_v7, %v12006_v7  ;;  %v12024_v32 = vsub.f32 %v11840_v50, %v11922_v63 }
 0xd2f   : > { %v6207_v51 = vmul.f32 %v12012_v24, %v12012_v24  ;;  %v12030_v54 = vsub.f32 %v11847_v57, %v11922_v63  ;;  %v12036_v42 = vsub.f32 %v11854_v44, %v11922_v63  ;;  %v12042_v10 = vsub.f32 %v11858_v49, %v11922_v63 }
 0xd30   : > { %v6227_v59 = vadd.f32 %v6226_v14, %v6196_v6  ;;  %v6208_v41 = vmul.f32 %v12018_v20, %v12018_v20  ;;  %v6209_v50 = vmul.f32 %v12024_v32, %v12024_v32  ;;  %v12048_v14 = vsub.f32 %v11864_v35, %v11922_v63 }
 0xd31   : > { %v6210_v57 = vmul.f32 %v12030_v54, %v12030_v54  ;;  %v6211_v44 = vmul.f32 %v12036_v42, %v12036_v42  ;;  %v6212_v49 = vmul.f32 %v12042_v10, %v12042_v10 }
 0xd32   : > { %v6228_v38 = vadd.f32 %v6227_v59, %v6197_v34  ;;  %v12054_v59 = vsub.f32 %v11871_v1, %v11922_v63  ;;  %v6213_v35 = vmul.f32 %v12048_v14, %v12048_v14 }
 0xd34   : > { %v6229_v40 = vadd.f32 %v6228_v38, %v6198_v31  ;;  %v12060_v38 = vsub.f32 %v11878_v28, %v11922_v63  ;;  %v6214_v1 = vmul.f32 %v12054_v59, %v12054_v59 }
 0xd36   : > { %v6230_v46 = vadd.f32 %v6229_v40, %v6199_v56  ;;  %v12066_v40 = vsub.f32 %v11882_v62, %v11922_v63  ;;  %v6215_v28 = vmul.f32 %v12060_v38, %v12060_v38 }
 0xd38   : > { %v6231_v19 = vadd.f32 %v6230_v46, %v6200_v55  ;;  %v12072_v46 = vsub.f32 %v11888_v0, %v11922_v63  ;;  %v6216_v62 = vmul.f32 %v12066_v40, %v12066_v40 }
 0xd3a   : > { %v6232_v15 = vadd.f32 %v6231_v19, %v6201_v2  ;;  %v12078_v19 = vsub.f32 %v11895_v43, %v11922_v63  ;;  %v6217_v0 = vmul.f32 %v12072_v46, %v12072_v46 }
 0xd3c   : > { %v6233_v3 = vadd.f32 %v6232_v15, %v6202_v11  ;;  %v12084_v15 = vsub.f32 %v11902_v17, %v11922_v63  ;;  %v6218_v43 = vmul.f32 %v12078_v19, %v12078_v19 }
 0xd3e   : > { %v6234_v13 = vadd.f32 %v6233_v3, %v6203_v52  ;;  %v12090_v3 = vsub.f32 %v11906_v60, %v11922_v63  ;;  %v6219_v17 = vmul.f32 %v12084_v15, %v12084_v15 }
 0xd40   : > { %v6235_v22 = vadd.f32 %v6234_v13, %v6204_v12  ;;  %v12096_v13 = vsub.f32 %v11910_v21, %v11922_v63  ;;  %v6220_v60 = vmul.f32 %v12090_v3, %v12090_v3 }
 0xd42   : > { %v6236_v48 = vadd.f32 %v6235_v22, %v6205_v58  ;;  %v12102_v22 = vsub.f32 %v11914_v53, %v11922_v63  ;;  %v6221_v21 = vmul.f32 %v12096_v13, %v12096_v13 }
 0xd44   : > { %v6237_v16 = vadd.f32 %v6236_v48, %v6206_v8  ;;  %v12108_v48 = vsub.f32 %v11918_v36, %v11922_v63  ;;  %v6484_v36 = vld [vmem:[%s12725_s7 + $0x1f8] sm:$0xff] }
 0xd45   : > { %v6436_v63 = vld [vmem:[%s12725_s7 + $0x78] sm:$0xff]  ;;  %7394 = vmatprep.subr.mxu0 %v6484_v36 }
 0xd46   : > { %v6238_v26 = vadd.f32 %v6237_v16, %v6207_v51  ;;  %v6222_v16 = vmul.f32 %v12102_v22, %v12102_v22  ;;  %v6223_v53 = vmul.f32 %v12108_v48, %v12108_v48  ;;  %v6476_v36 = vld [vmem:[%s12725_s7 + $0x1b8] sm:$0xff] }
 0xd48   : > { %v6239_v9 = vadd.f32 %v6238_v26, %v6208_v41 }
 0xd4a   : > { %v6240_v6 = vadd.f32 %v6239_v9, %v6209_v50  ;;  %v6452_v9 = vld [vmem:[%s12725_s7 + $0xf8] sm:$0xff] }
 0xd4b   : > { %7359 = vmatprep.subr.mxu1 %v6452_v9  ;;  %v6444_v9 = vld [vmem:[%s12725_s7 + $0xb8] sm:$0xff] }
 0xd4c   : > { %v6241_v34 = vadd.f32 %v6240_v6, %v6210_v57  ;;  %v6468_v57 = vld [vmem:[%s12725_s7 + $0x178] sm:$0xff]  ;;  %7360 = vmatpush3.msra.mxu1 %v6436_v63  ;;  %v6451_v6 = vld [vmem:[%s12725_s7 + $0xf0] sm:$0xff] }
 0xd4d   : > { %7395 = vmatpush3.msra.mxu0 %v6468_v57  ;;  %7361 = vmatprep.subr.mxu1 %v6451_v6  ;;  %v6428_v63 = vld [vmem:[%s12725_s7 + $0x38] sm:$0xff]  ;;  %v6443_v6 = vld [vmem:[%s12725_s7 + $0xb0] sm:$0xff] }
 0xd4e   : > { %v6242_v31 = vadd.f32 %v6241_v34, %v6211_v44  ;;  %v6483_v44 = vld [vmem:[%s12725_s7 + $0x1f0] sm:$0xff]  ;;  %v6460_v57 = vld [vmem:[%s12725_s7 + $0x138] sm:$0xff] }
 0xd4f   : > { %v6435_v34 = vld [vmem:[%s12725_s7 + $0x70] sm:$0xff]  ;;  %7396 = vmatprep.subr.mxu0 %v6483_v44 }
 0xd50   : > { %v6243_v56 = vadd.f32 %v6242_v31, %v6212_v49  ;;  %v6467_v49 = vld [vmem:[%s12725_s7 + $0x170] sm:$0xff]  ;;  %7362 = vmatpush3.msra.mxu1 %v6435_v34  ;;  %v6450_v31 = vld [vmem:[%s12725_s7 + $0xe8] sm:$0xff] }
 0xd51   : > { %7397 = vmatpush3.msra.mxu0 %v6467_v49  ;;  %7363 = vmatprep.subr.mxu1 %v6450_v31  ;;  %v6475_v44 = vld [vmem:[%s12725_s7 + $0x1b0] sm:$0xff]  ;;  %v6442_v31 = vld [vmem:[%s12725_s7 + $0xa8] sm:$0xff] }
 0xd52   : > { %v6244_v55 = vadd.f32 %v6243_v56, %v6213_v35  ;;  %v6482_v35 = vld [vmem:[%s12725_s7 + $0x1e8] sm:$0xff]  ;;  %v6427_v34 = vld [vmem:[%s12725_s7 + $0x30] sm:$0xff] }
 0xd53   : > { %v6434_v56 = vld [vmem:[%s12725_s7 + $0x68] sm:$0xff]  ;;  %7398 = vmatprep.subr.mxu0 %v6482_v35  ;;  %v6459_v49 = vld [vmem:[%s12725_s7 + $0x130] sm:$0xff] }
 0xd54   : > { %v6245_v2 = vadd.f32 %v6244_v55, %v6214_v1  ;;  %v6466_v1 = vld [vmem:[%s12725_s7 + $0x168] sm:$0xff]  ;;  %7364 = vmatpush3.msra.mxu1 %v6434_v56  ;;  %v6449_v55 = vld [vmem:[%s12725_s7 + $0xe0] sm:$0xff] }
 0xd55   : > { %7399 = vmatpush3.msra.mxu0 %v6466_v1  ;;  %7365 = vmatprep.subr.mxu1 %v6449_v55  ;;  %v6474_v35 = vld [vmem:[%s12725_s7 + $0x1a8] sm:$0xff]  ;;  %v6441_v55 = vld [vmem:[%s12725_s7 + $0xa0] sm:$0xff] }
 0xd56   : > { %v6246_v11 = vadd.f32 %v6245_v2, %v6215_v28  ;;  %v6481_v28 = vld [vmem:[%s12725_s7 + $0x1e0] sm:$0xff]  ;;  %v6426_v56 = vld [vmem:[%s12725_s7 + $0x28] sm:$0xff] }
 0xd57   : > { %v6433_v2 = vld [vmem:[%s12725_s7 + $0x60] sm:$0xff]  ;;  %7400 = vmatprep.subr.mxu0 %v6481_v28  ;;  %v6458_v1 = vld [vmem:[%s12725_s7 + $0x128] sm:$0xff] }
 0xd58   : > { %v6247_v52 = vadd.f32 %v6246_v11, %v6216_v62  ;;  %v6465_v62 = vld [vmem:[%s12725_s7 + $0x160] sm:$0xff]  ;;  %7366 = vmatpush3.msra.mxu1 %v6433_v2  ;;  %v6448_v11 = vld [vmem:[%s12725_s7 + $0xd8] sm:$0xff] }
 0xd59   : > { %7401 = vmatpush3.msra.mxu0 %v6465_v62  ;;  %7367 = vmatprep.subr.mxu1 %v6448_v11  ;;  %v6473_v28 = vld [vmem:[%s12725_s7 + $0x1a0] sm:$0xff]  ;;  %v6440_v11 = vld [vmem:[%s12725_s7 + $0x98] sm:$0xff] }
 0xd5a   : > { %v6248_v12 = vadd.f32 %v6247_v52, %v6217_v0  ;;  %v6480_v0 = vld [vmem:[%s12725_s7 + $0x1d8] sm:$0xff]  ;;  %v6425_v2 = vld [vmem:[%s12725_s7 + $0x20] sm:$0xff] }
 0xd5b   : > { %v6432_v52 = vld [vmem:[%s12725_s7 + $0x58] sm:$0xff]  ;;  %7402 = vmatprep.subr.mxu0 %v6480_v0  ;;  %v6457_v62 = vld [vmem:[%s12725_s7 + $0x120] sm:$0xff] }
 0xd5c   : > { %v6249_v58 = vadd.f32 %v6248_v12, %v6218_v43  ;;  %v6464_v43 = vld [vmem:[%s12725_s7 + $0x158] sm:$0xff]  ;;  %7368 = vmatpush3.msra.mxu1 %v6432_v52  ;;  %v6447_v12 = vld [vmem:[%s12725_s7 + $0xd0] sm:$0xff] }
 0xd5d   : > { %7403 = vmatpush3.msra.mxu0 %v6464_v43  ;;  %7369 = vmatprep.subr.mxu1 %v6447_v12  ;;  %v6472_v0 = vld [vmem:[%s12725_s7 + $0x198] sm:$0xff]  ;;  %v6439_v12 = vld [vmem:[%s12725_s7 + $0x90] sm:$0xff] }
 0xd5e   : > { %v6250_v8 = vadd.f32 %v6249_v58, %v6219_v17  ;;  %v6479_v17 = vld [vmem:[%s12725_s7 + $0x1d0] sm:$0xff]  ;;  %v6424_v43 = vld [vmem:[%s12725_s7 + $0x18] sm:$0xff] }
 0xd5f   : > { %v6431_v58 = vld [vmem:[%s12725_s7 + $0x50] sm:$0xff]  ;;  %7404 = vmatprep.subr.mxu0 %v6479_v17  ;;  %v6456_v17 = vld [vmem:[%s12725_s7 + $0x118] sm:$0xff] }
 0xd60   : > { %v6251_v51 = vadd.f32 %v6250_v8, %v6220_v60  ;;  %v6463_v60 = vld [vmem:[%s12725_s7 + $0x150] sm:$0xff]  ;;  %7370 = vmatpush3.msra.mxu1 %v6431_v58  ;;  %v6446_v8 = vld [vmem:[%s12725_s7 + $0xc8] sm:$0xff] }
 0xd61   : > { %7405 = vmatpush3.msra.mxu0 %v6463_v60  ;;  %7371 = vmatprep.subr.mxu1 %v6446_v8  ;;  %v6423_v60 = vld [vmem:[%s12725_s7 + $0x10] sm:$0xff] }
 0xd62   : > { %v6252_v41 = vadd.f32 %v6251_v51, %v6221_v21  ;;  %v6478_v21 = vld [vmem:[%s12725_s7 + $0x1c8] sm:$0xff]  ;;  %v6471_v8 = vld [vmem:[%s12725_s7 + $0x190] sm:$0xff] }
 0xd63   : > { %v6430_v51 = vld [vmem:[%s12725_s7 + $0x48] sm:$0xff]  ;;  %7406 = vmatprep.subr.mxu0 %v6478_v21 }
 0xd64   : > { %v6253_v26 = vadd.f32 %v6252_v41, %v6222_v16  ;;  %v6462_v16 = vld [vmem:[%s12725_s7 + $0x148] sm:$0xff]  ;;  %7372 = vmatpush3.msra.mxu1 %v6430_v51  ;;  %v6445_v41 = vld [vmem:[%s12725_s7 + $0xc0] sm:$0xff]  ;;  %v6455_v51 = vld [vmem:[%s12725_s7 + $0x110] sm:$0xff] }
 0xd65   : > { %7407 = vmatpush3.msra.mxu0 %v6462_v16  ;;  %7373 = vmatprep.subr.mxu1 %v6445_v41  ;;  %v6438_v21 = vld [vmem:[%s12725_s7 + $0x88] sm:$0xff] }
 0xd66   : > { %v6254_v50 = vadd.f32 %v6253_v26, %v6223_v53  ;;  %v6477_v53 = vld [vmem:[%s12725_s7 + $0x1c0] sm:$0xff]  ;;  %v6422_v16 = vld [vmem:[%s12725_s7 + $0x8] sm:$0xff] }
 0xd67   : > { %v6429_v26 = vld [vmem:[%s12725_s7 + $0x40] sm:$0xff]  ;;  %7408 = vmatprep.subr.mxu0 %v6477_v53  ;;  %v6470_v41 = vld [vmem:[%s12725_s7 + $0x188] sm:$0xff] }
 0xd68   : > { %6255 = vadd.xlane.f32.xlu1 %v6254_v50  ;;  %v6461_v50 = vld [vmem:[%s12725_s7 + $0x140] sm:$0xff]  ;;  %7374 = vmatpush3.msra.mxu1 %v6429_v26 }
 0xd69   : > { %7409 = vmatpush3.msra.mxu0 %v6461_v50  ;;  %7375 = vmatprep.subr.mxu1 %v6444_v9  ;;  %v6437_v26 = vld [vmem:[%s12725_s7 + $0x80] sm:$0xff]  ;;  %v6454_v50 = vld [vmem:[%s12725_s7 + $0x108] sm:$0xff] }
 0xd6a   : > { %7410 = vmatprep.subr.mxu0 %v6476_v36  ;;  %7376 = vmatpush3.msra.mxu1 %v6428_v63  ;;  %v6421_v9 = vld [vmem:[%s12725_s7] sm:$0xff] }
 0xd6b   : > { %7411 = vmatpush3.msra.mxu0 %v6460_v57  ;;  %7377 = vmatprep.subr.mxu1 %v6443_v6  ;;  %v6469_v36 = vld [vmem:[%s12725_s7 + $0x180] sm:$0xff] }
 0xd6c   : > { %7412 = vmatprep.subr.mxu0 %v6475_v44  ;;  %7378 = vmatpush3.msra.mxu1 %v6427_v34  ;;  %v6453_v57 = vld [vmem:[%s12725_s7 + $0x100] sm:$0xff] }
 0xd6d   : > { %7413 = vmatpush3.msra.mxu0 %v6459_v49  ;;  %7379 = vmatprep.subr.mxu1 %v6442_v31 }
 0xd6e   : > { %7414 = vmatprep.subr.mxu0 %v6474_v35  ;;  %7380 = vmatpush3.msra.mxu1 %v6426_v56 }
 0xd6f   : > { %7415 = vmatpush3.msra.mxu0 %v6458_v1  ;;  %7381 = vmatprep.subr.mxu1 %v6441_v55 }
 0xd70   : > { %7416 = vmatprep.subr.mxu0 %v6473_v28  ;;  %7382 = vmatpush3.msra.mxu1 %v6425_v2 }
 0xd71   : > { %7417 = vmatpush3.msra.mxu0 %v6457_v62  ;;  %7383 = vmatprep.subr.mxu1 %v6440_v11 }
 0xd72   : > { %7418 = vmatprep.subr.mxu0 %v6472_v0  ;;  %7384 = vmatpush3.msra.mxu1 %v6424_v43 }
 0xd73   : > { %7419 = vmatpush3.msra.mxu0 %v6456_v17  ;;  %7385 = vmatprep.subr.mxu1 %v6439_v12  ;;  %v8577_v17 = vld [vmem:[%s12754_s1 + $0x28] sm:$0xff] }
 0xd74   : > { %7420 = vmatprep.subr.mxu0 %v6471_v8  ;;  %7386 = vmatpush3.msra.mxu1 %v6423_v60  ;;  %v8578_v60 = vld [vmem:[%s12754_s1 + $0x30] sm:$0xff] }
 0xd75   : > { %7421 = vmatpush3.msra.mxu0 %v6455_v51  ;;  %7387 = vmatprep.subr.mxu1 %v6438_v21  ;;  %v8579_v21 = vld [vmem:[%s12754_s1 + $0x38] sm:$0xff] }
 0xd76   : > { %7422 = vmatprep.subr.mxu0 %v6470_v41  ;;  %7388 = vmatpush3.msra.mxu1 %v6422_v16  ;;  %v8580_v16 = vld [vmem:[%s12754_s1 + $0x40] sm:$0xff] }
 0xd77   : > { %7423 = vmatpush3.msra.mxu0 %v6454_v50  ;;  %7389 = vmatprep.subr.mxu1 %v6437_v26  ;;  %v8582_v50 = vld [vmem:[%s12754_s1 + $0x50] sm:$0xff] }
 0xd78   : > { %7424 = vmatprep.subr.mxu0 %v6469_v36  ;;  %7390 = vmatpush3.msra.mxu1 %v6421_v9  ;;  %v8583_v36 = vld [vmem:[%s12754_s1 + $0x58] sm:$0xff] }
 0xd79   : > { %7425 = vmatpush3.msra.mxu0 %v6453_v57  ;;  %v8584_v57 = vld [vmem:[%s12754_s1 + $0x60] sm:$0xff] }
 0xdf1   : > { %v6256_v52 = vpop.xlane.xlu1 %6255 }
 0xdf2   : > { %v6257_v58 = vrot.slane %v6256_v52, 4 }
 0xdf4   : > { %v6258_v53 = vadd.f32 %v6257_v58, %v6256_v52 }
 0xdf6   : > { %v6259_v63 = vrot.slane %v6258_v53, 2 }
 0xdf8   : > { %v6260_v6 = vadd.f32 %v6259_v63, %v6258_v53  ;;  %v8581_v53 = vld [vmem:[%s12754_s1 + $0x48] sm:$0xff] }
 0xdfa   : > { %v6261_v44 = vrot.slane %v6260_v6, 1 }
 0xdfc   : > { %v6262_v34 = vadd.f32 %v6261_v44, %v6260_v6  ;;  %v8585_v44 = vld [vmem:[%s12754_s1 + $0x68] sm:$0xff] }
 0xdfe   : > { %7563 = vpush %v6262_v34 }
 0xe2f   : > { %s7564_s26 = spop %7563 }
 0xe30   : > { %v6264_v49 = vstv %s7564_s26  ;;  %s8636_s26 = scalar_lea.vmem %s12646_s30, 16 }
 0xe31   : > { %v6265_v31 = vmul.f32 3.0517578e-05, %v6264_v49  ;;  %v8586_v49 = vld [vmem:[%s12754_s1 + $0x70] sm:$0xff]  ;;  %p8637_p11 = scmp.ne.s32.totalorder %s12646_s30, %s8636_s26  ;;  %p8644_p1 = scmp.lt.s32.totalorder %s8642_s11, %s8636_s26 }
 0xe33   : > { %v6266_v35 = vadd.f32 1e-05, %v6265_v31  ;;  %p8638_p12 = pnand %p8637_p11, %p8823_p5  ;;  %p8645_p2 = por %p8644_p1, %p8643_p0 }
 0xe35   : > { %8507 = vrsqrt.f32 %v6266_v35  ;;  %v8587_v35 = vld [vmem:[%s12754_s1 + $0x78] sm:$0xff]  ;;  %p8639_p13 = pneg %p8638_p12 }
 0xe37   : > { %p8646_p3 = pnand %p8645_p2, %p8639_p13 }
 0xe42   : > { %v8508_v56 = vpop.eup %8507 }
 0xe43   : > { %v6268_v1 = vmul.f32 %v8508_v56, %v11926_v39  ;;  %v6269_v55 = vmul.f32 %v8508_v56, %v11930_v27  ;;  %v6270_v28 = vmul.f32 %v8508_v56, %v11934_v45  ;;  %v6271_v2 = vmul.f32 %v8508_v56, %v11942_v4 }
 0xe44   : > { %v6272_v62 = vmul.f32 %v8508_v56, %v11946_v33  ;;  %v6273_v11 = vmul.f32 %v8508_v56, %v11952_v47  ;;  %v6274_v0 = vmul.f32 %v8508_v56, %v11958_v61  ;;  %v6275_v52 = vmul.f32 %v8508_v56, %v11964_v5 }
 0xe45   : > { %v6276_v43 = vmul.f32 %v8508_v56, %v11970_v29  ;;  %v6277_v12 = vmul.f32 %v8508_v56, %v11976_v23  ;;  %v6278_v39 = vmul.f32 %v8508_v56, %v11982_v25  ;;  %v6279_v27 = vmul.f32 %v8508_v56, %v11988_v18 }
 0xe46   : > { %v6280_v45 = vmul.f32 %v8508_v56, %v11994_v37  ;;  %v6281_v4 = vmul.f32 %v8508_v56, %v12000_v30  ;;  %v6282_v33 = vmul.f32 %v8508_v56, %v12006_v7  ;;  %v6283_v47 = vmul.f32 %v8508_v56, %v12012_v24 }
 0xe47   : > { %v6284_v61 = vmul.f32 %v8508_v56, %v12018_v20  ;;  %v6285_v5 = vmul.f32 %v8508_v56, %v12024_v32  ;;  %v6286_v29 = vmul.f32 %v8508_v56, %v12030_v54  ;;  %v6287_v23 = vmul.f32 %v8508_v56, %v12036_v42 }
 0xe48   : > { %v6288_v25 = vmul.f32 %v8508_v56, %v12042_v10  ;;  %v6289_v18 = vmul.f32 %v8508_v56, %v12048_v14  ;;  %v6290_v37 = vmul.f32 %v8508_v56, %v12054_v59  ;;  %v6291_v30 = vmul.f32 %v8508_v56, %v12060_v38  ;;  %v8572_v59 = vld [vmem:[%s12754_s1] sm:$0xff] }
 0xe49   : > { %v12333_v7 = vmul.f32 %v8508_v56, %v12066_v40  ;;  %v12336_v24 = vmul.f32 %v8508_v56, %v12072_v46  ;;  %v12339_v20 = vmul.f32 %v8508_v56, %v12078_v19  ;;  %v12342_v32 = vmul.f32 %v8508_v56, %v12084_v15  ;;  %v8573_v40 = vld [vmem:[%s12754_s1 + $0x8] sm:$0xff]  ;;  %v8574_v19 = vld [vmem:[%s12754_s1 + $0x10] sm:$0xff] }
 0xe4a   : > { %v12345_v54 = vmul.f32 %v8508_v56, %v12090_v3  ;;  %v12348_v42 = vmul.f32 %v8508_v56, %v12096_v13  ;;  %v12351_v10 = vmul.f32 %v8508_v56, %v12102_v22  ;;  %v12354_v14 = vmul.f32 %v8508_v56, %v12108_v48  ;;  %v8575_v3 = vld [vmem:[%s12754_s1 + $0x18] sm:$0xff]  ;;  %v8576_v22 = vld [vmem:[%s12754_s1 + $0x20] sm:$0xff] }
 0xe4b   : > { %v6300_v38 = vmul.f32 %v8572_v59, %v6268_v1  ;;  %v6301_v46 = vmul.f32 %v8573_v40, %v6269_v55  ;;  %v6302_v15 = vmul.f32 %v8574_v19, %v6270_v28  ;;  %v6303_v13 = vmul.f32 %v8575_v3, %v6271_v2  ;;  %v8588_v1 = vld [vmem:[%s12754_s1 + $0x80] sm:$0xff]  ;;  %v8589_v28 = vld [vmem:[%s12754_s1 + $0x88] sm:$0xff]  ;;  %v8602_v19 = vld [vmem:[%s12720_s2 + $0x30] sm:$0xff] }
 0xe4c   : > { %v6304_v48 = vmul.f32 %v8576_v22, %v6272_v62  ;;  %v6305_v58 = vmul.f32 %v8577_v17, %v6273_v11  ;;  %v6306_v8 = vmul.f32 %v8578_v60, %v6274_v0  ;;  %v6307_v51 = vmul.f32 %v8579_v21, %v6275_v52  ;;  %v8590_v62 = vld [vmem:[%s12754_s1 + $0x90] sm:$0xff]  ;;  %v8591_v0 = vld [vmem:[%s12754_s1 + $0x98] sm:$0xff]  ;;  %v8600_v59 = vld [vmem:[%s12720_s2 + $0x20] sm:$0xff] }
 0xe4d   : > { %v12383_v41 = vmul.f32 %v8580_v16, %v6276_v43  ;;  %v12388_v26 = vmul.f32 %v8581_v53, %v6277_v12  ;;  %v12393_v9 = vmul.f32 %v8582_v50, %v6278_v39  ;;  %v12398_v63 = vmul.f32 %v8583_v36, %v6279_v27  ;;  %v8592_v43 = vld [vmem:[%s12754_s1 + $0xa0] sm:$0xff]  ;;  %v8593_v39 = vld [vmem:[%s12754_s1 + $0xa8] sm:$0xff]  ;;  %v8603_v3 = vld [vmem:[%s12720_s2 + $0x38] sm:$0xff] }
 0xe4e   : > { %v12403_v6 = vmul.f32 %v8584_v57, %v6280_v45  ;;  %v12408_v34 = vmul.f32 %v8585_v44, %v6281_v4  ;;  %v12413_v31 = vmul.f32 %v8586_v49, %v6282_v33  ;;  %v12418_v56 = vmul.f32 %v8587_v35, %v6283_v47  ;;  %v8594_v45 = vld [vmem:[%s12754_s1 + $0xb0] sm:$0xff]  ;;  %v8595_v33 = vld [vmem:[%s12754_s1 + $0xb8] sm:$0xff]  ;;  %v8601_v40 = vld [vmem:[%s12720_s2 + $0x28] sm:$0xff] }
 0xe4f   : > { %v12423_v55 = vmul.f32 %v8588_v1, %v6284_v61  ;;  %v12428_v2 = vmul.f32 %v8589_v28, %v6285_v5  ;;  %v12433_v11 = vmul.f32 %v8590_v62, %v6286_v29  ;;  %v12438_v52 = vmul.f32 %v8591_v0, %v6287_v23  ;;  %v8596_v61 = vld [vmem:[%s12720_s2] sm:$0xff]  ;;  %v8597_v29 = vld [vmem:[%s12720_s2 + $0x8] sm:$0xff]  ;;  %v8606_v60 = vld [vmem:[%s12754_s1 + $0xd0] sm:$0xff] }
 0xe50   : > { %v12443_v12 = vmul.f32 %v8592_v43, %v6288_v25  ;;  %v12448_v27 = vmul.f32 %v8593_v39, %v6289_v18  ;;  %v12453_v4 = vmul.f32 %v8594_v45, %v6290_v37  ;;  %v12458_v47 = vmul.f32 %v8595_v33, %v6291_v30  ;;  %v8598_v25 = vld [vmem:[%s12720_s2 + $0x10] sm:$0xff]  ;;  %v8599_v37 = vld [vmem:[%s12720_s2 + $0x18] sm:$0xff]  ;;  %v8604_v22 = vld [vmem:[%s12754_s1 + $0xc0] sm:$0xff] }
 0xe51   : > { %v6332_v5 = vadd.f32 %v8596_v61, %v6300_v38  ;;  %v6333_v23 = vadd.f32 %v8597_v29, %v6301_v46  ;;  %v6334_v18 = vadd.f32 %v8598_v25, %v6302_v15  ;;  %v6335_v30 = vadd.f32 %v8599_v37, %v6303_v13  ;;  %v8605_v17 = vld [vmem:[%s12754_s1 + $0xc8] sm:$0xff]  ;;  %v8607_v21 = vld [vmem:[%s12754_s1 + $0xd8] sm:$0xff]  ;;  %v8610_v53 = vld [vmem:[%s12754_s1 + $0xf0] sm:$0xff] }
 0xe52   : > { %v6336_v38 = vadd.f32 %v8600_v59, %v6304_v48  ;;  %v6337_v46 = vadd.f32 %v8601_v40, %v6305_v58  ;;  %v6338_v15 = vadd.f32 %v8602_v19, %v6306_v8  ;;  %v6339_v13 = vadd.f32 %v8603_v3, %v6307_v51  ;;  %v8608_v51 = vld [vmem:[%s12754_s1 + $0xe0] sm:$0xff]  ;;  %v8609_v16 = vld [vmem:[%s12754_s1 + $0xe8] sm:$0xff]  ;;  %v8611_v50 = vld [vmem:[%s12754_s1 + $0xf8] sm:$0xff] }
 0xe53   : > { %v12488_v48 = vmul.f32 %v8604_v22, %v12333_v7  ;;  %v12494_v58 = vmul.f32 %v8605_v17, %v12336_v24  ;;  %v12500_v8 = vmul.f32 %v8606_v60, %v12339_v20  ;;  %v12506_v7 = vmul.f32 %v8607_v21, %v12342_v32  ;;  %v8612_v36 = vld [vmem:[%s12720_s2 + $0x40] sm:$0xff]  ;;  %v8613_v57 = vld [vmem:[%s12720_s2 + $0x48] sm:$0xff]  ;;  %v8614_v44 = vld [vmem:[%s12720_s2 + $0x50] sm:$0xff] }
 0xe54   : > { %v12512_v24 = vmul.f32 %v8608_v51, %v12345_v54  ;;  %v12518_v20 = vmul.f32 %v8609_v16, %v12348_v42  ;;  %v12524_v32 = vmul.f32 %v8610_v53, %v12351_v10  ;;  %v12530_v54 = vmul.f32 %v8611_v50, %v12354_v14  ;;  %v8615_v14 = vld [vmem:[%s12720_s2 + $0x58] sm:$0xff] }
 0xe55   : > { %v6340_v42 = vadd.f32 %v8612_v36, %v12383_v41  ;;  %v6341_v10 = vadd.f32 %v8613_v57, %v12388_v26  ;;  %v6342_v49 = vadd.f32 %v8614_v44, %v12393_v9  ;;  %v6343_v35 = vadd.f32 %v8615_v14, %v12398_v63  ;;  %v8616_v26 = vld [vmem:[%s12720_s2 + $0x60] sm:$0xff]  ;;  %v8617_v9 = vld [vmem:[%s12720_s2 + $0x68] sm:$0xff]  ;;  %v8618_v63 = vld [vmem:[%s12720_s2 + $0x70] sm:$0xff] }
 0xe56   : > { %v6364_v1 = vadd.f32 %v6336_v38, %v6332_v5  ;;  %v6377_v41 = vadd.f32 %v6337_v46, %v6333_v23  ;;  %v6390_v28 = vadd.f32 %v6338_v15, %v6334_v18  ;;  %v6403_v62 = vadd.f32 %v6339_v13, %v6335_v30  ;;  %v8619_v45 = vld [vmem:[%s12720_s2 + $0x78] sm:$0xff] }
 0xe57   : > { %v6344_v0 = vadd.f32 %v8616_v26, %v12403_v6  ;;  %v6345_v43 = vadd.f32 %v8617_v9, %v12408_v34  ;;  %v6346_v39 = vadd.f32 %v8618_v63, %v12413_v31  ;;  %v6347_v33 = vadd.f32 %v8619_v45, %v12418_v56  ;;  %v8620_v34 = vld [vmem:[%s12720_s2 + $0x80] sm:$0xff]  ;;  %v8621_v31 = vld [vmem:[%s12720_s2 + $0x88] sm:$0xff]  ;;  %v8622_v56 = vld [vmem:[%s12720_s2 + $0x90] sm:$0xff] }
 0xe58   : > { %v6365_v61 = vadd.f32 %v6364_v1, %v6340_v42  ;;  %v6378_v6 = vadd.f32 %v6377_v41, %v6341_v10  ;;  %v6391_v5 = vadd.f32 %v6390_v28, %v6342_v49  ;;  %v6404_v29 = vadd.f32 %v6403_v62, %v6343_v35  ;;  %v8623_v37 = vld [vmem:[%s12720_s2 + $0x98] sm:$0xff] }
 0xe59   : > { %v6348_v23 = vadd.f32 %v8620_v34, %v12423_v55  ;;  %v6349_v25 = vadd.f32 %v8621_v31, %v12428_v2  ;;  %v6350_v18 = vadd.f32 %v8622_v56, %v12433_v11  ;;  %v6351_v30 = vadd.f32 %v8623_v37, %v12438_v52  ;;  %v8624_v2 = vld [vmem:[%s12720_s2 + $0xa0] sm:$0xff]  ;;  %v8625_v11 = vld [vmem:[%s12720_s2 + $0xa8] sm:$0xff]  ;;  %v8626_v52 = vld [vmem:[%s12720_s2 + $0xb0] sm:$0xff] }
 0xe5a   : > { %v6366_v59 = vadd.f32 %v6365_v61, %v6344_v0  ;;  %v6379_v55 = vadd.f32 %v6378_v6, %v6345_v43  ;;  %v6392_v38 = vadd.f32 %v6391_v5, %v6346_v39  ;;  %v6405_v40 = vadd.f32 %v6404_v29, %v6347_v33  ;;  %v8627_v3 = vld [vmem:[%s12720_s2 + $0xb8] sm:$0xff] }
 0xe5b   : > { %v6352_v46 = vadd.f32 %v8624_v2, %v12443_v12  ;;  %v6353_v19 = vadd.f32 %v8625_v11, %v12448_v27  ;;  %v6354_v15 = vadd.f32 %v8626_v52, %v12453_v4  ;;  %v6355_v13 = vadd.f32 %v8627_v3, %v12458_v47  ;;  %v8628_v27 = vld [vmem:[%s12720_s2 + $0xc0] sm:$0xff]  ;;  %v8629_v4 = vld [vmem:[%s12720_s2 + $0xc8] sm:$0xff]  ;;  %v8630_v47 = vld [vmem:[%s12720_s2 + $0xd0] sm:$0xff] }
 0xe5c   : > { %v6367_v22 = vadd.f32 %v6366_v59, %v6348_v23  ;;  %v6380_v12 = vadd.f32 %v6379_v55, %v6349_v25  ;;  %v6393_v17 = vadd.f32 %v6392_v38, %v6350_v18  ;;  %v6406_v60 = vadd.f32 %v6405_v40, %v6351_v30  ;;  %v8631_v53 = vld [vmem:[%s12720_s2 + $0xd8] sm:$0xff]  ;;  %v6485_v3 = vld [vmem:[%s12726_s8] sm:$0x1] }
 0xe5d   : > { %v6356_v21 = vadd.f32 %v8628_v27, %v12488_v48  ;;  %v6357_v51 = vadd.f32 %v8629_v4, %v12494_v58  ;;  %v6358_v16 = vadd.f32 %v8630_v47, %v12500_v8  ;;  %v6359_v50 = vadd.f32 %v8631_v53, %v12506_v7  ;;  %v8632_v58 = vld [vmem:[%s12720_s2 + $0xe0] sm:$0xff]  ;;  %v8633_v8 = vld [vmem:[%s12720_s2 + $0xe8] sm:$0xff]  ;;  %v8634_v7 = vld [vmem:[%s12720_s2 + $0xf0] sm:$0xff] }
 0xe5e   : > { %v6368_v36 = vadd.f32 %v6367_v22, %v6352_v46  ;;  %v6381_v48 = vadd.f32 %v6380_v12, %v6353_v19  ;;  %v6394_v42 = vadd.f32 %v6393_v17, %v6354_v15  ;;  %v6407_v57 = vadd.f32 %v6406_v60, %v6355_v13  ;;  %v8635_v14 = vld [vmem:[%s12720_s2 + $0xf8] sm:$0xff] }
 0xe5f   : > { %v6360_v10 = vadd.f32 %v8632_v58, %v12512_v24  ;;  %v6361_v44 = vadd.f32 %v8633_v8, %v12518_v20  ;;  %v6362_v49 = vadd.f32 %v8634_v7, %v12524_v32  ;;  %v6363_v35 = vadd.f32 %v8635_v14, %v12530_v54 }
 0xe60   : > { %v6369_v1 = vadd.f32 %v6368_v36, %v6356_v21  ;;  %v6395_v24 = vadd.f32 %v6394_v42, %v6358_v16  ;;  %v6382_v41 = vadd.f32 %v6381_v48, %v6357_v51  ;;  %v6408_v28 = vadd.f32 %v6407_v57, %v6359_v50 }
 0xe62   : > { %v6370_v62 = vadd.f32 %v6369_v1, %v6360_v10  ;;  %v6396_v26 = vadd.f32 %v6395_v24, %v6362_v49  ;;  %v6383_v0 = vadd.f32 %v6382_v41, %v6361_v44  ;;  %v6409_v20 = vadd.f32 %v6408_v28, %v6363_v35 }
 0xe64   : > { %v6371_v9 = vrot.slane %v6370_v62, 4  ;;  %v6397_v43 = vrot.slane %v6396_v26, 4  ;;  %v6384_v63 = vrot.slane %v6383_v0, 4  ;;  %v6410_v39 = vrot.slane %v6409_v20, 4 }
 0xe66   : > { %v6372_v45 = vadd.f32 %v6371_v9, %v6370_v62  ;;  %v6398_v32 = vadd.f32 %v6397_v43, %v6396_v26  ;;  %v6385_v33 = vadd.f32 %v6384_v63, %v6383_v0  ;;  %v6411_v61 = vadd.f32 %v6410_v39, %v6409_v20 }
 0xe68   : > { %v6373_v6 = vrot.slane %v6372_v45, 2  ;;  %v6399_v5 = vrot.slane %v6398_v32, 2  ;;  %v6386_v29 = vrot.slane %v6385_v33, 2  ;;  %v6412_v54 = vrot.slane %v6411_v61, 2 }
 0xe6a   : > { %v6374_v34 = vadd.f32 %v6373_v6, %v6372_v45  ;;  %v6400_v23 = vadd.f32 %v6399_v5, %v6398_v32  ;;  %v6387_v31 = vadd.f32 %v6386_v29, %v6385_v33  ;;  %v6413_v25 = vadd.f32 %v6412_v54, %v6411_v61 }
 0xe6c   : > { %v6375_v56 = vrot.slane %v6374_v34, 1  ;;  %v6401_v18 = vrot.slane %v6400_v23, 1  ;;  %v6388_v37 = vrot.slane %v6387_v31, 1  ;;  %v6414_v30 = vrot.slane %v6413_v25, 1 }
 0xe6e   : > { %v6389_v59 = vadd.f32 %v6388_v37, %v6387_v31  ;;  %v6415_v55 = vadd.f32 %v6414_v30, %v6413_v25  ;;  %v6376_v38 = vadd.f32 %v6375_v56, %v6374_v34  ;;  %v6402_v40 = vadd.f32 %v6401_v18, %v6400_v23 }
 0xe70   : > { %v6418_v2 = vmul.f32 0.015625, %v6389_v59  ;;  %v6420_v46 = vmul.f32 0.015625, %v6415_v55  ;;  %v6417_v11 = vmul.f32 0.015625, %v6376_v38  ;;  %v6419_v19 = vmul.f32 0.015625, %v6402_v40 }
 0xe72   : > { %6550 = vmatprep.mubr.f32.mxu1 %v6418_v2  ;;  %6620 = vmatprep.mubr.f32.mxu0 %v6420_v46 }
 0xe73   : > { %6551 = vmatmul.mubr.f32.vlgmr.msra.gmra.mxu1 %v6417_v11  ;;  %6621 = vmatmul.mubr.f32.vlgmr.msra.gmra.mxu0 %v6419_v19 }
 0xf33   : > { %v7391_v52 = vpop.f32.mrf.mxu1  ;;  %v7426_v15 = vpop.f32.mrf.mxu0 }
 0xf35   : > { %v7392_v13 = vpop.f32.mrf.mxu1  ;;  %v7427_v22 = vpop.f32.mrf.mxu0 }
 0xf36   : > { %v7393_v12 = vadd.f32 %v7392_v13, %v7391_v52  ;;  %v7428_v60 = vadd.f32 %v7427_v22, %v7426_v15 }
 0xf38   : > { %v6553_v17 = vadd.f32 %v7393_v12, %v6485_v3 }
 0xf3a   : > { %v6623_v27 = vadd.f32 %v7428_v60, %v6553_v17 }
 0xf3c   : > { %v6627_v21 = vsel %vm6626_vm1, %v6623_v27, -inf }
 0xf3d   : > { %6628 = vmax.xlane.f32.xlu0 %v6627_v21 }
 0xfc6   : > { %v6629_v4 = vpop.xlane.xlu0 %6628 }
 0xfc7   : > { %v6630_v51 = vsub.f32 %v6623_v27, %v6629_v4 }
 0xfc9   : > { %v6631_v47 = vmul.f32 1.442695, %v6630_v51 }
 0xfcb   : > { %8509 = vpow2.f32 %v6631_v47 }
 0xfd8   : > { %v8510_v16 = vpop.eup %8509 }
 0xfd9   : > { %v6633_v53 = vsel %vm6626_vm1, %v8510_v16, 0.0 }
 0xfda   : > { %6634 = vadd.xlane.f32.xlu1 %v6633_v53 }
0x1063   : > { %v6635_v50 = vpop.xlane.xlu1 %6634 }
0x1064   : > { %8511 = vrcp.f32 %v6635_v50 }
0x1065   : > { %8513 = vlog2.f32 %v6635_v50 }
0x1071   : > { %v8512_v36 = vpop.eup %8511 }
0x1072   : > { %v8514_v48 = vpop.eup %8513  ;;  %v6637_v42 = vmul.f32 %v8512_v36, %v8510_v16 }
0x1073   : > { %v6640_v57 = vmul.f32 0.6931472, %v8514_v48 }
0x1074   : > { %6638 = vst.msk [vmem:[%s355_s28] sm:$0x1] %vm6626_vm1, %v6637_v42 }
0x1075   : > { %v6641_v58 = vsub.f32 %v6630_v51, %v6640_v57 }
0x1076   : > { %8649 = shalt.err (!%p8646_p3)
}
0x1077   : > { %s8650_s29 = scalar_lea.hbm %s12644_s21, 16  ;;  %s8654_s25 = scalar_lea.hbm %s12727_s9, 32 }
0x1078   : > { %p8651_p4 = scmp.ne.s32.totalorder %s12644_s21, %s8650_s29  ;;  %p8655_p9 = scmp.lt.s32.totalorder %s12644_s21, %s12727_s9 }
0x1079   : > { %p8656_p10 = scmp.lt.s32.totalorder %s8654_s25, %s8650_s29 }
0x107a   : > { %p8652_p7 = pnand %p8651_p4, %p8823_p5 }
0x107b   : > { %p8657_p11 = por %p8656_p10, %p8655_p9 }
0x107c   : > { %p8653_p8 = pneg %p8652_p7 }
0x107e   : > { %p8658_p12 = pnand %p8657_p11, %p8653_p8 }
0x1080   : > { %8661 = shalt.err (!%p8658_p12)
}
0x1081   : > { %7565 = dma.vmem_to_hbm [thread:$0]  (%p8823_p5), %s12646_s30, 16, %s12644_s21, %s6644_s22  }
0x1082   : > { %s12819_s11 = scalar_lea.vmem [#allocation4], %s12634_s27  ;;  %s6648_s1 = scalar_lea.sflag [#allocation5], %s12634_s27 }
0x1083   : > { %6642 = vst.msk [vmem:[%s12819_s11] sm:$0x1] %vm6626_vm1, %v6641_v58  ;;  %s8662_s26 = scalar_lea.vmem %s12654_s12, 16  ;;  %s8729_s20 = smov [#allocation4]  }
0x1084   : > { %p8663_p13 = scmp.ne.s32.totalorder %s12654_s12, %s8662_s26  ;;  %s8666_s29 = sshll.u32 %s8729_s20, 4  ;;  %s8667_s29 = int_to_ptr.vmem [resolvable:$false] %s8666_s29 }
0x1085   : > { %s8668_s28 = scalar_lea.vmem %s8667_s29, 32  ;;  %p8669_p2 = scmp.lt.s32.totalorder %s12654_s12, %s8667_s29 }
0x1086   : > { %p8664_p0 = pnand %p8663_p13, %p8823_p5  ;;  %p8670_p3 = scmp.lt.s32.totalorder %s8668_s28, %s8662_s26 }
0x1088   : > { %p8665_p1 = pneg %p8664_p0  ;;  %p8671_p4 = por %p8670_p3, %p8669_p2 }
0x108a   : > { %p8672_p7 = pnand %p8671_p4, %p8665_p1 }
0x108c   : > { %8675 = shalt.err (!%p8672_p7)
}
0x108d   : > { %s8676_s30 = scalar_lea.hbm %s12652_s0, 16  ;;  %s8680_s22 = scalar_lea.hbm %s12728_s10, 32 }
0x108e   : > { %p8677_p8 = scmp.ne.s32.totalorder %s12652_s0, %s8676_s30  ;;  %p8681_p11 = scmp.lt.s32.totalorder %s12652_s0, %s12728_s10 }
0x108f   : > { %p8682_p12 = scmp.lt.s32.totalorder %s8680_s22, %s8676_s30 }
0x1090   : > { %p8678_p9 = pnand %p8677_p8, %p8823_p5 }
0x1091   : > { %p8683_p13 = por %p8682_p12, %p8681_p11 }
0x1092   : > { %p8679_p10 = pneg %p8678_p9 }
0x1094   : > { %p8684_p0 = pnand %p8683_p13, %p8679_p10 }
0x1096   : > { %8687 = shalt.err (!%p8684_p0)
}
0x1097   : > { %7566 = dma.vmem_to_hbm [thread:$0]  (%p8823_p5), %s12654_s12, 16, %s12652_s0, %s6648_s1  }
0x1098 PF: > { %p7576_p1 = scmp.ge.s32.totalorder %s8726_s16, 2  ;;  %s6685_s18 = sand.u32 1, %s8714_s13  }
0x1099   : > { %s6686_s11 = scalar_lea.sflag [#allocation3], %s6685_s18 }
0x109a   : > { %p7570_p2 = pnand %p7576_p1, %p8827_p6 }
0x109c   : > { %p7571_p3 = pneg %p7570_p2 }
0x109e   : > { %8705 = dma.done.wait (%p7571_p3), %s6686_s11, 16  }
0x109f   : > { %8707 = vsyncadd (%p7571_p3), %s6686_s11, 4294967280  ;;  %s6694_s26 = scalar_lea.sflag [#allocation5], %s6685_s18 }
0x10a0   : > { %8709 = dma.done.wait (%p7571_p3), %s6694_s26, 16  }
0x10a1   : > { %8711 = vsyncadd (%p7571_p3), %s6694_s26, 4294967280  ;;  %s12820_s23 = sld [smem:[#allocation8_spill]]  ;;  %p24_p5 = scmp.ge.s32.totalorder %s8810_s19, 4  }
0x10a2   : > { %s12821_s13 = smov %s8718_s14  ;;  %s12822_s14 = smov %s8722_s15 }
0x10a3   : > { %s12824_s16 = smov %s8810_s19  ;;  %26 = sbr.rel (!%p24_p5) target bundleno = 8 (0x8), region = 108 }
0x10a7   : > { %s12823_s15 = smov %s12820_s23 }
0x10a8   :  { %6698 = vsyncpa [#allocation3], 1 }
0x10a9   :  { %6700 = vsyncpa [#allocation3 + $0x1], 1 }
0x10aa   :  { %6701 = vsyncpa [#allocation5], 1 }
0x10ab   :  { %6703 = vsyncpa [#allocation5 + $0x1], 1 }

</bundles_post_ra>
